<compile_context>
chip_gen: v6e
topology: v6e:2x2x1
jax: 0.10.0
libtpu: 0.0.40
codegen_flags: <defaults>
</compile_context>

<pallas_src>
import math

import jax
import jax.numpy as jnp
from jax import lax
from jax.experimental import pallas as pl
from jax.experimental.pallas import tpu as pltpu

# ----------------------------- configuration -----------------------------
BS = 2            # batch size
NUM_VIEW = 2      # number of camera views
H = 16            # image feature map height
W = 16            # image feature map width
HW = H * W
S = NUM_VIEW * HW # memory sequence length
BV = BS * NUM_VIEW
C = 32            # dim_in (embedding dim)
NHEAD = 4
HD = C // NHEAD   # per-head dim
FF = 64           # decoder FFN hidden dim
NUM_LAYERS = 2
NQ = 8            # number of object queries
NUM_SEM_CLS = 5
HEAD_HIDDEN = 32
HEAD_ORDER = ('sem_cls_head', 'center_head', 'size_head', 'rotation_head')
HEAD_WIDTHS = (NUM_SEM_CLS + 1, 3, 3, 6)
HEAD_OUT = sum(HEAD_WIDTHS)                         # 18
_HOFF = [0]
for _w in HEAD_WIDTHS:
    _HOFF.append(_HOFF[-1] + _w)
OUT_LANES = 128                                     # lane-dense packed kernel output
POS_FEATS = 128
TEMPERATURE = 10000.0
SCALE = [-2.0, 2.0, -2.0, 2.0, 0.5, 4.5]
TWO_PI = 2.0 * math.pi

# synthetic pinhole camera intrinsics (camera.project)
FX = 8.0
FY = 8.0
CX = (W - 1) / 2.0
CY = (H - 1) / 2.0
EPS_Z = 1e-5

_BF = jnp.bfloat16
_F32 = jnp.float32


# ----------------------------- in-kernel helpers -----------------------------
def _ln(x, g, b, eps=1e-5):
    """LayerNorm over the channel (lane) axis, f32, rsqrt on the EUP."""
    mu = jnp.mean(x, axis=-1, keepdims=True)
    xc = x - mu
    var = jnp.mean(xc * xc, axis=-1, keepdims=True)
    return xc * lax.rsqrt(var + eps) * g + b


def _fused_mha(x_q, xkT_bf, xv_bf, a_w, c_w, wvo_w, bo_w):
    """All-head attention with pre-folded weights.

    a_w  : (C, NHEAD*C) bf16  = [Wq_h Wk_h^T / sqrt(HD)]_h  (heads on lanes)
    c_w  : (1, NHEAD*C) f32   = [bq_h Wk_h^T / sqrt(HD)]_h
    wvo_w: (NHEAD*C, C) bf16  = vstack_h(Wv_h Wo_h)
    bo_w : (1, C) f32         = bo + sum_h bv_h Wo_h
    xkT_bf: (C, Lk) bf16 pre-transposed keys; xv_bf: (Lk, C) bf16 values.
    (Key bias drops exactly under softmax; value bias fold is exact with an exact normalizer.)
    """
    qrow = jnp.dot(x_q.astype(_BF), a_w, preferred_element_type=_F32) + c_w        # (NQ, 4C)
    qs = jnp.concatenate([qrow[:, h * C:(h + 1) * C] for h in range(NHEAD)], axis=0)  # (4NQ, C)
    s = jnp.dot(qs.astype(_BF), xkT_bf, preferred_element_type=_F32)               # (4NQ, Lk)
    s = s - jnp.max(s, axis=-1, keepdims=True)
    e = jnp.exp(s)
    p = e * (1.0 / jnp.sum(e, axis=-1, keepdims=True))
    ctx = jnp.dot(p.astype(_BF), xv_bf, preferred_element_type=_F32)               # (4NQ, C)
    ctx_l = jnp.concatenate([ctx[h * NQ:(h + 1) * NQ, :] for h in range(NHEAD)], axis=1)  # (NQ, 4C)
    return jnp.dot(ctx_l.astype(_BF), wvo_w, preferred_element_type=_F32) + bo_w


# ----------------------------- fully fused decoder kernel -----------------------------
def _decoder_kernel(cam_ref,          # (1, 4, 3*V) f32  [x,y,z,1] -> camera coords, per view
                    qpos_ref,         # (1, NQ, 3) f32   raw query_pos (pre-sigmoid)
                    mem_ref,          # (1, S, C) bf16   multi-view image features
                    memT_ref,         # (1, C, S) bf16   pre-transposed memory (cross-attn keys)
                    tab_ref,          # (2, 128) f32     row0 = 1/dim_t, row1 = sin phase
                    pe_w1_ref, pe_b1_ref, pe_w2_ref, pe_b2_ref,
                    sa_A_ref, sa_c_ref, sa_Wvo_ref, sa_bo_ref,
                    ca_A_ref, ca_c_ref, ca_Wvo_ref, ca_bo_ref,
                    norm_ref,         # (L, 6, 1, C) f32 [g1,b1,g2,b2,g3,b3]
                    ff_w1_ref, ff_b1_ref, ff_w2_ref, ff_b2_ref,
                    hd_w1_ref, hd_b1_ref, hd_w2_ref, hd_b2_ref,
                    out_ref):         # (1, L, NQ, OUT_LANES) f32
    camM = cam_ref[0]                                                   # (4, 3*V) f32
    inv_dim = tab_ref[0:1, :]                                           # (1, 128)
    phase = tab_ref[1:2, :]                                             # (1, 128)
    iota_s = lax.broadcasted_iota(jnp.int32, (NQ, S), 1)
    ones = jnp.ones((NQ, 1), _F32)

    qp = qpos_ref[0]                                                    # (NQ, 3)
    rx = jax.nn.sigmoid(qp[:, 0:1])
    ry = jax.nn.sigmoid(qp[:, 1:2])
    rz = jax.nn.sigmoid(qp[:, 2:3])

    def _inv_sig(t, eps=1e-3):
        t = jnp.clip(t, 0.0, 1.0)
        return jnp.log(jnp.maximum(t, eps) / jnp.maximum(1.0 - t, eps))

    for l in range(NUM_LAYERS):
        # ---- denormalize reference points (also = coord_pos of this layer) ----
        px = rx * (SCALE[1] - SCALE[0]) + SCALE[0]
        py = ry * (SCALE[3] - SCALE[2]) + SCALE[2]
        pz = rz * (SCALE[5] - SCALE[4]) + SCALE[4]

        # ---- camera transform (one tiny f32 matmul for both views) ----
        P = jnp.concatenate([px, py, pz, ones], axis=1)                 # (NQ, 4)
        PC = jnp.dot(P, camM, preferred_element_type=_F32)              # (NQ, 3*V)

        # ---- pinhole projection + bilinear taps -> one (NQ, S) weight matrix ----
        wmat = jnp.zeros((NQ, S), _F32)
        cnt = jnp.zeros((NQ, 1), _F32)
        for v in range(NUM_VIEW):
            xc = PC[:, 3 * v + 0:3 * v + 1]
            yc = PC[:, 3 * v + 1:3 * v + 2]
            zc = PC[:, 3 * v + 2:3 * v + 3]
            front = zc > EPS_Z
            zs = jnp.maximum(zc, EPS_Z)
            u = FX * xc / zs + CX
            vv = FY * yc / zs + CY
            valid = front & (u >= 0.0) & (u <= W - 1.0) & (vv >= 0.0) & (vv <= H - 1.0)
            cnt = cnt + valid.astype(_F32)
            x0 = jnp.floor(u)
            y0 = jnp.floor(vv)
            wx1 = u - x0
            wy1 = vv - y0
            taps = ((x0, y0, (1.0 - wx1) * (1.0 - wy1)),
                    (x0 + 1.0, y0, wx1 * (1.0 - wy1)),
                    (x0, y0 + 1.0, (1.0 - wx1) * wy1),
                    (x0 + 1.0, y0 + 1.0, wx1 * wy1))
            for xi, yi, wgt in taps:
                # grid_sample(padding_mode='zeros', align_corners=True) semantics.
                # TODO(synk): behind-camera (z<=eps) taps are zeroed AND excluded from the
                # valid count (camera.project behaviour for such points is unspecified).
                inb = (xi >= 0.0) & (xi <= W - 1.0) & (yi >= 0.0) & (yi <= H - 1.0) & front
                idx = (jnp.clip(yi, 0.0, H - 1.0).astype(jnp.int32) * W
                       + jnp.clip(xi, 0.0, W - 1.0).astype(jnp.int32) + v * HW)
                wmat = wmat + jnp.where(iota_s == idx, jnp.where(inb, wgt, 0.0), 0.0)
        wmat = wmat * (1.0 / jnp.maximum(cnt, 1.0))     # multi-view average folded into taps
        tgt = jnp.dot(wmat.astype(_BF), mem_ref[0], preferred_element_type=_F32)   # (NQ, C)

        # ---- pos2posemb3d (single fused sin, order [y, x, z]) + position-encoder MLP ----
        ph = jnp.concatenate([(ry * TWO_PI) * inv_dim + phase,
                              (rx * TWO_PI) * inv_dim + phase,
                              (rz * TWO_PI) * inv_dim + phase], axis=1)             # (NQ, 384)
        emb = jnp.sin(ph).astype(_BF)
        pf = jnp.maximum(jnp.dot(emb, pe_w1_ref[...], preferred_element_type=_F32)
                         + pe_b1_ref[...], 0.0)
        pos_feat = jnp.dot(pf.astype(_BF), pe_w2_ref[...],
                           preferred_element_type=_F32) + pe_b2_ref[...]            # (NQ, C)

        # ---- self-attention (q = k = tgt + query_pos, v = tgt) ----
        q_in = tgt + pos_feat
        sa = _fused_mha(q_in, jnp.transpose(q_in).astype(_BF), tgt.astype(_BF),
                        sa_A_ref[l], sa_c_ref[l], sa_Wvo_ref[l], sa_bo_ref[l])
        tgt = _ln(tgt + sa, norm_ref[l, 0], norm_ref[l, 1])

        # ---- cross-attention over the full multi-view memory (pos=None) ----
        ca = _fused_mha(tgt + pos_feat, memT_ref[0], mem_ref[0],
                        ca_A_ref[l], ca_c_ref[l], ca_Wvo_ref[l], ca_bo_ref[l])
        tgt = _ln(tgt + ca, norm_ref[l, 2], norm_ref[l, 3])

        # ---- FFN ----
        h1 = jnp.maximum(jnp.dot(tgt.astype(_BF), ff_w1_ref[l],
                                 preferred_element_type=_F32) + ff_b1_ref[l], 0.0)
        h2 = jnp.dot(h1.astype(_BF), ff_w2_ref[l],
                     preferred_element_type=_F32) + ff_b2_ref[l]
        tgt = _ln(tgt + h2, norm_ref[l, 4], norm_ref[l, 5])

        # ---- fused prediction heads (lane-dense, zero-padded to 128 outputs) ----
        hh = jnp.maximum(jnp.dot(tgt.astype(_BF), hd_w1_ref[...],
                                 preferred_element_type=_F32) + hd_b1_ref[...], 0.0)  # (NQ, 128)
        raw = jnp.dot(hh.astype(_BF), hd_w2_ref[...],
                      preferred_element_type=_F32) + hd_b2_ref[...]                   # (NQ, 128)

        # ---- box glue + reference-point update (feeds the next layer in-kernel) ----
        nrx = jax.nn.sigmoid(raw[:, 6:7] + _inv_sig(rx))
        nry = jax.nn.sigmoid(raw[:, 7:8] + _inv_sig(ry))
        nrz = jax.nn.sigmoid(raw[:, 8:9] + _inv_sig(rz))
        cux = nrx * (SCALE[1] - SCALE[0]) + SCALE[0]
        cuy = nry * (SCALE[3] - SCALE[2]) + SCALE[2]
        cuz = nrz * (SCALE[5] - SCALE[4]) + SCALE[4]

        out_ref[0, l] = jnp.concatenate(
            [raw[:, 0:HEAD_OUT],                 # lanes  0:18  raw head outputs
             cux, cuy, cuz,                      # lanes 18:21  center_unnormalized
             px, py, pz,                         # lanes 21:24  coord_pos
             jnp.zeros((NQ, OUT_LANES - HEAD_OUT - 6), _F32)], axis=1)

        # reference_points = normalize(denormalize(sigmoid(.))) == sigmoid(.)
        rx, ry, rz = nrx, nry, nrz


def _const_spec(x):
    zeros = (0,) * x.ndim
    return pl.BlockSpec(x.shape, lambda b, _z=zeros: _z)


# ----------------------------- JAX glue (post-kernel only) -----------------------------
def compute_objectness_and_cls_prob(cls_logits):
    probs = jax.nn.softmax(cls_logits, axis=-1)
    objectness = 1.0 - probs[..., -1]
    return lax.stop_gradient(probs[..., :-1]), lax.stop_gradient(objectness)


# ----------------------------- full forward -----------------------------
def transformer_decoder_forward(packed, tgt, memory, query_pos, meta):
    del tgt   # unused: each layer re-derives its tgt from the projected pixel features
    T_camera_pseudoCam = meta['T_camera_pseudoCam']   # (B, V, 4, 4)
    T_world_pseudoCam = meta['T_world_pseudoCam']     # (B, V, 4, 4)
    T_world_local = meta['T_world_local']             # (B, V, 4, 4)
    T_camera_local = T_camera_pseudoCam @ (jnp.linalg.inv(T_world_pseudoCam) @ T_world_local)

    # (B, 4, 3*V): column (3v+i) maps homogeneous [x,y,z,1] to camera coord i of view v.
    cam_mat = jnp.transpose(T_camera_local[:, :, :3, :], (0, 1, 3, 2))       # (B, V, 4, 3)
    cam_mat = jnp.transpose(cam_mat, (0, 2, 1, 3)).reshape(BS, 4, NUM_VIEW * 3).astype(_F32)

    mem_bf = memory.astype(_BF)                          # (B, S, C)   layer-invariant
    memT_bf = jnp.swapaxes(memory, 1, 2).astype(_BF)     # (B, C, S)   pre-transposed keys

    pe = packed['pos_enc']
    hd = packed['heads']
    ly = packed['layers']
    const_inputs = (packed['tab'],
                    pe['w1'], pe['b1'], pe['w2'], pe['b2'],
                    ly['sa_A'], ly['sa_c'], ly['sa_Wvo'], ly['sa_bo'],
                    ly['ca_A'], ly['ca_c'], ly['ca_Wvo'], ly['ca_bo'],
                    ly['norms'],
                    ly['ff_w1'], ly['ff_b1'], ly['ff_w2'], ly['ff_b2'],
                    hd['w1'], hd['b1'], hd['w2'], hd['b2'])

    out = pl.pallas_call(
        _decoder_kernel,
        out_shape=jax.ShapeDtypeStruct((BS, NUM_LAYERS, NQ, OUT_LANES), jnp.float32),
        grid=(BS,),
        in_specs=[
            pl.BlockSpec((1, 4, NUM_VIEW * 3), lambda b: (b, 0, 0)),   # cam_mat
            pl.BlockSpec((1, NQ, 3), lambda b: (b, 0, 0)),             # query_pos
            pl.BlockSpec((1, S, C), lambda b: (b, 0, 0)),              # memory
            pl.BlockSpec((1, C, S), lambda b: (b, 0, 0)),              # memory^T
        ] + [_const_spec(x) for x in const_inputs],
        out_specs=pl.BlockSpec((1, NUM_LAYERS, NQ, OUT_LANES), lambda b: (b, 0, 0, 0)),
        compiler_params=pltpu.CompilerParams(dimension_semantics=("parallel",)),
    )(cam_mat, query_pos, mem_bf, memT_bf, *const_inputs)

    intermediate = []
    for l in range(NUM_LAYERS):
        o = out[:, l]                                    # (B, NQ, 128)
        cls_logits = o[..., _HOFF[0]:_HOFF[1]]           # (B, NQ, 6)
        size_scale = o[..., _HOFF[2]:_HOFF[3]]           # (B, NQ, 3)
        ortho6d = o[..., _HOFF[3]:_HOFF[4]]              # (B, NQ, 6)
        center_unnormalized = o[..., HEAD_OUT:HEAD_OUT + 3]
        coord_pos = o[..., HEAD_OUT + 3:HEAD_OUT + 6]
        semcls_prob, objectness_prob = compute_objectness_and_cls_prob(cls_logits)
        del objectness_prob
        # TODO(synk): dataset-specific mean-size table of the real box_processor unavailable.
        size_unnormalized = jax.nn.softplus(size_scale)
        intermediate.append({'pred_logits': cls_logits,
                             'center_unnormalized': center_unnormalized,
                             'size_unnormalized': size_unnormalized,
                             'ortho6d': ortho6d,
                             'sem_cls_prob': semcls_prob,
                             'coord_pos': coord_pos})
    return intermediate


# ----------------------------- parameter init & packing -----------------------------
def init_params(key):
    keys = iter(jax.random.split(key, 256))

    def lin(kin, kout):
        return {'w': jax.random.normal(next(keys), (kin, kout), jnp.float32) / math.sqrt(kin),
                'b': jnp.zeros((kout,), jnp.float32)}

    def ln_p():
        return {'g': jnp.ones((C,), jnp.float32), 'b': jnp.zeros((C,), jnp.float32)}

    def mha_p():
        return {'q': lin(C, C), 'k': lin(C, C), 'v': lin(C, C), 'o': lin(C, C)}

    def layer_p():
        # TODO(synk): the decoder_layer module is injected in the reference; a standard
        # DETR-style post-norm layer (self-attn + cross-attn + FFN) is used here.
        return {'self_attn': mha_p(), 'cross_attn': mha_p(),
                'lin1': lin(C, FF), 'lin2': lin(FF, C),
                'norm1': ln_p(), 'norm2': ln_p(), 'norm3': ln_p()}

    return {
        'layers': [layer_p() for _ in range(NUM_LAYERS)],
        'pos_enc': {'l1': lin(POS_FEATS * 3, C), 'l2': lin(C, C)},
        'heads': {
            'sem_cls_head': {'l1': lin(C, HEAD_HIDDEN), 'l2': lin(HEAD_HIDDEN, NUM_SEM_CLS + 1)},
            'center_head': {'l1': lin(C, HEAD_HIDDEN), 'l2': lin(HEAD_HIDDEN, 3)},
            'size_head': {'l1': lin(C, HEAD_HIDDEN), 'l2': lin(HEAD_HIDDEN, 3)},
            'rotation_head': {'l1': lin(C, HEAD_HIDDEN), 'l2': lin(HEAD_HIDDEN, 6)},
        },
    }


def pack_params(params):
    """Repack into kernel-friendly layouts: Wq.Wk^T / Wv.Wo folded per head, heads fused into
    128-lane slabs, per-layer weights stacked on a leading axis, bf16 MXU operands."""
    def bf(x):
        return x.astype(jnp.bfloat16)

    scale = 1.0 / math.sqrt(HD)

    def fold_attn(ap):
        a_blk, c_blk, wvo_blk = [], [], []
        bo_fold = ap['o']['b']
        for h in range(NHEAD):
            wq = ap['q']['w'][:, h * HD:(h + 1) * HD]
            wk = ap['k']['w'][:, h * HD:(h + 1) * HD]
            wv = ap['v']['w'][:, h * HD:(h + 1) * HD]
            wo = ap['o']['w'][h * HD:(h + 1) * HD, :]
            bq = ap['q']['b'][h * HD:(h + 1) * HD]
            bvb = ap['v']['b'][h * HD:(h + 1) * HD]
            a_blk.append((wq @ wk.T) * scale)        # (C, C)
            c_blk.append((bq @ wk.T) * scale)        # (C,)
            wvo_blk.append(wv @ wo)                  # (C, C)
            bo_fold = bo_fold + bvb @ wo
        # key bias bk is a per-query constant under softmax -> dropped exactly.
        return (jnp.concatenate(a_blk, axis=1),                       # (C, 4C)
                jnp.concatenate(c_blk).reshape(1, NHEAD * C),
                jnp.concatenate(wvo_blk, axis=0),                     # (4C, C)
                bo_fold.reshape(1, C))

    sa_A, sa_c, sa_Wvo, sa_bo = [], [], [], []
    ca_A, ca_c, ca_Wvo, ca_bo = [], [], [], []
    norms, ff_w1, ff_b1, ff_w2, ff_b2 = [], [], [], [], []
    for lp in params['layers']:
        a, cvec, wvo, bo = fold_attn(lp['self_attn'])
        sa_A.append(a); sa_c.append(cvec); sa_Wvo.append(wvo); sa_bo.append(bo)
        a, cvec, wvo, bo = fold_attn(lp['cross_attn'])
        ca_A.append(a); ca_c.append(cvec); ca_Wvo.append(wvo); ca_bo.append(bo)
        norms.append(jnp.stack([lp['norm1']['g'], lp['norm1']['b'],
                                lp['norm2']['g'], lp['norm2']['b'],
                                lp['norm3']['g'], lp['norm3']['b']]).reshape(6, 1, C))
        ff_w1.append(lp['lin1']['w']); ff_b1.append(lp['lin1']['b'].reshape(1, FF))
        ff_w2.append(lp['lin2']['w']); ff_b2.append(lp['lin2']['b'].reshape(1, C))

    layers = {
        'sa_A': bf(jnp.stack(sa_A)), 'sa_c': jnp.stack(sa_c),
        'sa_Wvo': bf(jnp.stack(sa_Wvo)), 'sa_bo': jnp.stack(sa_bo),
        'ca_A': bf(jnp.stack(ca_A)), 'ca_c': jnp.stack(ca_c),
        'ca_Wvo': bf(jnp.stack(ca_Wvo)), 'ca_bo': jnp.stack(ca_bo),
        'norms': jnp.stack(norms),
        'ff_w1': bf(jnp.stack(ff_w1)), 'ff_b1': jnp.stack(ff_b1),
        'ff_w2': bf(jnp.stack(ff_w2)), 'ff_b2': jnp.stack(ff_b2),
    }

    heads = params['heads']
    hd_w1 = jnp.concatenate([heads[n]['l1']['w'] for n in HEAD_ORDER], axis=1)         # (C, 128)
    hd_b1 = jnp.concatenate([heads[n]['l1']['b'] for n in HEAD_ORDER]).reshape(1, -1)
    hd_w2 = jnp.zeros((len(HEAD_ORDER) * HEAD_HIDDEN, OUT_LANES), jnp.float32)
    for i, n in enumerate(HEAD_ORDER):
        hd_w2 = hd_w2.at[i * HEAD_HIDDEN:(i + 1) * HEAD_HIDDEN,
                         _HOFF[i]:_HOFF[i + 1]].set(heads[n]['l2']['w'])
    hd_b2 = jnp.zeros((OUT_LANES,), jnp.float32).at[0:HEAD_OUT].set(
        jnp.concatenate([heads[n]['l2']['b'] for n in HEAD_ORDER])).reshape(1, OUT_LANES)

    pe = params['pos_enc']
    dim_t = TEMPERATURE ** (2.0 * jnp.floor(jnp.arange(POS_FEATS, dtype=jnp.float32) / 2.0)
                            / POS_FEATS)
    phase = jnp.where(jnp.arange(POS_FEATS) % 2 == 0, 0.0, math.pi / 2.0).astype(jnp.float32)
    tab = jnp.stack([(1.0 / dim_t).astype(jnp.float32), phase])                        # (2, 128)

    return {
        'layers': layers,
        'pos_enc': {'w1': bf(pe['l1']['w']),               # rows ordered [y, x, z] 128-blocks
                    'b1': pe['l1']['b'].reshape(1, C),
                    'w2': bf(pe['l2']['w']),
                    'b2': pe['l2']['b'].reshape(1, C)},
        'heads': {'w1': bf(hd_w1), 'b1': hd_b1, 'w2': bf(hd_w2), 'b2': hd_b2},
        'tab': tab,
    }


# ----------------------------- main -----------------------------
if __name__ == "__main__":
    key = jax.random.PRNGKey(0)
    kp, km, kq, kt = jax.random.split(key, 4)

    raw_params = init_params(kp)
    packed = pack_params(raw_params)

    memory = jax.random.normal(km, (BS, NUM_VIEW * H * W, C), jnp.float32)
    query_pos = jax.random.normal(kq, (BS, NQ, 3), jnp.float32)
    tgt = jax.random.normal(kt, (NQ, BS, C), jnp.float32)   # unused by the reference forward

    eye = jnp.eye(4, dtype=jnp.float32)
    T_camera_pseudoCam = jnp.tile(eye, (BS, NUM_VIEW, 1, 1))
    view_trans = jnp.array([[0.1, 0.0, 3.0], [-0.1, 0.0, 3.0]], jnp.float32)
    T_camera_pseudoCam = T_camera_pseudoCam.at[:, :, :3, 3].set(
        jnp.broadcast_to(view_trans, (BS, NUM_VIEW, 3)))
    meta = {
        'T_camera_pseudoCam': T_camera_pseudoCam,
        'T_world_pseudoCam': jnp.tile(eye, (BS, NUM_VIEW, 1, 1)),
        'T_world_local': jnp.tile(eye, (BS, NUM_VIEW, 1, 1)),
    }

    fwd = jax.jit(transformer_decoder_forward)
    intermediate = fwd(packed, tgt, memory, query_pos, meta)
    jax.block_until_ready(intermediate[-1]['center_unnormalized'])

    assert len(intermediate) == NUM_LAYERS
    assert intermediate[-1]['pred_logits'].shape == (BS, NQ, NUM_SEM_CLS + 1)
    assert intermediate[-1]['center_unnormalized'].shape == (BS, NQ, 3)
    assert intermediate[-1]['size_unnormalized'].shape == (BS, NQ, 3)
    assert intermediate[-1]['ortho6d'].shape == (BS, NQ, 6)
    assert intermediate[-1]['sem_cls_prob'].shape == (BS, NQ, NUM_SEM_CLS)
    assert intermediate[-1]['coord_pos'].shape == (BS, NQ, 3)
    assert bool(jnp.all(jnp.isfinite(intermediate[-1]['center_unnormalized'])))
    assert bool(jnp.all(jnp.isfinite(intermediate[-1]['pred_logits'])))
    print("KERNEL_OK")
</pallas_src>

<mosaic_0001>
module attributes {stable_mosaic.version = 11 : i64} {
  func.func @_decoder_kernel(%arg0: i32, %arg1: memref<1x4x6xf32, #tpu.memory_space<vmem>>, %arg2: memref<1x8x3xf32, #tpu.memory_space<vmem>>, %arg3: memref<1x512x32xbf16, #tpu.memory_space<vmem>>, %arg4: memref<1x32x512xbf16, #tpu.memory_space<vmem>>, %arg5: memref<2x128xf32, #tpu.memory_space<vmem>>, %arg6: memref<384x32xbf16, #tpu.memory_space<vmem>>, %arg7: memref<1x32xf32, #tpu.memory_space<vmem>>, %arg8: memref<32x32xbf16, #tpu.memory_space<vmem>>, %arg9: memref<1x32xf32, #tpu.memory_space<vmem>>, %arg10: memref<2x32x128xbf16, #tpu.memory_space<vmem>>, %arg11: memref<2x1x128xf32, #tpu.memory_space<vmem>>, %arg12: memref<2x128x32xbf16, #tpu.memory_space<vmem>>, %arg13: memref<2x1x32xf32, #tpu.memory_space<vmem>>, %arg14: memref<2x32x128xbf16, #tpu.memory_space<vmem>>, %arg15: memref<2x1x128xf32, #tpu.memory_space<vmem>>, %arg16: memref<2x128x32xbf16, #tpu.memory_space<vmem>>, %arg17: memref<2x1x32xf32, #tpu.memory_space<vmem>>, %arg18: memref<2x6x1x32xf32, #tpu.memory_space<vmem>>, %arg19: memref<2x32x64xbf16, #tpu.memory_space<vmem>>, %arg20: memref<2x1x64xf32, #tpu.memory_space<vmem>>, %arg21: memref<2x64x32xbf16, #tpu.memory_space<vmem>>, %arg22: memref<2x1x32xf32, #tpu.memory_space<vmem>>, %arg23: memref<32x128xbf16, #tpu.memory_space<vmem>>, %arg24: memref<1x128xf32, #tpu.memory_space<vmem>>, %arg25: memref<128x128xbf16, #tpu.memory_space<vmem>>, %arg26: memref<1x128xf32, #tpu.memory_space<vmem>>, %arg27: memref<1x2x8x128xf32, #tpu.memory_space<vmem>>) attributes {dimension_semantics = [#tpu.dimension_semantics<parallel>], iteration_bounds = array<i64: 2>, scalar_prefetch = 0 : i64, scratch_operands = 0 : i64, tpu.core_type = #tpu.core_type<tc>, window_params = [{transform_indices = @transform_0, window_bounds = array<i64: 1, 4, 6>}, {transform_indices = @transform_1, window_bounds = array<i64: 1, 8, 3>}, {transform_indices = @transform_2, window_bounds = array<i64: 1, 512, 32>}, {transform_indices = @transform_3, window_bounds = array<i64: 1, 32, 512>}, {pipeline_mode = #tpu.pipeline_mode<synchronous>, transform_indices = @transform_4, window_bounds = array<i64: 2, 128>}, {pipeline_mode = #tpu.pipeline_mode<synchronous>, transform_indices = @transform_5, window_bounds = array<i64: 384, 32>}, {pipeline_mode = #tpu.pipeline_mode<synchronous>, transform_indices = @transform_6, window_bounds = array<i64: 1, 32>}, {pipeline_mode = #tpu.pipeline_mode<synchronous>, transform_indices = @transform_7, window_bounds = array<i64: 32, 32>}, {pipeline_mode = #tpu.pipeline_mode<synchronous>, transform_indices = @transform_8, window_bounds = array<i64: 1, 32>}, {pipeline_mode = #tpu.pipeline_mode<synchronous>, transform_indices = @transform_9, window_bounds = array<i64: 2, 32, 128>}, {pipeline_mode = #tpu.pipeline_mode<synchronous>, transform_indices = @transform_10, window_bounds = array<i64: 2, 1, 128>}, {pipeline_mode = #tpu.pipeline_mode<synchronous>, transform_indices = @transform_11, window_bounds = array<i64: 2, 128, 32>}, {pipeline_mode = #tpu.pipeline_mode<synchronous>, transform_indices = @transform_12, window_bounds = array<i64: 2, 1, 32>}, {pipeline_mode = #tpu.pipeline_mode<synchronous>, transform_indices = @transform_13, window_bounds = array<i64: 2, 32, 128>}, {pipeline_mode = #tpu.pipeline_mode<synchronous>, transform_indices = @transform_14, window_bounds = array<i64: 2, 1, 128>}, {pipeline_mode = #tpu.pipeline_mode<synchronous>, transform_indices = @transform_15, window_bounds = array<i64: 2, 128, 32>}, {pipeline_mode = #tpu.pipeline_mode<synchronous>, transform_indices = @transform_16, window_bounds = array<i64: 2, 1, 32>}, {pipeline_mode = #tpu.pipeline_mode<synchronous>, transform_indices = @transform_17, window_bounds = array<i64: 2, 6, 1, 32>}, {pipeline_mode = #tpu.pipeline_mode<synchronous>, transform_indices = @transform_18, window_bounds = array<i64: 2, 32, 64>}, {pipeline_mode = #tpu.pipeline_mode<synchronous>, transform_indices = @transform_19, window_bounds = array<i64: 2, 1, 64>}, {pipeline_mode = #tpu.pipeline_mode<synchronous>, transform_indices = @transform_20, window_bounds = array<i64: 2, 64, 32>}, {pipeline_mode = #tpu.pipeline_mode<synchronous>, transform_indices = @transform_21, window_bounds = array<i64: 2, 1, 32>}, {pipeline_mode = #tpu.pipeline_mode<synchronous>, transform_indices = @transform_22, window_bounds = array<i64: 32, 128>}, {pipeline_mode = #tpu.pipeline_mode<synchronous>, transform_indices = @transform_23, window_bounds = array<i64: 1, 128>}, {pipeline_mode = #tpu.pipeline_mode<synchronous>, transform_indices = @transform_24, window_bounds = array<i64: 128, 128>}, {pipeline_mode = #tpu.pipeline_mode<synchronous>, transform_indices = @transform_25, window_bounds = array<i64: 1, 128>}, {transform_indices = @transform_26, window_bounds = array<i64: 1, 2, 8, 128>}]} {
    %c0 = arith.constant 0 : index
    %c0_0 = arith.constant 0 : index
    %c0_1 = arith.constant 0 : index
    %0 = vector.load %arg1[%c0, %c0_0, %c0_1] : memref<1x4x6xf32, #tpu.memory_space<vmem>>, vector<1x4x6xf32>
    %1 = vector.shape_cast %0 : vector<1x4x6xf32> to vector<4x6xf32>
    %c0_2 = arith.constant 0 : index
    %c0_3 = arith.constant 0 : index
    %2 = vector.load %arg5[%c0_2, %c0_3] : memref<2x128xf32, #tpu.memory_space<vmem>>, vector<1x128xf32>
    %c1 = arith.constant 1 : index
    %c0_4 = arith.constant 0 : index
    %3 = vector.load %arg5[%c1, %c0_4] : memref<2x128xf32, #tpu.memory_space<vmem>>, vector<1x128xf32>
    %4 = tpu.iota {dimensions = array<i32: 1>} : vector<8x512xi32>
    %cst = arith.constant 1.000000e+00 : f32
    %5 = vector.broadcast %cst : f32 to vector<8x1xf32>
    %c0_5 = arith.constant 0 : index
    %c0_6 = arith.constant 0 : index
    %c0_7 = arith.constant 0 : index
    %6 = vector.load %arg2[%c0_5, %c0_6, %c0_7] : memref<1x8x3xf32, #tpu.memory_space<vmem>>, vector<1x8x3xf32>
    %7 = vector.shape_cast %6 : vector<1x8x3xf32> to vector<8x3xf32>
    %8 = vector.extract_strided_slice %7 {offsets = [0, 0], sizes = [8, 1], strides = [1, 1]} : vector<8x3xf32> to vector<8x1xf32>
    %9 = arith.negf %8 : vector<8x1xf32>
    %10 = math.exp %9 : vector<8x1xf32>
    %cst_8 = arith.constant 1.000000e+00 : f32
    %11 = vector.broadcast %cst_8 : f32 to vector<8x1xf32>
    %12 = arith.addf %11, %10 : vector<8x1xf32>
    %13 = arith.divf %11, %12 : vector<8x1xf32>
    %14 = vector.extract_strided_slice %7 {offsets = [0, 1], sizes = [8, 1], strides = [1, 1]} : vector<8x3xf32> to vector<8x1xf32>
    %15 = arith.negf %14 : vector<8x1xf32>
    %16 = math.exp %15 : vector<8x1xf32>
    %cst_9 = arith.constant 1.000000e+00 : f32
    %17 = vector.broadcast %cst_9 : f32 to vector<8x1xf32>
    %18 = arith.addf %17, %16 : vector<8x1xf32>
    %19 = arith.divf %17, %18 : vector<8x1xf32>
    %20 = vector.extract_strided_slice %7 {offsets = [0, 2], sizes = [8, 1], strides = [1, 1]} : vector<8x3xf32> to vector<8x1xf32>
    %21 = arith.negf %20 : vector<8x1xf32>
    %22 = math.exp %21 : vector<8x1xf32>
    %cst_10 = arith.constant 1.000000e+00 : f32
    %23 = vector.broadcast %cst_10 : f32 to vector<8x1xf32>
    %24 = arith.addf %23, %22 : vector<8x1xf32>
    %25 = arith.divf %23, %24 : vector<8x1xf32>
    %cst_11 = arith.constant 4.000000e+00 : f32
    %26 = vector.broadcast %cst_11 : f32 to vector<8x1xf32>
    %27 = arith.mulf %13, %26 : vector<8x1xf32>
    %cst_12 = arith.constant -2.000000e+00 : f32
    %28 = vector.broadcast %cst_12 : f32 to vector<8x1xf32>
    %29 = arith.addf %27, %28 : vector<8x1xf32>
    %cst_13 = arith.constant 4.000000e+00 : f32
    %30 = vector.broadcast %cst_13 : f32 to vector<8x1xf32>
    %31 = arith.mulf %19, %30 : vector<8x1xf32>
    %cst_14 = arith.constant -2.000000e+00 : f32
    %32 = vector.broadcast %cst_14 : f32 to vector<8x1xf32>
    %33 = arith.addf %31, %32 : vector<8x1xf32>
    %cst_15 = arith.constant 4.000000e+00 : f32
    %34 = vector.broadcast %cst_15 : f32 to vector<8x1xf32>
    %35 = arith.mulf %25, %34 : vector<8x1xf32>
    %cst_16 = arith.constant 5.000000e-01 : f32
    %36 = vector.broadcast %cst_16 : f32 to vector<8x1xf32>
    %37 = arith.addf %35, %36 : vector<8x1xf32>
    %38 = tpu.concatenate %29, %33, %37, %5 in 1 : vector<8x1xf32>, vector<8x1xf32>, vector<8x1xf32>, vector<8x1xf32> -> vector<8x4xf32>
    %cst_17 = arith.constant dense<0.000000e+00> : vector<8x6xf32>
    %39 = tpu.matmul %38, %1, %cst_17 {dimension_numbers = #tpu.dot_dimension_numbers<[1], [0], [0], [1], [0, 0, 1, 1], [], []>} : vector<8x4xf32>, vector<4x6xf32>, vector<8x6xf32> -> vector<8x6xf32>
    %cst_18 = arith.constant 0.000000e+00 : f32
    %40 = vector.broadcast %cst_18 : f32 to vector<8x512xf32>
    %cst_19 = arith.constant 0.000000e+00 : f32
    %41 = vector.broadcast %cst_19 : f32 to vector<8x1xf32>
    %42 = vector.extract_strided_slice %39 {offsets = [0, 0], sizes = [8, 1], strides = [1, 1]} : vector<8x6xf32> to vector<8x1xf32>
    %43 = vector.extract_strided_slice %39 {offsets = [0, 1], sizes = [8, 1], strides = [1, 1]} : vector<8x6xf32> to vector<8x1xf32>
    %44 = vector.extract_strided_slice %39 {offsets = [0, 2], sizes = [8, 1], strides = [1, 1]} : vector<8x6xf32> to vector<8x1xf32>
    %cst_20 = arith.constant 9.99999974E-6 : f32
    %45 = vector.broadcast %cst_20 : f32 to vector<8x1xf32>
    %46 = arith.cmpf ogt, %44, %45 : vector<8x1xf32>
    %cst_21 = arith.constant 9.99999974E-6 : f32
    %47 = vector.broadcast %cst_21 : f32 to vector<8x1xf32>
    %48 = arith.maximumf %44, %47 : vector<8x1xf32>
    %cst_22 = arith.constant 8.000000e+00 : f32
    %49 = vector.broadcast %cst_22 : f32 to vector<8x1xf32>
    %50 = arith.mulf %49, %42 : vector<8x1xf32>
    %51 = arith.divf %50, %48 : vector<8x1xf32>
    %cst_23 = arith.constant 7.500000e+00 : f32
    %52 = vector.broadcast %cst_23 : f32 to vector<8x1xf32>
    %53 = arith.addf %51, %52 : vector<8x1xf32>
    %cst_24 = arith.constant 8.000000e+00 : f32
    %54 = vector.broadcast %cst_24 : f32 to vector<8x1xf32>
    %55 = arith.mulf %54, %43 : vector<8x1xf32>
    %56 = arith.divf %55, %48 : vector<8x1xf32>
    %cst_25 = arith.constant 7.500000e+00 : f32
    %57 = vector.broadcast %cst_25 : f32 to vector<8x1xf32>
    %58 = arith.addf %56, %57 : vector<8x1xf32>
    %cst_26 = arith.constant 0.000000e+00 : f32
    %59 = vector.broadcast %cst_26 : f32 to vector<8x1xf32>
    %60 = arith.cmpf oge, %53, %59 : vector<8x1xf32>
    %61 = arith.andi %46, %60 : vector<8x1xi1>
    %cst_27 = arith.constant 1.500000e+01 : f32
    %62 = vector.broadcast %cst_27 : f32 to vector<8x1xf32>
    %63 = arith.cmpf ole, %53, %62 : vector<8x1xf32>
    %64 = arith.andi %61, %63 : vector<8x1xi1>
    %cst_28 = arith.constant 0.000000e+00 : f32
    %65 = vector.broadcast %cst_28 : f32 to vector<8x1xf32>
    %66 = arith.cmpf oge, %58, %65 : vector<8x1xf32>
    %67 = arith.andi %64, %66 : vector<8x1xi1>
    %cst_29 = arith.constant 1.500000e+01 : f32
    %68 = vector.broadcast %cst_29 : f32 to vector<8x1xf32>
    %69 = arith.cmpf ole, %58, %68 : vector<8x1xf32>
    %70 = arith.andi %67, %69 : vector<8x1xi1>
    %71 = arith.extui %70 : vector<8x1xi1> to vector<8x1xi32>
    %72 = arith.sitofp %71 : vector<8x1xi32> to vector<8x1xf32>
    %73 = arith.addf %41, %72 : vector<8x1xf32>
    %74 = math.floor %53 : vector<8x1xf32>
    %75 = math.floor %58 : vector<8x1xf32>
    %76 = arith.subf %53, %74 : vector<8x1xf32>
    %77 = arith.subf %58, %75 : vector<8x1xf32>
    %cst_30 = arith.constant 1.000000e+00 : f32
    %78 = vector.broadcast %cst_30 : f32 to vector<8x1xf32>
    %79 = arith.subf %78, %76 : vector<8x1xf32>
    %cst_31 = arith.constant 1.000000e+00 : f32
    %80 = vector.broadcast %cst_31 : f32 to vector<8x1xf32>
    %81 = arith.subf %80, %77 : vector<8x1xf32>
    %82 = arith.mulf %79, %81 : vector<8x1xf32>
    %cst_32 = arith.constant 1.000000e+00 : f32
    %83 = vector.broadcast %cst_32 : f32 to vector<8x1xf32>
    %84 = arith.addf %74, %83 : vector<8x1xf32>
    %cst_33 = arith.constant 1.000000e+00 : f32
    %85 = vector.broadcast %cst_33 : f32 to vector<8x1xf32>
    %86 = arith.subf %85, %77 : vector<8x1xf32>
    %87 = arith.mulf %76, %86 : vector<8x1xf32>
    %cst_34 = arith.constant 1.000000e+00 : f32
    %88 = vector.broadcast %cst_34 : f32 to vector<8x1xf32>
    %89 = arith.addf %75, %88 : vector<8x1xf32>
    %cst_35 = arith.constant 1.000000e+00 : f32
    %90 = vector.broadcast %cst_35 : f32 to vector<8x1xf32>
    %91 = arith.subf %90, %76 : vector<8x1xf32>
    %92 = arith.mulf %91, %77 : vector<8x1xf32>
    %cst_36 = arith.constant 1.000000e+00 : f32
    %93 = vector.broadcast %cst_36 : f32 to vector<8x1xf32>
    %94 = arith.addf %74, %93 : vector<8x1xf32>
    %cst_37 = arith.constant 1.000000e+00 : f32
    %95 = vector.broadcast %cst_37 : f32 to vector<8x1xf32>
    %96 = arith.addf %75, %95 : vector<8x1xf32>
    %97 = arith.mulf %76, %77 : vector<8x1xf32>
    %cst_38 = arith.constant 0.000000e+00 : f32
    %98 = vector.broadcast %cst_38 : f32 to vector<8x1xf32>
    %99 = arith.cmpf oge, %74, %98 : vector<8x1xf32>
    %cst_39 = arith.constant 1.500000e+01 : f32
    %100 = vector.broadcast %cst_39 : f32 to vector<8x1xf32>
    %101 = arith.cmpf ole, %74, %100 : vector<8x1xf32>
    %102 = arith.andi %99, %101 : vector<8x1xi1>
    %cst_40 = arith.constant 0.000000e+00 : f32
    %103 = vector.broadcast %cst_40 : f32 to vector<8x1xf32>
    %104 = arith.cmpf oge, %75, %103 : vector<8x1xf32>
    %105 = arith.andi %102, %104 : vector<8x1xi1>
    %cst_41 = arith.constant 1.500000e+01 : f32
    %106 = vector.broadcast %cst_41 : f32 to vector<8x1xf32>
    %107 = arith.cmpf ole, %75, %106 : vector<8x1xf32>
    %108 = arith.andi %105, %107 : vector<8x1xi1>
    %109 = arith.andi %108, %46 : vector<8x1xi1>
    %cst_42 = arith.constant 0.000000e+00 : f32
    %cst_43 = arith.constant 1.500000e+01 : f32
    %110 = vector.broadcast %cst_42 : f32 to vector<8x1xf32>
    %111 = arith.maximumf %110, %75 : vector<8x1xf32>
    %112 = vector.broadcast %cst_43 : f32 to vector<8x1xf32>
    %113 = arith.minimumf %112, %111 : vector<8x1xf32>
    %114 = arith.fptosi %113 : vector<8x1xf32> to vector<8x1xi32>
    %c16_i32 = arith.constant 16 : i32
    %115 = vector.broadcast %c16_i32 : i32 to vector<8x1xi32>
    %116 = arith.muli %114, %115 : vector<8x1xi32>
    %cst_44 = arith.constant 0.000000e+00 : f32
    %cst_45 = arith.constant 1.500000e+01 : f32
    %117 = vector.broadcast %cst_44 : f32 to vector<8x1xf32>
    %118 = arith.maximumf %117, %74 : vector<8x1xf32>
    %119 = vector.broadcast %cst_45 : f32 to vector<8x1xf32>
    %120 = arith.minimumf %119, %118 : vector<8x1xf32>
    %121 = arith.fptosi %120 : vector<8x1xf32> to vector<8x1xi32>
    %122 = arith.addi %116, %121 : vector<8x1xi32>
    %c0_i32 = arith.constant 0 : i32
    %123 = vector.broadcast %c0_i32 : i32 to vector<8x1xi32>
    %124 = arith.addi %122, %123 : vector<8x1xi32>
    %125 = vector.broadcast %124 : vector<8x1xi32> to vector<8x512xi32>
    %126 = arith.cmpi eq, %4, %125 : vector<8x512xi32>
    %cst_46 = arith.constant 0.000000e+00 : f32
    %127 = vector.broadcast %cst_46 : f32 to vector<8x1xf32>
    %128 = arith.select %109, %82, %127 : vector<8x1xi1>, vector<8x1xf32>
    %cst_47 = arith.constant 0.000000e+00 : f32
    %129 = vector.shape_cast %128 : vector<8x1xf32> to vector<8x1xf32>
    %130 = vector.broadcast %129 : vector<8x1xf32> to vector<8x512xf32>
    %131 = vector.broadcast %cst_47 : f32 to vector<8x512xf32>
    %132 = arith.select %126, %130, %131 : vector<8x512xi1>, vector<8x512xf32>
    %133 = arith.addf %40, %132 : vector<8x512xf32>
    %cst_48 = arith.constant 0.000000e+00 : f32
    %134 = vector.broadcast %cst_48 : f32 to vector<8x1xf32>
    %135 = arith.cmpf oge, %84, %134 : vector<8x1xf32>
    %cst_49 = arith.constant 1.500000e+01 : f32
    %136 = vector.broadcast %cst_49 : f32 to vector<8x1xf32>
    %137 = arith.cmpf ole, %84, %136 : vector<8x1xf32>
    %138 = arith.andi %135, %137 : vector<8x1xi1>
    %cst_50 = arith.constant 0.000000e+00 : f32
    %139 = vector.broadcast %cst_50 : f32 to vector<8x1xf32>
    %140 = arith.cmpf oge, %75, %139 : vector<8x1xf32>
    %141 = arith.andi %138, %140 : vector<8x1xi1>
    %cst_51 = arith.constant 1.500000e+01 : f32
    %142 = vector.broadcast %cst_51 : f32 to vector<8x1xf32>
    %143 = arith.cmpf ole, %75, %142 : vector<8x1xf32>
    %144 = arith.andi %141, %143 : vector<8x1xi1>
    %145 = arith.andi %144, %46 : vector<8x1xi1>
    %cst_52 = arith.constant 0.000000e+00 : f32
    %cst_53 = arith.constant 1.500000e+01 : f32
    %146 = vector.broadcast %cst_52 : f32 to vector<8x1xf32>
    %147 = arith.maximumf %146, %75 : vector<8x1xf32>
    %148 = vector.broadcast %cst_53 : f32 to vector<8x1xf32>
    %149 = arith.minimumf %148, %147 : vector<8x1xf32>
    %150 = arith.fptosi %149 : vector<8x1xf32> to vector<8x1xi32>
    %c16_i32_54 = arith.constant 16 : i32
    %151 = vector.broadcast %c16_i32_54 : i32 to vector<8x1xi32>
    %152 = arith.muli %150, %151 : vector<8x1xi32>
    %cst_55 = arith.constant 0.000000e+00 : f32
    %cst_56 = arith.constant 1.500000e+01 : f32
    %153 = vector.broadcast %cst_55 : f32 to vector<8x1xf32>
    %154 = arith.maximumf %153, %84 : vector<8x1xf32>
    %155 = vector.broadcast %cst_56 : f32 to vector<8x1xf32>
    %156 = arith.minimumf %155, %154 : vector<8x1xf32>
    %157 = arith.fptosi %156 : vector<8x1xf32> to vector<8x1xi32>
    %158 = arith.addi %152, %157 : vector<8x1xi32>
    %c0_i32_57 = arith.constant 0 : i32
    %159 = vector.broadcast %c0_i32_57 : i32 to vector<8x1xi32>
    %160 = arith.addi %158, %159 : vector<8x1xi32>
    %161 = vector.broadcast %160 : vector<8x1xi32> to vector<8x512xi32>
    %162 = arith.cmpi eq, %4, %161 : vector<8x512xi32>
    %cst_58 = arith.constant 0.000000e+00 : f32
    %163 = vector.broadcast %cst_58 : f32 to vector<8x1xf32>
    %164 = arith.select %145, %87, %163 : vector<8x1xi1>, vector<8x1xf32>
    %cst_59 = arith.constant 0.000000e+00 : f32
    %165 = vector.shape_cast %164 : vector<8x1xf32> to vector<8x1xf32>
    %166 = vector.broadcast %165 : vector<8x1xf32> to vector<8x512xf32>
    %167 = vector.broadcast %cst_59 : f32 to vector<8x512xf32>
    %168 = arith.select %162, %166, %167 : vector<8x512xi1>, vector<8x512xf32>
    %169 = arith.addf %133, %168 : vector<8x512xf32>
    %cst_60 = arith.constant 0.000000e+00 : f32
    %170 = vector.broadcast %cst_60 : f32 to vector<8x1xf32>
    %171 = arith.cmpf oge, %74, %170 : vector<8x1xf32>
    %cst_61 = arith.constant 1.500000e+01 : f32
    %172 = vector.broadcast %cst_61 : f32 to vector<8x1xf32>
    %173 = arith.cmpf ole, %74, %172 : vector<8x1xf32>
    %174 = arith.andi %171, %173 : vector<8x1xi1>
    %cst_62 = arith.constant 0.000000e+00 : f32
    %175 = vector.broadcast %cst_62 : f32 to vector<8x1xf32>
    %176 = arith.cmpf oge, %89, %175 : vector<8x1xf32>
    %177 = arith.andi %174, %176 : vector<8x1xi1>
    %cst_63 = arith.constant 1.500000e+01 : f32
    %178 = vector.broadcast %cst_63 : f32 to vector<8x1xf32>
    %179 = arith.cmpf ole, %89, %178 : vector<8x1xf32>
    %180 = arith.andi %177, %179 : vector<8x1xi1>
    %181 = arith.andi %180, %46 : vector<8x1xi1>
    %cst_64 = arith.constant 0.000000e+00 : f32
    %cst_65 = arith.constant 1.500000e+01 : f32
    %182 = vector.broadcast %cst_64 : f32 to vector<8x1xf32>
    %183 = arith.maximumf %182, %89 : vector<8x1xf32>
    %184 = vector.broadcast %cst_65 : f32 to vector<8x1xf32>
    %185 = arith.minimumf %184, %183 : vector<8x1xf32>
    %186 = arith.fptosi %185 : vector<8x1xf32> to vector<8x1xi32>
    %c16_i32_66 = arith.constant 16 : i32
    %187 = vector.broadcast %c16_i32_66 : i32 to vector<8x1xi32>
    %188 = arith.muli %186, %187 : vector<8x1xi32>
    %cst_67 = arith.constant 0.000000e+00 : f32
    %cst_68 = arith.constant 1.500000e+01 : f32
    %189 = vector.broadcast %cst_67 : f32 to vector<8x1xf32>
    %190 = arith.maximumf %189, %74 : vector<8x1xf32>
    %191 = vector.broadcast %cst_68 : f32 to vector<8x1xf32>
    %192 = arith.minimumf %191, %190 : vector<8x1xf32>
    %193 = arith.fptosi %192 : vector<8x1xf32> to vector<8x1xi32>
    %194 = arith.addi %188, %193 : vector<8x1xi32>
    %c0_i32_69 = arith.constant 0 : i32
    %195 = vector.broadcast %c0_i32_69 : i32 to vector<8x1xi32>
    %196 = arith.addi %194, %195 : vector<8x1xi32>
    %197 = vector.broadcast %196 : vector<8x1xi32> to vector<8x512xi32>
    %198 = arith.cmpi eq, %4, %197 : vector<8x512xi32>
    %cst_70 = arith.constant 0.000000e+00 : f32
    %199 = vector.broadcast %cst_70 : f32 to vector<8x1xf32>
    %200 = arith.select %181, %92, %199 : vector<8x1xi1>, vector<8x1xf32>
    %cst_71 = arith.constant 0.000000e+00 : f32
    %201 = vector.shape_cast %200 : vector<8x1xf32> to vector<8x1xf32>
    %202 = vector.broadcast %201 : vector<8x1xf32> to vector<8x512xf32>
    %203 = vector.broadcast %cst_71 : f32 to vector<8x512xf32>
    %204 = arith.select %198, %202, %203 : vector<8x512xi1>, vector<8x512xf32>
    %205 = arith.addf %169, %204 : vector<8x512xf32>
    %cst_72 = arith.constant 0.000000e+00 : f32
    %206 = vector.broadcast %cst_72 : f32 to vector<8x1xf32>
    %207 = arith.cmpf oge, %94, %206 : vector<8x1xf32>
    %cst_73 = arith.constant 1.500000e+01 : f32
    %208 = vector.broadcast %cst_73 : f32 to vector<8x1xf32>
    %209 = arith.cmpf ole, %94, %208 : vector<8x1xf32>
    %210 = arith.andi %207, %209 : vector<8x1xi1>
    %cst_74 = arith.constant 0.000000e+00 : f32
    %211 = vector.broadcast %cst_74 : f32 to vector<8x1xf32>
    %212 = arith.cmpf oge, %96, %211 : vector<8x1xf32>
    %213 = arith.andi %210, %212 : vector<8x1xi1>
    %cst_75 = arith.constant 1.500000e+01 : f32
    %214 = vector.broadcast %cst_75 : f32 to vector<8x1xf32>
    %215 = arith.cmpf ole, %96, %214 : vector<8x1xf32>
    %216 = arith.andi %213, %215 : vector<8x1xi1>
    %217 = arith.andi %216, %46 : vector<8x1xi1>
    %cst_76 = arith.constant 0.000000e+00 : f32
    %cst_77 = arith.constant 1.500000e+01 : f32
    %218 = vector.broadcast %cst_76 : f32 to vector<8x1xf32>
    %219 = arith.maximumf %218, %96 : vector<8x1xf32>
    %220 = vector.broadcast %cst_77 : f32 to vector<8x1xf32>
    %221 = arith.minimumf %220, %219 : vector<8x1xf32>
    %222 = arith.fptosi %221 : vector<8x1xf32> to vector<8x1xi32>
    %c16_i32_78 = arith.constant 16 : i32
    %223 = vector.broadcast %c16_i32_78 : i32 to vector<8x1xi32>
    %224 = arith.muli %222, %223 : vector<8x1xi32>
    %cst_79 = arith.constant 0.000000e+00 : f32
    %cst_80 = arith.constant 1.500000e+01 : f32
    %225 = vector.broadcast %cst_79 : f32 to vector<8x1xf32>
    %226 = arith.maximumf %225, %94 : vector<8x1xf32>
    %227 = vector.broadcast %cst_80 : f32 to vector<8x1xf32>
    %228 = arith.minimumf %227, %226 : vector<8x1xf32>
    %229 = arith.fptosi %228 : vector<8x1xf32> to vector<8x1xi32>
    %230 = arith.addi %224, %229 : vector<8x1xi32>
    %c0_i32_81 = arith.constant 0 : i32
    %231 = vector.broadcast %c0_i32_81 : i32 to vector<8x1xi32>
    %232 = arith.addi %230, %231 : vector<8x1xi32>
    %233 = vector.broadcast %232 : vector<8x1xi32> to vector<8x512xi32>
    %234 = arith.cmpi eq, %4, %233 : vector<8x512xi32>
    %cst_82 = arith.constant 0.000000e+00 : f32
    %235 = vector.broadcast %cst_82 : f32 to vector<8x1xf32>
    %236 = arith.select %217, %97, %235 : vector<8x1xi1>, vector<8x1xf32>
    %cst_83 = arith.constant 0.000000e+00 : f32
    %237 = vector.shape_cast %236 : vector<8x1xf32> to vector<8x1xf32>
    %238 = vector.broadcast %237 : vector<8x1xf32> to vector<8x512xf32>
    %239 = vector.broadcast %cst_83 : f32 to vector<8x512xf32>
    %240 = arith.select %234, %238, %239 : vector<8x512xi1>, vector<8x512xf32>
    %241 = arith.addf %205, %240 : vector<8x512xf32>
    %242 = vector.extract_strided_slice %39 {offsets = [0, 3], sizes = [8, 1], strides = [1, 1]} : vector<8x6xf32> to vector<8x1xf32>
    %243 = vector.extract_strided_slice %39 {offsets = [0, 4], sizes = [8, 1], strides = [1, 1]} : vector<8x6xf32> to vector<8x1xf32>
    %244 = vector.extract_strided_slice %39 {offsets = [0, 5], sizes = [8, 1], strides = [1, 1]} : vector<8x6xf32> to vector<8x1xf32>
    %cst_84 = arith.constant 9.99999974E-6 : f32
    %245 = vector.broadcast %cst_84 : f32 to vector<8x1xf32>
    %246 = arith.cmpf ogt, %244, %245 : vector<8x1xf32>
    %cst_85 = arith.constant 9.99999974E-6 : f32
    %247 = vector.broadcast %cst_85 : f32 to vector<8x1xf32>
    %248 = arith.maximumf %244, %247 : vector<8x1xf32>
    %cst_86 = arith.constant 8.000000e+00 : f32
    %249 = vector.broadcast %cst_86 : f32 to vector<8x1xf32>
    %250 = arith.mulf %249, %242 : vector<8x1xf32>
    %251 = arith.divf %250, %248 : vector<8x1xf32>
    %cst_87 = arith.constant 7.500000e+00 : f32
    %252 = vector.broadcast %cst_87 : f32 to vector<8x1xf32>
    %253 = arith.addf %251, %252 : vector<8x1xf32>
    %cst_88 = arith.constant 8.000000e+00 : f32
    %254 = vector.broadcast %cst_88 : f32 to vector<8x1xf32>
    %255 = arith.mulf %254, %243 : vector<8x1xf32>
    %256 = arith.divf %255, %248 : vector<8x1xf32>
    %cst_89 = arith.constant 7.500000e+00 : f32
    %257 = vector.broadcast %cst_89 : f32 to vector<8x1xf32>
    %258 = arith.addf %256, %257 : vector<8x1xf32>
    %cst_90 = arith.constant 0.000000e+00 : f32
    %259 = vector.broadcast %cst_90 : f32 to vector<8x1xf32>
    %260 = arith.cmpf oge, %253, %259 : vector<8x1xf32>
    %261 = arith.andi %246, %260 : vector<8x1xi1>
    %cst_91 = arith.constant 1.500000e+01 : f32
    %262 = vector.broadcast %cst_91 : f32 to vector<8x1xf32>
    %263 = arith.cmpf ole, %253, %262 : vector<8x1xf32>
    %264 = arith.andi %261, %263 : vector<8x1xi1>
    %cst_92 = arith.constant 0.000000e+00 : f32
    %265 = vector.broadcast %cst_92 : f32 to vector<8x1xf32>
    %266 = arith.cmpf oge, %258, %265 : vector<8x1xf32>
    %267 = arith.andi %264, %266 : vector<8x1xi1>
    %cst_93 = arith.constant 1.500000e+01 : f32
    %268 = vector.broadcast %cst_93 : f32 to vector<8x1xf32>
    %269 = arith.cmpf ole, %258, %268 : vector<8x1xf32>
    %270 = arith.andi %267, %269 : vector<8x1xi1>
    %271 = arith.extui %270 : vector<8x1xi1> to vector<8x1xi32>
    %272 = arith.sitofp %271 : vector<8x1xi32> to vector<8x1xf32>
    %273 = arith.addf %73, %272 : vector<8x1xf32>
    %274 = math.floor %253 : vector<8x1xf32>
    %275 = math.floor %258 : vector<8x1xf32>
    %276 = arith.subf %253, %274 : vector<8x1xf32>
    %277 = arith.subf %258, %275 : vector<8x1xf32>
    %cst_94 = arith.constant 1.000000e+00 : f32
    %278 = vector.broadcast %cst_94 : f32 to vector<8x1xf32>
    %279 = arith.subf %278, %276 : vector<8x1xf32>
    %cst_95 = arith.constant 1.000000e+00 : f32
    %280 = vector.broadcast %cst_95 : f32 to vector<8x1xf32>
    %281 = arith.subf %280, %277 : vector<8x1xf32>
    %282 = arith.mulf %279, %281 : vector<8x1xf32>
    %cst_96 = arith.constant 1.000000e+00 : f32
    %283 = vector.broadcast %cst_96 : f32 to vector<8x1xf32>
    %284 = arith.addf %274, %283 : vector<8x1xf32>
    %cst_97 = arith.constant 1.000000e+00 : f32
    %285 = vector.broadcast %cst_97 : f32 to vector<8x1xf32>
    %286 = arith.subf %285, %277 : vector<8x1xf32>
    %287 = arith.mulf %276, %286 : vector<8x1xf32>
    %cst_98 = arith.constant 1.000000e+00 : f32
    %288 = vector.broadcast %cst_98 : f32 to vector<8x1xf32>
    %289 = arith.addf %275, %288 : vector<8x1xf32>
    %cst_99 = arith.constant 1.000000e+00 : f32
    %290 = vector.broadcast %cst_99 : f32 to vector<8x1xf32>
    %291 = arith.subf %290, %276 : vector<8x1xf32>
    %292 = arith.mulf %291, %277 : vector<8x1xf32>
    %cst_100 = arith.constant 1.000000e+00 : f32
    %293 = vector.broadcast %cst_100 : f32 to vector<8x1xf32>
    %294 = arith.addf %274, %293 : vector<8x1xf32>
    %cst_101 = arith.constant 1.000000e+00 : f32
    %295 = vector.broadcast %cst_101 : f32 to vector<8x1xf32>
    %296 = arith.addf %275, %295 : vector<8x1xf32>
    %297 = arith.mulf %276, %277 : vector<8x1xf32>
    %cst_102 = arith.constant 0.000000e+00 : f32
    %298 = vector.broadcast %cst_102 : f32 to vector<8x1xf32>
    %299 = arith.cmpf oge, %274, %298 : vector<8x1xf32>
    %cst_103 = arith.constant 1.500000e+01 : f32
    %300 = vector.broadcast %cst_103 : f32 to vector<8x1xf32>
    %301 = arith.cmpf ole, %274, %300 : vector<8x1xf32>
    %302 = arith.andi %299, %301 : vector<8x1xi1>
    %cst_104 = arith.constant 0.000000e+00 : f32
    %303 = vector.broadcast %cst_104 : f32 to vector<8x1xf32>
    %304 = arith.cmpf oge, %275, %303 : vector<8x1xf32>
    %305 = arith.andi %302, %304 : vector<8x1xi1>
    %cst_105 = arith.constant 1.500000e+01 : f32
    %306 = vector.broadcast %cst_105 : f32 to vector<8x1xf32>
    %307 = arith.cmpf ole, %275, %306 : vector<8x1xf32>
    %308 = arith.andi %305, %307 : vector<8x1xi1>
    %309 = arith.andi %308, %246 : vector<8x1xi1>
    %cst_106 = arith.constant 0.000000e+00 : f32
    %cst_107 = arith.constant 1.500000e+01 : f32
    %310 = vector.broadcast %cst_106 : f32 to vector<8x1xf32>
    %311 = arith.maximumf %310, %275 : vector<8x1xf32>
    %312 = vector.broadcast %cst_107 : f32 to vector<8x1xf32>
    %313 = arith.minimumf %312, %311 : vector<8x1xf32>
    %314 = arith.fptosi %313 : vector<8x1xf32> to vector<8x1xi32>
    %c16_i32_108 = arith.constant 16 : i32
    %315 = vector.broadcast %c16_i32_108 : i32 to vector<8x1xi32>
    %316 = arith.muli %314, %315 : vector<8x1xi32>
    %cst_109 = arith.constant 0.000000e+00 : f32
    %cst_110 = arith.constant 1.500000e+01 : f32
    %317 = vector.broadcast %cst_109 : f32 to vector<8x1xf32>
    %318 = arith.maximumf %317, %274 : vector<8x1xf32>
    %319 = vector.broadcast %cst_110 : f32 to vector<8x1xf32>
    %320 = arith.minimumf %319, %318 : vector<8x1xf32>
    %321 = arith.fptosi %320 : vector<8x1xf32> to vector<8x1xi32>
    %322 = arith.addi %316, %321 : vector<8x1xi32>
    %c256_i32 = arith.constant 256 : i32
    %323 = vector.broadcast %c256_i32 : i32 to vector<8x1xi32>
    %324 = arith.addi %322, %323 : vector<8x1xi32>
    %325 = vector.broadcast %324 : vector<8x1xi32> to vector<8x512xi32>
    %326 = arith.cmpi eq, %4, %325 : vector<8x512xi32>
    %cst_111 = arith.constant 0.000000e+00 : f32
    %327 = vector.broadcast %cst_111 : f32 to vector<8x1xf32>
    %328 = arith.select %309, %282, %327 : vector<8x1xi1>, vector<8x1xf32>
    %cst_112 = arith.constant 0.000000e+00 : f32
    %329 = vector.shape_cast %328 : vector<8x1xf32> to vector<8x1xf32>
    %330 = vector.broadcast %329 : vector<8x1xf32> to vector<8x512xf32>
    %331 = vector.broadcast %cst_112 : f32 to vector<8x512xf32>
    %332 = arith.select %326, %330, %331 : vector<8x512xi1>, vector<8x512xf32>
    %333 = arith.addf %241, %332 : vector<8x512xf32>
    %cst_113 = arith.constant 0.000000e+00 : f32
    %334 = vector.broadcast %cst_113 : f32 to vector<8x1xf32>
    %335 = arith.cmpf oge, %284, %334 : vector<8x1xf32>
    %cst_114 = arith.constant 1.500000e+01 : f32
    %336 = vector.broadcast %cst_114 : f32 to vector<8x1xf32>
    %337 = arith.cmpf ole, %284, %336 : vector<8x1xf32>
    %338 = arith.andi %335, %337 : vector<8x1xi1>
    %cst_115 = arith.constant 0.000000e+00 : f32
    %339 = vector.broadcast %cst_115 : f32 to vector<8x1xf32>
    %340 = arith.cmpf oge, %275, %339 : vector<8x1xf32>
    %341 = arith.andi %338, %340 : vector<8x1xi1>
    %cst_116 = arith.constant 1.500000e+01 : f32
    %342 = vector.broadcast %cst_116 : f32 to vector<8x1xf32>
    %343 = arith.cmpf ole, %275, %342 : vector<8x1xf32>
    %344 = arith.andi %341, %343 : vector<8x1xi1>
    %345 = arith.andi %344, %246 : vector<8x1xi1>
    %cst_117 = arith.constant 0.000000e+00 : f32
    %cst_118 = arith.constant 1.500000e+01 : f32
    %346 = vector.broadcast %cst_117 : f32 to vector<8x1xf32>
    %347 = arith.maximumf %346, %275 : vector<8x1xf32>
    %348 = vector.broadcast %cst_118 : f32 to vector<8x1xf32>
    %349 = arith.minimumf %348, %347 : vector<8x1xf32>
    %350 = arith.fptosi %349 : vector<8x1xf32> to vector<8x1xi32>
    %c16_i32_119 = arith.constant 16 : i32
    %351 = vector.broadcast %c16_i32_119 : i32 to vector<8x1xi32>
    %352 = arith.muli %350, %351 : vector<8x1xi32>
    %cst_120 = arith.constant 0.000000e+00 : f32
    %cst_121 = arith.constant 1.500000e+01 : f32
    %353 = vector.broadcast %cst_120 : f32 to vector<8x1xf32>
    %354 = arith.maximumf %353, %284 : vector<8x1xf32>
    %355 = vector.broadcast %cst_121 : f32 to vector<8x1xf32>
    %356 = arith.minimumf %355, %354 : vector<8x1xf32>
    %357 = arith.fptosi %356 : vector<8x1xf32> to vector<8x1xi32>
    %358 = arith.addi %352, %357 : vector<8x1xi32>
    %c256_i32_122 = arith.constant 256 : i32
    %359 = vector.broadcast %c256_i32_122 : i32 to vector<8x1xi32>
    %360 = arith.addi %358, %359 : vector<8x1xi32>
    %361 = vector.broadcast %360 : vector<8x1xi32> to vector<8x512xi32>
    %362 = arith.cmpi eq, %4, %361 : vector<8x512xi32>
    %cst_123 = arith.constant 0.000000e+00 : f32
    %363 = vector.broadcast %cst_123 : f32 to vector<8x1xf32>
    %364 = arith.select %345, %287, %363 : vector<8x1xi1>, vector<8x1xf32>
    %cst_124 = arith.constant 0.000000e+00 : f32
    %365 = vector.shape_cast %364 : vector<8x1xf32> to vector<8x1xf32>
    %366 = vector.broadcast %365 : vector<8x1xf32> to vector<8x512xf32>
    %367 = vector.broadcast %cst_124 : f32 to vector<8x512xf32>
    %368 = arith.select %362, %366, %367 : vector<8x512xi1>, vector<8x512xf32>
    %369 = arith.addf %333, %368 : vector<8x512xf32>
    %cst_125 = arith.constant 0.000000e+00 : f32
    %370 = vector.broadcast %cst_125 : f32 to vector<8x1xf32>
    %371 = arith.cmpf oge, %274, %370 : vector<8x1xf32>
    %cst_126 = arith.constant 1.500000e+01 : f32
    %372 = vector.broadcast %cst_126 : f32 to vector<8x1xf32>
    %373 = arith.cmpf ole, %274, %372 : vector<8x1xf32>
    %374 = arith.andi %371, %373 : vector<8x1xi1>
    %cst_127 = arith.constant 0.000000e+00 : f32
    %375 = vector.broadcast %cst_127 : f32 to vector<8x1xf32>
    %376 = arith.cmpf oge, %289, %375 : vector<8x1xf32>
    %377 = arith.andi %374, %376 : vector<8x1xi1>
    %cst_128 = arith.constant 1.500000e+01 : f32
    %378 = vector.broadcast %cst_128 : f32 to vector<8x1xf32>
    %379 = arith.cmpf ole, %289, %378 : vector<8x1xf32>
    %380 = arith.andi %377, %379 : vector<8x1xi1>
    %381 = arith.andi %380, %246 : vector<8x1xi1>
    %cst_129 = arith.constant 0.000000e+00 : f32
    %cst_130 = arith.constant 1.500000e+01 : f32
    %382 = vector.broadcast %cst_129 : f32 to vector<8x1xf32>
    %383 = arith.maximumf %382, %289 : vector<8x1xf32>
    %384 = vector.broadcast %cst_130 : f32 to vector<8x1xf32>
    %385 = arith.minimumf %384, %383 : vector<8x1xf32>
    %386 = arith.fptosi %385 : vector<8x1xf32> to vector<8x1xi32>
    %c16_i32_131 = arith.constant 16 : i32
    %387 = vector.broadcast %c16_i32_131 : i32 to vector<8x1xi32>
    %388 = arith.muli %386, %387 : vector<8x1xi32>
    %cst_132 = arith.constant 0.000000e+00 : f32
    %cst_133 = arith.constant 1.500000e+01 : f32
    %389 = vector.broadcast %cst_132 : f32 to vector<8x1xf32>
    %390 = arith.maximumf %389, %274 : vector<8x1xf32>
    %391 = vector.broadcast %cst_133 : f32 to vector<8x1xf32>
    %392 = arith.minimumf %391, %390 : vector<8x1xf32>
    %393 = arith.fptosi %392 : vector<8x1xf32> to vector<8x1xi32>
    %394 = arith.addi %388, %393 : vector<8x1xi32>
    %c256_i32_134 = arith.constant 256 : i32
    %395 = vector.broadcast %c256_i32_134 : i32 to vector<8x1xi32>
    %396 = arith.addi %394, %395 : vector<8x1xi32>
    %397 = vector.broadcast %396 : vector<8x1xi32> to vector<8x512xi32>
    %398 = arith.cmpi eq, %4, %397 : vector<8x512xi32>
    %cst_135 = arith.constant 0.000000e+00 : f32
    %399 = vector.broadcast %cst_135 : f32 to vector<8x1xf32>
    %400 = arith.select %381, %292, %399 : vector<8x1xi1>, vector<8x1xf32>
    %cst_136 = arith.constant 0.000000e+00 : f32
    %401 = vector.shape_cast %400 : vector<8x1xf32> to vector<8x1xf32>
    %402 = vector.broadcast %401 : vector<8x1xf32> to vector<8x512xf32>
    %403 = vector.broadcast %cst_136 : f32 to vector<8x512xf32>
    %404 = arith.select %398, %402, %403 : vector<8x512xi1>, vector<8x512xf32>
    %405 = arith.addf %369, %404 : vector<8x512xf32>
    %cst_137 = arith.constant 0.000000e+00 : f32
    %406 = vector.broadcast %cst_137 : f32 to vector<8x1xf32>
    %407 = arith.cmpf oge, %294, %406 : vector<8x1xf32>
    %cst_138 = arith.constant 1.500000e+01 : f32
    %408 = vector.broadcast %cst_138 : f32 to vector<8x1xf32>
    %409 = arith.cmpf ole, %294, %408 : vector<8x1xf32>
    %410 = arith.andi %407, %409 : vector<8x1xi1>
    %cst_139 = arith.constant 0.000000e+00 : f32
    %411 = vector.broadcast %cst_139 : f32 to vector<8x1xf32>
    %412 = arith.cmpf oge, %296, %411 : vector<8x1xf32>
    %413 = arith.andi %410, %412 : vector<8x1xi1>
    %cst_140 = arith.constant 1.500000e+01 : f32
    %414 = vector.broadcast %cst_140 : f32 to vector<8x1xf32>
    %415 = arith.cmpf ole, %296, %414 : vector<8x1xf32>
    %416 = arith.andi %413, %415 : vector<8x1xi1>
    %417 = arith.andi %416, %246 : vector<8x1xi1>
    %cst_141 = arith.constant 0.000000e+00 : f32
    %cst_142 = arith.constant 1.500000e+01 : f32
    %418 = vector.broadcast %cst_141 : f32 to vector<8x1xf32>
    %419 = arith.maximumf %418, %296 : vector<8x1xf32>
    %420 = vector.broadcast %cst_142 : f32 to vector<8x1xf32>
    %421 = arith.minimumf %420, %419 : vector<8x1xf32>
    %422 = arith.fptosi %421 : vector<8x1xf32> to vector<8x1xi32>
    %c16_i32_143 = arith.constant 16 : i32
    %423 = vector.broadcast %c16_i32_143 : i32 to vector<8x1xi32>
    %424 = arith.muli %422, %423 : vector<8x1xi32>
    %cst_144 = arith.constant 0.000000e+00 : f32
    %cst_145 = arith.constant 1.500000e+01 : f32
    %425 = vector.broadcast %cst_144 : f32 to vector<8x1xf32>
    %426 = arith.maximumf %425, %294 : vector<8x1xf32>
    %427 = vector.broadcast %cst_145 : f32 to vector<8x1xf32>
    %428 = arith.minimumf %427, %426 : vector<8x1xf32>
    %429 = arith.fptosi %428 : vector<8x1xf32> to vector<8x1xi32>
    %430 = arith.addi %424, %429 : vector<8x1xi32>
    %c256_i32_146 = arith.constant 256 : i32
    %431 = vector.broadcast %c256_i32_146 : i32 to vector<8x1xi32>
    %432 = arith.addi %430, %431 : vector<8x1xi32>
    %433 = vector.broadcast %432 : vector<8x1xi32> to vector<8x512xi32>
    %434 = arith.cmpi eq, %4, %433 : vector<8x512xi32>
    %cst_147 = arith.constant 0.000000e+00 : f32
    %435 = vector.broadcast %cst_147 : f32 to vector<8x1xf32>
    %436 = arith.select %417, %297, %435 : vector<8x1xi1>, vector<8x1xf32>
    %cst_148 = arith.constant 0.000000e+00 : f32
    %437 = vector.shape_cast %436 : vector<8x1xf32> to vector<8x1xf32>
    %438 = vector.broadcast %437 : vector<8x1xf32> to vector<8x512xf32>
    %439 = vector.broadcast %cst_148 : f32 to vector<8x512xf32>
    %440 = arith.select %434, %438, %439 : vector<8x512xi1>, vector<8x512xf32>
    %441 = arith.addf %405, %440 : vector<8x512xf32>
    %cst_149 = arith.constant 1.000000e+00 : f32
    %442 = vector.broadcast %cst_149 : f32 to vector<8x1xf32>
    %443 = arith.maximumf %273, %442 : vector<8x1xf32>
    %cst_150 = arith.constant 1.000000e+00 : f32
    %444 = vector.broadcast %cst_150 : f32 to vector<8x1xf32>
    %445 = arith.divf %444, %443 : vector<8x1xf32>
    %446 = vector.broadcast %445 : vector<8x1xf32> to vector<8x512xf32>
    %447 = arith.mulf %441, %446 : vector<8x512xf32>
    %448 = arith.truncf %447 : vector<8x512xf32> to vector<8x512xbf16>
    %c0_151 = arith.constant 0 : index
    %c0_152 = arith.constant 0 : index
    %c0_153 = arith.constant 0 : index
    %449 = vector.load %arg3[%c0_151, %c0_152, %c0_153] : memref<1x512x32xbf16, #tpu.memory_space<vmem>>, vector<1x512x32xbf16>
    %450 = vector.shape_cast %449 : vector<1x512x32xbf16> to vector<512x32xbf16>
    %cst_154 = arith.constant dense<0.000000e+00> : vector<8x32xf32>
    %451 = tpu.matmul %448, %450, %cst_154 {dimension_numbers = #tpu.dot_dimension_numbers<[1], [0], [0], [1], [0, 0, 1, 1], [], []>} : vector<8x512xbf16>, vector<512x32xbf16>, vector<8x32xf32> -> vector<8x32xf32>
    %cst_155 = arith.constant 6.28318548 : f32
    %452 = vector.broadcast %cst_155 : f32 to vector<8x1xf32>
    %453 = arith.mulf %19, %452 : vector<8x1xf32>
    %454 = vector.broadcast %453 : vector<8x1xf32> to vector<8x128xf32>
    %455 = vector.broadcast %2 : vector<1x128xf32> to vector<8x128xf32>
    %456 = arith.mulf %454, %455 : vector<8x128xf32>
    %457 = vector.broadcast %3 : vector<1x128xf32> to vector<8x128xf32>
    %458 = arith.addf %456, %457 : vector<8x128xf32>
    %cst_156 = arith.constant 6.28318548 : f32
    %459 = vector.broadcast %cst_156 : f32 to vector<8x1xf32>
    %460 = arith.mulf %13, %459 : vector<8x1xf32>
    %461 = vector.broadcast %460 : vector<8x1xf32> to vector<8x128xf32>
    %462 = vector.broadcast %2 : vector<1x128xf32> to vector<8x128xf32>
    %463 = arith.mulf %461, %462 : vector<8x128xf32>
    %464 = vector.broadcast %3 : vector<1x128xf32> to vector<8x128xf32>
    %465 = arith.addf %463, %464 : vector<8x128xf32>
    %cst_157 = arith.constant 6.28318548 : f32
    %466 = vector.broadcast %cst_157 : f32 to vector<8x1xf32>
    %467 = arith.mulf %25, %466 : vector<8x1xf32>
    %468 = vector.broadcast %467 : vector<8x1xf32> to vector<8x128xf32>
    %469 = vector.broadcast %2 : vector<1x128xf32> to vector<8x128xf32>
    %470 = arith.mulf %468, %469 : vector<8x128xf32>
    %471 = vector.broadcast %3 : vector<1x128xf32> to vector<8x128xf32>
    %472 = arith.addf %470, %471 : vector<8x128xf32>
    %473 = tpu.concatenate %458, %465, %472 in 1 : vector<8x128xf32>, vector<8x128xf32>, vector<8x128xf32> -> vector<8x384xf32>
    %474 = math.sin %473 : vector<8x384xf32>
    %475 = arith.truncf %474 : vector<8x384xf32> to vector<8x384xbf16>
    %c0_158 = arith.constant 0 : index
    %c0_159 = arith.constant 0 : index
    %476 = vector.load %arg6[%c0_158, %c0_159] : memref<384x32xbf16, #tpu.memory_space<vmem>>, vector<384x32xbf16>
    %cst_160 = arith.constant dense<0.000000e+00> : vector<8x32xf32>
    %477 = tpu.matmul %475, %476, %cst_160 {dimension_numbers = #tpu.dot_dimension_numbers<[1], [0], [0], [1], [0, 0, 1, 1], [], []>} : vector<8x384xbf16>, vector<384x32xbf16>, vector<8x32xf32> -> vector<8x32xf32>
    %c0_161 = arith.constant 0 : index
    %c0_162 = arith.constant 0 : index
    %478 = vector.load %arg7[%c0_161, %c0_162] : memref<1x32xf32, #tpu.memory_space<vmem>>, vector<1x32xf32>
    %479 = vector.broadcast %478 : vector<1x32xf32> to vector<8x32xf32>
    %480 = arith.addf %477, %479 : vector<8x32xf32>
    %cst_163 = arith.constant 0.000000e+00 : f32
    %481 = vector.broadcast %cst_163 : f32 to vector<8x32xf32>
    %482 = arith.maximumf %480, %481 : vector<8x32xf32>
    %483 = arith.truncf %482 : vector<8x32xf32> to vector<8x32xbf16>
    %c0_164 = arith.constant 0 : index
    %c0_165 = arith.constant 0 : index
    %484 = vector.load %arg8[%c0_164, %c0_165] : memref<32x32xbf16, #tpu.memory_space<vmem>>, vector<32x32xbf16>
    %cst_166 = arith.constant dense<0.000000e+00> : vector<8x32xf32>
    %485 = tpu.matmul %483, %484, %cst_166 {dimension_numbers = #tpu.dot_dimension_numbers<[1], [0], [0], [1], [0, 0, 1, 1], [], []>} : vector<8x32xbf16>, vector<32x32xbf16>, vector<8x32xf32> -> vector<8x32xf32>
    %c0_167 = arith.constant 0 : index
    %c0_168 = arith.constant 0 : index
    %486 = vector.load %arg9[%c0_167, %c0_168] : memref<1x32xf32, #tpu.memory_space<vmem>>, vector<1x32xf32>
    %487 = vector.broadcast %486 : vector<1x32xf32> to vector<8x32xf32>
    %488 = arith.addf %485, %487 : vector<8x32xf32>
    %489 = arith.addf %451, %488 : vector<8x32xf32>
    %490 = tpu.transpose %489, [1, 0] : vector<8x32xf32> -> vector<32x8xf32>
    %491 = arith.truncf %490 : vector<32x8xf32> to vector<32x8xbf16>
    %492 = arith.truncf %451 : vector<8x32xf32> to vector<8x32xbf16>
    %c0_169 = arith.constant 0 : index
    %c0_170 = arith.constant 0 : index
    %c0_171 = arith.constant 0 : index
    %493 = vector.load %arg10[%c0_169, %c0_170, %c0_171] : memref<2x32x128xbf16, #tpu.memory_space<vmem>>, vector<1x32x128xbf16>
    %494 = vector.shape_cast %493 : vector<1x32x128xbf16> to vector<32x128xbf16>
    %c0_172 = arith.constant 0 : index
    %c0_173 = arith.constant 0 : index
    %c0_174 = arith.constant 0 : index
    %495 = vector.load %arg11[%c0_172, %c0_173, %c0_174] : memref<2x1x128xf32, #tpu.memory_space<vmem>>, vector<1x1x128xf32>
    %496 = vector.shape_cast %495 : vector<1x1x128xf32> to vector<1x128xf32>
    %c0_175 = arith.constant 0 : index
    %c0_176 = arith.constant 0 : index
    %c0_177 = arith.constant 0 : index
    %497 = vector.load %arg12[%c0_175, %c0_176, %c0_177] : memref<2x128x32xbf16, #tpu.memory_space<vmem>>, vector<1x128x32xbf16>
    %498 = vector.shape_cast %497 : vector<1x128x32xbf16> to vector<128x32xbf16>
    %c0_178 = arith.constant 0 : index
    %c0_179 = arith.constant 0 : index
    %c0_180 = arith.constant 0 : index
    %499 = vector.load %arg13[%c0_178, %c0_179, %c0_180] : memref<2x1x32xf32, #tpu.memory_space<vmem>>, vector<1x1x32xf32>
    %500 = vector.shape_cast %499 : vector<1x1x32xf32> to vector<1x32xf32>
    %501 = arith.truncf %489 : vector<8x32xf32> to vector<8x32xbf16>
    %cst_181 = arith.constant dense<0.000000e+00> : vector<8x128xf32>
    %502 = tpu.matmul %501, %494, %cst_181 {dimension_numbers = #tpu.dot_dimension_numbers<[1], [0], [0], [1], [0, 0, 1, 1], [], []>} : vector<8x32xbf16>, vector<32x128xbf16>, vector<8x128xf32> -> vector<8x128xf32>
    %503 = vector.broadcast %496 : vector<1x128xf32> to vector<8x128xf32>
    %504 = arith.addf %502, %503 : vector<8x128xf32>
    %505 = vector.extract_strided_slice %504 {offsets = [0, 0], sizes = [8, 32], strides = [1, 1]} : vector<8x128xf32> to vector<8x32xf32>
    %506 = vector.extract_strided_slice %504 {offsets = [0, 32], sizes = [8, 32], strides = [1, 1]} : vector<8x128xf32> to vector<8x32xf32>
    %507 = vector.extract_strided_slice %504 {offsets = [0, 64], sizes = [8, 32], strides = [1, 1]} : vector<8x128xf32> to vector<8x32xf32>
    %508 = vector.extract_strided_slice %504 {offsets = [0, 96], sizes = [8, 32], strides = [1, 1]} : vector<8x128xf32> to vector<8x32xf32>
    %509 = tpu.concatenate %505, %506, %507, %508 in 0 : vector<8x32xf32>, vector<8x32xf32>, vector<8x32xf32>, vector<8x32xf32> -> vector<32x32xf32>
    %510 = arith.truncf %509 : vector<32x32xf32> to vector<32x32xbf16>
    %cst_182 = arith.constant dense<0.000000e+00> : vector<32x8xf32>
    %511 = tpu.matmul %510, %491, %cst_182 {dimension_numbers = #tpu.dot_dimension_numbers<[1], [0], [0], [1], [0, 0, 1, 1], [], []>} : vector<32x32xbf16>, vector<32x8xbf16>, vector<32x8xf32> -> vector<32x8xf32>
    %cst_183 = arith.constant dense<0xFF800000> : vector<32xf32>
    %512 = vector.multi_reduction <maximumf>, %511, %cst_183 [1] : vector<32x8xf32> to vector<32xf32>
    %513 = vector.shape_cast %512 : vector<32xf32> to vector<32x1xf32>
    %514 = vector.broadcast %513 : vector<32x1xf32> to vector<32x8xf32>
    %515 = arith.subf %511, %514 : vector<32x8xf32>
    %516 = math.exp %515 : vector<32x8xf32>
    %cst_184 = arith.constant dense<0.000000e+00> : vector<32xf32>
    %517 = vector.multi_reduction <add>, %516, %cst_184 [1] : vector<32x8xf32> to vector<32xf32>
    %518 = vector.shape_cast %517 : vector<32xf32> to vector<32x1xf32>
    %cst_185 = arith.constant 1.000000e+00 : f32
    %519 = vector.broadcast %cst_185 : f32 to vector<32x1xf32>
    %520 = arith.divf %519, %518 : vector<32x1xf32>
    %521 = vector.broadcast %520 : vector<32x1xf32> to vector<32x8xf32>
    %522 = arith.mulf %516, %521 : vector<32x8xf32>
    %523 = arith.truncf %522 : vector<32x8xf32> to vector<32x8xbf16>
    %cst_186 = arith.constant dense<0.000000e+00> : vector<32x32xf32>
    %524 = tpu.matmul %523, %492, %cst_186 {dimension_numbers = #tpu.dot_dimension_numbers<[1], [0], [0], [1], [0, 0, 1, 1], [], []>} : vector<32x8xbf16>, vector<8x32xbf16>, vector<32x32xf32> -> vector<32x32xf32>
    %525 = vector.extract_strided_slice %524 {offsets = [0, 0], sizes = [8, 32], strides = [1, 1]} : vector<32x32xf32> to vector<8x32xf32>
    %526 = vector.extract_strided_slice %524 {offsets = [8, 0], sizes = [8, 32], strides = [1, 1]} : vector<32x32xf32> to vector<8x32xf32>
    %527 = vector.extract_strided_slice %524 {offsets = [16, 0], sizes = [8, 32], strides = [1, 1]} : vector<32x32xf32> to vector<8x32xf32>
    %528 = vector.extract_strided_slice %524 {offsets = [24, 0], sizes = [8, 32], strides = [1, 1]} : vector<32x32xf32> to vector<8x32xf32>
    %529 = tpu.concatenate %525, %526, %527, %528 in 1 : vector<8x32xf32>, vector<8x32xf32>, vector<8x32xf32>, vector<8x32xf32> -> vector<8x128xf32>
    %530 = arith.truncf %529 : vector<8x128xf32> to vector<8x128xbf16>
    %cst_187 = arith.constant dense<0.000000e+00> : vector<8x32xf32>
    %531 = tpu.matmul %530, %498, %cst_187 {dimension_numbers = #tpu.dot_dimension_numbers<[1], [0], [0], [1], [0, 0, 1, 1], [], []>} : vector<8x128xbf16>, vector<128x32xbf16>, vector<8x32xf32> -> vector<8x32xf32>
    %532 = vector.broadcast %500 : vector<1x32xf32> to vector<8x32xf32>
    %533 = arith.addf %531, %532 : vector<8x32xf32>
    %534 = arith.addf %451, %533 : vector<8x32xf32>
    %c0_188 = arith.constant 0 : index
    %c0_189 = arith.constant 0 : index
    %c0_190 = arith.constant 0 : index
    %c0_191 = arith.constant 0 : index
    %535 = vector.load %arg18[%c0_188, %c0_189, %c0_190, %c0_191] : memref<2x6x1x32xf32, #tpu.memory_space<vmem>>, vector<1x1x1x32xf32>
    %536 = vector.shape_cast %535 : vector<1x1x1x32xf32> to vector<1x32xf32>
    %c0_192 = arith.constant 0 : index
    %c1_193 = arith.constant 1 : index
    %c0_194 = arith.constant 0 : index
    %c0_195 = arith.constant 0 : index
    %537 = vector.load %arg18[%c0_192, %c1_193, %c0_194, %c0_195] : memref<2x6x1x32xf32, #tpu.memory_space<vmem>>, vector<1x1x1x32xf32>
    %538 = vector.shape_cast %537 : vector<1x1x1x32xf32> to vector<1x32xf32>
    %cst_196 = arith.constant dense<0.000000e+00> : vector<8xf32>
    %539 = vector.multi_reduction <add>, %534, %cst_196 [1] : vector<8x32xf32> to vector<8xf32>
    %540 = vector.shape_cast %539 : vector<8xf32> to vector<8x1xf32>
    %cst_197 = arith.constant 3.200000e+01 : f32
    %541 = vector.broadcast %cst_197 : f32 to vector<8x1xf32>
    %542 = arith.divf %540, %541 : vector<8x1xf32>
    %543 = vector.broadcast %542 : vector<8x1xf32> to vector<8x32xf32>
    %544 = arith.subf %534, %543 : vector<8x32xf32>
    %545 = arith.mulf %544, %544 : vector<8x32xf32>
    %cst_198 = arith.constant dense<0.000000e+00> : vector<8xf32>
    %546 = vector.multi_reduction <add>, %545, %cst_198 [1] : vector<8x32xf32> to vector<8xf32>
    %547 = vector.shape_cast %546 : vector<8xf32> to vector<8x1xf32>
    %cst_199 = arith.constant 3.200000e+01 : f32
    %548 = vector.broadcast %cst_199 : f32 to vector<8x1xf32>
    %549 = arith.divf %547, %548 : vector<8x1xf32>
    %cst_200 = arith.constant 9.99999974E-6 : f32
    %550 = vector.broadcast %cst_200 : f32 to vector<8x1xf32>
    %551 = arith.addf %549, %550 : vector<8x1xf32>
    %552 = math.rsqrt %551 : vector<8x1xf32>
    %553 = vector.broadcast %552 : vector<8x1xf32> to vector<8x32xf32>
    %554 = arith.mulf %544, %553 : vector<8x32xf32>
    %555 = vector.broadcast %536 : vector<1x32xf32> to vector<8x32xf32>
    %556 = arith.mulf %554, %555 : vector<8x32xf32>
    %557 = vector.broadcast %538 : vector<1x32xf32> to vector<8x32xf32>
    %558 = arith.addf %556, %557 : vector<8x32xf32>
    %559 = arith.addf %558, %488 : vector<8x32xf32>
    %c0_201 = arith.constant 0 : index
    %c0_202 = arith.constant 0 : index
    %c0_203 = arith.constant 0 : index
    %560 = vector.load %arg4[%c0_201, %c0_202, %c0_203] : memref<1x32x512xbf16, #tpu.memory_space<vmem>>, vector<1x32x512xbf16>
    %561 = vector.shape_cast %560 : vector<1x32x512xbf16> to vector<32x512xbf16>
    %c0_204 = arith.constant 0 : index
    %c0_205 = arith.constant 0 : index
    %c0_206 = arith.constant 0 : index
    %562 = vector.load %arg3[%c0_204, %c0_205, %c0_206] : memref<1x512x32xbf16, #tpu.memory_space<vmem>>, vector<1x512x32xbf16>
    %563 = vector.shape_cast %562 : vector<1x512x32xbf16> to vector<512x32xbf16>
    %c0_207 = arith.constant 0 : index
    %c0_208 = arith.constant 0 : index
    %c0_209 = arith.constant 0 : index
    %564 = vector.load %arg14[%c0_207, %c0_208, %c0_209] : memref<2x32x128xbf16, #tpu.memory_space<vmem>>, vector<1x32x128xbf16>
    %565 = vector.shape_cast %564 : vector<1x32x128xbf16> to vector<32x128xbf16>
    %c0_210 = arith.constant 0 : index
    %c0_211 = arith.constant 0 : index
    %c0_212 = arith.constant 0 : index
    %566 = vector.load %arg15[%c0_210, %c0_211, %c0_212] : memref<2x1x128xf32, #tpu.memory_space<vmem>>, vector<1x1x128xf32>
    %567 = vector.shape_cast %566 : vector<1x1x128xf32> to vector<1x128xf32>
    %c0_213 = arith.constant 0 : index
    %c0_214 = arith.constant 0 : index
    %c0_215 = arith.constant 0 : index
    %568 = vector.load %arg16[%c0_213, %c0_214, %c0_215] : memref<2x128x32xbf16, #tpu.memory_space<vmem>>, vector<1x128x32xbf16>
    %569 = vector.shape_cast %568 : vector<1x128x32xbf16> to vector<128x32xbf16>
    %c0_216 = arith.constant 0 : index
    %c0_217 = arith.constant 0 : index
    %c0_218 = arith.constant 0 : index
    %570 = vector.load %arg17[%c0_216, %c0_217, %c0_218] : memref<2x1x32xf32, #tpu.memory_space<vmem>>, vector<1x1x32xf32>
    %571 = vector.shape_cast %570 : vector<1x1x32xf32> to vector<1x32xf32>
    %572 = arith.truncf %559 : vector<8x32xf32> to vector<8x32xbf16>
    %cst_219 = arith.constant dense<0.000000e+00> : vector<8x128xf32>
    %573 = tpu.matmul %572, %565, %cst_219 {dimension_numbers = #tpu.dot_dimension_numbers<[1], [0], [0], [1], [0, 0, 1, 1], [], []>} : vector<8x32xbf16>, vector<32x128xbf16>, vector<8x128xf32> -> vector<8x128xf32>
    %574 = vector.broadcast %567 : vector<1x128xf32> to vector<8x128xf32>
    %575 = arith.addf %573, %574 : vector<8x128xf32>
    %576 = vector.extract_strided_slice %575 {offsets = [0, 0], sizes = [8, 32], strides = [1, 1]} : vector<8x128xf32> to vector<8x32xf32>
    %577 = vector.extract_strided_slice %575 {offsets = [0, 32], sizes = [8, 32], strides = [1, 1]} : vector<8x128xf32> to vector<8x32xf32>
    %578 = vector.extract_strided_slice %575 {offsets = [0, 64], sizes = [8, 32], strides = [1, 1]} : vector<8x128xf32> to vector<8x32xf32>
    %579 = vector.extract_strided_slice %575 {offsets = [0, 96], sizes = [8, 32], strides = [1, 1]} : vector<8x128xf32> to vector<8x32xf32>
    %580 = tpu.concatenate %576, %577, %578, %579 in 0 : vector<8x32xf32>, vector<8x32xf32>, vector<8x32xf32>, vector<8x32xf32> -> vector<32x32xf32>
    %581 = arith.truncf %580 : vector<32x32xf32> to vector<32x32xbf16>
    %cst_220 = arith.constant dense<0.000000e+00> : vector<32x512xf32>
    %582 = tpu.matmul %581, %561, %cst_220 {dimension_numbers = #tpu.dot_dimension_numbers<[1], [0], [0], [1], [0, 0, 1, 1], [], []>} : vector<32x32xbf16>, vector<32x512xbf16>, vector<32x512xf32> -> vector<32x512xf32>
    %cst_221 = arith.constant dense<0xFF800000> : vector<32xf32>
    %583 = vector.multi_reduction <maximumf>, %582, %cst_221 [1] : vector<32x512xf32> to vector<32xf32>
    %584 = vector.shape_cast %583 : vector<32xf32> to vector<32x1xf32>
    %585 = vector.broadcast %584 : vector<32x1xf32> to vector<32x512xf32>
    %586 = arith.subf %582, %585 : vector<32x512xf32>
    %587 = math.exp %586 : vector<32x512xf32>
    %cst_222 = arith.constant dense<0.000000e+00> : vector<32xf32>
    %588 = vector.multi_reduction <add>, %587, %cst_222 [1] : vector<32x512xf32> to vector<32xf32>
    %589 = vector.shape_cast %588 : vector<32xf32> to vector<32x1xf32>
    %cst_223 = arith.constant 1.000000e+00 : f32
    %590 = vector.broadcast %cst_223 : f32 to vector<32x1xf32>
    %591 = arith.divf %590, %589 : vector<32x1xf32>
    %592 = vector.broadcast %591 : vector<32x1xf32> to vector<32x512xf32>
    %593 = arith.mulf %587, %592 : vector<32x512xf32>
    %594 = arith.truncf %593 : vector<32x512xf32> to vector<32x512xbf16>
    %cst_224 = arith.constant dense<0.000000e+00> : vector<32x32xf32>
    %595 = tpu.matmul %594, %563, %cst_224 {dimension_numbers = #tpu.dot_dimension_numbers<[1], [0], [0], [1], [0, 0, 1, 1], [], []>} : vector<32x512xbf16>, vector<512x32xbf16>, vector<32x32xf32> -> vector<32x32xf32>
    %596 = vector.extract_strided_slice %595 {offsets = [0, 0], sizes = [8, 32], strides = [1, 1]} : vector<32x32xf32> to vector<8x32xf32>
    %597 = vector.extract_strided_slice %595 {offsets = [8, 0], sizes = [8, 32], strides = [1, 1]} : vector<32x32xf32> to vector<8x32xf32>
    %598 = vector.extract_strided_slice %595 {offsets = [16, 0], sizes = [8, 32], strides = [1, 1]} : vector<32x32xf32> to vector<8x32xf32>
    %599 = vector.extract_strided_slice %595 {offsets = [24, 0], sizes = [8, 32], strides = [1, 1]} : vector<32x32xf32> to vector<8x32xf32>
    %600 = tpu.concatenate %596, %597, %598, %599 in 1 : vector<8x32xf32>, vector<8x32xf32>, vector<8x32xf32>, vector<8x32xf32> -> vector<8x128xf32>
    %601 = arith.truncf %600 : vector<8x128xf32> to vector<8x128xbf16>
    %cst_225 = arith.constant dense<0.000000e+00> : vector<8x32xf32>
    %602 = tpu.matmul %601, %569, %cst_225 {dimension_numbers = #tpu.dot_dimension_numbers<[1], [0], [0], [1], [0, 0, 1, 1], [], []>} : vector<8x128xbf16>, vector<128x32xbf16>, vector<8x32xf32> -> vector<8x32xf32>
    %603 = vector.broadcast %571 : vector<1x32xf32> to vector<8x32xf32>
    %604 = arith.addf %602, %603 : vector<8x32xf32>
    %605 = arith.addf %558, %604 : vector<8x32xf32>
    %c0_226 = arith.constant 0 : index
    %c2 = arith.constant 2 : index
    %c0_227 = arith.constant 0 : index
    %c0_228 = arith.constant 0 : index
    %606 = vector.load %arg18[%c0_226, %c2, %c0_227, %c0_228] : memref<2x6x1x32xf32, #tpu.memory_space<vmem>>, vector<1x1x1x32xf32>
    %607 = vector.shape_cast %606 : vector<1x1x1x32xf32> to vector<1x32xf32>
    %c0_229 = arith.constant 0 : index
    %c3 = arith.constant 3 : index
    %c0_230 = arith.constant 0 : index
    %c0_231 = arith.constant 0 : index
    %608 = vector.load %arg18[%c0_229, %c3, %c0_230, %c0_231] : memref<2x6x1x32xf32, #tpu.memory_space<vmem>>, vector<1x1x1x32xf32>
    %609 = vector.shape_cast %608 : vector<1x1x1x32xf32> to vector<1x32xf32>
    %cst_232 = arith.constant dense<0.000000e+00> : vector<8xf32>
    %610 = vector.multi_reduction <add>, %605, %cst_232 [1] : vector<8x32xf32> to vector<8xf32>
    %611 = vector.shape_cast %610 : vector<8xf32> to vector<8x1xf32>
    %cst_233 = arith.constant 3.200000e+01 : f32
    %612 = vector.broadcast %cst_233 : f32 to vector<8x1xf32>
    %613 = arith.divf %611, %612 : vector<8x1xf32>
    %614 = vector.broadcast %613 : vector<8x1xf32> to vector<8x32xf32>
    %615 = arith.subf %605, %614 : vector<8x32xf32>
    %616 = arith.mulf %615, %615 : vector<8x32xf32>
    %cst_234 = arith.constant dense<0.000000e+00> : vector<8xf32>
    %617 = vector.multi_reduction <add>, %616, %cst_234 [1] : vector<8x32xf32> to vector<8xf32>
    %618 = vector.shape_cast %617 : vector<8xf32> to vector<8x1xf32>
    %cst_235 = arith.constant 3.200000e+01 : f32
    %619 = vector.broadcast %cst_235 : f32 to vector<8x1xf32>
    %620 = arith.divf %618, %619 : vector<8x1xf32>
    %cst_236 = arith.constant 9.99999974E-6 : f32
    %621 = vector.broadcast %cst_236 : f32 to vector<8x1xf32>
    %622 = arith.addf %620, %621 : vector<8x1xf32>
    %623 = math.rsqrt %622 : vector<8x1xf32>
    %624 = vector.broadcast %623 : vector<8x1xf32> to vector<8x32xf32>
    %625 = arith.mulf %615, %624 : vector<8x32xf32>
    %626 = vector.broadcast %607 : vector<1x32xf32> to vector<8x32xf32>
    %627 = arith.mulf %625, %626 : vector<8x32xf32>
    %628 = vector.broadcast %609 : vector<1x32xf32> to vector<8x32xf32>
    %629 = arith.addf %627, %628 : vector<8x32xf32>
    %630 = arith.truncf %629 : vector<8x32xf32> to vector<8x32xbf16>
    %c0_237 = arith.constant 0 : index
    %c0_238 = arith.constant 0 : index
    %c0_239 = arith.constant 0 : index
    %631 = vector.load %arg19[%c0_237, %c0_238, %c0_239] : memref<2x32x64xbf16, #tpu.memory_space<vmem>>, vector<1x32x64xbf16>
    %632 = vector.shape_cast %631 : vector<1x32x64xbf16> to vector<32x64xbf16>
    %cst_240 = arith.constant dense<0.000000e+00> : vector<8x64xf32>
    %633 = tpu.matmul %630, %632, %cst_240 {dimension_numbers = #tpu.dot_dimension_numbers<[1], [0], [0], [1], [0, 0, 1, 1], [], []>} : vector<8x32xbf16>, vector<32x64xbf16>, vector<8x64xf32> -> vector<8x64xf32>
    %c0_241 = arith.constant 0 : index
    %c0_242 = arith.constant 0 : index
    %c0_243 = arith.constant 0 : index
    %634 = vector.load %arg20[%c0_241, %c0_242, %c0_243] : memref<2x1x64xf32, #tpu.memory_space<vmem>>, vector<1x1x64xf32>
    %635 = vector.shape_cast %634 : vector<1x1x64xf32> to vector<1x64xf32>
    %636 = vector.broadcast %635 : vector<1x64xf32> to vector<8x64xf32>
    %637 = arith.addf %633, %636 : vector<8x64xf32>
    %cst_244 = arith.constant 0.000000e+00 : f32
    %638 = vector.broadcast %cst_244 : f32 to vector<8x64xf32>
    %639 = arith.maximumf %637, %638 : vector<8x64xf32>
    %640 = arith.truncf %639 : vector<8x64xf32> to vector<8x64xbf16>
    %c0_245 = arith.constant 0 : index
    %c0_246 = arith.constant 0 : index
    %c0_247 = arith.constant 0 : index
    %641 = vector.load %arg21[%c0_245, %c0_246, %c0_247] : memref<2x64x32xbf16, #tpu.memory_space<vmem>>, vector<1x64x32xbf16>
    %642 = vector.shape_cast %641 : vector<1x64x32xbf16> to vector<64x32xbf16>
    %cst_248 = arith.constant dense<0.000000e+00> : vector<8x32xf32>
    %643 = tpu.matmul %640, %642, %cst_248 {dimension_numbers = #tpu.dot_dimension_numbers<[1], [0], [0], [1], [0, 0, 1, 1], [], []>} : vector<8x64xbf16>, vector<64x32xbf16>, vector<8x32xf32> -> vector<8x32xf32>
    %c0_249 = arith.constant 0 : index
    %c0_250 = arith.constant 0 : index
    %c0_251 = arith.constant 0 : index
    %644 = vector.load %arg22[%c0_249, %c0_250, %c0_251] : memref<2x1x32xf32, #tpu.memory_space<vmem>>, vector<1x1x32xf32>
    %645 = vector.shape_cast %644 : vector<1x1x32xf32> to vector<1x32xf32>
    %646 = vector.broadcast %645 : vector<1x32xf32> to vector<8x32xf32>
    %647 = arith.addf %643, %646 : vector<8x32xf32>
    %648 = arith.addf %629, %647 : vector<8x32xf32>
    %c0_252 = arith.constant 0 : index
    %c4 = arith.constant 4 : index
    %c0_253 = arith.constant 0 : index
    %c0_254 = arith.constant 0 : index
    %649 = vector.load %arg18[%c0_252, %c4, %c0_253, %c0_254] : memref<2x6x1x32xf32, #tpu.memory_space<vmem>>, vector<1x1x1x32xf32>
    %650 = vector.shape_cast %649 : vector<1x1x1x32xf32> to vector<1x32xf32>
    %c0_255 = arith.constant 0 : index
    %c5 = arith.constant 5 : index
    %c0_256 = arith.constant 0 : index
    %c0_257 = arith.constant 0 : index
    %651 = vector.load %arg18[%c0_255, %c5, %c0_256, %c0_257] : memref<2x6x1x32xf32, #tpu.memory_space<vmem>>, vector<1x1x1x32xf32>
    %652 = vector.shape_cast %651 : vector<1x1x1x32xf32> to vector<1x32xf32>
    %cst_258 = arith.constant dense<0.000000e+00> : vector<8xf32>
    %653 = vector.multi_reduction <add>, %648, %cst_258 [1] : vector<8x32xf32> to vector<8xf32>
    %654 = vector.shape_cast %653 : vector<8xf32> to vector<8x1xf32>
    %cst_259 = arith.constant 3.200000e+01 : f32
    %655 = vector.broadcast %cst_259 : f32 to vector<8x1xf32>
    %656 = arith.divf %654, %655 : vector<8x1xf32>
    %657 = vector.broadcast %656 : vector<8x1xf32> to vector<8x32xf32>
    %658 = arith.subf %648, %657 : vector<8x32xf32>
    %659 = arith.mulf %658, %658 : vector<8x32xf32>
    %cst_260 = arith.constant dense<0.000000e+00> : vector<8xf32>
    %660 = vector.multi_reduction <add>, %659, %cst_260 [1] : vector<8x32xf32> to vector<8xf32>
    %661 = vector.shape_cast %660 : vector<8xf32> to vector<8x1xf32>
    %cst_261 = arith.constant 3.200000e+01 : f32
    %662 = vector.broadcast %cst_261 : f32 to vector<8x1xf32>
    %663 = arith.divf %661, %662 : vector<8x1xf32>
    %cst_262 = arith.constant 9.99999974E-6 : f32
    %664 = vector.broadcast %cst_262 : f32 to vector<8x1xf32>
    %665 = arith.addf %663, %664 : vector<8x1xf32>
    %666 = math.rsqrt %665 : vector<8x1xf32>
    %667 = vector.broadcast %666 : vector<8x1xf32> to vector<8x32xf32>
    %668 = arith.mulf %658, %667 : vector<8x32xf32>
    %669 = vector.broadcast %650 : vector<1x32xf32> to vector<8x32xf32>
    %670 = arith.mulf %668, %669 : vector<8x32xf32>
    %671 = vector.broadcast %652 : vector<1x32xf32> to vector<8x32xf32>
    %672 = arith.addf %670, %671 : vector<8x32xf32>
    %673 = arith.truncf %672 : vector<8x32xf32> to vector<8x32xbf16>
    %c0_263 = arith.constant 0 : index
    %c0_264 = arith.constant 0 : index
    %674 = vector.load %arg23[%c0_263, %c0_264] : memref<32x128xbf16, #tpu.memory_space<vmem>>, vector<32x128xbf16>
    %cst_265 = arith.constant dense<0.000000e+00> : vector<8x128xf32>
    %675 = tpu.matmul %673, %674, %cst_265 {dimension_numbers = #tpu.dot_dimension_numbers<[1], [0], [0], [1], [0, 0, 1, 1], [], []>} : vector<8x32xbf16>, vector<32x128xbf16>, vector<8x128xf32> -> vector<8x128xf32>
    %c0_266 = arith.constant 0 : index
    %c0_267 = arith.constant 0 : index
    %676 = vector.load %arg24[%c0_266, %c0_267] : memref<1x128xf32, #tpu.memory_space<vmem>>, vector<1x128xf32>
    %677 = vector.broadcast %676 : vector<1x128xf32> to vector<8x128xf32>
    %678 = arith.addf %675, %677 : vector<8x128xf32>
    %cst_268 = arith.constant 0.000000e+00 : f32
    %679 = vector.broadcast %cst_268 : f32 to vector<8x128xf32>
    %680 = arith.maximumf %678, %679 : vector<8x128xf32>
    %681 = arith.truncf %680 : vector<8x128xf32> to vector<8x128xbf16>
    %c0_269 = arith.constant 0 : index
    %c0_270 = arith.constant 0 : index
    %682 = vector.load %arg25[%c0_269, %c0_270] : memref<128x128xbf16, #tpu.memory_space<vmem>>, vector<128x128xbf16>
    %cst_271 = arith.constant dense<0.000000e+00> : vector<8x128xf32>
    %683 = tpu.matmul %681, %682, %cst_271 {dimension_numbers = #tpu.dot_dimension_numbers<[1], [0], [0], [1], [0, 0, 1, 1], [], []>} : vector<8x128xbf16>, vector<128x128xbf16>, vector<8x128xf32> -> vector<8x128xf32>
    %c0_272 = arith.constant 0 : index
    %c0_273 = arith.constant 0 : index
    %684 = vector.load %arg26[%c0_272, %c0_273] : memref<1x128xf32, #tpu.memory_space<vmem>>, vector<1x128xf32>
    %685 = vector.broadcast %684 : vector<1x128xf32> to vector<8x128xf32>
    %686 = arith.addf %683, %685 : vector<8x128xf32>
    %687 = vector.extract_strided_slice %686 {offsets = [0, 6], sizes = [8, 1], strides = [1, 1]} : vector<8x128xf32> to vector<8x1xf32>
    %cst_274 = arith.constant 0.000000e+00 : f32
    %cst_275 = arith.constant 1.000000e+00 : f32
    %688 = vector.broadcast %cst_274 : f32 to vector<8x1xf32>
    %689 = arith.maximumf %688, %13 : vector<8x1xf32>
    %690 = vector.broadcast %cst_275 : f32 to vector<8x1xf32>
    %691 = arith.minimumf %690, %689 : vector<8x1xf32>
    %cst_276 = arith.constant 1.000000e-03 : f32
    %692 = vector.broadcast %cst_276 : f32 to vector<8x1xf32>
    %693 = arith.maximumf %691, %692 : vector<8x1xf32>
    %cst_277 = arith.constant 1.000000e+00 : f32
    %694 = vector.broadcast %cst_277 : f32 to vector<8x1xf32>
    %695 = arith.subf %694, %691 : vector<8x1xf32>
    %cst_278 = arith.constant 1.000000e-03 : f32
    %696 = vector.broadcast %cst_278 : f32 to vector<8x1xf32>
    %697 = arith.maximumf %695, %696 : vector<8x1xf32>
    %698 = arith.divf %693, %697 : vector<8x1xf32>
    %699 = math.log %698 : vector<8x1xf32>
    %700 = arith.addf %687, %699 : vector<8x1xf32>
    %701 = arith.negf %700 : vector<8x1xf32>
    %702 = math.exp %701 : vector<8x1xf32>
    %cst_279 = arith.constant 1.000000e+00 : f32
    %703 = vector.broadcast %cst_279 : f32 to vector<8x1xf32>
    %704 = arith.addf %703, %702 : vector<8x1xf32>
    %705 = arith.divf %703, %704 : vector<8x1xf32>
    %706 = vector.extract_strided_slice %686 {offsets = [0, 7], sizes = [8, 1], strides = [1, 1]} : vector<8x128xf32> to vector<8x1xf32>
    %cst_280 = arith.constant 0.000000e+00 : f32
    %cst_281 = arith.constant 1.000000e+00 : f32
    %707 = vector.broadcast %cst_280 : f32 to vector<8x1xf32>
    %708 = arith.maximumf %707, %19 : vector<8x1xf32>
    %709 = vector.broadcast %cst_281 : f32 to vector<8x1xf32>
    %710 = arith.minimumf %709, %708 : vector<8x1xf32>
    %cst_282 = arith.constant 1.000000e-03 : f32
    %711 = vector.broadcast %cst_282 : f32 to vector<8x1xf32>
    %712 = arith.maximumf %710, %711 : vector<8x1xf32>
    %cst_283 = arith.constant 1.000000e+00 : f32
    %713 = vector.broadcast %cst_283 : f32 to vector<8x1xf32>
    %714 = arith.subf %713, %710 : vector<8x1xf32>
    %cst_284 = arith.constant 1.000000e-03 : f32
    %715 = vector.broadcast %cst_284 : f32 to vector<8x1xf32>
    %716 = arith.maximumf %714, %715 : vector<8x1xf32>
    %717 = arith.divf %712, %716 : vector<8x1xf32>
    %718 = math.log %717 : vector<8x1xf32>
    %719 = arith.addf %706, %718 : vector<8x1xf32>
    %720 = arith.negf %719 : vector<8x1xf32>
    %721 = math.exp %720 : vector<8x1xf32>
    %cst_285 = arith.constant 1.000000e+00 : f32
    %722 = vector.broadcast %cst_285 : f32 to vector<8x1xf32>
    %723 = arith.addf %722, %721 : vector<8x1xf32>
    %724 = arith.divf %722, %723 : vector<8x1xf32>
    %725 = vector.extract_strided_slice %686 {offsets = [0, 8], sizes = [8, 1], strides = [1, 1]} : vector<8x128xf32> to vector<8x1xf32>
    %cst_286 = arith.constant 0.000000e+00 : f32
    %cst_287 = arith.constant 1.000000e+00 : f32
    %726 = vector.broadcast %cst_286 : f32 to vector<8x1xf32>
    %727 = arith.maximumf %726, %25 : vector<8x1xf32>
    %728 = vector.broadcast %cst_287 : f32 to vector<8x1xf32>
    %729 = arith.minimumf %728, %727 : vector<8x1xf32>
    %cst_288 = arith.constant 1.000000e-03 : f32
    %730 = vector.broadcast %cst_288 : f32 to vector<8x1xf32>
    %731 = arith.maximumf %729, %730 : vector<8x1xf32>
    %cst_289 = arith.constant 1.000000e+00 : f32
    %732 = vector.broadcast %cst_289 : f32 to vector<8x1xf32>
    %733 = arith.subf %732, %729 : vector<8x1xf32>
    %cst_290 = arith.constant 1.000000e-03 : f32
    %734 = vector.broadcast %cst_290 : f32 to vector<8x1xf32>
    %735 = arith.maximumf %733, %734 : vector<8x1xf32>
    %736 = arith.divf %731, %735 : vector<8x1xf32>
    %737 = math.log %736 : vector<8x1xf32>
    %738 = arith.addf %725, %737 : vector<8x1xf32>
    %739 = arith.negf %738 : vector<8x1xf32>
    %740 = math.exp %739 : vector<8x1xf32>
    %cst_291 = arith.constant 1.000000e+00 : f32
    %741 = vector.broadcast %cst_291 : f32 to vector<8x1xf32>
    %742 = arith.addf %741, %740 : vector<8x1xf32>
    %743 = arith.divf %741, %742 : vector<8x1xf32>
    %cst_292 = arith.constant 4.000000e+00 : f32
    %744 = vector.broadcast %cst_292 : f32 to vector<8x1xf32>
    %745 = arith.mulf %705, %744 : vector<8x1xf32>
    %cst_293 = arith.constant -2.000000e+00 : f32
    %746 = vector.broadcast %cst_293 : f32 to vector<8x1xf32>
    %747 = arith.addf %745, %746 : vector<8x1xf32>
    %cst_294 = arith.constant 4.000000e+00 : f32
    %748 = vector.broadcast %cst_294 : f32 to vector<8x1xf32>
    %749 = arith.mulf %724, %748 : vector<8x1xf32>
    %cst_295 = arith.constant -2.000000e+00 : f32
    %750 = vector.broadcast %cst_295 : f32 to vector<8x1xf32>
    %751 = arith.addf %749, %750 : vector<8x1xf32>
    %cst_296 = arith.constant 4.000000e+00 : f32
    %752 = vector.broadcast %cst_296 : f32 to vector<8x1xf32>
    %753 = arith.mulf %743, %752 : vector<8x1xf32>
    %cst_297 = arith.constant 5.000000e-01 : f32
    %754 = vector.broadcast %cst_297 : f32 to vector<8x1xf32>
    %755 = arith.addf %753, %754 : vector<8x1xf32>
    %756 = vector.extract_strided_slice %686 {offsets = [0, 0], sizes = [8, 18], strides = [1, 1]} : vector<8x128xf32> to vector<8x18xf32>
    %cst_298 = arith.constant 0.000000e+00 : f32
    %757 = vector.broadcast %cst_298 : f32 to vector<8x104xf32>
    %758 = tpu.concatenate %756, %747, %751, %755, %29, %33, %37, %757 in 1 : vector<8x18xf32>, vector<8x1xf32>, vector<8x1xf32>, vector<8x1xf32>, vector<8x1xf32>, vector<8x1xf32>, vector<8x1xf32>, vector<8x104xf32> -> vector<8x128xf32>
    %c0_299 = arith.constant 0 : index
    %c0_300 = arith.constant 0 : index
    %c0_301 = arith.constant 0 : index
    %c0_302 = arith.constant 0 : index
    %759 = vector.load %arg27[%c0_299, %c0_300, %c0_301, %c0_302] : memref<1x2x8x128xf32, #tpu.memory_space<vmem>>, vector<1x1x8x128xf32>
    %760 = vector.shape_cast %759 : vector<1x1x8x128xf32> to vector<8x128xf32>
    %761 = vector.shape_cast %758 : vector<8x128xf32> to vector<1x1x8x128xf32>
    tpu.vector_store %arg27[%c0_299, %c0_300, %c0_301, %c0_302], %761 {strides = array<i32>} : memref<1x2x8x128xf32, #tpu.memory_space<vmem>>, vector<1x1x8x128xf32>,
    %cst_303 = arith.constant 4.000000e+00 : f32
    %762 = vector.broadcast %cst_303 : f32 to vector<8x1xf32>
    %763 = arith.mulf %705, %762 : vector<8x1xf32>
    %cst_304 = arith.constant -2.000000e+00 : f32
    %764 = vector.broadcast %cst_304 : f32 to vector<8x1xf32>
    %765 = arith.addf %763, %764 : vector<8x1xf32>
    %cst_305 = arith.constant 4.000000e+00 : f32
    %766 = vector.broadcast %cst_305 : f32 to vector<8x1xf32>
    %767 = arith.mulf %724, %766 : vector<8x1xf32>
    %cst_306 = arith.constant -2.000000e+00 : f32
    %768 = vector.broadcast %cst_306 : f32 to vector<8x1xf32>
    %769 = arith.addf %767, %768 : vector<8x1xf32>
    %cst_307 = arith.constant 4.000000e+00 : f32
    %770 = vector.broadcast %cst_307 : f32 to vector<8x1xf32>
    %771 = arith.mulf %743, %770 : vector<8x1xf32>
    %cst_308 = arith.constant 5.000000e-01 : f32
    %772 = vector.broadcast %cst_308 : f32 to vector<8x1xf32>
    %773 = arith.addf %771, %772 : vector<8x1xf32>
    %774 = tpu.concatenate %765, %769, %773, %5 in 1 : vector<8x1xf32>, vector<8x1xf32>, vector<8x1xf32>, vector<8x1xf32> -> vector<8x4xf32>
    %cst_309 = arith.constant dense<0.000000e+00> : vector<8x6xf32>
    %775 = tpu.matmul %774, %1, %cst_309 {dimension_numbers = #tpu.dot_dimension_numbers<[1], [0], [0], [1], [0, 0, 1, 1], [], []>} : vector<8x4xf32>, vector<4x6xf32>, vector<8x6xf32> -> vector<8x6xf32>
    %cst_310 = arith.constant 0.000000e+00 : f32
    %776 = vector.broadcast %cst_310 : f32 to vector<8x512xf32>
    %cst_311 = arith.constant 0.000000e+00 : f32
    %777 = vector.broadcast %cst_311 : f32 to vector<8x1xf32>
    %778 = vector.extract_strided_slice %775 {offsets = [0, 0], sizes = [8, 1], strides = [1, 1]} : vector<8x6xf32> to vector<8x1xf32>
    %779 = vector.extract_strided_slice %775 {offsets = [0, 1], sizes = [8, 1], strides = [1, 1]} : vector<8x6xf32> to vector<8x1xf32>
    %780 = vector.extract_strided_slice %775 {offsets = [0, 2], sizes = [8, 1], strides = [1, 1]} : vector<8x6xf32> to vector<8x1xf32>
    %cst_312 = arith.constant 9.99999974E-6 : f32
    %781 = vector.broadcast %cst_312 : f32 to vector<8x1xf32>
    %782 = arith.cmpf ogt, %780, %781 : vector<8x1xf32>
    %cst_313 = arith.constant 9.99999974E-6 : f32
    %783 = vector.broadcast %cst_313 : f32 to vector<8x1xf32>
    %784 = arith.maximumf %780, %783 : vector<8x1xf32>
    %cst_314 = arith.constant 8.000000e+00 : f32
    %785 = vector.broadcast %cst_314 : f32 to vector<8x1xf32>
    %786 = arith.mulf %785, %778 : vector<8x1xf32>
    %787 = arith.divf %786, %784 : vector<8x1xf32>
    %cst_315 = arith.constant 7.500000e+00 : f32
    %788 = vector.broadcast %cst_315 : f32 to vector<8x1xf32>
    %789 = arith.addf %787, %788 : vector<8x1xf32>
    %cst_316 = arith.constant 8.000000e+00 : f32
    %790 = vector.broadcast %cst_316 : f32 to vector<8x1xf32>
    %791 = arith.mulf %790, %779 : vector<8x1xf32>
    %792 = arith.divf %791, %784 : vector<8x1xf32>
    %cst_317 = arith.constant 7.500000e+00 : f32
    %793 = vector.broadcast %cst_317 : f32 to vector<8x1xf32>
    %794 = arith.addf %792, %793 : vector<8x1xf32>
    %cst_318 = arith.constant 0.000000e+00 : f32
    %795 = vector.broadcast %cst_318 : f32 to vector<8x1xf32>
    %796 = arith.cmpf oge, %789, %795 : vector<8x1xf32>
    %797 = arith.andi %782, %796 : vector<8x1xi1>
    %cst_319 = arith.constant 1.500000e+01 : f32
    %798 = vector.broadcast %cst_319 : f32 to vector<8x1xf32>
    %799 = arith.cmpf ole, %789, %798 : vector<8x1xf32>
    %800 = arith.andi %797, %799 : vector<8x1xi1>
    %cst_320 = arith.constant 0.000000e+00 : f32
    %801 = vector.broadcast %cst_320 : f32 to vector<8x1xf32>
    %802 = arith.cmpf oge, %794, %801 : vector<8x1xf32>
    %803 = arith.andi %800, %802 : vector<8x1xi1>
    %cst_321 = arith.constant 1.500000e+01 : f32
    %804 = vector.broadcast %cst_321 : f32 to vector<8x1xf32>
    %805 = arith.cmpf ole, %794, %804 : vector<8x1xf32>
    %806 = arith.andi %803, %805 : vector<8x1xi1>
    %807 = arith.extui %806 : vector<8x1xi1> to vector<8x1xi32>
    %808 = arith.sitofp %807 : vector<8x1xi32> to vector<8x1xf32>
    %809 = arith.addf %777, %808 : vector<8x1xf32>
    %810 = math.floor %789 : vector<8x1xf32>
    %811 = math.floor %794 : vector<8x1xf32>
    %812 = arith.subf %789, %810 : vector<8x1xf32>
    %813 = arith.subf %794, %811 : vector<8x1xf32>
    %cst_322 = arith.constant 1.000000e+00 : f32
    %814 = vector.broadcast %cst_322 : f32 to vector<8x1xf32>
    %815 = arith.subf %814, %812 : vector<8x1xf32>
    %cst_323 = arith.constant 1.000000e+00 : f32
    %816 = vector.broadcast %cst_323 : f32 to vector<8x1xf32>
    %817 = arith.subf %816, %813 : vector<8x1xf32>
    %818 = arith.mulf %815, %817 : vector<8x1xf32>
    %cst_324 = arith.constant 1.000000e+00 : f32
    %819 = vector.broadcast %cst_324 : f32 to vector<8x1xf32>
    %820 = arith.addf %810, %819 : vector<8x1xf32>
    %cst_325 = arith.constant 1.000000e+00 : f32
    %821 = vector.broadcast %cst_325 : f32 to vector<8x1xf32>
    %822 = arith.subf %821, %813 : vector<8x1xf32>
    %823 = arith.mulf %812, %822 : vector<8x1xf32>
    %cst_326 = arith.constant 1.000000e+00 : f32
    %824 = vector.broadcast %cst_326 : f32 to vector<8x1xf32>
    %825 = arith.addf %811, %824 : vector<8x1xf32>
    %cst_327 = arith.constant 1.000000e+00 : f32
    %826 = vector.broadcast %cst_327 : f32 to vector<8x1xf32>
    %827 = arith.subf %826, %812 : vector<8x1xf32>
    %828 = arith.mulf %827, %813 : vector<8x1xf32>
    %cst_328 = arith.constant 1.000000e+00 : f32
    %829 = vector.broadcast %cst_328 : f32 to vector<8x1xf32>
    %830 = arith.addf %810, %829 : vector<8x1xf32>
    %cst_329 = arith.constant 1.000000e+00 : f32
    %831 = vector.broadcast %cst_329 : f32 to vector<8x1xf32>
    %832 = arith.addf %811, %831 : vector<8x1xf32>
    %833 = arith.mulf %812, %813 : vector<8x1xf32>
    %cst_330 = arith.constant 0.000000e+00 : f32
    %834 = vector.broadcast %cst_330 : f32 to vector<8x1xf32>
    %835 = arith.cmpf oge, %810, %834 : vector<8x1xf32>
    %cst_331 = arith.constant 1.500000e+01 : f32
    %836 = vector.broadcast %cst_331 : f32 to vector<8x1xf32>
    %837 = arith.cmpf ole, %810, %836 : vector<8x1xf32>
    %838 = arith.andi %835, %837 : vector<8x1xi1>
    %cst_332 = arith.constant 0.000000e+00 : f32
    %839 = vector.broadcast %cst_332 : f32 to vector<8x1xf32>
    %840 = arith.cmpf oge, %811, %839 : vector<8x1xf32>
    %841 = arith.andi %838, %840 : vector<8x1xi1>
    %cst_333 = arith.constant 1.500000e+01 : f32
    %842 = vector.broadcast %cst_333 : f32 to vector<8x1xf32>
    %843 = arith.cmpf ole, %811, %842 : vector<8x1xf32>
    %844 = arith.andi %841, %843 : vector<8x1xi1>
    %845 = arith.andi %844, %782 : vector<8x1xi1>
    %cst_334 = arith.constant 0.000000e+00 : f32
    %cst_335 = arith.constant 1.500000e+01 : f32
    %846 = vector.broadcast %cst_334 : f32 to vector<8x1xf32>
    %847 = arith.maximumf %846, %811 : vector<8x1xf32>
    %848 = vector.broadcast %cst_335 : f32 to vector<8x1xf32>
    %849 = arith.minimumf %848, %847 : vector<8x1xf32>
    %850 = arith.fptosi %849 : vector<8x1xf32> to vector<8x1xi32>
    %c16_i32_336 = arith.constant 16 : i32
    %851 = vector.broadcast %c16_i32_336 : i32 to vector<8x1xi32>
    %852 = arith.muli %850, %851 : vector<8x1xi32>
    %cst_337 = arith.constant 0.000000e+00 : f32
    %cst_338 = arith.constant 1.500000e+01 : f32
    %853 = vector.broadcast %cst_337 : f32 to vector<8x1xf32>
    %854 = arith.maximumf %853, %810 : vector<8x1xf32>
    %855 = vector.broadcast %cst_338 : f32 to vector<8x1xf32>
    %856 = arith.minimumf %855, %854 : vector<8x1xf32>
    %857 = arith.fptosi %856 : vector<8x1xf32> to vector<8x1xi32>
    %858 = arith.addi %852, %857 : vector<8x1xi32>
    %c0_i32_339 = arith.constant 0 : i32
    %859 = vector.broadcast %c0_i32_339 : i32 to vector<8x1xi32>
    %860 = arith.addi %858, %859 : vector<8x1xi32>
    %861 = vector.broadcast %860 : vector<8x1xi32> to vector<8x512xi32>
    %862 = arith.cmpi eq, %4, %861 : vector<8x512xi32>
    %cst_340 = arith.constant 0.000000e+00 : f32
    %863 = vector.broadcast %cst_340 : f32 to vector<8x1xf32>
    %864 = arith.select %845, %818, %863 : vector<8x1xi1>, vector<8x1xf32>
    %cst_341 = arith.constant 0.000000e+00 : f32
    %865 = vector.shape_cast %864 : vector<8x1xf32> to vector<8x1xf32>
    %866 = vector.broadcast %865 : vector<8x1xf32> to vector<8x512xf32>
    %867 = vector.broadcast %cst_341 : f32 to vector<8x512xf32>
    %868 = arith.select %862, %866, %867 : vector<8x512xi1>, vector<8x512xf32>
    %869 = arith.addf %776, %868 : vector<8x512xf32>
    %cst_342 = arith.constant 0.000000e+00 : f32
    %870 = vector.broadcast %cst_342 : f32 to vector<8x1xf32>
    %871 = arith.cmpf oge, %820, %870 : vector<8x1xf32>
    %cst_343 = arith.constant 1.500000e+01 : f32
    %872 = vector.broadcast %cst_343 : f32 to vector<8x1xf32>
    %873 = arith.cmpf ole, %820, %872 : vector<8x1xf32>
    %874 = arith.andi %871, %873 : vector<8x1xi1>
    %cst_344 = arith.constant 0.000000e+00 : f32
    %875 = vector.broadcast %cst_344 : f32 to vector<8x1xf32>
    %876 = arith.cmpf oge, %811, %875 : vector<8x1xf32>
    %877 = arith.andi %874, %876 : vector<8x1xi1>
    %cst_345 = arith.constant 1.500000e+01 : f32
    %878 = vector.broadcast %cst_345 : f32 to vector<8x1xf32>
    %879 = arith.cmpf ole, %811, %878 : vector<8x1xf32>
    %880 = arith.andi %877, %879 : vector<8x1xi1>
    %881 = arith.andi %880, %782 : vector<8x1xi1>
    %cst_346 = arith.constant 0.000000e+00 : f32
    %cst_347 = arith.constant 1.500000e+01 : f32
    %882 = vector.broadcast %cst_346 : f32 to vector<8x1xf32>
    %883 = arith.maximumf %882, %811 : vector<8x1xf32>
    %884 = vector.broadcast %cst_347 : f32 to vector<8x1xf32>
    %885 = arith.minimumf %884, %883 : vector<8x1xf32>
    %886 = arith.fptosi %885 : vector<8x1xf32> to vector<8x1xi32>
    %c16_i32_348 = arith.constant 16 : i32
    %887 = vector.broadcast %c16_i32_348 : i32 to vector<8x1xi32>
    %888 = arith.muli %886, %887 : vector<8x1xi32>
    %cst_349 = arith.constant 0.000000e+00 : f32
    %cst_350 = arith.constant 1.500000e+01 : f32
    %889 = vector.broadcast %cst_349 : f32 to vector<8x1xf32>
    %890 = arith.maximumf %889, %820 : vector<8x1xf32>
    %891 = vector.broadcast %cst_350 : f32 to vector<8x1xf32>
    %892 = arith.minimumf %891, %890 : vector<8x1xf32>
    %893 = arith.fptosi %892 : vector<8x1xf32> to vector<8x1xi32>
    %894 = arith.addi %888, %893 : vector<8x1xi32>
    %c0_i32_351 = arith.constant 0 : i32
    %895 = vector.broadcast %c0_i32_351 : i32 to vector<8x1xi32>
    %896 = arith.addi %894, %895 : vector<8x1xi32>
    %897 = vector.broadcast %896 : vector<8x1xi32> to vector<8x512xi32>
    %898 = arith.cmpi eq, %4, %897 : vector<8x512xi32>
    %cst_352 = arith.constant 0.000000e+00 : f32
    %899 = vector.broadcast %cst_352 : f32 to vector<8x1xf32>
    %900 = arith.select %881, %823, %899 : vector<8x1xi1>, vector<8x1xf32>
    %cst_353 = arith.constant 0.000000e+00 : f32
    %901 = vector.shape_cast %900 : vector<8x1xf32> to vector<8x1xf32>
    %902 = vector.broadcast %901 : vector<8x1xf32> to vector<8x512xf32>
    %903 = vector.broadcast %cst_353 : f32 to vector<8x512xf32>
    %904 = arith.select %898, %902, %903 : vector<8x512xi1>, vector<8x512xf32>
    %905 = arith.addf %869, %904 : vector<8x512xf32>
    %cst_354 = arith.constant 0.000000e+00 : f32
    %906 = vector.broadcast %cst_354 : f32 to vector<8x1xf32>
    %907 = arith.cmpf oge, %810, %906 : vector<8x1xf32>
    %cst_355 = arith.constant 1.500000e+01 : f32
    %908 = vector.broadcast %cst_355 : f32 to vector<8x1xf32>
    %909 = arith.cmpf ole, %810, %908 : vector<8x1xf32>
    %910 = arith.andi %907, %909 : vector<8x1xi1>
    %cst_356 = arith.constant 0.000000e+00 : f32
    %911 = vector.broadcast %cst_356 : f32 to vector<8x1xf32>
    %912 = arith.cmpf oge, %825, %911 : vector<8x1xf32>
    %913 = arith.andi %910, %912 : vector<8x1xi1>
    %cst_357 = arith.constant 1.500000e+01 : f32
    %914 = vector.broadcast %cst_357 : f32 to vector<8x1xf32>
    %915 = arith.cmpf ole, %825, %914 : vector<8x1xf32>
    %916 = arith.andi %913, %915 : vector<8x1xi1>
    %917 = arith.andi %916, %782 : vector<8x1xi1>
    %cst_358 = arith.constant 0.000000e+00 : f32
    %cst_359 = arith.constant 1.500000e+01 : f32
    %918 = vector.broadcast %cst_358 : f32 to vector<8x1xf32>
    %919 = arith.maximumf %918, %825 : vector<8x1xf32>
    %920 = vector.broadcast %cst_359 : f32 to vector<8x1xf32>
    %921 = arith.minimumf %920, %919 : vector<8x1xf32>
    %922 = arith.fptosi %921 : vector<8x1xf32> to vector<8x1xi32>
    %c16_i32_360 = arith.constant 16 : i32
    %923 = vector.broadcast %c16_i32_360 : i32 to vector<8x1xi32>
    %924 = arith.muli %922, %923 : vector<8x1xi32>
    %cst_361 = arith.constant 0.000000e+00 : f32
    %cst_362 = arith.constant 1.500000e+01 : f32
    %925 = vector.broadcast %cst_361 : f32 to vector<8x1xf32>
    %926 = arith.maximumf %925, %810 : vector<8x1xf32>
    %927 = vector.broadcast %cst_362 : f32 to vector<8x1xf32>
    %928 = arith.minimumf %927, %926 : vector<8x1xf32>
    %929 = arith.fptosi %928 : vector<8x1xf32> to vector<8x1xi32>
    %930 = arith.addi %924, %929 : vector<8x1xi32>
    %c0_i32_363 = arith.constant 0 : i32
    %931 = vector.broadcast %c0_i32_363 : i32 to vector<8x1xi32>
    %932 = arith.addi %930, %931 : vector<8x1xi32>
    %933 = vector.broadcast %932 : vector<8x1xi32> to vector<8x512xi32>
    %934 = arith.cmpi eq, %4, %933 : vector<8x512xi32>
    %cst_364 = arith.constant 0.000000e+00 : f32
    %935 = vector.broadcast %cst_364 : f32 to vector<8x1xf32>
    %936 = arith.select %917, %828, %935 : vector<8x1xi1>, vector<8x1xf32>
    %cst_365 = arith.constant 0.000000e+00 : f32
    %937 = vector.shape_cast %936 : vector<8x1xf32> to vector<8x1xf32>
    %938 = vector.broadcast %937 : vector<8x1xf32> to vector<8x512xf32>
    %939 = vector.broadcast %cst_365 : f32 to vector<8x512xf32>
    %940 = arith.select %934, %938, %939 : vector<8x512xi1>, vector<8x512xf32>
    %941 = arith.addf %905, %940 : vector<8x512xf32>
    %cst_366 = arith.constant 0.000000e+00 : f32
    %942 = vector.broadcast %cst_366 : f32 to vector<8x1xf32>
    %943 = arith.cmpf oge, %830, %942 : vector<8x1xf32>
    %cst_367 = arith.constant 1.500000e+01 : f32
    %944 = vector.broadcast %cst_367 : f32 to vector<8x1xf32>
    %945 = arith.cmpf ole, %830, %944 : vector<8x1xf32>
    %946 = arith.andi %943, %945 : vector<8x1xi1>
    %cst_368 = arith.constant 0.000000e+00 : f32
    %947 = vector.broadcast %cst_368 : f32 to vector<8x1xf32>
    %948 = arith.cmpf oge, %832, %947 : vector<8x1xf32>
    %949 = arith.andi %946, %948 : vector<8x1xi1>
    %cst_369 = arith.constant 1.500000e+01 : f32
    %950 = vector.broadcast %cst_369 : f32 to vector<8x1xf32>
    %951 = arith.cmpf ole, %832, %950 : vector<8x1xf32>
    %952 = arith.andi %949, %951 : vector<8x1xi1>
    %953 = arith.andi %952, %782 : vector<8x1xi1>
    %cst_370 = arith.constant 0.000000e+00 : f32
    %cst_371 = arith.constant 1.500000e+01 : f32
    %954 = vector.broadcast %cst_370 : f32 to vector<8x1xf32>
    %955 = arith.maximumf %954, %832 : vector<8x1xf32>
    %956 = vector.broadcast %cst_371 : f32 to vector<8x1xf32>
    %957 = arith.minimumf %956, %955 : vector<8x1xf32>
    %958 = arith.fptosi %957 : vector<8x1xf32> to vector<8x1xi32>
    %c16_i32_372 = arith.constant 16 : i32
    %959 = vector.broadcast %c16_i32_372 : i32 to vector<8x1xi32>
    %960 = arith.muli %958, %959 : vector<8x1xi32>
    %cst_373 = arith.constant 0.000000e+00 : f32
    %cst_374 = arith.constant 1.500000e+01 : f32
    %961 = vector.broadcast %cst_373 : f32 to vector<8x1xf32>
    %962 = arith.maximumf %961, %830 : vector<8x1xf32>
    %963 = vector.broadcast %cst_374 : f32 to vector<8x1xf32>
    %964 = arith.minimumf %963, %962 : vector<8x1xf32>
    %965 = arith.fptosi %964 : vector<8x1xf32> to vector<8x1xi32>
    %966 = arith.addi %960, %965 : vector<8x1xi32>
    %c0_i32_375 = arith.constant 0 : i32
    %967 = vector.broadcast %c0_i32_375 : i32 to vector<8x1xi32>
    %968 = arith.addi %966, %967 : vector<8x1xi32>
    %969 = vector.broadcast %968 : vector<8x1xi32> to vector<8x512xi32>
    %970 = arith.cmpi eq, %4, %969 : vector<8x512xi32>
    %cst_376 = arith.constant 0.000000e+00 : f32
    %971 = vector.broadcast %cst_376 : f32 to vector<8x1xf32>
    %972 = arith.select %953, %833, %971 : vector<8x1xi1>, vector<8x1xf32>
    %cst_377 = arith.constant 0.000000e+00 : f32
    %973 = vector.shape_cast %972 : vector<8x1xf32> to vector<8x1xf32>
    %974 = vector.broadcast %973 : vector<8x1xf32> to vector<8x512xf32>
    %975 = vector.broadcast %cst_377 : f32 to vector<8x512xf32>
    %976 = arith.select %970, %974, %975 : vector<8x512xi1>, vector<8x512xf32>
    %977 = arith.addf %941, %976 : vector<8x512xf32>
    %978 = vector.extract_strided_slice %775 {offsets = [0, 3], sizes = [8, 1], strides = [1, 1]} : vector<8x6xf32> to vector<8x1xf32>
    %979 = vector.extract_strided_slice %775 {offsets = [0, 4], sizes = [8, 1], strides = [1, 1]} : vector<8x6xf32> to vector<8x1xf32>
    %980 = vector.extract_strided_slice %775 {offsets = [0, 5], sizes = [8, 1], strides = [1, 1]} : vector<8x6xf32> to vector<8x1xf32>
    %cst_378 = arith.constant 9.99999974E-6 : f32
    %981 = vector.broadcast %cst_378 : f32 to vector<8x1xf32>
    %982 = arith.cmpf ogt, %980, %981 : vector<8x1xf32>
    %cst_379 = arith.constant 9.99999974E-6 : f32
    %983 = vector.broadcast %cst_379 : f32 to vector<8x1xf32>
    %984 = arith.maximumf %980, %983 : vector<8x1xf32>
    %cst_380 = arith.constant 8.000000e+00 : f32
    %985 = vector.broadcast %cst_380 : f32 to vector<8x1xf32>
    %986 = arith.mulf %985, %978 : vector<8x1xf32>
    %987 = arith.divf %986, %984 : vector<8x1xf32>
    %cst_381 = arith.constant 7.500000e+00 : f32
    %988 = vector.broadcast %cst_381 : f32 to vector<8x1xf32>
    %989 = arith.addf %987, %988 : vector<8x1xf32>
    %cst_382 = arith.constant 8.000000e+00 : f32
    %990 = vector.broadcast %cst_382 : f32 to vector<8x1xf32>
    %991 = arith.mulf %990, %979 : vector<8x1xf32>
    %992 = arith.divf %991, %984 : vector<8x1xf32>
    %cst_383 = arith.constant 7.500000e+00 : f32
    %993 = vector.broadcast %cst_383 : f32 to vector<8x1xf32>
    %994 = arith.addf %992, %993 : vector<8x1xf32>
    %cst_384 = arith.constant 0.000000e+00 : f32
    %995 = vector.broadcast %cst_384 : f32 to vector<8x1xf32>
    %996 = arith.cmpf oge, %989, %995 : vector<8x1xf32>
    %997 = arith.andi %982, %996 : vector<8x1xi1>
    %cst_385 = arith.constant 1.500000e+01 : f32
    %998 = vector.broadcast %cst_385 : f32 to vector<8x1xf32>
    %999 = arith.cmpf ole, %989, %998 : vector<8x1xf32>
    %1000 = arith.andi %997, %999 : vector<8x1xi1>
    %cst_386 = arith.constant 0.000000e+00 : f32
    %1001 = vector.broadcast %cst_386 : f32 to vector<8x1xf32>
    %1002 = arith.cmpf oge, %994, %1001 : vector<8x1xf32>
    %1003 = arith.andi %1000, %1002 : vector<8x1xi1>
    %cst_387 = arith.constant 1.500000e+01 : f32
    %1004 = vector.broadcast %cst_387 : f32 to vector<8x1xf32>
    %1005 = arith.cmpf ole, %994, %1004 : vector<8x1xf32>
    %1006 = arith.andi %1003, %1005 : vector<8x1xi1>
    %1007 = arith.extui %1006 : vector<8x1xi1> to vector<8x1xi32>
    %1008 = arith.sitofp %1007 : vector<8x1xi32> to vector<8x1xf32>
    %1009 = arith.addf %809, %1008 : vector<8x1xf32>
    %1010 = math.floor %989 : vector<8x1xf32>
    %1011 = math.floor %994 : vector<8x1xf32>
    %1012 = arith.subf %989, %1010 : vector<8x1xf32>
    %1013 = arith.subf %994, %1011 : vector<8x1xf32>
    %cst_388 = arith.constant 1.000000e+00 : f32
    %1014 = vector.broadcast %cst_388 : f32 to vector<8x1xf32>
    %1015 = arith.subf %1014, %1012 : vector<8x1xf32>
    %cst_389 = arith.constant 1.000000e+00 : f32
    %1016 = vector.broadcast %cst_389 : f32 to vector<8x1xf32>
    %1017 = arith.subf %1016, %1013 : vector<8x1xf32>
    %1018 = arith.mulf %1015, %1017 : vector<8x1xf32>
    %cst_390 = arith.constant 1.000000e+00 : f32
    %1019 = vector.broadcast %cst_390 : f32 to vector<8x1xf32>
    %1020 = arith.addf %1010, %1019 : vector<8x1xf32>
    %cst_391 = arith.constant 1.000000e+00 : f32
    %1021 = vector.broadcast %cst_391 : f32 to vector<8x1xf32>
    %1022 = arith.subf %1021, %1013 : vector<8x1xf32>
    %1023 = arith.mulf %1012, %1022 : vector<8x1xf32>
    %cst_392 = arith.constant 1.000000e+00 : f32
    %1024 = vector.broadcast %cst_392 : f32 to vector<8x1xf32>
    %1025 = arith.addf %1011, %1024 : vector<8x1xf32>
    %cst_393 = arith.constant 1.000000e+00 : f32
    %1026 = vector.broadcast %cst_393 : f32 to vector<8x1xf32>
    %1027 = arith.subf %1026, %1012 : vector<8x1xf32>
    %1028 = arith.mulf %1027, %1013 : vector<8x1xf32>
    %cst_394 = arith.constant 1.000000e+00 : f32
    %1029 = vector.broadcast %cst_394 : f32 to vector<8x1xf32>
    %1030 = arith.addf %1010, %1029 : vector<8x1xf32>
    %cst_395 = arith.constant 1.000000e+00 : f32
    %1031 = vector.broadcast %cst_395 : f32 to vector<8x1xf32>
    %1032 = arith.addf %1011, %1031 : vector<8x1xf32>
    %1033 = arith.mulf %1012, %1013 : vector<8x1xf32>
    %cst_396 = arith.constant 0.000000e+00 : f32
    %1034 = vector.broadcast %cst_396 : f32 to vector<8x1xf32>
    %1035 = arith.cmpf oge, %1010, %1034 : vector<8x1xf32>
    %cst_397 = arith.constant 1.500000e+01 : f32
    %1036 = vector.broadcast %cst_397 : f32 to vector<8x1xf32>
    %1037 = arith.cmpf ole, %1010, %1036 : vector<8x1xf32>
    %1038 = arith.andi %1035, %1037 : vector<8x1xi1>
    %cst_398 = arith.constant 0.000000e+00 : f32
    %1039 = vector.broadcast %cst_398 : f32 to vector<8x1xf32>
    %1040 = arith.cmpf oge, %1011, %1039 : vector<8x1xf32>
    %1041 = arith.andi %1038, %1040 : vector<8x1xi1>
    %cst_399 = arith.constant 1.500000e+01 : f32
    %1042 = vector.broadcast %cst_399 : f32 to vector<8x1xf32>
    %1043 = arith.cmpf ole, %1011, %1042 : vector<8x1xf32>
    %1044 = arith.andi %1041, %1043 : vector<8x1xi1>
    %1045 = arith.andi %1044, %982 : vector<8x1xi1>
    %cst_400 = arith.constant 0.000000e+00 : f32
    %cst_401 = arith.constant 1.500000e+01 : f32
    %1046 = vector.broadcast %cst_400 : f32 to vector<8x1xf32>
    %1047 = arith.maximumf %1046, %1011 : vector<8x1xf32>
    %1048 = vector.broadcast %cst_401 : f32 to vector<8x1xf32>
    %1049 = arith.minimumf %1048, %1047 : vector<8x1xf32>
    %1050 = arith.fptosi %1049 : vector<8x1xf32> to vector<8x1xi32>
    %c16_i32_402 = arith.constant 16 : i32
    %1051 = vector.broadcast %c16_i32_402 : i32 to vector<8x1xi32>
    %1052 = arith.muli %1050, %1051 : vector<8x1xi32>
    %cst_403 = arith.constant 0.000000e+00 : f32
    %cst_404 = arith.constant 1.500000e+01 : f32
    %1053 = vector.broadcast %cst_403 : f32 to vector<8x1xf32>
    %1054 = arith.maximumf %1053, %1010 : vector<8x1xf32>
    %1055 = vector.broadcast %cst_404 : f32 to vector<8x1xf32>
    %1056 = arith.minimumf %1055, %1054 : vector<8x1xf32>
    %1057 = arith.fptosi %1056 : vector<8x1xf32> to vector<8x1xi32>
    %1058 = arith.addi %1052, %1057 : vector<8x1xi32>
    %c256_i32_405 = arith.constant 256 : i32
    %1059 = vector.broadcast %c256_i32_405 : i32 to vector<8x1xi32>
    %1060 = arith.addi %1058, %1059 : vector<8x1xi32>
    %1061 = vector.broadcast %1060 : vector<8x1xi32> to vector<8x512xi32>
    %1062 = arith.cmpi eq, %4, %1061 : vector<8x512xi32>
    %cst_406 = arith.constant 0.000000e+00 : f32
    %1063 = vector.broadcast %cst_406 : f32 to vector<8x1xf32>
    %1064 = arith.select %1045, %1018, %1063 : vector<8x1xi1>, vector<8x1xf32>
    %cst_407 = arith.constant 0.000000e+00 : f32
    %1065 = vector.shape_cast %1064 : vector<8x1xf32> to vector<8x1xf32>
    %1066 = vector.broadcast %1065 : vector<8x1xf32> to vector<8x512xf32>
    %1067 = vector.broadcast %cst_407 : f32 to vector<8x512xf32>
    %1068 = arith.select %1062, %1066, %1067 : vector<8x512xi1>, vector<8x512xf32>
    %1069 = arith.addf %977, %1068 : vector<8x512xf32>
    %cst_408 = arith.constant 0.000000e+00 : f32
    %1070 = vector.broadcast %cst_408 : f32 to vector<8x1xf32>
    %1071 = arith.cmpf oge, %1020, %1070 : vector<8x1xf32>
    %cst_409 = arith.constant 1.500000e+01 : f32
    %1072 = vector.broadcast %cst_409 : f32 to vector<8x1xf32>
    %1073 = arith.cmpf ole, %1020, %1072 : vector<8x1xf32>
    %1074 = arith.andi %1071, %1073 : vector<8x1xi1>
    %cst_410 = arith.constant 0.000000e+00 : f32
    %1075 = vector.broadcast %cst_410 : f32 to vector<8x1xf32>
    %1076 = arith.cmpf oge, %1011, %1075 : vector<8x1xf32>
    %1077 = arith.andi %1074, %1076 : vector<8x1xi1>
    %cst_411 = arith.constant 1.500000e+01 : f32
    %1078 = vector.broadcast %cst_411 : f32 to vector<8x1xf32>
    %1079 = arith.cmpf ole, %1011, %1078 : vector<8x1xf32>
    %1080 = arith.andi %1077, %1079 : vector<8x1xi1>
    %1081 = arith.andi %1080, %982 : vector<8x1xi1>
    %cst_412 = arith.constant 0.000000e+00 : f32
    %cst_413 = arith.constant 1.500000e+01 : f32
    %1082 = vector.broadcast %cst_412 : f32 to vector<8x1xf32>
    %1083 = arith.maximumf %1082, %1011 : vector<8x1xf32>
    %1084 = vector.broadcast %cst_413 : f32 to vector<8x1xf32>
    %1085 = arith.minimumf %1084, %1083 : vector<8x1xf32>
    %1086 = arith.fptosi %1085 : vector<8x1xf32> to vector<8x1xi32>
    %c16_i32_414 = arith.constant 16 : i32
    %1087 = vector.broadcast %c16_i32_414 : i32 to vector<8x1xi32>
    %1088 = arith.muli %1086, %1087 : vector<8x1xi32>
    %cst_415 = arith.constant 0.000000e+00 : f32
    %cst_416 = arith.constant 1.500000e+01 : f32
    %1089 = vector.broadcast %cst_415 : f32 to vector<8x1xf32>
    %1090 = arith.maximumf %1089, %1020 : vector<8x1xf32>
    %1091 = vector.broadcast %cst_416 : f32 to vector<8x1xf32>
    %1092 = arith.minimumf %1091, %1090 : vector<8x1xf32>
    %1093 = arith.fptosi %1092 : vector<8x1xf32> to vector<8x1xi32>
    %1094 = arith.addi %1088, %1093 : vector<8x1xi32>
    %c256_i32_417 = arith.constant 256 : i32
    %1095 = vector.broadcast %c256_i32_417 : i32 to vector<8x1xi32>
    %1096 = arith.addi %1094, %1095 : vector<8x1xi32>
    %1097 = vector.broadcast %1096 : vector<8x1xi32> to vector<8x512xi32>
    %1098 = arith.cmpi eq, %4, %1097 : vector<8x512xi32>
    %cst_418 = arith.constant 0.000000e+00 : f32
    %1099 = vector.broadcast %cst_418 : f32 to vector<8x1xf32>
    %1100 = arith.select %1081, %1023, %1099 : vector<8x1xi1>, vector<8x1xf32>
    %cst_419 = arith.constant 0.000000e+00 : f32
    %1101 = vector.shape_cast %1100 : vector<8x1xf32> to vector<8x1xf32>
    %1102 = vector.broadcast %1101 : vector<8x1xf32> to vector<8x512xf32>
    %1103 = vector.broadcast %cst_419 : f32 to vector<8x512xf32>
    %1104 = arith.select %1098, %1102, %1103 : vector<8x512xi1>, vector<8x512xf32>
    %1105 = arith.addf %1069, %1104 : vector<8x512xf32>
    %cst_420 = arith.constant 0.000000e+00 : f32
    %1106 = vector.broadcast %cst_420 : f32 to vector<8x1xf32>
    %1107 = arith.cmpf oge, %1010, %1106 : vector<8x1xf32>
    %cst_421 = arith.constant 1.500000e+01 : f32
    %1108 = vector.broadcast %cst_421 : f32 to vector<8x1xf32>
    %1109 = arith.cmpf ole, %1010, %1108 : vector<8x1xf32>
    %1110 = arith.andi %1107, %1109 : vector<8x1xi1>
    %cst_422 = arith.constant 0.000000e+00 : f32
    %1111 = vector.broadcast %cst_422 : f32 to vector<8x1xf32>
    %1112 = arith.cmpf oge, %1025, %1111 : vector<8x1xf32>
    %1113 = arith.andi %1110, %1112 : vector<8x1xi1>
    %cst_423 = arith.constant 1.500000e+01 : f32
    %1114 = vector.broadcast %cst_423 : f32 to vector<8x1xf32>
    %1115 = arith.cmpf ole, %1025, %1114 : vector<8x1xf32>
    %1116 = arith.andi %1113, %1115 : vector<8x1xi1>
    %1117 = arith.andi %1116, %982 : vector<8x1xi1>
    %cst_424 = arith.constant 0.000000e+00 : f32
    %cst_425 = arith.constant 1.500000e+01 : f32
    %1118 = vector.broadcast %cst_424 : f32 to vector<8x1xf32>
    %1119 = arith.maximumf %1118, %1025 : vector<8x1xf32>
    %1120 = vector.broadcast %cst_425 : f32 to vector<8x1xf32>
    %1121 = arith.minimumf %1120, %1119 : vector<8x1xf32>
    %1122 = arith.fptosi %1121 : vector<8x1xf32> to vector<8x1xi32>
    %c16_i32_426 = arith.constant 16 : i32
    %1123 = vector.broadcast %c16_i32_426 : i32 to vector<8x1xi32>
    %1124 = arith.muli %1122, %1123 : vector<8x1xi32>
    %cst_427 = arith.constant 0.000000e+00 : f32
    %cst_428 = arith.constant 1.500000e+01 : f32
    %1125 = vector.broadcast %cst_427 : f32 to vector<8x1xf32>
    %1126 = arith.maximumf %1125, %1010 : vector<8x1xf32>
    %1127 = vector.broadcast %cst_428 : f32 to vector<8x1xf32>
    %1128 = arith.minimumf %1127, %1126 : vector<8x1xf32>
    %1129 = arith.fptosi %1128 : vector<8x1xf32> to vector<8x1xi32>
    %1130 = arith.addi %1124, %1129 : vector<8x1xi32>
    %c256_i32_429 = arith.constant 256 : i32
    %1131 = vector.broadcast %c256_i32_429 : i32 to vector<8x1xi32>
    %1132 = arith.addi %1130, %1131 : vector<8x1xi32>
    %1133 = vector.broadcast %1132 : vector<8x1xi32> to vector<8x512xi32>
    %1134 = arith.cmpi eq, %4, %1133 : vector<8x512xi32>
    %cst_430 = arith.constant 0.000000e+00 : f32
    %1135 = vector.broadcast %cst_430 : f32 to vector<8x1xf32>
    %1136 = arith.select %1117, %1028, %1135 : vector<8x1xi1>, vector<8x1xf32>
    %cst_431 = arith.constant 0.000000e+00 : f32
    %1137 = vector.shape_cast %1136 : vector<8x1xf32> to vector<8x1xf32>
    %1138 = vector.broadcast %1137 : vector<8x1xf32> to vector<8x512xf32>
    %1139 = vector.broadcast %cst_431 : f32 to vector<8x512xf32>
    %1140 = arith.select %1134, %1138, %1139 : vector<8x512xi1>, vector<8x512xf32>
    %1141 = arith.addf %1105, %1140 : vector<8x512xf32>
    %cst_432 = arith.constant 0.000000e+00 : f32
    %1142 = vector.broadcast %cst_432 : f32 to vector<8x1xf32>
    %1143 = arith.cmpf oge, %1030, %1142 : vector<8x1xf32>
    %cst_433 = arith.constant 1.500000e+01 : f32
    %1144 = vector.broadcast %cst_433 : f32 to vector<8x1xf32>
    %1145 = arith.cmpf ole, %1030, %1144 : vector<8x1xf32>
    %1146 = arith.andi %1143, %1145 : vector<8x1xi1>
    %cst_434 = arith.constant 0.000000e+00 : f32
    %1147 = vector.broadcast %cst_434 : f32 to vector<8x1xf32>
    %1148 = arith.cmpf oge, %1032, %1147 : vector<8x1xf32>
    %1149 = arith.andi %1146, %1148 : vector<8x1xi1>
    %cst_435 = arith.constant 1.500000e+01 : f32
    %1150 = vector.broadcast %cst_435 : f32 to vector<8x1xf32>
    %1151 = arith.cmpf ole, %1032, %1150 : vector<8x1xf32>
    %1152 = arith.andi %1149, %1151 : vector<8x1xi1>
    %1153 = arith.andi %1152, %982 : vector<8x1xi1>
    %cst_436 = arith.constant 0.000000e+00 : f32
    %cst_437 = arith.constant 1.500000e+01 : f32
    %1154 = vector.broadcast %cst_436 : f32 to vector<8x1xf32>
    %1155 = arith.maximumf %1154, %1032 : vector<8x1xf32>
    %1156 = vector.broadcast %cst_437 : f32 to vector<8x1xf32>
    %1157 = arith.minimumf %1156, %1155 : vector<8x1xf32>
    %1158 = arith.fptosi %1157 : vector<8x1xf32> to vector<8x1xi32>
    %c16_i32_438 = arith.constant 16 : i32
    %1159 = vector.broadcast %c16_i32_438 : i32 to vector<8x1xi32>
    %1160 = arith.muli %1158, %1159 : vector<8x1xi32>
    %cst_439 = arith.constant 0.000000e+00 : f32
    %cst_440 = arith.constant 1.500000e+01 : f32
    %1161 = vector.broadcast %cst_439 : f32 to vector<8x1xf32>
    %1162 = arith.maximumf %1161, %1030 : vector<8x1xf32>
    %1163 = vector.broadcast %cst_440 : f32 to vector<8x1xf32>
    %1164 = arith.minimumf %1163, %1162 : vector<8x1xf32>
    %1165 = arith.fptosi %1164 : vector<8x1xf32> to vector<8x1xi32>
    %1166 = arith.addi %1160, %1165 : vector<8x1xi32>
    %c256_i32_441 = arith.constant 256 : i32
    %1167 = vector.broadcast %c256_i32_441 : i32 to vector<8x1xi32>
    %1168 = arith.addi %1166, %1167 : vector<8x1xi32>
    %1169 = vector.broadcast %1168 : vector<8x1xi32> to vector<8x512xi32>
    %1170 = arith.cmpi eq, %4, %1169 : vector<8x512xi32>
    %cst_442 = arith.constant 0.000000e+00 : f32
    %1171 = vector.broadcast %cst_442 : f32 to vector<8x1xf32>
    %1172 = arith.select %1153, %1033, %1171 : vector<8x1xi1>, vector<8x1xf32>
    %cst_443 = arith.constant 0.000000e+00 : f32
    %1173 = vector.shape_cast %1172 : vector<8x1xf32> to vector<8x1xf32>
    %1174 = vector.broadcast %1173 : vector<8x1xf32> to vector<8x512xf32>
    %1175 = vector.broadcast %cst_443 : f32 to vector<8x512xf32>
    %1176 = arith.select %1170, %1174, %1175 : vector<8x512xi1>, vector<8x512xf32>
    %1177 = arith.addf %1141, %1176 : vector<8x512xf32>
    %cst_444 = arith.constant 1.000000e+00 : f32
    %1178 = vector.broadcast %cst_444 : f32 to vector<8x1xf32>
    %1179 = arith.maximumf %1009, %1178 : vector<8x1xf32>
    %cst_445 = arith.constant 1.000000e+00 : f32
    %1180 = vector.broadcast %cst_445 : f32 to vector<8x1xf32>
    %1181 = arith.divf %1180, %1179 : vector<8x1xf32>
    %1182 = vector.broadcast %1181 : vector<8x1xf32> to vector<8x512xf32>
    %1183 = arith.mulf %1177, %1182 : vector<8x512xf32>
    %1184 = arith.truncf %1183 : vector<8x512xf32> to vector<8x512xbf16>
    %c0_446 = arith.constant 0 : index
    %c0_447 = arith.constant 0 : index
    %c0_448 = arith.constant 0 : index
    %1185 = vector.load %arg3[%c0_446, %c0_447, %c0_448] : memref<1x512x32xbf16, #tpu.memory_space<vmem>>, vector<1x512x32xbf16>
    %1186 = vector.shape_cast %1185 : vector<1x512x32xbf16> to vector<512x32xbf16>
    %cst_449 = arith.constant dense<0.000000e+00> : vector<8x32xf32>
    %1187 = tpu.matmul %1184, %1186, %cst_449 {dimension_numbers = #tpu.dot_dimension_numbers<[1], [0], [0], [1], [0, 0, 1, 1], [], []>} : vector<8x512xbf16>, vector<512x32xbf16>, vector<8x32xf32> -> vector<8x32xf32>
    %cst_450 = arith.constant 6.28318548 : f32
    %1188 = vector.broadcast %cst_450 : f32 to vector<8x1xf32>
    %1189 = arith.mulf %724, %1188 : vector<8x1xf32>
    %1190 = vector.broadcast %1189 : vector<8x1xf32> to vector<8x128xf32>
    %1191 = vector.broadcast %2 : vector<1x128xf32> to vector<8x128xf32>
    %1192 = arith.mulf %1190, %1191 : vector<8x128xf32>
    %1193 = vector.broadcast %3 : vector<1x128xf32> to vector<8x128xf32>
    %1194 = arith.addf %1192, %1193 : vector<8x128xf32>
    %cst_451 = arith.constant 6.28318548 : f32
    %1195 = vector.broadcast %cst_451 : f32 to vector<8x1xf32>
    %1196 = arith.mulf %705, %1195 : vector<8x1xf32>
    %1197 = vector.broadcast %1196 : vector<8x1xf32> to vector<8x128xf32>
    %1198 = vector.broadcast %2 : vector<1x128xf32> to vector<8x128xf32>
    %1199 = arith.mulf %1197, %1198 : vector<8x128xf32>
    %1200 = vector.broadcast %3 : vector<1x128xf32> to vector<8x128xf32>
    %1201 = arith.addf %1199, %1200 : vector<8x128xf32>
    %cst_452 = arith.constant 6.28318548 : f32
    %1202 = vector.broadcast %cst_452 : f32 to vector<8x1xf32>
    %1203 = arith.mulf %743, %1202 : vector<8x1xf32>
    %1204 = vector.broadcast %1203 : vector<8x1xf32> to vector<8x128xf32>
    %1205 = vector.broadcast %2 : vector<1x128xf32> to vector<8x128xf32>
    %1206 = arith.mulf %1204, %1205 : vector<8x128xf32>
    %1207 = vector.broadcast %3 : vector<1x128xf32> to vector<8x128xf32>
    %1208 = arith.addf %1206, %1207 : vector<8x128xf32>
    %1209 = tpu.concatenate %1194, %1201, %1208 in 1 : vector<8x128xf32>, vector<8x128xf32>, vector<8x128xf32> -> vector<8x384xf32>
    %1210 = math.sin %1209 : vector<8x384xf32>
    %1211 = arith.truncf %1210 : vector<8x384xf32> to vector<8x384xbf16>
    %c0_453 = arith.constant 0 : index
    %c0_454 = arith.constant 0 : index
    %1212 = vector.load %arg6[%c0_453, %c0_454] : memref<384x32xbf16, #tpu.memory_space<vmem>>, vector<384x32xbf16>
    %cst_455 = arith.constant dense<0.000000e+00> : vector<8x32xf32>
    %1213 = tpu.matmul %1211, %1212, %cst_455 {dimension_numbers = #tpu.dot_dimension_numbers<[1], [0], [0], [1], [0, 0, 1, 1], [], []>} : vector<8x384xbf16>, vector<384x32xbf16>, vector<8x32xf32> -> vector<8x32xf32>
    %c0_456 = arith.constant 0 : index
    %c0_457 = arith.constant 0 : index
    %1214 = vector.load %arg7[%c0_456, %c0_457] : memref<1x32xf32, #tpu.memory_space<vmem>>, vector<1x32xf32>
    %1215 = vector.broadcast %1214 : vector<1x32xf32> to vector<8x32xf32>
    %1216 = arith.addf %1213, %1215 : vector<8x32xf32>
    %cst_458 = arith.constant 0.000000e+00 : f32
    %1217 = vector.broadcast %cst_458 : f32 to vector<8x32xf32>
    %1218 = arith.maximumf %1216, %1217 : vector<8x32xf32>
    %1219 = arith.truncf %1218 : vector<8x32xf32> to vector<8x32xbf16>
    %c0_459 = arith.constant 0 : index
    %c0_460 = arith.constant 0 : index
    %1220 = vector.load %arg8[%c0_459, %c0_460] : memref<32x32xbf16, #tpu.memory_space<vmem>>, vector<32x32xbf16>
    %cst_461 = arith.constant dense<0.000000e+00> : vector<8x32xf32>
    %1221 = tpu.matmul %1219, %1220, %cst_461 {dimension_numbers = #tpu.dot_dimension_numbers<[1], [0], [0], [1], [0, 0, 1, 1], [], []>} : vector<8x32xbf16>, vector<32x32xbf16>, vector<8x32xf32> -> vector<8x32xf32>
    %c0_462 = arith.constant 0 : index
    %c0_463 = arith.constant 0 : index
    %1222 = vector.load %arg9[%c0_462, %c0_463] : memref<1x32xf32, #tpu.memory_space<vmem>>, vector<1x32xf32>
    %1223 = vector.broadcast %1222 : vector<1x32xf32> to vector<8x32xf32>
    %1224 = arith.addf %1221, %1223 : vector<8x32xf32>
    %1225 = arith.addf %1187, %1224 : vector<8x32xf32>
    %1226 = tpu.transpose %1225, [1, 0] : vector<8x32xf32> -> vector<32x8xf32>
    %1227 = arith.truncf %1226 : vector<32x8xf32> to vector<32x8xbf16>
    %1228 = arith.truncf %1187 : vector<8x32xf32> to vector<8x32xbf16>
    %c1_464 = arith.constant 1 : index
    %c0_465 = arith.constant 0 : index
    %c0_466 = arith.constant 0 : index
    %1229 = vector.load %arg10[%c1_464, %c0_465, %c0_466] : memref<2x32x128xbf16, #tpu.memory_space<vmem>>, vector<1x32x128xbf16>
    %1230 = vector.shape_cast %1229 : vector<1x32x128xbf16> to vector<32x128xbf16>
    %c1_467 = arith.constant 1 : index
    %c0_468 = arith.constant 0 : index
    %c0_469 = arith.constant 0 : index
    %1231 = vector.load %arg11[%c1_467, %c0_468, %c0_469] : memref<2x1x128xf32, #tpu.memory_space<vmem>>, vector<1x1x128xf32>
    %1232 = vector.shape_cast %1231 : vector<1x1x128xf32> to vector<1x128xf32>
    %c1_470 = arith.constant 1 : index
    %c0_471 = arith.constant 0 : index
    %c0_472 = arith.constant 0 : index
    %1233 = vector.load %arg12[%c1_470, %c0_471, %c0_472] : memref<2x128x32xbf16, #tpu.memory_space<vmem>>, vector<1x128x32xbf16>
    %1234 = vector.shape_cast %1233 : vector<1x128x32xbf16> to vector<128x32xbf16>
    %c1_473 = arith.constant 1 : index
    %c0_474 = arith.constant 0 : index
    %c0_475 = arith.constant 0 : index
    %1235 = vector.load %arg13[%c1_473, %c0_474, %c0_475] : memref<2x1x32xf32, #tpu.memory_space<vmem>>, vector<1x1x32xf32>
    %1236 = vector.shape_cast %1235 : vector<1x1x32xf32> to vector<1x32xf32>
    %1237 = arith.truncf %1225 : vector<8x32xf32> to vector<8x32xbf16>
    %cst_476 = arith.constant dense<0.000000e+00> : vector<8x128xf32>
    %1238 = tpu.matmul %1237, %1230, %cst_476 {dimension_numbers = #tpu.dot_dimension_numbers<[1], [0], [0], [1], [0, 0, 1, 1], [], []>} : vector<8x32xbf16>, vector<32x128xbf16>, vector<8x128xf32> -> vector<8x128xf32>
    %1239 = vector.broadcast %1232 : vector<1x128xf32> to vector<8x128xf32>
    %1240 = arith.addf %1238, %1239 : vector<8x128xf32>
    %1241 = vector.extract_strided_slice %1240 {offsets = [0, 0], sizes = [8, 32], strides = [1, 1]} : vector<8x128xf32> to vector<8x32xf32>
    %1242 = vector.extract_strided_slice %1240 {offsets = [0, 32], sizes = [8, 32], strides = [1, 1]} : vector<8x128xf32> to vector<8x32xf32>
    %1243 = vector.extract_strided_slice %1240 {offsets = [0, 64], sizes = [8, 32], strides = [1, 1]} : vector<8x128xf32> to vector<8x32xf32>
    %1244 = vector.extract_strided_slice %1240 {offsets = [0, 96], sizes = [8, 32], strides = [1, 1]} : vector<8x128xf32> to vector<8x32xf32>
    %1245 = tpu.concatenate %1241, %1242, %1243, %1244 in 0 : vector<8x32xf32>, vector<8x32xf32>, vector<8x32xf32>, vector<8x32xf32> -> vector<32x32xf32>
    %1246 = arith.truncf %1245 : vector<32x32xf32> to vector<32x32xbf16>
    %cst_477 = arith.constant dense<0.000000e+00> : vector<32x8xf32>
    %1247 = tpu.matmul %1246, %1227, %cst_477 {dimension_numbers = #tpu.dot_dimension_numbers<[1], [0], [0], [1], [0, 0, 1, 1], [], []>} : vector<32x32xbf16>, vector<32x8xbf16>, vector<32x8xf32> -> vector<32x8xf32>
    %cst_478 = arith.constant dense<0xFF800000> : vector<32xf32>
    %1248 = vector.multi_reduction <maximumf>, %1247, %cst_478 [1] : vector<32x8xf32> to vector<32xf32>
    %1249 = vector.shape_cast %1248 : vector<32xf32> to vector<32x1xf32>
    %1250 = vector.broadcast %1249 : vector<32x1xf32> to vector<32x8xf32>
    %1251 = arith.subf %1247, %1250 : vector<32x8xf32>
    %1252 = math.exp %1251 : vector<32x8xf32>
    %cst_479 = arith.constant dense<0.000000e+00> : vector<32xf32>
    %1253 = vector.multi_reduction <add>, %1252, %cst_479 [1] : vector<32x8xf32> to vector<32xf32>
    %1254 = vector.shape_cast %1253 : vector<32xf32> to vector<32x1xf32>
    %cst_480 = arith.constant 1.000000e+00 : f32
    %1255 = vector.broadcast %cst_480 : f32 to vector<32x1xf32>
    %1256 = arith.divf %1255, %1254 : vector<32x1xf32>
    %1257 = vector.broadcast %1256 : vector<32x1xf32> to vector<32x8xf32>
    %1258 = arith.mulf %1252, %1257 : vector<32x8xf32>
    %1259 = arith.truncf %1258 : vector<32x8xf32> to vector<32x8xbf16>
    %cst_481 = arith.constant dense<0.000000e+00> : vector<32x32xf32>
    %1260 = tpu.matmul %1259, %1228, %cst_481 {dimension_numbers = #tpu.dot_dimension_numbers<[1], [0], [0], [1], [0, 0, 1, 1], [], []>} : vector<32x8xbf16>, vector<8x32xbf16>, vector<32x32xf32> -> vector<32x32xf32>
    %1261 = vector.extract_strided_slice %1260 {offsets = [0, 0], sizes = [8, 32], strides = [1, 1]} : vector<32x32xf32> to vector<8x32xf32>
    %1262 = vector.extract_strided_slice %1260 {offsets = [8, 0], sizes = [8, 32], strides = [1, 1]} : vector<32x32xf32> to vector<8x32xf32>
    %1263 = vector.extract_strided_slice %1260 {offsets = [16, 0], sizes = [8, 32], strides = [1, 1]} : vector<32x32xf32> to vector<8x32xf32>
    %1264 = vector.extract_strided_slice %1260 {offsets = [24, 0], sizes = [8, 32], strides = [1, 1]} : vector<32x32xf32> to vector<8x32xf32>
    %1265 = tpu.concatenate %1261, %1262, %1263, %1264 in 1 : vector<8x32xf32>, vector<8x32xf32>, vector<8x32xf32>, vector<8x32xf32> -> vector<8x128xf32>
    %1266 = arith.truncf %1265 : vector<8x128xf32> to vector<8x128xbf16>
    %cst_482 = arith.constant dense<0.000000e+00> : vector<8x32xf32>
    %1267 = tpu.matmul %1266, %1234, %cst_482 {dimension_numbers = #tpu.dot_dimension_numbers<[1], [0], [0], [1], [0, 0, 1, 1], [], []>} : vector<8x128xbf16>, vector<128x32xbf16>, vector<8x32xf32> -> vector<8x32xf32>
    %1268 = vector.broadcast %1236 : vector<1x32xf32> to vector<8x32xf32>
    %1269 = arith.addf %1267, %1268 : vector<8x32xf32>
    %1270 = arith.addf %1187, %1269 : vector<8x32xf32>
    %c1_483 = arith.constant 1 : index
    %c0_484 = arith.constant 0 : index
    %c0_485 = arith.constant 0 : index
    %c0_486 = arith.constant 0 : index
    %1271 = vector.load %arg18[%c1_483, %c0_484, %c0_485, %c0_486] : memref<2x6x1x32xf32, #tpu.memory_space<vmem>>, vector<1x1x1x32xf32>
    %1272 = vector.shape_cast %1271 : vector<1x1x1x32xf32> to vector<1x32xf32>
    %c1_487 = arith.constant 1 : index
    %c1_488 = arith.constant 1 : index
    %c0_489 = arith.constant 0 : index
    %c0_490 = arith.constant 0 : index
    %1273 = vector.load %arg18[%c1_487, %c1_488, %c0_489, %c0_490] : memref<2x6x1x32xf32, #tpu.memory_space<vmem>>, vector<1x1x1x32xf32>
    %1274 = vector.shape_cast %1273 : vector<1x1x1x32xf32> to vector<1x32xf32>
    %cst_491 = arith.constant dense<0.000000e+00> : vector<8xf32>
    %1275 = vector.multi_reduction <add>, %1270, %cst_491 [1] : vector<8x32xf32> to vector<8xf32>
    %1276 = vector.shape_cast %1275 : vector<8xf32> to vector<8x1xf32>
    %cst_492 = arith.constant 3.200000e+01 : f32
    %1277 = vector.broadcast %cst_492 : f32 to vector<8x1xf32>
    %1278 = arith.divf %1276, %1277 : vector<8x1xf32>
    %1279 = vector.broadcast %1278 : vector<8x1xf32> to vector<8x32xf32>
    %1280 = arith.subf %1270, %1279 : vector<8x32xf32>
    %1281 = arith.mulf %1280, %1280 : vector<8x32xf32>
    %cst_493 = arith.constant dense<0.000000e+00> : vector<8xf32>
    %1282 = vector.multi_reduction <add>, %1281, %cst_493 [1] : vector<8x32xf32> to vector<8xf32>
    %1283 = vector.shape_cast %1282 : vector<8xf32> to vector<8x1xf32>
    %cst_494 = arith.constant 3.200000e+01 : f32
    %1284 = vector.broadcast %cst_494 : f32 to vector<8x1xf32>
    %1285 = arith.divf %1283, %1284 : vector<8x1xf32>
    %cst_495 = arith.constant 9.99999974E-6 : f32
    %1286 = vector.broadcast %cst_495 : f32 to vector<8x1xf32>
    %1287 = arith.addf %1285, %1286 : vector<8x1xf32>
    %1288 = math.rsqrt %1287 : vector<8x1xf32>
    %1289 = vector.broadcast %1288 : vector<8x1xf32> to vector<8x32xf32>
    %1290 = arith.mulf %1280, %1289 : vector<8x32xf32>
    %1291 = vector.broadcast %1272 : vector<1x32xf32> to vector<8x32xf32>
    %1292 = arith.mulf %1290, %1291 : vector<8x32xf32>
    %1293 = vector.broadcast %1274 : vector<1x32xf32> to vector<8x32xf32>
    %1294 = arith.addf %1292, %1293 : vector<8x32xf32>
    %1295 = arith.addf %1294, %1224 : vector<8x32xf32>
    %c0_496 = arith.constant 0 : index
    %c0_497 = arith.constant 0 : index
    %c0_498 = arith.constant 0 : index
    %1296 = vector.load %arg4[%c0_496, %c0_497, %c0_498] : memref<1x32x512xbf16, #tpu.memory_space<vmem>>, vector<1x32x512xbf16>
    %1297 = vector.shape_cast %1296 : vector<1x32x512xbf16> to vector<32x512xbf16>
    %c0_499 = arith.constant 0 : index
    %c0_500 = arith.constant 0 : index
    %c0_501 = arith.constant 0 : index
    %1298 = vector.load %arg3[%c0_499, %c0_500, %c0_501] : memref<1x512x32xbf16, #tpu.memory_space<vmem>>, vector<1x512x32xbf16>
    %1299 = vector.shape_cast %1298 : vector<1x512x32xbf16> to vector<512x32xbf16>
    %c1_502 = arith.constant 1 : index
    %c0_503 = arith.constant 0 : index
    %c0_504 = arith.constant 0 : index
    %1300 = vector.load %arg14[%c1_502, %c0_503, %c0_504] : memref<2x32x128xbf16, #tpu.memory_space<vmem>>, vector<1x32x128xbf16>
    %1301 = vector.shape_cast %1300 : vector<1x32x128xbf16> to vector<32x128xbf16>
    %c1_505 = arith.constant 1 : index
    %c0_506 = arith.constant 0 : index
    %c0_507 = arith.constant 0 : index
    %1302 = vector.load %arg15[%c1_505, %c0_506, %c0_507] : memref<2x1x128xf32, #tpu.memory_space<vmem>>, vector<1x1x128xf32>
    %1303 = vector.shape_cast %1302 : vector<1x1x128xf32> to vector<1x128xf32>
    %c1_508 = arith.constant 1 : index
    %c0_509 = arith.constant 0 : index
    %c0_510 = arith.constant 0 : index
    %1304 = vector.load %arg16[%c1_508, %c0_509, %c0_510] : memref<2x128x32xbf16, #tpu.memory_space<vmem>>, vector<1x128x32xbf16>
    %1305 = vector.shape_cast %1304 : vector<1x128x32xbf16> to vector<128x32xbf16>
    %c1_511 = arith.constant 1 : index
    %c0_512 = arith.constant 0 : index
    %c0_513 = arith.constant 0 : index
    %1306 = vector.load %arg17[%c1_511, %c0_512, %c0_513] : memref<2x1x32xf32, #tpu.memory_space<vmem>>, vector<1x1x32xf32>
    %1307 = vector.shape_cast %1306 : vector<1x1x32xf32> to vector<1x32xf32>
    %1308 = arith.truncf %1295 : vector<8x32xf32> to vector<8x32xbf16>
    %cst_514 = arith.constant dense<0.000000e+00> : vector<8x128xf32>
    %1309 = tpu.matmul %1308, %1301, %cst_514 {dimension_numbers = #tpu.dot_dimension_numbers<[1], [0], [0], [1], [0, 0, 1, 1], [], []>} : vector<8x32xbf16>, vector<32x128xbf16>, vector<8x128xf32> -> vector<8x128xf32>
    %1310 = vector.broadcast %1303 : vector<1x128xf32> to vector<8x128xf32>
    %1311 = arith.addf %1309, %1310 : vector<8x128xf32>
    %1312 = vector.extract_strided_slice %1311 {offsets = [0, 0], sizes = [8, 32], strides = [1, 1]} : vector<8x128xf32> to vector<8x32xf32>
    %1313 = vector.extract_strided_slice %1311 {offsets = [0, 32], sizes = [8, 32], strides = [1, 1]} : vector<8x128xf32> to vector<8x32xf32>
    %1314 = vector.extract_strided_slice %1311 {offsets = [0, 64], sizes = [8, 32], strides = [1, 1]} : vector<8x128xf32> to vector<8x32xf32>
    %1315 = vector.extract_strided_slice %1311 {offsets = [0, 96], sizes = [8, 32], strides = [1, 1]} : vector<8x128xf32> to vector<8x32xf32>
    %1316 = tpu.concatenate %1312, %1313, %1314, %1315 in 0 : vector<8x32xf32>, vector<8x32xf32>, vector<8x32xf32>, vector<8x32xf32> -> vector<32x32xf32>
    %1317 = arith.truncf %1316 : vector<32x32xf32> to vector<32x32xbf16>
    %cst_515 = arith.constant dense<0.000000e+00> : vector<32x512xf32>
    %1318 = tpu.matmul %1317, %1297, %cst_515 {dimension_numbers = #tpu.dot_dimension_numbers<[1], [0], [0], [1], [0, 0, 1, 1], [], []>} : vector<32x32xbf16>, vector<32x512xbf16>, vector<32x512xf32> -> vector<32x512xf32>
    %cst_516 = arith.constant dense<0xFF800000> : vector<32xf32>
    %1319 = vector.multi_reduction <maximumf>, %1318, %cst_516 [1] : vector<32x512xf32> to vector<32xf32>
    %1320 = vector.shape_cast %1319 : vector<32xf32> to vector<32x1xf32>
    %1321 = vector.broadcast %1320 : vector<32x1xf32> to vector<32x512xf32>
    %1322 = arith.subf %1318, %1321 : vector<32x512xf32>
    %1323 = math.exp %1322 : vector<32x512xf32>
    %cst_517 = arith.constant dense<0.000000e+00> : vector<32xf32>
    %1324 = vector.multi_reduction <add>, %1323, %cst_517 [1] : vector<32x512xf32> to vector<32xf32>
    %1325 = vector.shape_cast %1324 : vector<32xf32> to vector<32x1xf32>
    %cst_518 = arith.constant 1.000000e+00 : f32
    %1326 = vector.broadcast %cst_518 : f32 to vector<32x1xf32>
    %1327 = arith.divf %1326, %1325 : vector<32x1xf32>
    %1328 = vector.broadcast %1327 : vector<32x1xf32> to vector<32x512xf32>
    %1329 = arith.mulf %1323, %1328 : vector<32x512xf32>
    %1330 = arith.truncf %1329 : vector<32x512xf32> to vector<32x512xbf16>
    %cst_519 = arith.constant dense<0.000000e+00> : vector<32x32xf32>
    %1331 = tpu.matmul %1330, %1299, %cst_519 {dimension_numbers = #tpu.dot_dimension_numbers<[1], [0], [0], [1], [0, 0, 1, 1], [], []>} : vector<32x512xbf16>, vector<512x32xbf16>, vector<32x32xf32> -> vector<32x32xf32>
    %1332 = vector.extract_strided_slice %1331 {offsets = [0, 0], sizes = [8, 32], strides = [1, 1]} : vector<32x32xf32> to vector<8x32xf32>
    %1333 = vector.extract_strided_slice %1331 {offsets = [8, 0], sizes = [8, 32], strides = [1, 1]} : vector<32x32xf32> to vector<8x32xf32>
    %1334 = vector.extract_strided_slice %1331 {offsets = [16, 0], sizes = [8, 32], strides = [1, 1]} : vector<32x32xf32> to vector<8x32xf32>
    %1335 = vector.extract_strided_slice %1331 {offsets = [24, 0], sizes = [8, 32], strides = [1, 1]} : vector<32x32xf32> to vector<8x32xf32>
    %1336 = tpu.concatenate %1332, %1333, %1334, %1335 in 1 : vector<8x32xf32>, vector<8x32xf32>, vector<8x32xf32>, vector<8x32xf32> -> vector<8x128xf32>
    %1337 = arith.truncf %1336 : vector<8x128xf32> to vector<8x128xbf16>
    %cst_520 = arith.constant dense<0.000000e+00> : vector<8x32xf32>
    %1338 = tpu.matmul %1337, %1305, %cst_520 {dimension_numbers = #tpu.dot_dimension_numbers<[1], [0], [0], [1], [0, 0, 1, 1], [], []>} : vector<8x128xbf16>, vector<128x32xbf16>, vector<8x32xf32> -> vector<8x32xf32>
    %1339 = vector.broadcast %1307 : vector<1x32xf32> to vector<8x32xf32>
    %1340 = arith.addf %1338, %1339 : vector<8x32xf32>
    %1341 = arith.addf %1294, %1340 : vector<8x32xf32>
    %c1_521 = arith.constant 1 : index
    %c2_522 = arith.constant 2 : index
    %c0_523 = arith.constant 0 : index
    %c0_524 = arith.constant 0 : index
    %1342 = vector.load %arg18[%c1_521, %c2_522, %c0_523, %c0_524] : memref<2x6x1x32xf32, #tpu.memory_space<vmem>>, vector<1x1x1x32xf32>
    %1343 = vector.shape_cast %1342 : vector<1x1x1x32xf32> to vector<1x32xf32>
    %c1_525 = arith.constant 1 : index
    %c3_526 = arith.constant 3 : index
    %c0_527 = arith.constant 0 : index
    %c0_528 = arith.constant 0 : index
    %1344 = vector.load %arg18[%c1_525, %c3_526, %c0_527, %c0_528] : memref<2x6x1x32xf32, #tpu.memory_space<vmem>>, vector<1x1x1x32xf32>
    %1345 = vector.shape_cast %1344 : vector<1x1x1x32xf32> to vector<1x32xf32>
    %cst_529 = arith.constant dense<0.000000e+00> : vector<8xf32>
    %1346 = vector.multi_reduction <add>, %1341, %cst_529 [1] : vector<8x32xf32> to vector<8xf32>
    %1347 = vector.shape_cast %1346 : vector<8xf32> to vector<8x1xf32>
    %cst_530 = arith.constant 3.200000e+01 : f32
    %1348 = vector.broadcast %cst_530 : f32 to vector<8x1xf32>
    %1349 = arith.divf %1347, %1348 : vector<8x1xf32>
    %1350 = vector.broadcast %1349 : vector<8x1xf32> to vector<8x32xf32>
    %1351 = arith.subf %1341, %1350 : vector<8x32xf32>
    %1352 = arith.mulf %1351, %1351 : vector<8x32xf32>
    %cst_531 = arith.constant dense<0.000000e+00> : vector<8xf32>
    %1353 = vector.multi_reduction <add>, %1352, %cst_531 [1] : vector<8x32xf32> to vector<8xf32>
    %1354 = vector.shape_cast %1353 : vector<8xf32> to vector<8x1xf32>
    %cst_532 = arith.constant 3.200000e+01 : f32
    %1355 = vector.broadcast %cst_532 : f32 to vector<8x1xf32>
    %1356 = arith.divf %1354, %1355 : vector<8x1xf32>
    %cst_533 = arith.constant 9.99999974E-6 : f32
    %1357 = vector.broadcast %cst_533 : f32 to vector<8x1xf32>
    %1358 = arith.addf %1356, %1357 : vector<8x1xf32>
    %1359 = math.rsqrt %1358 : vector<8x1xf32>
    %1360 = vector.broadcast %1359 : vector<8x1xf32> to vector<8x32xf32>
    %1361 = arith.mulf %1351, %1360 : vector<8x32xf32>
    %1362 = vector.broadcast %1343 : vector<1x32xf32> to vector<8x32xf32>
    %1363 = arith.mulf %1361, %1362 : vector<8x32xf32>
    %1364 = vector.broadcast %1345 : vector<1x32xf32> to vector<8x32xf32>
    %1365 = arith.addf %1363, %1364 : vector<8x32xf32>
    %1366 = arith.truncf %1365 : vector<8x32xf32> to vector<8x32xbf16>
    %c1_534 = arith.constant 1 : index
    %c0_535 = arith.constant 0 : index
    %c0_536 = arith.constant 0 : index
    %1367 = vector.load %arg19[%c1_534, %c0_535, %c0_536] : memref<2x32x64xbf16, #tpu.memory_space<vmem>>, vector<1x32x64xbf16>
    %1368 = vector.shape_cast %1367 : vector<1x32x64xbf16> to vector<32x64xbf16>
    %cst_537 = arith.constant dense<0.000000e+00> : vector<8x64xf32>
    %1369 = tpu.matmul %1366, %1368, %cst_537 {dimension_numbers = #tpu.dot_dimension_numbers<[1], [0], [0], [1], [0, 0, 1, 1], [], []>} : vector<8x32xbf16>, vector<32x64xbf16>, vector<8x64xf32> -> vector<8x64xf32>
    %c1_538 = arith.constant 1 : index
    %c0_539 = arith.constant 0 : index
    %c0_540 = arith.constant 0 : index
    %1370 = vector.load %arg20[%c1_538, %c0_539, %c0_540] : memref<2x1x64xf32, #tpu.memory_space<vmem>>, vector<1x1x64xf32>
    %1371 = vector.shape_cast %1370 : vector<1x1x64xf32> to vector<1x64xf32>
    %1372 = vector.broadcast %1371 : vector<1x64xf32> to vector<8x64xf32>
    %1373 = arith.addf %1369, %1372 : vector<8x64xf32>
    %cst_541 = arith.constant 0.000000e+00 : f32
    %1374 = vector.broadcast %cst_541 : f32 to vector<8x64xf32>
    %1375 = arith.maximumf %1373, %1374 : vector<8x64xf32>
    %1376 = arith.truncf %1375 : vector<8x64xf32> to vector<8x64xbf16>
    %c1_542 = arith.constant 1 : index
    %c0_543 = arith.constant 0 : index
    %c0_544 = arith.constant 0 : index
    %1377 = vector.load %arg21[%c1_542, %c0_543, %c0_544] : memref<2x64x32xbf16, #tpu.memory_space<vmem>>, vector<1x64x32xbf16>
    %1378 = vector.shape_cast %1377 : vector<1x64x32xbf16> to vector<64x32xbf16>
    %cst_545 = arith.constant dense<0.000000e+00> : vector<8x32xf32>
    %1379 = tpu.matmul %1376, %1378, %cst_545 {dimension_numbers = #tpu.dot_dimension_numbers<[1], [0], [0], [1], [0, 0, 1, 1], [], []>} : vector<8x64xbf16>, vector<64x32xbf16>, vector<8x32xf32> -> vector<8x32xf32>
    %c1_546 = arith.constant 1 : index
    %c0_547 = arith.constant 0 : index
    %c0_548 = arith.constant 0 : index
    %1380 = vector.load %arg22[%c1_546, %c0_547, %c0_548] : memref<2x1x32xf32, #tpu.memory_space<vmem>>, vector<1x1x32xf32>
    %1381 = vector.shape_cast %1380 : vector<1x1x32xf32> to vector<1x32xf32>
    %1382 = vector.broadcast %1381 : vector<1x32xf32> to vector<8x32xf32>
    %1383 = arith.addf %1379, %1382 : vector<8x32xf32>
    %1384 = arith.addf %1365, %1383 : vector<8x32xf32>
    %c1_549 = arith.constant 1 : index
    %c4_550 = arith.constant 4 : index
    %c0_551 = arith.constant 0 : index
    %c0_552 = arith.constant 0 : index
    %1385 = vector.load %arg18[%c1_549, %c4_550, %c0_551, %c0_552] : memref<2x6x1x32xf32, #tpu.memory_space<vmem>>, vector<1x1x1x32xf32>
    %1386 = vector.shape_cast %1385 : vector<1x1x1x32xf32> to vector<1x32xf32>
    %c1_553 = arith.constant 1 : index
    %c5_554 = arith.constant 5 : index
    %c0_555 = arith.constant 0 : index
    %c0_556 = arith.constant 0 : index
    %1387 = vector.load %arg18[%c1_553, %c5_554, %c0_555, %c0_556] : memref<2x6x1x32xf32, #tpu.memory_space<vmem>>, vector<1x1x1x32xf32>
    %1388 = vector.shape_cast %1387 : vector<1x1x1x32xf32> to vector<1x32xf32>
    %cst_557 = arith.constant dense<0.000000e+00> : vector<8xf32>
    %1389 = vector.multi_reduction <add>, %1384, %cst_557 [1] : vector<8x32xf32> to vector<8xf32>
    %1390 = vector.shape_cast %1389 : vector<8xf32> to vector<8x1xf32>
    %cst_558 = arith.constant 3.200000e+01 : f32
    %1391 = vector.broadcast %cst_558 : f32 to vector<8x1xf32>
    %1392 = arith.divf %1390, %1391 : vector<8x1xf32>
    %1393 = vector.broadcast %1392 : vector<8x1xf32> to vector<8x32xf32>
    %1394 = arith.subf %1384, %1393 : vector<8x32xf32>
    %1395 = arith.mulf %1394, %1394 : vector<8x32xf32>
    %cst_559 = arith.constant dense<0.000000e+00> : vector<8xf32>
    %1396 = vector.multi_reduction <add>, %1395, %cst_559 [1] : vector<8x32xf32> to vector<8xf32>
    %1397 = vector.shape_cast %1396 : vector<8xf32> to vector<8x1xf32>
    %cst_560 = arith.constant 3.200000e+01 : f32
    %1398 = vector.broadcast %cst_560 : f32 to vector<8x1xf32>
    %1399 = arith.divf %1397, %1398 : vector<8x1xf32>
    %cst_561 = arith.constant 9.99999974E-6 : f32
    %1400 = vector.broadcast %cst_561 : f32 to vector<8x1xf32>
    %1401 = arith.addf %1399, %1400 : vector<8x1xf32>
    %1402 = math.rsqrt %1401 : vector<8x1xf32>
    %1403 = vector.broadcast %1402 : vector<8x1xf32> to vector<8x32xf32>
    %1404 = arith.mulf %1394, %1403 : vector<8x32xf32>
    %1405 = vector.broadcast %1386 : vector<1x32xf32> to vector<8x32xf32>
    %1406 = arith.mulf %1404, %1405 : vector<8x32xf32>
    %1407 = vector.broadcast %1388 : vector<1x32xf32> to vector<8x32xf32>
    %1408 = arith.addf %1406, %1407 : vector<8x32xf32>
    %1409 = arith.truncf %1408 : vector<8x32xf32> to vector<8x32xbf16>
    %c0_562 = arith.constant 0 : index
    %c0_563 = arith.constant 0 : index
    %1410 = vector.load %arg23[%c0_562, %c0_563] : memref<32x128xbf16, #tpu.memory_space<vmem>>, vector<32x128xbf16>
    %cst_564 = arith.constant dense<0.000000e+00> : vector<8x128xf32>
    %1411 = tpu.matmul %1409, %1410, %cst_564 {dimension_numbers = #tpu.dot_dimension_numbers<[1], [0], [0], [1], [0, 0, 1, 1], [], []>} : vector<8x32xbf16>, vector<32x128xbf16>, vector<8x128xf32> -> vector<8x128xf32>
    %c0_565 = arith.constant 0 : index
    %c0_566 = arith.constant 0 : index
    %1412 = vector.load %arg24[%c0_565, %c0_566] : memref<1x128xf32, #tpu.memory_space<vmem>>, vector<1x128xf32>
    %1413 = vector.broadcast %1412 : vector<1x128xf32> to vector<8x128xf32>
    %1414 = arith.addf %1411, %1413 : vector<8x128xf32>
    %cst_567 = arith.constant 0.000000e+00 : f32
    %1415 = vector.broadcast %cst_567 : f32 to vector<8x128xf32>
    %1416 = arith.maximumf %1414, %1415 : vector<8x128xf32>
    %1417 = arith.truncf %1416 : vector<8x128xf32> to vector<8x128xbf16>
    %c0_568 = arith.constant 0 : index
    %c0_569 = arith.constant 0 : index
    %1418 = vector.load %arg25[%c0_568, %c0_569] : memref<128x128xbf16, #tpu.memory_space<vmem>>, vector<128x128xbf16>
    %cst_570 = arith.constant dense<0.000000e+00> : vector<8x128xf32>
    %1419 = tpu.matmul %1417, %1418, %cst_570 {dimension_numbers = #tpu.dot_dimension_numbers<[1], [0], [0], [1], [0, 0, 1, 1], [], []>} : vector<8x128xbf16>, vector<128x128xbf16>, vector<8x128xf32> -> vector<8x128xf32>
    %c0_571 = arith.constant 0 : index
    %c0_572 = arith.constant 0 : index
    %1420 = vector.load %arg26[%c0_571, %c0_572] : memref<1x128xf32, #tpu.memory_space<vmem>>, vector<1x128xf32>
    %1421 = vector.broadcast %1420 : vector<1x128xf32> to vector<8x128xf32>
    %1422 = arith.addf %1419, %1421 : vector<8x128xf32>
    %1423 = vector.extract_strided_slice %1422 {offsets = [0, 6], sizes = [8, 1], strides = [1, 1]} : vector<8x128xf32> to vector<8x1xf32>
    %cst_573 = arith.constant 0.000000e+00 : f32
    %cst_574 = arith.constant 1.000000e+00 : f32
    %1424 = vector.broadcast %cst_573 : f32 to vector<8x1xf32>
    %1425 = arith.maximumf %1424, %705 : vector<8x1xf32>
    %1426 = vector.broadcast %cst_574 : f32 to vector<8x1xf32>
    %1427 = arith.minimumf %1426, %1425 : vector<8x1xf32>
    %cst_575 = arith.constant 1.000000e-03 : f32
    %1428 = vector.broadcast %cst_575 : f32 to vector<8x1xf32>
    %1429 = arith.maximumf %1427, %1428 : vector<8x1xf32>
    %cst_576 = arith.constant 1.000000e+00 : f32
    %1430 = vector.broadcast %cst_576 : f32 to vector<8x1xf32>
    %1431 = arith.subf %1430, %1427 : vector<8x1xf32>
    %cst_577 = arith.constant 1.000000e-03 : f32
    %1432 = vector.broadcast %cst_577 : f32 to vector<8x1xf32>
    %1433 = arith.maximumf %1431, %1432 : vector<8x1xf32>
    %1434 = arith.divf %1429, %1433 : vector<8x1xf32>
    %1435 = math.log %1434 : vector<8x1xf32>
    %1436 = arith.addf %1423, %1435 : vector<8x1xf32>
    %1437 = arith.negf %1436 : vector<8x1xf32>
    %1438 = math.exp %1437 : vector<8x1xf32>
    %cst_578 = arith.constant 1.000000e+00 : f32
    %1439 = vector.broadcast %cst_578 : f32 to vector<8x1xf32>
    %1440 = arith.addf %1439, %1438 : vector<8x1xf32>
    %1441 = arith.divf %1439, %1440 : vector<8x1xf32>
    %1442 = vector.extract_strided_slice %1422 {offsets = [0, 7], sizes = [8, 1], strides = [1, 1]} : vector<8x128xf32> to vector<8x1xf32>
    %cst_579 = arith.constant 0.000000e+00 : f32
    %cst_580 = arith.constant 1.000000e+00 : f32
    %1443 = vector.broadcast %cst_579 : f32 to vector<8x1xf32>
    %1444 = arith.maximumf %1443, %724 : vector<8x1xf32>
    %1445 = vector.broadcast %cst_580 : f32 to vector<8x1xf32>
    %1446 = arith.minimumf %1445, %1444 : vector<8x1xf32>
    %cst_581 = arith.constant 1.000000e-03 : f32
    %1447 = vector.broadcast %cst_581 : f32 to vector<8x1xf32>
    %1448 = arith.maximumf %1446, %1447 : vector<8x1xf32>
    %cst_582 = arith.constant 1.000000e+00 : f32
    %1449 = vector.broadcast %cst_582 : f32 to vector<8x1xf32>
    %1450 = arith.subf %1449, %1446 : vector<8x1xf32>
    %cst_583 = arith.constant 1.000000e-03 : f32
    %1451 = vector.broadcast %cst_583 : f32 to vector<8x1xf32>
    %1452 = arith.maximumf %1450, %1451 : vector<8x1xf32>
    %1453 = arith.divf %1448, %1452 : vector<8x1xf32>
    %1454 = math.log %1453 : vector<8x1xf32>
    %1455 = arith.addf %1442, %1454 : vector<8x1xf32>
    %1456 = arith.negf %1455 : vector<8x1xf32>
    %1457 = math.exp %1456 : vector<8x1xf32>
    %cst_584 = arith.constant 1.000000e+00 : f32
    %1458 = vector.broadcast %cst_584 : f32 to vector<8x1xf32>
    %1459 = arith.addf %1458, %1457 : vector<8x1xf32>
    %1460 = arith.divf %1458, %1459 : vector<8x1xf32>
    %1461 = vector.extract_strided_slice %1422 {offsets = [0, 8], sizes = [8, 1], strides = [1, 1]} : vector<8x128xf32> to vector<8x1xf32>
    %cst_585 = arith.constant 0.000000e+00 : f32
    %cst_586 = arith.constant 1.000000e+00 : f32
    %1462 = vector.broadcast %cst_585 : f32 to vector<8x1xf32>
    %1463 = arith.maximumf %1462, %743 : vector<8x1xf32>
    %1464 = vector.broadcast %cst_586 : f32 to vector<8x1xf32>
    %1465 = arith.minimumf %1464, %1463 : vector<8x1xf32>
    %cst_587 = arith.constant 1.000000e-03 : f32
    %1466 = vector.broadcast %cst_587 : f32 to vector<8x1xf32>
    %1467 = arith.maximumf %1465, %1466 : vector<8x1xf32>
    %cst_588 = arith.constant 1.000000e+00 : f32
    %1468 = vector.broadcast %cst_588 : f32 to vector<8x1xf32>
    %1469 = arith.subf %1468, %1465 : vector<8x1xf32>
    %cst_589 = arith.constant 1.000000e-03 : f32
    %1470 = vector.broadcast %cst_589 : f32 to vector<8x1xf32>
    %1471 = arith.maximumf %1469, %1470 : vector<8x1xf32>
    %1472 = arith.divf %1467, %1471 : vector<8x1xf32>
    %1473 = math.log %1472 : vector<8x1xf32>
    %1474 = arith.addf %1461, %1473 : vector<8x1xf32>
    %1475 = arith.negf %1474 : vector<8x1xf32>
    %1476 = math.exp %1475 : vector<8x1xf32>
    %cst_590 = arith.constant 1.000000e+00 : f32
    %1477 = vector.broadcast %cst_590 : f32 to vector<8x1xf32>
    %1478 = arith.addf %1477, %1476 : vector<8x1xf32>
    %1479 = arith.divf %1477, %1478 : vector<8x1xf32>
    %cst_591 = arith.constant 4.000000e+00 : f32
    %1480 = vector.broadcast %cst_591 : f32 to vector<8x1xf32>
    %1481 = arith.mulf %1441, %1480 : vector<8x1xf32>
    %cst_592 = arith.constant -2.000000e+00 : f32
    %1482 = vector.broadcast %cst_592 : f32 to vector<8x1xf32>
    %1483 = arith.addf %1481, %1482 : vector<8x1xf32>
    %cst_593 = arith.constant 4.000000e+00 : f32
    %1484 = vector.broadcast %cst_593 : f32 to vector<8x1xf32>
    %1485 = arith.mulf %1460, %1484 : vector<8x1xf32>
    %cst_594 = arith.constant -2.000000e+00 : f32
    %1486 = vector.broadcast %cst_594 : f32 to vector<8x1xf32>
    %1487 = arith.addf %1485, %1486 : vector<8x1xf32>
    %cst_595 = arith.constant 4.000000e+00 : f32
    %1488 = vector.broadcast %cst_595 : f32 to vector<8x1xf32>
    %1489 = arith.mulf %1479, %1488 : vector<8x1xf32>
    %cst_596 = arith.constant 5.000000e-01 : f32
    %1490 = vector.broadcast %cst_596 : f32 to vector<8x1xf32>
    %1491 = arith.addf %1489, %1490 : vector<8x1xf32>
    %1492 = vector.extract_strided_slice %1422 {offsets = [0, 0], sizes = [8, 18], strides = [1, 1]} : vector<8x128xf32> to vector<8x18xf32>
    %cst_597 = arith.constant 0.000000e+00 : f32
    %1493 = vector.broadcast %cst_597 : f32 to vector<8x104xf32>
    %1494 = tpu.concatenate %1492, %1483, %1487, %1491, %765, %769, %773, %1493 in 1 : vector<8x18xf32>, vector<8x1xf32>, vector<8x1xf32>, vector<8x1xf32>, vector<8x1xf32>, vector<8x1xf32>, vector<8x1xf32>, vector<8x104xf32> -> vector<8x128xf32>
    %c0_598 = arith.constant 0 : index
    %c1_599 = arith.constant 1 : index
    %c0_600 = arith.constant 0 : index
    %c0_601 = arith.constant 0 : index
    %1495 = vector.load %arg27[%c0_598, %c1_599, %c0_600, %c0_601] : memref<1x2x8x128xf32, #tpu.memory_space<vmem>>, vector<1x1x8x128xf32>
    %1496 = vector.shape_cast %1495 : vector<1x1x8x128xf32> to vector<8x128xf32>
    %1497 = vector.shape_cast %1494 : vector<8x128xf32> to vector<1x1x8x128xf32>
    tpu.vector_store %arg27[%c0_598, %c1_599, %c0_600, %c0_601], %1497 {strides = array<i32>} : memref<1x2x8x128xf32, #tpu.memory_space<vmem>>, vector<1x1x8x128xf32>,
    return
  }
  func.func @transform_0(%arg0: i32) -> (i32, i32, i32) {
    %c0_i32 = arith.constant 0 : i32
    %c0_i32_0 = arith.constant 0 : i32
    %c0_i32_1 = arith.constant 0 : i32
    return %arg0, %c0_i32, %c0_i32_0 : i32, i32, i32
  }
  func.func @transform_1(%arg0: i32) -> (i32, i32, i32) {
    %c0_i32 = arith.constant 0 : i32
    %c0_i32_0 = arith.constant 0 : i32
    %c0_i32_1 = arith.constant 0 : i32
    return %arg0, %c0_i32, %c0_i32_0 : i32, i32, i32
  }
  func.func @transform_2(%arg0: i32) -> (i32, i32, i32) {
    %c0_i32 = arith.constant 0 : i32
    %c0_i32_0 = arith.constant 0 : i32
    %c0_i32_1 = arith.constant 0 : i32
    return %arg0, %c0_i32, %c0_i32_0 : i32, i32, i32
  }
  func.func @transform_3(%arg0: i32) -> (i32, i32, i32) {
    %c0_i32 = arith.constant 0 : i32
    %c0_i32_0 = arith.constant 0 : i32
    %c0_i32_1 = arith.constant 0 : i32
    return %arg0, %c0_i32, %c0_i32_0 : i32, i32, i32
  }
  func.func @transform_4(%arg0: i32) -> (i32, i32) {
    %c0_i32 = arith.constant 0 : i32
    %c0_i32_0 = arith.constant 0 : i32
    %c0_i32_1 = arith.constant 0 : i32
    return %c0_i32, %c0_i32_0 : i32, i32
  }
  func.func @transform_5(%arg0: i32) -> (i32, i32) {
    %c0_i32 = arith.constant 0 : i32
    %c0_i32_0 = arith.constant 0 : i32
    %c0_i32_1 = arith.constant 0 : i32
    return %c0_i32, %c0_i32_0 : i32, i32
  }
  func.func @transform_6(%arg0: i32) -> (i32, i32) {
    %c0_i32 = arith.constant 0 : i32
    %c0_i32_0 = arith.constant 0 : i32
    %c0_i32_1 = arith.constant 0 : i32
    return %c0_i32, %c0_i32_0 : i32, i32
  }
  func.func @transform_7(%arg0: i32) -> (i32, i32) {
    %c0_i32 = arith.constant 0 : i32
    %c0_i32_0 = arith.constant 0 : i32
    %c0_i32_1 = arith.constant 0 : i32
    return %c0_i32, %c0_i32_0 : i32, i32
  }
  func.func @transform_8(%arg0: i32) -> (i32, i32) {
    %c0_i32 = arith.constant 0 : i32
    %c0_i32_0 = arith.constant 0 : i32
    %c0_i32_1 = arith.constant 0 : i32
    return %c0_i32, %c0_i32_0 : i32, i32
  }
  func.func @transform_9(%arg0: i32) -> (i32, i32, i32) {
    %c0_i32 = arith.constant 0 : i32
    %c0_i32_0 = arith.constant 0 : i32
    %c0_i32_1 = arith.constant 0 : i32
    %c0_i32_2 = arith.constant 0 : i32
    return %c0_i32, %c0_i32_0, %c0_i32_1 : i32, i32, i32
  }
  func.func @transform_10(%arg0: i32) -> (i32, i32, i32) {
    %c0_i32 = arith.constant 0 : i32
    %c0_i32_0 = arith.constant 0 : i32
    %c0_i32_1 = arith.constant 0 : i32
    %c0_i32_2 = arith.constant 0 : i32
    return %c0_i32, %c0_i32_0, %c0_i32_1 : i32, i32, i32
  }
  func.func @transform_11(%arg0: i32) -> (i32, i32, i32) {
    %c0_i32 = arith.constant 0 : i32
    %c0_i32_0 = arith.constant 0 : i32
    %c0_i32_1 = arith.constant 0 : i32
    %c0_i32_2 = arith.constant 0 : i32
    return %c0_i32, %c0_i32_0, %c0_i32_1 : i32, i32, i32
  }
  func.func @transform_12(%arg0: i32) -> (i32, i32, i32) {
    %c0_i32 = arith.constant 0 : i32
    %c0_i32_0 = arith.constant 0 : i32
    %c0_i32_1 = arith.constant 0 : i32
    %c0_i32_2 = arith.constant 0 : i32
    return %c0_i32, %c0_i32_0, %c0_i32_1 : i32, i32, i32
  }
  func.func @transform_13(%arg0: i32) -> (i32, i32, i32) {
    %c0_i32 = arith.constant 0 : i32
    %c0_i32_0 = arith.constant 0 : i32
    %c0_i32_1 = arith.constant 0 : i32
    %c0_i32_2 = arith.constant 0 : i32
    return %c0_i32, %c0_i32_0, %c0_i32_1 : i32, i32, i32
  }
  func.func @transform_14(%arg0: i32) -> (i32, i32, i32) {
    %c0_i32 = arith.constant 0 : i32
    %c0_i32_0 = arith.constant 0 : i32
    %c0_i32_1 = arith.constant 0 : i32
    %c0_i32_2 = arith.constant 0 : i32
    return %c0_i32, %c0_i32_0, %c0_i32_1 : i32, i32, i32
  }
  func.func @transform_15(%arg0: i32) -> (i32, i32, i32) {
    %c0_i32 = arith.constant 0 : i32
    %c0_i32_0 = arith.constant 0 : i32
    %c0_i32_1 = arith.constant 0 : i32
    %c0_i32_2 = arith.constant 0 : i32
    return %c0_i32, %c0_i32_0, %c0_i32_1 : i32, i32, i32
  }
  func.func @transform_16(%arg0: i32) -> (i32, i32, i32) {
    %c0_i32 = arith.constant 0 : i32
    %c0_i32_0 = arith.constant 0 : i32
    %c0_i32_1 = arith.constant 0 : i32
    %c0_i32_2 = arith.constant 0 : i32
    return %c0_i32, %c0_i32_0, %c0_i32_1 : i32, i32, i32
  }
  func.func @transform_17(%arg0: i32) -> (i32, i32, i32, i32) {
    %c0_i32 = arith.constant 0 : i32
    %c0_i32_0 = arith.constant 0 : i32
    %c0_i32_1 = arith.constant 0 : i32
    %c0_i32_2 = arith.constant 0 : i32
    %c0_i32_3 = arith.constant 0 : i32
    return %c0_i32, %c0_i32_0, %c0_i32_1, %c0_i32_2 : i32, i32, i32, i32
  }
  func.func @transform_18(%arg0: i32) -> (i32, i32, i32) {
    %c0_i32 = arith.constant 0 : i32
    %c0_i32_0 = arith.constant 0 : i32
    %c0_i32_1 = arith.constant 0 : i32
    %c0_i32_2 = arith.constant 0 : i32
    return %c0_i32, %c0_i32_0, %c0_i32_1 : i32, i32, i32
  }
  func.func @transform_19(%arg0: i32) -> (i32, i32, i32) {
    %c0_i32 = arith.constant 0 : i32
    %c0_i32_0 = arith.constant 0 : i32
    %c0_i32_1 = arith.constant 0 : i32
    %c0_i32_2 = arith.constant 0 : i32
    return %c0_i32, %c0_i32_0, %c0_i32_1 : i32, i32, i32
  }
  func.func @transform_20(%arg0: i32) -> (i32, i32, i32) {
    %c0_i32 = arith.constant 0 : i32
    %c0_i32_0 = arith.constant 0 : i32
    %c0_i32_1 = arith.constant 0 : i32
    %c0_i32_2 = arith.constant 0 : i32
    return %c0_i32, %c0_i32_0, %c0_i32_1 : i32, i32, i32
  }
  func.func @transform_21(%arg0: i32) -> (i32, i32, i32) {
    %c0_i32 = arith.constant 0 : i32
    %c0_i32_0 = arith.constant 0 : i32
    %c0_i32_1 = arith.constant 0 : i32
    %c0_i32_2 = arith.constant 0 : i32
    return %c0_i32, %c0_i32_0, %c0_i32_1 : i32, i32, i32
  }
  func.func @transform_22(%arg0: i32) -> (i32, i32) {
    %c0_i32 = arith.constant 0 : i32
    %c0_i32_0 = arith.constant 0 : i32
    %c0_i32_1 = arith.constant 0 : i32
    return %c0_i32, %c0_i32_0 : i32, i32
  }
  func.func @transform_23(%arg0: i32) -> (i32, i32) {
    %c0_i32 = arith.constant 0 : i32
    %c0_i32_0 = arith.constant 0 : i32
    %c0_i32_1 = arith.constant 0 : i32
    return %c0_i32, %c0_i32_0 : i32, i32
  }
  func.func @transform_24(%arg0: i32) -> (i32, i32) {
    %c0_i32 = arith.constant 0 : i32
    %c0_i32_0 = arith.constant 0 : i32
    %c0_i32_1 = arith.constant 0 : i32
    return %c0_i32, %c0_i32_0 : i32, i32
  }
  func.func @transform_25(%arg0: i32) -> (i32, i32) {
    %c0_i32 = arith.constant 0 : i32
    %c0_i32_0 = arith.constant 0 : i32
    %c0_i32_1 = arith.constant 0 : i32
    return %c0_i32, %c0_i32_0 : i32, i32
  }
  func.func @transform_26(%arg0: i32) -> (i32, i32, i32, i32) {
    %c0_i32 = arith.constant 0 : i32
    %c0_i32_0 = arith.constant 0 : i32
    %c0_i32_1 = arith.constant 0 : i32
    %c0_i32_2 = arith.constant 0 : i32
    return %arg0, %c0_i32, %c0_i32_0, %c0_i32_1 : i32, i32, i32, i32
  }
}

</mosaic_0001>

<bundles_post_ra>
// kernel: custom-call.11
= control target key start
LH: loop header
LB: loop body
LE: loop exit
PB: predicated region body
PF: predicated region fallthrough
CT: control target
= control target key end

     0   :  { %s1070_s0 = inlined_call_operand.hbm [shape: f32[2,2,4,4], index: 0, kind: input, shape index: {}]   ;;  %s1071_s1 = inlined_call_operand.vmem [shape: f32[2,2,4,4], index: 1, kind: output, shape index: {0}]   ;;  %s1072_s2 = inlined_call_operand.hbm [shape: s32[2,2,4], index: 2, kind: output, shape index: {1}]   ;;  %s1073_s3 = inlined_call_operand.vmem [shape: s32[2,2,4], index: 3, kind: output, shape index: {2}]  }
   0x1   :  { %1077 = sst [smem:[#allocation14_spill]] %s1070_s0 }
   0x2   :  { %5 = vsyncpa [#allocation2], 0 }
   0x3   :  { %7 = vsyncpa [#allocation2 + $0x1], 0 }
   0x4   :  { %8 = vsyncpa [#allocation3], 0 }
   0x5   :  { %10 = vsyncpa [#allocation3 + $0x1], 0  ;;  %s848_s12 = smov 0   ;;  %s850_s13 = smov 0  }
   0x6   :  { %s852_s14 = smov 0   ;;  %s854_s15 = smov 0  }
   0x7   :  { %s856_s16 = smov 0   ;;  %s858_s17 = smov 0  }
   0x8   :  { %s860_s18 = smov 0   ;;  %s862_s19 = smov 0  }
   0x9 LB: > { %s1074_s20 = sadd.s32 4294967295, %s819_s19   ;;  %s587_s21 = sadd.s32 4294967294, %s819_s19   ;;  %s819_s19 = sphi %s862_s19, %s16_s19   ;;  %s815_s18 = sphi %s860_s18, %s1093_s18   ;;  %s811_s17 = sphi %s858_s17, %s1092_s17   ;;  %s807_s16 = sphi %s856_s16, %s1091_s16   ;;  %s803_s15 = sphi %s854_s15, %s1090_s15   ;;  %s799_s14 = sphi %s852_s14, %s1089_s14   ;;  %s795_s13 = sphi %s850_s13, %s1088_s13   ;;  %s791_s12 = sphi %s848_s12, %s1087_s12  }
   0xa   : > { %s25_s22 = sadd.s32 1, %s811_s17  ;;  %s28_s23 = sadd.s32 1, %s815_s18 }
   0xb   : > { %p26_p0 = scmp.ge.s32.totalorder %s25_s22, 2  ;;  %s32_s24 = sshrl.u32 %s811_s17, 3 }
   0xc   : > { %s39_s25 = sadd.s32 1, %s799_s14  ;;  %p49_p1 = scmp.ne.s32.totalorder %s799_s14, %s795_s13 }
   0xd   : > { %s1095_s22 = smov (%p26_p0, %s25_s22), 0  ;;  %s1097_s23 = smov (!%p26_p0, %s28_s23), %s815_s18 }
   0xe   : > { %s33_s26 = sshrl.u32 %s1095_s22, 3  ;;  %p50_p2 = scmp.eq.s32.totalorder %s1074_s20, 3 }
   0xf   : > { %p30_p3 = scmp.ge.s32.totalorder %s1097_s23, 2  ;;  %s35_s27 = ssub.s32 %s32_s24, %s33_s26 }
  0x10   : > { %p902_p4 = por %p50_p2, %p49_p1  ;;  %p55_p5 = scmp.ne.s32.totalorder %s795_s13, %s791_s12 }
  0x11   : > { %s1099_s23 = smov (%p30_p3, %s1097_s23), 0  ;;  %p56_p6 = scmp.eq.s32.totalorder %s587_s21, 3 }
  0x12   : > { %1079 = sst [smem:[#allocation13_spill]] %s1099_s23  ;;  %s34_s29 = ssub.s32 %s815_s18, %s1099_s23 }
  0x13   : > { %p618_p7 = scmp.lt.s32.totalorder %s819_s19, 4  ;;  %s36_s30 = sor.u32 %s35_s27, %s34_s29 }
  0x14   : > { %p913_p8 = por %p56_p6, %p55_p5  ;;  %p37_p9 = scmp.eq.s32.totalorder %s36_s30, 0 }
  0x15   : > { %s103_s5 = sand.u32 1, %s819_s19   ;;  %s591_s8 = sshll.u32 %s815_s18, 1 }
  0x16   : > { %s590_s6 = sshll.u32 %s103_s5, 2  ;;  %s112_s9 = sadd.s32 %s811_s17, %s591_s8 }
  0x17   : > { %s919_s7 = scalar_select %p37_p9, %s799_s14, %s39_s25  }
  0x18   : > { %s107_s10 = scalar_lea.vmem [#allocation1], %s590_s6  ;;  %s592_s24 = sshll.u32 %s112_s9, 6 }
  0x19   : > { %s116_s11 = sshll.u32 %s107_s10, 4  ;;  %s1081_s0 = sld [smem:[#allocation14_spill]]  ;;  %s117_s11 = int_to_ptr.vmem [resolvable:$true] %s116_s11 }
  0x1a   : > { %p593_p10 = scmp.ge.s32.totalorder %s819_s19, 1  ;;  %s104_s29 = scalar_lea.sflag [#allocation2], %s103_s5 }
  0x1b   : > { %s707_s20 = scalar_lea.vmem %s117_s11, 64  ;;  %s825_s30 = smov [#allocation1]  }
  0x1c   : > { %p708_p11 = scmp.ne.s32.totalorder %s117_s11, %s707_s20  ;;  %s711_s25 = sshll.u32 %s825_s30, 4  ;;  %s712_s25 = int_to_ptr.vmem [resolvable:$false] %s711_s25 }
  0x1d   : > { %s713_s23 = scalar_lea.vmem %s712_s25, 128  ;;  %p714_p0 = scmp.lt.s32.totalorder %s117_s11, %s712_s25 }
  0x1e   : > { %p709_p12 = pnand %p708_p11, %p618_p7  ;;  %p715_p1 = scmp.lt.s32.totalorder %s713_s23, %s707_s20 }
  0x1f   : > { %s114_s27 = scalar_lea.hbm %s1081_s0, %s592_s24 }
  0x20   : > { %p710_p13 = pneg %p709_p12  ;;  %p716_p2 = por %p715_p1, %p714_p0 }
  0x22   : > { %p717_p3 = pnand %p716_p2, %p710_p13 }
  0x24   : > { %720 = shalt.err (!%p717_p3)
}
  0x25   : > { %611 = dma.hbm_to_vmem [thread:$0]  (%p618_p7), %s114_s27, 64, %s117_s11, %s104_s29  }
  0x26   : > { %p121_p5 = scmp.lt.s32.totalorder %s819_s19, 5 }
  0x28   : > { %p122_p6 = pnand %p593_p10, %p121_p5 }
  0x2a   : > { %125 = sbr.rel (%p122_p6) target bundleno = 468 (0x1d4), region = 20 }
  0x2f   : > { %s1082_s5 = sadd.s32 4294967295, %s819_s19  }
  0x30   : > { %s127_s6 = sand.u32 1, %s1082_s5  }
  0x31   : > { %s128_s8 = scalar_lea.sflag [#allocation2], %s127_s6 }
  0x32   : > { %783 = dma.done.wait %s128_s8, 64  }
  0x33   : > { %784 = vsyncadd %s128_s8, 4294967232  ;;  %s594_s20 = sshll.u32 %s127_s6, 2  ;;  %s164_s23 = sand.u32 7, %s803_s15   ;;  %v169_v0 = vlaneseq  ;;  %v826_v2 = vmov 0  }
  0x34   : > { %s940_s9 = scalar_lea.vmem [#allocation6], %s164_s23  ;;  %s1076_s10 = sand.u32 1, %s795_s13  }
  0x35   : > { %v938_v1 = vshrl.u32 %v169_v0, 7  ;;  %168 = vst [vmem:[%s940_s9] sm:$0x1] %v826_v2  ;;  %s947_s11 = sshll.u32 %s1076_s10, 1  ;;  %s137_s24 = scalar_lea.vmem [#allocation1], %s594_s20 }
  0x36   : > { %v158_v3 = vld [vmem:[%s137_s24] sm:$0xf]  ;;  %s949_s21 = scalar_lea.vmem [#allocation5], %s594_s20  ;;  %s148_s26 = scalar_lea.vmem [#allocation7], %s947_s11 }
  0x37   : > { %173 = vst [vmem:[#allocation10] sm:$0xff] %v938_v1  ;;  %159 = vst [vmem:[#allocation0] sm:$0xf] %v158_v3  ;;  %s953_s29 = scalar_lea.vmem [#allocation8], %s164_s23  ;;  %s955_s30 = smov 0  }
  0x3e   : > { %v162_v4 = vld [vmem:[#allocation0] sm:$0xff] }
  0x3f   : > { %163 = vst [vmem:[#allocation4] sm:$0xff] %v162_v4 }
  0x40 LB: >> { %vm189_vm0 = vcmp.lt.s32.totalorder %v938_v1, 4  ;;  %v962_v7 = vstv %s823_s30  ;;  %s230_s25 = ssub.s32 128, %s823_s30  ;;  %v236_v37 = vand.u32 127, %v169_v0  ;;  %v239_v39 = vld [vmem:[%s940_s9] ss:$0 sm:$0xff]  ;;  %s242_s5 = scalar_lea.vmem [#allocation4], %s823_s30  ;;  %s823_s30 = sphi %s955_s30, %s179_s30  }
  0x41   : >> { %vm188_vm1 = vcmp.ge.s32.totalorder %v938_v1, %v962_v7  ;;  %s248_s8 = scalar_lea.vmem [#allocation10], %s823_s30  ;;  %vm268_vm15 = vcmp.gt.s32.totalorder %v938_v1, %v962_v7  ;;  %s179_s30 = sadd.s32 1, %s823_s30  }
  0x42   : >> { %vm190_vm3 = vmand %vm188_vm1, %vm189_vm0  ;;  %vm260_vm12 = vcmp.gt.s32.totalorder %v236_v37, %v962_v7  ;;  %vm237_vm13 = vcmp.eq.s32.totalorder %v236_v37, %v962_v7  ;;  %v250_v41 = vld [vmem:[%s248_s8] ss:$0 sm:$0xff]  ;;  %p176_p7 = scmp.ge.s32.totalorder %s179_s30, 4  }
  0x43   : >> { %vm272_vm1 = vmand %vm268_vm15, %vm237_vm13  ;;  %s602_s24 = sshll.u32 (%p176_p7), %s807_s16, 1 }
  0x46   : >> { %v184_v5 = vld [vmem:[#allocation4] sm:$0xff]  ;;  %v244_v40 = vld [vmem:[%s242_s5] ss:$0 sm:$0xff] }
  0x47   : >> { %v185_v6 = vand.u32 2147483647, %v184_v5 }
  0x49   : >> { %vm598_vm2 = vcmp.gt.f32.partialorder %v185_v6, -inf }
  0x4a   : >> { %vm192_vm4 = vmand %vm190_vm3, %vm598_vm2 }
  0x4b   : >> { %v193_v8 = vsel %vm192_vm4, %v938_v1, %v962_v7  ;;  %v194_v9 = vsel %vm192_vm4, %v185_v6, -inf }
  0x4c   : >> { %v195_v10 = vrot.slane %v194_v9, 1  ;;  %v196_v11 = vrot.slane %v193_v8, 1 }
  0x4e   : >> { %vm197_vm5 = vcmp.ge.f32.partialorder %v195_v10, %v194_v9  ;;  %v200_v12 = vrot.slane %v195_v10, 1  ;;  %v201_v13 = vrot.slane %v196_v11, 1 }
  0x4f   : >> { %v198_v14 = vsel %vm197_vm5, %v195_v10, %v194_v9  ;;  %v199_v15 = vsel %vm197_vm5, %v196_v11, %v193_v8 }
  0x50   : >> { %vm202_vm6 = vcmp.ge.f32.partialorder %v200_v12, %v198_v14  ;;  %v205_v16 = vrot.slane %v200_v12, 1  ;;  %v206_v17 = vrot.slane %v201_v13, 1 }
  0x51   : >> { %v203_v18 = vsel %vm202_vm6, %v200_v12, %v198_v14  ;;  %v204_v19 = vsel %vm202_vm6, %v201_v13, %v199_v15 }
  0x52   : >> { %vm207_vm7 = vcmp.ge.f32.partialorder %v205_v16, %v203_v18  ;;  %v210_v20 = vrot.slane %v205_v16, 1  ;;  %v211_v21 = vrot.slane %v206_v17, 1 }
  0x53   : >> { %v208_v22 = vsel %vm207_vm7, %v205_v16, %v203_v18  ;;  %v209_v23 = vsel %vm207_vm7, %v206_v17, %v204_v19 }
  0x54   : >> { %vm212_vm8 = vcmp.ge.f32.partialorder %v210_v20, %v208_v22  ;;  %v215_v24 = vrot.slane %v210_v20, 1  ;;  %v216_v25 = vrot.slane %v211_v21, 1 }
  0x55   : >> { %v213_v26 = vsel %vm212_vm8, %v210_v20, %v208_v22  ;;  %v214_v27 = vsel %vm212_vm8, %v211_v21, %v209_v23 }
  0x56   : >> { %vm217_vm9 = vcmp.ge.f32.partialorder %v215_v24, %v213_v26  ;;  %v220_v28 = vrot.slane %v215_v24, 1  ;;  %v221_v29 = vrot.slane %v216_v25, 1 }
  0x57   : >> { %v218_v30 = vsel %vm217_vm9, %v215_v24, %v213_v26  ;;  %v219_v31 = vsel %vm217_vm9, %v216_v25, %v214_v27 }
  0x58   : >> { %vm222_vm10 = vcmp.ge.f32.partialorder %v220_v28, %v218_v30  ;;  %v225_v32 = vrot.slane %v220_v28, 1  ;;  %v226_v33 = vrot.slane %v221_v29, 1 }
  0x59   : >> { %v223_v34 = vsel %vm222_vm10, %v220_v28, %v218_v30  ;;  %v224_v35 = vsel %vm222_vm10, %v221_v29, %v219_v31 }
  0x5a   : >> { %vm227_vm11 = vcmp.ge.f32.partialorder %v225_v32, %v223_v34 }
  0x5b   : >> { %v229_v36 = vsel %vm227_vm11, %v226_v33, %v224_v35 }
  0x5c   : >> { %231 = vrot.lane.b32.xlu0 %v229_v36, %s230_s25  ;;  %s405_s25 = sshrl.u32 (%p176_p7), %s803_s15, 3 }
  0xce   : >> { %v232_v38 = vpop.permute.xlu0 %231 }
  0xcf   : >> { %608 = vpush %v232_v38 }
 0x100   : >> { %s609_s6 = spop %608 }
 0x101   : >> { %v238_v42 = vstv %s609_s6  ;;  %s243_s20 = scalar_lea.vmem [#allocation4], %s609_s6  ;;  %s249_s23 = scalar_lea.vmem [#allocation10], %s609_s6 }
 0x102   : >> { %v245_v43 = vld [vmem:[%s243_s20] ss:$0 sm:$0xff]  ;;  %v240_v45 = vsel %vm237_vm13, %v238_v42, %v239_v39  ;;  %s994_s6 = sadd.s32 (%p176_p7), %s807_s16, %s405_s25  ;;  %s1083_s16 = sand.u32 (%p176_p7), 1, %s795_s13  }
 0x103   : >> { %v251_v44 = vld [vmem:[%s249_s23] ss:$0 sm:$0xff]  ;;  %246 = vst [vmem:[%s243_s20] sm:$0x1] %v244_v40  ;;  %vm254_vm14 = vcmp.ne.f32.partialorder %v245_v43, 0.0  ;;  %241 = vst [vmem:[%s940_s9] sm:$0x1] %v240_v45  ;;  %v261_v52 = vsel %vm260_vm12, %v245_v43, 0.0 }
 0x104   : >> { %252 = vst [vmem:[%s249_s23] sm:$0x1] %v250_v41  ;;  %247 = vst [vmem:[%s242_s5] sm:$0x1] %v245_v43  ;;  %s366_s5 = sadd.s32 (%p176_p7), %s803_s15, %s602_s24  ;;  %s604_s30 = sshll.u32 (%p176_p7), %s994_s6, 5 }
 0x105   : >> { %253 = vst [vmem:[%s248_s8] sm:$0x1] %v251_v44  ;;  %vm255_vm0 = vmand %vm237_vm13, %vm254_vm14  ;;  %s603_s9 = sshll.u32 (%p176_p7), %s366_s5, 2  ;;  %s1007_s0 = scalar_lea.hbm (%p176_p7), %s1072_s2, %s604_s30 }
 0x106   : >> { %v256_v46 = vsel %vm255_vm0, %v245_v43, 1.0  ;;  %s1002_s23 = scalar_lea.vmem (%p176_p7), %s1071_s1, %s603_s9  ;;  %s413_s15 = sshll.u32 (%p176_p7), %s148_s26, 4  ;;  %s414_s15 = int_to_ptr.vmem [resolvable:$true] %s413_s15 }
 0x107   : >> { %v269_v47 = vsel %vm268_vm15, %v256_v46, 1.0  ;;  %s357_s24 = scalar_lea.sflag (%p176_p7), [#allocation3], %s1083_s16  ;;  %s721_s25 = scalar_lea.vmem (%p176_p7), %s414_s15, 32 }
 0x108   : >> { %693 = vrcp.f32 %v269_v47  ;;  %p722_p9 = scmp.ne.s32.totalorder (%p176_p7), %s414_s15, %s721_s25  ;;  %s827_s5 = smov (%p176_p7), [#allocation7]  }
 0x109   : > { %s725_s8 = sshll.u32 (%p176_p7), %s827_s5, 4  ;;  %s726_s8 = int_to_ptr.vmem [resolvable:$false] %s725_s8 }
 0x10a   : > { %v340_v58 = vld [vmem:[#allocation6] sm:$0x3] (%p176_p7)  ;;  %p723_p10 = pnand (%p176_p7), %p722_p9, %p902_p4  ;;  %s727_s9 = scalar_lea.vmem (%p176_p7), %s726_s8, 64 }
 0x10b   : >> { %v265_v49 = vld [vmem:[#allocation4] sm:$0xff]  ;;  %343 = vst [vmem:[%s148_s26] sm:$0x3] (%p176_p7), %v340_v58  ;;  %p728_p12 = scmp.lt.s32.totalorder (%p176_p7), %s414_s15, %s726_s8  ;;  %p729_p13 = scmp.lt.s32.totalorder (%p176_p7), %s727_s9, %s721_s25 }
 0x10c   : > { %v279_v56 = vld [vmem:[#allocation10] sm:$0xff] (%p176_p7)  ;;  %p724_p11 = pneg (%p176_p7), %p723_p10 }
 0x10d   : > { %p730_p0 = por (%p176_p7), %p729_p13, %p728_p12 }
 0x10f   : > { %p731_p1 = pnand (%p176_p7), %p730_p0, %p724_p11 }
 0x115   : >> { %v694_v48 = vpop.eup %693 }
 0x116   : >> { %v271_v50 = vmul.f32 %v694_v48, %v265_v49 }
 0x118   : >> { %v273_v51 = vsel %vm272_vm1, %v271_v50, 0.0 }
 0x119   : >> { %274 = vadd.xlane.f32.xlu0 %v273_v51 }
 0x146   : > { %295 = vxpose.xlu0.b32.start.end [1/1] (short) (narrow) (%p176_p7), %v279_v56, 8 }
 0x1a2   : >> { %v275_v53 = vpop.xlane.xlu0 %274 }
 0x1a3   : >> { %v276_v54 = vmul.f32 %v275_v53, %v261_v52  ;;  %178 = sbr.rel (!%p176_p7) target bundleno = 64 (0x40), region = 173 }
 0x1a5   : >> { %v277_v55 = vsub.f32 %v271_v50, %v276_v54 }
 0x1a7   : >> { %278 = vst [vmem:[#allocation4] sm:$0xff] %v277_v55 }
 0x1ae   : > { %v332_v57 = vld [vmem:[#allocation4] sm:$0xf] }
 0x1af   : > { %335 = vst [vmem:[%s949_s21] sm:$0xf] %v332_v57 }
 0x1b6   : > { %v385_v59 = vld [vmem:[%s949_s21] sm:$0xf] }
 0x1b7   : > { %734 = shalt.err (!%p731_p1)
}
 0x1b8   : > { %s735_s10 = scalar_lea.hbm %s1007_s0, 32  ;;  %s739_s27 = scalar_lea.hbm %s1072_s2, 64 }
 0x1b9   : > { %p736_p2 = scmp.ne.s32.totalorder %s1007_s0, %s735_s10  ;;  %p740_p6 = scmp.lt.s32.totalorder %s1007_s0, %s1072_s2 }
 0x1ba   : > { %p741_p7 = scmp.lt.s32.totalorder %s739_s27, %s735_s10 }
 0x1bb   : > { %p737_p3 = pnand %p736_p2, %p902_p4 }
 0x1bc   : > { %p742_p9 = por %p741_p7, %p740_p6 }
 0x1bd   : > { %p738_p5 = pneg %p737_p3 }
 0x1bf   : > { %p743_p10 = pnand %p742_p9, %p738_p5 }
 0x1c1   : > { %746 = shalt.err (!%p743_p10)
}
 0x1c2   : > { %612 = dma.vmem_to_hbm [thread:$0]  (%p902_p4), %s414_s15, 32, %s1007_s0, %s357_s24   ;;  %386 = vst [vmem:[%s1002_s23] sm:$0xf] %v385_v59  ;;  %v311_v60 = vpop.trf.xlu0 }
 0x1c3   : > { %327 = vst [vmem:[%s953_s29] sm:$0x1] %v311_v60  ;;  %s1084_s16 = scalar_lea.vmem [#allocation9], %s947_s11  ;;  %s605_s25 = sshll.u32 (%p902_p4), %s994_s6, 1 }
 0x1c4   : > { %s1085_s5 = scalar_lea.vmem (%p902_p4), [#allocation9], %s947_s11  ;;  %s423_s10 = scalar_lea.vmem (%p902_p4), %s1073_s3, %s605_s25 }
 0x1c7   : > { %419 = sbr.rel (!%p902_p4) target bundleno = 468 (0x1d4), region = 66 }
 0x1ca   : > { %v348_v61 = vld [vmem:[#allocation8] sm:$0x3] }
 0x1cb   : > { %351 = vst [vmem:[%s1084_s16] sm:$0x3] %v348_v61 }
 0x1d2   : > { %v440_v62 = vld [vmem:[%s1085_s5] sm:$0x3] }
 0x1d3   : > { %441 = vst [vmem:[%s423_s10] sm:$0x3] %v440_v62 }
 0x1d4 PF: > { %p619_p11 = scmp.ge.s32.totalorder %s819_s19, 2  ;;  %s469_s0 = sand.u32 1, %s791_s12  }
 0x1d5   : > { %s470_s28 = scalar_lea.sflag [#allocation3], %s469_s0 }
 0x1d6   : > { %p615_p12 = pnand %p619_p11, %p913_p8 }
 0x1d8   : > { %p616_p4 = pneg %p615_p12 }
 0x1da   : > { %786 = dma.done.wait (%p616_p4), %s470_s28, 32  }
 0x1db   : > { %788 = vsyncadd (%p616_p4), %s470_s28, 4294967264  ;;  %s16_s19 = sadd.s32 1, %s819_s19   ;;  %s1086_s11 = sld [smem:[#allocation13_spill]] }
 0x1dc   : > { %p13_p13 = scmp.ge.s32.totalorder %s16_s19, 6   ;;  %s1087_s12 = smov %s795_s13 }
 0x1dd   : > { %s1088_s13 = smov %s799_s14  ;;  %s1089_s14 = smov %s919_s7 }
 0x1de   : > { %s1090_s15 = smov %s811_s17  ;;  %s1091_s16 = smov %s815_s18 }
 0x1df   : > { %s1092_s17 = smov %s1095_s22  ;;  %15 = sbr.rel (!%p13_p13) target bundleno = 9 (0x9), region = 184 }
 0x1e1   : > { %s1093_s18 = smov %s1086_s11 }
 0x1e4   :  { %482 = vsyncpa [#allocation2], 1 }
 0x1e5   :  { %484 = vsyncpa [#allocation2 + $0x1], 1 }
 0x1e6   :  { %485 = vsyncpa [#allocation3], 1 }
 0x1e7   :  { %487 = vsyncpa [#allocation3 + $0x1], 1 }

// kernel: custom-call.13
= control target key start
LH: loop header
LB: loop body
LE: loop exit
PB: predicated region body
PF: predicated region fallthrough
CT: control target
= control target key end

     0   :  { %s415_s6 = smov 0   ;;  %s417_s7 = smov 0   ;;  %s484_s0 = inlined_call_operand.vmem [shape: f32[2,2,1,4,4], index: 0, kind: input, shape index: {}]   ;;  %s485_s1 = inlined_call_operand.vmem [shape: f32[2,2,1,4,4], index: 1, kind: output, shape index: {}]  }
   0x1   :  { %s419_s8 = smov 0   ;;  %s421_s9 = smov 0  }
   0x2   :  { %s423_s10 = smov 0  }
   0x3 LB: > { %s307_s11 = sadd.s32 4294967295, %s402_s10   ;;  %s36_s12 = sadd.s32 1, %s394_s8  ;;  %s402_s10 = sphi %s423_s10, %s7_s10   ;;  %s398_s9 = sphi %s421_s9, %s489_s9   ;;  %s394_s8 = sphi %s419_s8, %s488_s8   ;;  %s390_s7 = sphi %s417_s7, %s487_s7   ;;  %s386_s6 = sphi %s415_s6, %s486_s6  }
   0x4   : > { %p38_p0 = scmp.ge.s32.totalorder %s36_s12, 2  ;;  %s40_s13 = sadd.s32 1, %s398_s9 }
   0x5   : > { %p309_p2 = scmp.ge.s32.totalorder %s402_s10, 4 }
   0x6   : > { %s491_s12 = smov (%p38_p0, %s36_s12), 0  ;;  %s493_s13 = smov (!%p38_p0, %s40_s13), %s398_s9 }
   0x7   : > { %p42_p1 = scmp.ge.s32.totalorder %s493_s13, 2  ;;  %54 = sbr.rel (%p309_p2) target bundleno = 15 (0xf), region = 16 }
   0x8   : > { %s56_s14 = sand.u32 (!%p309_p2), 1, %s402_s10   ;;  %s311_s15 = sshll.u32 (!%p309_p2), %s398_s9, 1 }
   0x9   : > { %s495_s13 = smov (%p42_p1, %s493_s13), 0  ;;  %s310_s16 = sshll.u32 (!%p309_p2), %s56_s14, 2 }
   0xa   : > { %s63_s17 = sadd.s32 (!%p309_p2), %s394_s8, %s311_s15  ;;  %s58_s22 = scalar_lea.vmem (!%p309_p2), [#allocation1], %s310_s16 }
   0xb   : > { %s312_s18 = sshll.u32 (!%p309_p2), %s63_s17, 2 }
   0xc   : > { %s65_s21 = scalar_lea.vmem %s484_s0, %s312_s18 }
   0xd   : > { %v82_v0 = vld [vmem:[%s65_s21] sm:$0xf] }
   0xe   : > { %83 = vst [vmem:[%s58_s22] sm:$0xf] %v82_v0 }
   0xf PF: > { %p313_p3 = scmp.ge.s32.totalorder %s402_s10, 1  ;;  %p100_p4 = scmp.lt.s32.totalorder %s402_s10, 5 }
  0x11   : > { %p101_p5 = pnand %p313_p3, %p100_p4 }
  0x13   : > { %104 = sbr.rel (%p101_p5) target bundleno = 644 (0x284), region = 50 }
  0x18   : > { %s457_s23 = sand.u32 1, %s307_s11   ;;  %v123_v1 = vlaneseq  ;;  %v404_v11 = vmov -1.0   ;;  %s317_s26 = sshll.u32 %s390_s7, 1 }
  0x19   : > { %s314_s24 = sshll.u32 %s457_s23, 2  ;;  %s202_s27 = sadd.s32 %s386_s6, %s317_s26 }
  0x1a   : > { %s113_s25 = scalar_lea.vmem [#allocation1], %s314_s24  ;;  %v124_v3 = vand.u32 127, %v123_v1  ;;  %v127_v4 = vshrl.u32 %v123_v1, 7  ;;  %s117_s28 = scalar_lea.vmem [#allocation3], %s314_s24 }
  0x1b   : > { %v121_v2 = vld [vmem:[%s113_s25] sm:$0xf]  ;;  %s318_s29 = sshll.u32 %s202_s27, 2 }
  0x1c   : > { %122 = vst [vmem:[#allocation0] sm:$0xf] %v121_v2  ;;  %vm125_vm0 = vcmp.lt.s32.totalorder %v124_v3, 4  ;;  %vm134_vm1 = vcmp.ge.s32.totalorder %v127_v4, %v124_v3  ;;  %vm129_vm2 = vcmp.eq.s32.totalorder %v127_v4, %v124_v3  ;;  %vm148_vm4 = vcmp.eq.s32.totalorder %v124_v3, 0  ;;  %s204_s3 = scalar_lea.vmem %s485_s1, %s318_s29 }
  0x1d   : > { %vm135_vm3 = vmand %vm134_vm1, %vm125_vm0  ;;  %vm145_vm5 = vcmp.eq.s32.totalorder %v124_v3, %v127_v4  ;;  %v149_v12 = vsel %vm148_vm4, 1.0, %v404_v11  ;;  %vm156_vm6 = vcmp.eq.s32.totalorder %v124_v3, 1  ;;  %vm166_vm7 = vcmp.eq.s32.totalorder %v124_v3, 2 }
  0x1e   : > { %v150_v13 = vsel %vm145_vm5, %v149_v12, 0.0  ;;  %vm176_vm8 = vcmp.eq.s32.totalorder %v124_v3, 3 }
  0x23   : > { %v130_v5 = vld [vmem:[#allocation0] sm:$0xff] }
  0x24   : > { %v131_v6 = vsel %vm129_vm2, %v130_v5, 0.0  ;;  %v136_v7 = vsel %vm135_vm3, %v130_v5, 0.0 }
  0x25   : > { %132 = vadd.xlane.f32.xlu0 %v131_v6 }
  0xae   : > { %v133_v8 = vpop.xlane.xlu0 %132 }
  0xaf   : > { %362 = vrcp.f32 %v133_v8  ;;  %vm183_vm9 = vweird.f32 %v133_v8 }
  0xbc   : > { %v363_v9 = vpop.eup %362 }
  0xbd   : > { %v138_v10 = vmul.f32 %v363_v9, %v136_v7 }
  0xbf   : > { %139 = vst [vmem:[#allocation4] sm:$0xff] %v138_v10 }
  0xc6   : > { %v152_v14 = vld [vmem:[#allocation4 + $0x1] ss:$0 sm:$0xff]  ;;  %v162_v17 = vld [vmem:[#allocation4 + $0x2] ss:$0 sm:$0xff]  ;;  %v172_v22 = vld [vmem:[#allocation4 + $0x3] ss:$0 sm:$0xff] }
  0xc7   : > { %v153_v15 = vxor.u32 2147483648, %v152_v14  ;;  %v163_v19 = vxor.u32 2147483648, %v162_v17  ;;  %v173_v24 = vxor.u32 2147483648, %v172_v22 }
  0xc9   : > { %v157_v16 = vmul.f32 %v153_v15, %v150_v13 }
  0xcb   : > { %158 = vadd.xlane.f32.xlu0 %v157_v16 }
 0x154   : > { %v159_v18 = vpop.xlane.xlu0 %158 }
 0x155   : > { %v160_v20 = vsel %vm156_vm6, %v159_v18, %v150_v13 }
 0x156   : > { %v167_v21 = vmul.f32 %v163_v19, %v160_v20 }
 0x158   : > { %168 = vadd.xlane.f32.xlu1 %v167_v21 }
 0x1e1   : > { %v169_v23 = vpop.xlane.xlu1 %168 }
 0x1e2   : > { %v170_v25 = vsel %vm166_vm7, %v169_v23, %v160_v20 }
 0x1e3   : > { %v177_v26 = vmul.f32 %v173_v24, %v170_v25 }
 0x1e5   : > { %178 = vadd.xlane.f32.xlu1 %v177_v26 }
 0x26e   : > { %v179_v27 = vpop.xlane.xlu1 %178 }
 0x26f   : > { %v180_v28 = vsel %vm176_vm8, %v179_v27, %v170_v25 }
 0x270   : > { %v182_v29 = vmul.f32 %v363_v9, %v180_v28 }
 0x272   : > { %v184_v30 = vsel %vm183_vm9, %v180_v28, %v182_v29 }
 0x273   : > { %185 = vst [vmem:[#allocation2] sm:$0xff] %v184_v30 }
 0x27a   : > { %v190_v31 = vld [vmem:[#allocation2] sm:$0xf] }
 0x27b   : > { %193 = vst [vmem:[%s117_s28] sm:$0xf] %v190_v31 }
 0x282   : > { %v221_v32 = vld [vmem:[%s117_s28] sm:$0xf] }
 0x283   : > { %222 = vst [vmem:[%s204_s3] sm:$0xf] %v221_v32 }
 0x284 PF: > { %s7_s10 = sadd.s32 1, %s402_s10   ;;  %s486_s6 = smov %s394_s8 }
 0x285   : > { %p4_p6 = scmp.ge.s32.totalorder %s7_s10, 6   ;;  %s487_s7 = smov %s398_s9 }
 0x286   : > { %s488_s8 = smov %s491_s12  ;;  %s489_s9 = smov %s495_s13 }
 0x287   :  { %6 = sbr.rel (!%p4_p6) target bundleno = 3 (0x3), region = 113 }

// kernel: custom-call.12
= control target key start
LH: loop header
LB: loop body
LE: loop exit
PB: predicated region body
PF: predicated region fallthrough
CT: control target
= control target key end

     0   :  { %s414_s6 = smov 0   ;;  %s416_s7 = smov 0   ;;  %s483_s0 = inlined_call_operand.vmem [shape: f32[2,2,1,4,4], index: 0, kind: input, shape index: {}]   ;;  %s484_s1 = inlined_call_operand.vmem [shape: f32[2,2,1,4,4], index: 1, kind: output, shape index: {}]  }
   0x1   :  { %s418_s8 = smov 0   ;;  %s420_s9 = smov 0  }
   0x2   :  { %s422_s10 = smov 0  }
   0x3 LB: > { %s306_s11 = sadd.s32 4294967295, %s401_s10   ;;  %s36_s12 = sadd.s32 1, %s393_s8  ;;  %s401_s10 = sphi %s422_s10, %s7_s10   ;;  %s397_s9 = sphi %s420_s9, %s488_s9   ;;  %s393_s8 = sphi %s418_s8, %s487_s8   ;;  %s389_s7 = sphi %s416_s7, %s486_s7   ;;  %s385_s6 = sphi %s414_s6, %s485_s6  }
   0x4   : > { %p38_p0 = scmp.ge.s32.totalorder %s36_s12, 2  ;;  %s40_s13 = sadd.s32 1, %s397_s9 }
   0x5   : > { %p308_p2 = scmp.ge.s32.totalorder %s401_s10, 4 }
   0x6   : > { %s490_s12 = smov (%p38_p0, %s36_s12), 0  ;;  %s492_s13 = smov (!%p38_p0, %s40_s13), %s397_s9 }
   0x7   : > { %p42_p1 = scmp.ge.s32.totalorder %s492_s13, 2  ;;  %54 = sbr.rel (%p308_p2) target bundleno = 15 (0xf), region = 16 }
   0x8   : > { %s56_s14 = sand.u32 (!%p308_p2), 1, %s401_s10   ;;  %s310_s15 = sshll.u32 (!%p308_p2), %s397_s9, 1 }
   0x9   : > { %s494_s13 = smov (%p42_p1, %s492_s13), 0  ;;  %s309_s16 = sshll.u32 (!%p308_p2), %s56_s14, 2 }
   0xa   : > { %s63_s17 = sadd.s32 (!%p308_p2), %s393_s8, %s310_s15  ;;  %s58_s22 = scalar_lea.vmem (!%p308_p2), [#allocation1], %s309_s16 }
   0xb   : > { %s311_s18 = sshll.u32 (!%p308_p2), %s63_s17, 2 }
   0xc   : > { %s65_s21 = scalar_lea.vmem %s483_s0, %s311_s18 }
   0xd   : > { %v82_v0 = vld [vmem:[%s65_s21] sm:$0xf] }
   0xe   : > { %83 = vst [vmem:[%s58_s22] sm:$0xf] %v82_v0 }
   0xf PF: > { %p312_p3 = scmp.ge.s32.totalorder %s401_s10, 1  ;;  %p100_p4 = scmp.lt.s32.totalorder %s401_s10, 5 }
  0x11   : > { %p101_p5 = pnand %p312_p3, %p100_p4 }
  0x13   : > { %104 = sbr.rel (%p101_p5) target bundleno = 644 (0x284), region = 50 }
  0x18   : > { %s456_s23 = sand.u32 1, %s306_s11   ;;  %v123_v1 = vlaneseq  ;;  %v403_v11 = vmov -1.0   ;;  %s316_s26 = sshll.u32 %s389_s7, 1 }
  0x19   : > { %s313_s24 = sshll.u32 %s456_s23, 2  ;;  %s201_s27 = sadd.s32 %s385_s6, %s316_s26 }
  0x1a   : > { %s113_s25 = scalar_lea.vmem [#allocation1], %s313_s24  ;;  %v124_v3 = vand.u32 127, %v123_v1  ;;  %v127_v4 = vshrl.u32 %v123_v1, 7  ;;  %s117_s28 = scalar_lea.vmem [#allocation3], %s313_s24 }
  0x1b   : > { %v121_v2 = vld [vmem:[%s113_s25] sm:$0xf]  ;;  %s317_s29 = sshll.u32 %s201_s27, 2 }
  0x1c   : > { %122 = vst [vmem:[#allocation0] sm:$0xf] %v121_v2  ;;  %vm125_vm0 = vcmp.lt.s32.totalorder %v124_v3, 4  ;;  %vm134_vm1 = vcmp.le.s32.totalorder %v127_v4, %v124_v3  ;;  %vm129_vm2 = vcmp.eq.s32.totalorder %v127_v4, %v124_v3  ;;  %vm148_vm4 = vcmp.eq.s32.totalorder %v124_v3, 3  ;;  %s203_s3 = scalar_lea.vmem %s484_s1, %s317_s29 }
  0x1d   : > { %vm135_vm3 = vmand %vm134_vm1, %vm125_vm0  ;;  %vm145_vm5 = vcmp.eq.s32.totalorder %v124_v3, %v127_v4  ;;  %v149_v12 = vsel %vm148_vm4, 1.0, %v403_v11  ;;  %vm156_vm6 = vcmp.eq.s32.totalorder %v124_v3, 2  ;;  %vm166_vm7 = vcmp.eq.s32.totalorder %v124_v3, 1 }
  0x1e   : > { %v150_v13 = vsel %vm145_vm5, %v149_v12, 0.0  ;;  %vm175_vm8 = vcmp.eq.s32.totalorder %v124_v3, 0 }
  0x23   : > { %v130_v5 = vld [vmem:[#allocation0] sm:$0xff] }
  0x24   : > { %v131_v6 = vsel %vm129_vm2, %v130_v5, 0.0  ;;  %v136_v7 = vsel %vm135_vm3, %v130_v5, 0.0 }
  0x25   : > { %132 = vadd.xlane.f32.xlu0 %v131_v6 }
  0xae   : > { %v133_v8 = vpop.xlane.xlu0 %132 }
  0xaf   : > { %361 = vrcp.f32 %v133_v8  ;;  %vm182_vm9 = vweird.f32 %v133_v8 }
  0xbc   : > { %v362_v9 = vpop.eup %361 }
  0xbd   : > { %v138_v10 = vmul.f32 %v362_v9, %v136_v7 }
  0xbf   : > { %139 = vst [vmem:[#allocation4] sm:$0xff] %v138_v10 }
  0xc6   : > { %v152_v14 = vld [vmem:[#allocation4 + $0x2] ss:$0 sm:$0xff]  ;;  %v162_v17 = vld [vmem:[#allocation4 + $0x1] ss:$0 sm:$0xff]  ;;  %v171_v22 = vld [vmem:[#allocation4] ss:$0 sm:$0xff] }
  0xc7   : > { %v153_v15 = vxor.u32 2147483648, %v152_v14  ;;  %v163_v19 = vxor.u32 2147483648, %v162_v17  ;;  %v172_v24 = vxor.u32 2147483648, %v171_v22 }
  0xc9   : > { %v157_v16 = vmul.f32 %v153_v15, %v150_v13 }
  0xcb   : > { %158 = vadd.xlane.f32.xlu0 %v157_v16 }
 0x154   : > { %v159_v18 = vpop.xlane.xlu0 %158 }
 0x155   : > { %v160_v20 = vsel %vm156_vm6, %v159_v18, %v150_v13 }
 0x156   : > { %v167_v21 = vmul.f32 %v163_v19, %v160_v20 }
 0x158   : > { %168 = vadd.xlane.f32.xlu1 %v167_v21 }
 0x1e1   : > { %v169_v23 = vpop.xlane.xlu1 %168 }
 0x1e2   : > { %v170_v25 = vsel %vm166_vm7, %v169_v23, %v160_v20 }
 0x1e3   : > { %v176_v26 = vmul.f32 %v172_v24, %v170_v25 }
 0x1e5   : > { %177 = vadd.xlane.f32.xlu1 %v176_v26 }
 0x26e   : > { %v178_v27 = vpop.xlane.xlu1 %177 }
 0x26f   : > { %v179_v28 = vsel %vm175_vm8, %v178_v27, %v170_v25 }
 0x270   : > { %v181_v29 = vmul.f32 %v362_v9, %v179_v28 }
 0x272   : > { %v183_v30 = vsel %vm182_vm9, %v179_v28, %v181_v29 }
 0x273   : > { %184 = vst [vmem:[#allocation2] sm:$0xff] %v183_v30 }
 0x27a   : > { %v189_v31 = vld [vmem:[#allocation2] sm:$0xf] }
 0x27b   : > { %192 = vst [vmem:[%s117_s28] sm:$0xf] %v189_v31 }
 0x282   : > { %v220_v32 = vld [vmem:[%s117_s28] sm:$0xf] }
 0x283   : > { %221 = vst [vmem:[%s203_s3] sm:$0xf] %v220_v32 }
 0x284 PF: > { %s7_s10 = sadd.s32 1, %s401_s10   ;;  %s485_s6 = smov %s393_s8 }
 0x285   : > { %p4_p6 = scmp.ge.s32.totalorder %s7_s10, 6   ;;  %s486_s7 = smov %s397_s9 }
 0x286   : > { %s487_s8 = smov %s490_s12  ;;  %s488_s9 = smov %s494_s13 }
 0x287   :  { %6 = sbr.rel (!%p4_p6) target bundleno = 3 (0x3), region = 112 }

// kernel: transformer_decoder_forward.1
= control target key start
LH: loop header
LB: loop body
LE: loop exit
PB: predicated region body
PF: predicated region fallthrough
CT: control target
= control target key end

     0   :  { %s8536_s27 = smov 0   ;;  %s10653_s0 = inlined_call_operand.vmem [shape: f32[2,4,6], index: 0, kind: input, shape index: {}]   ;;  %s10654_s1 = inlined_call_operand.vmem [shape: f32[2,8,3], index: 1, kind: input, shape index: {}]   ;;  %s10655_s2 = inlined_call_operand.vmem [shape: bf16[2,512,32], index: 2, kind: input, shape index: {}]   ;;  %s10656_s3 = inlined_call_operand.vmem [shape: bf16[2,32,512], index: 3, kind: input, shape index: {}]   ;;  %s10657_s4 = inlined_call_operand.vmem [shape: f32[2,128], index: 4, kind: input, shape index: {}]   ;;  %s10658_s5 = inlined_call_operand.vmem [shape: bf16[384,32], index: 5, kind: input, shape index: {}]   ;;  %s10659_s6 = inlined_call_operand.vmem [shape: f32[1,32], index: 6, kind: input, shape index: {}]   ;;  %s10660_s7 = inlined_call_operand.vmem [shape: bf16[32,32], index: 7, kind: input, shape index: {}]   ;;  %s10661_s8 = inlined_call_operand.vmem [shape: f32[1,32], index: 8, kind: input, shape index: {}]   ;;  %s10662_s9 = inlined_call_operand.vmem [shape: bf16[2,32,128], index: 9, kind: input, shape index: {}]   ;;  %s10663_s10 = inlined_call_operand.vmem [shape: f32[2,1,128], index: 10, kind: input, shape index: {}]   ;;  %s10664_s11 = inlined_call_operand.vmem [shape: bf16[2,128,32], index: 11, kind: input, shape index: {}]   ;;  %s10665_s12 = inlined_call_operand.vmem [shape: f32[2,1,32], index: 12, kind: input, shape index: {}]   ;;  %s10666_s13 = inlined_call_operand.vmem [shape: bf16[2,32,128], index: 13, kind: input, shape index: {}]   ;;  %s10667_s14 = inlined_call_operand.vmem [shape: f32[2,1,128], index: 14, kind: input, shape index: {}]   ;;  %s10668_s15 = inlined_call_operand.vmem [shape: bf16[2,128,32], index: 15, kind: input, shape index: {}]   ;;  %s10669_s16 = inlined_call_operand.vmem [shape: f32[2,1,32], index: 16, kind: input, shape index: {}]   ;;  %s10670_s17 = inlined_call_operand.vmem [shape: f32[2,6,1,32], index: 17, kind: input, shape index: {}]   ;;  %s10671_s18 = inlined_call_operand.vmem [shape: bf16[2,32,64], index: 18, kind: input, shape index: {}]   ;;  %s10672_s19 = inlined_call_operand.vmem [shape: f32[2,1,64], index: 19, kind: input, shape index: {}]   ;;  %s10673_s20 = inlined_call_operand.vmem [shape: bf16[2,64,32], index: 20, kind: input, shape index: {}]   ;;  %s10674_s21 = inlined_call_operand.vmem [shape: f32[2,1,32], index: 21, kind: input, shape index: {}]   ;;  %s10675_s22 = inlined_call_operand.vmem [shape: bf16[32,128], index: 22, kind: input, shape index: {}]   ;;  %s10676_s23 = inlined_call_operand.vmem [shape: f32[1,128], index: 23, kind: input, shape index: {}]   ;;  %s10677_s24 = inlined_call_operand.vmem [shape: bf16[128,128], index: 24, kind: input, shape index: {}]   ;;  %s10678_s25 = inlined_call_operand.vmem [shape: f32[1,128], index: 25, kind: input, shape index: {}]   ;;  %s10679_s26 = inlined_call_operand.vmem [shape: f32[2,2,8,128], index: 26, kind: output, shape index: {}]  }
   0x1   :  { %10714 = sst [smem:[#allocation5_spill]] %s10653_s0 }
   0x2   :  { %10715 = sst [smem:[#allocation6_spill]] %s10654_s1 }
   0x3   :  { %10716 = sst [smem:[#allocation7_spill]] %s10655_s2 }
   0x4   :  { %10717 = sst [smem:[#allocation8_spill]] %s10656_s3 }
   0x5   :  { %10718 = sst [smem:[#allocation9_spill]] %s10657_s4 }
   0x6   :  { %10719 = sst [smem:[#allocation10_spill]] %s10658_s5 }
   0x7   :  { %10720 = sst [smem:[#allocation11_spill]] %s10659_s6 }
   0x8   :  { %10721 = sst [smem:[#allocation12_spill]] %s10660_s7 }
   0x9   :  { %10722 = sst [smem:[#allocation13_spill]] %s10661_s8 }
   0xa   :  { %10723 = sst [smem:[#allocation14_spill]] %s10662_s9 }
   0xb   :  { %10724 = sst [smem:[#allocation15_spill]] %s10663_s10 }
   0xc   :  { %10725 = sst [smem:[#allocation16_spill]] %s10666_s13 }
   0xd   :  { %10726 = sst [smem:[#allocation17_spill]] %s10667_s14 }
   0xe   :  { %10727 = sst [smem:[#allocation18_spill]] %s10678_s25 }
   0xf   :  { %10728 = sst [smem:[#allocation19_spill]] %s10679_s26 }
  0x10 LB: > { %10729 = sst [smem:[#allocation2_spill]] %s8370_s27  ;;  %s6733_s3 = sadd.s32 4294967295, %s8370_s27   ;;  %s8370_s27 = sphi %s8536_s27, %s36_s27  }
  0x11   : > { %p6737_p0 = scmp.ge.s32.totalorder %s8370_s27, 1  ;;  %p740_p1 = scmp.lt.s32.totalorder %s8370_s27, 3 }
  0x13   : > { %p741_p2 = pnand %p6737_p0, %p740_p1 }
  0x15   : > { %744 = sbr.rel (%p741_p2) target bundleno = 11765 (0x2df5), region = 124 }
  0x1a   : > { %p823_p3 = scmp.lt.s32.totalorder %s6733_s3, 1  ;;  %v8372_v0 = vmov 0.0   ;;  %vm8373_vm0 = vmmov 0   ;;  %vm873_vm1 = vcmask 1043456   ;;  %s10731_s29 = sld [smem:[#allocation5_spill]]  ;;  %vm865_vm2 = vcmask 15360  }
  0x1b   : > { %7494 = vmatprep.subr.mxu0 %v8372_v0  ;;  %7496 = vmatprep.mubr.msk.f32.mxu0 %vm8373_vm0, %v8372_v0  ;;  %s10732_s2 = sld [smem:[#allocation6_spill]]  ;;  %vm10690_vm3 = vcmask 23552   ;;  %vm10689_vm4 = vcmask 31744   ;;  %v8374_v12 = vmov 0   ;;  %s10698_s27 = smov 127   ;;  %v8379_v38 = vmov 1  }
  0x1c   : > { %s10832_s3 = smov (!%p823_p3, %s6733_s3), 1  ;;  %s10733_s26 = sld [smem:[#allocation7_spill]]  ;;  %7875 = vset.pattern.permute.xlu0 %v8374_v12  ;;  %7876 = vset.pattern.permute.xlu1 %v8379_v38  ;;  %v8386_v60 = vmov 1326507024   ;;  %v8387_v63 = vmov 683565275  }
  0x1d   : > { %10730 = sst [smem:[#allocation3_spill]] %s10832_s3  ;;  %s6738_s7 = sshll.u32 %s10832_s3, 2 }
  0x1e   : > { %s6739_s28 = sshll.u32 %s10832_s3, 3  ;;  %s7117_s10 = sshll.u32 %s10832_s3, 8 }
  0x1f   : > { %s7118_s6 = sshll.u32 %s10832_s3, 6  ;;  %s10734_s4 = sld [smem:[#allocation8_spill]] }
  0x20   : > { %s8554_s0 = scalar_lea.vmem %s10731_s29, %s6738_s7  ;;  %s10692_s9 = smov 1  }
  0x21   : > { %s830_s5 = scalar_lea.vmem %s10732_s2, %s6739_s28  ;;  %v847_v1 = vld [vmem:[%s8554_s0] sm:$0xf]  ;;  %s10694_s28 = smov 2  }
  0x22   : > { %v855_v2 = vld [vmem:[%s830_s5] sm:$0xff]  ;;  %s8565_s25 = scalar_lea.vmem %s10733_s26, %s7117_s10  ;;  %7495 = vmatpush3.msk.msra.mxu0 %vm873_vm1, %v847_v1  ;;  %s10696_s26 = smov 126  }
  0x23   : > { %v6746_v3 = vmul.f32 -1.442695, %v855_v2  ;;  %s10691_s30 = smov 125   ;;  %s10746_s10 = sld [smem:[#allocation9_spill]] }
  0x24   : > { %s10754_s1 = sld [smem:[#allocation14_spill]]  ;;  %s10702_s7 = smov 32  }
  0x25   : > { %8117 = vpow2.f32 %v6746_v3  ;;  %s8571_s29 = scalar_lea.vmem %s10734_s4, %s7118_s6  ;;  %s10747_s4 = sld [smem:[#allocation10_spill]] }
  0x26   : > { %10735 = sst [smem:[#allocation4_spill]] %s8571_s29  ;;  %s10700_s6 = smov 96  }
  0x27   : > { %s10756_s5 = sld [smem:[#allocation11_spill]]  ;;  %s10759_s8 = smov 64  }
  0x28   : > { %s10762_s13 = sld [smem:[#allocation16_spill]]  ;;  %s8394_s2 = smov 122  }
  0x29   : > { %s10763_s14 = sld [smem:[#allocation17_spill]]  ;;  %s10771_s3 = smov 125  }
  0x32   : > { %v8118_v4 = vpop.eup %8117 }
  0x33   : > { %v859_v5 = vadd.f32 1.0, %v8118_v4 }
  0x35   : > { %8119 = vrcp.f32 %v859_v5 }
  0x42   : > { %v8573_v6 = vpop.eup %8119 }
  0x43   : > { %v862_v7 = vmul.f32 4.0, %v8573_v6  ;;  %v1595_v50 = vmul.f32 6.2831855, %v8573_v6 }
  0x45   : > { %v8576_v8 = vadd.f32 -2.0, %v862_v7  ;;  %v8578_v9 = vadd.f32 0.5, %v862_v7 }
  0x47   : > { %v866_v10 = vsel %vm865_vm2, %v8576_v8, %v8578_v9 }
  0x48   : > { %v868_v11 = vsel %vm10690_vm3, %v866_v10, 1.0 }
  0x49   : > { %7497 = vmatmul.mubr.msk.f32.vlgmr.msra.gmra.mxu0 %vm10689_vm4, %v868_v11 }
 0x109   : > { %v8586_v13 = vpop.f32.mrf.mxu0 }
 0x10a   : > { %v948_v14 = vmax.f32 %v8586_v13, 1e-05  ;;  %v949_v18 = vmul.f32 8.0, %v8586_v13  ;;  %vm947_vm10 = vcmp.gt.f32.partialorder %v8586_v13, 1e-05 }
 0x10b   : > { %v7498_v15 = vpop.f32.mrf.mxu0  ;;  %v1025_v42 = vsel %vm947_vm10, 1, %v8374_v12 }
 0x10c   : > { %951 = vrot.lane.b32.xlu0 %v948_v14, %s10696_s26 }
 0x110   : > { %957 = vrot.lane.b32.xlu0 %v948_v14, %s10698_s27 }
 0x17e   : > { %v952_v16 = vpop.permute.xlu0 %951 }
 0x17f   : > { %8121 = vrcp.f32 %v952_v16 }
 0x182   : > { %v958_v17 = vpop.permute.xlu0 %957 }
 0x183   : > { %8123 = vrcp.f32 %v958_v17 }
 0x18c   : > { %v8122_v19 = vpop.eup %8121 }
 0x18d   : > { %v955_v20 = vmul.f32 %v8122_v19, %v949_v18  ;;  %v8382_v19 = vmov 3  }
 0x18f   : > { %v956_v21 = vadd.f32 7.5, %v955_v20 }
 0x190   : > { %v8124_v22 = vpop.eup %8123 }
 0x191   : > { %vm963_vm5 = vcmp.ge.f32.partialorder %v956_v21, 0.0  ;;  %v8592_v23 = vfloor.f32 %v956_v21  ;;  %v961_v24 = vmul.f32 %v8124_v22, %v949_v18  ;;  %vm969_vm6 = vcmp.le.f32.partialorder %v956_v21, 15.0  ;;  %v7911_v22 = vld [vmem:[%s8565_s25 + $0x30] sm:$0xff]  }
 0x192   : > { %v964_v25 = vsel %vm963_vm5, 1, %v8374_v12  ;;  %v970_v30 = vsel %vm969_vm6, 1, %v8374_v12  ;;  %v8381_v18 = vmov 2  }
 0x193   : > { %965 = vrot.lane.b32.xlu1 %v964_v25, %s10694_s28  ;;  %v962_v26 = vadd.f32 7.5, %v961_v24  ;;  %v8597_v27 = vsub.f32 %v956_v21, %v8592_v23  ;;  %v8602_v29 = vadd.f32 1.0, %v8592_v23  ;;  %v1034_v33 = vmax.f32 %v8592_v23, 0.0 }
 0x195   : > { %vm975_vm7 = vcmp.ge.f32.partialorder %v962_v26, 0.0  ;;  %v8599_v28 = vfloor.f32 %v962_v26  ;;  %vm981_vm8 = vcmp.le.f32.partialorder %v962_v26, 15.0  ;;  %v1067_v34 = vmax.f32 %v8602_v29, 0.0 }
 0x196   : > { %v976_v31 = vsel %vm975_vm7, 1, %v8374_v12  ;;  %v982_v35 = vsel %vm981_vm8, 1, %v8374_v12  ;;  %v1035_v40 = vmin.f32 %v1034_v33, 15.0  ;;  %vm1061_vm4 = vcmp.ge.f32.partialorder %v8602_v29, 0.0  ;;  %v8720_v33 = vld [vmem:[%s10746_s10] ss:$0 sm:$0xff] }
 0x197   : > { %971 = vrot.lane.b32.xlu1 %v970_v30, %s10694_s28  ;;  %977 = vrot.lane.b32.xlu0 %v976_v31, %s10692_s9  ;;  %vm1013_vm9 = vcmp.ge.f32.partialorder %v8599_v28, 0.0  ;;  %v8610_v32 = vsub.f32 %v962_v26, %v8599_v28  ;;  %v8620_v37 = vadd.f32 1.0, %v8599_v28  ;;  %v1068_v41 = vmin.f32 %v1067_v34, 15.0  ;;  %s10704_s28 = smov 64  }
 0x198   : > { %v1014_v36 = vsel %vm1013_vm9, 1, %v8374_v12  ;;  %vm1019_vm12 = vcmp.le.f32.partialorder %v8599_v28, 15.0  ;;  %v7800_v43 = vtrunc.f32 %v1035_v40  ;;  %v1030_v59 = vmax.f32 %v8599_v28, 0.0 }
 0x199   : > { %v995_v39 = vsub.f32 1.0, %v8610_v32  ;;  %vm1094_vm11 = vcmp.ge.f32.partialorder %v8620_v37, 0.0  ;;  %v7802_v44 = vtrunc.f32 %v1068_v41  ;;  %v1020_v46 = vsel %vm1019_vm12, 1, %v8374_v12 }
 0x19a   : > { %v1095_v45 = vsel %vm1094_vm11, 1, %v8374_v12  ;;  %v7801_v47 = vcvt.f32.s32 %v7800_v43  ;;  %vm1100_vm13 = vcmp.le.f32.partialorder %v8620_v37, 15.0  ;;  %vm1010_vm12 = vcmp.ge.f32.partialorder %v8592_v23, 0.0 }
 0x19b   : > { %983 = vrot.lane.b32.xlu1 %v982_v35, %s10692_s9  ;;  %1015 = vrot.lane.b32.xlu0 %v1014_v36, %s10698_s27  ;;  %v7803_v48 = vcvt.f32.s32 %v7802_v44  ;;  %v1101_v49 = vsel %vm1100_vm13, 1, %v8374_v12  ;;  %vm1011_vm13 = vcmp.le.f32.partialorder %v8592_v23, 15.0  ;;  %v1031_v1 = vmin.f32 %v1030_v59, 15.0  ;;  %v8726_v36 = vld [vmem:[%s10746_s10 + $0x1] ss:$0 sm:$0xff] }
 0x19c   : > { %v1107_v2 = vmax.f32 %v8620_v37, 0.0  ;;  %v994_v13 = vsub.f32 1.0, %v8597_v27 }
 0x19d   : > { %v7798_v7 = vtrunc.f32 %v1031_v1 }
 0x19e   : > { %v1108_v10 = vmin.f32 %v1107_v2, 15.0  ;;  %v8388_v2 = vmov 2475754826  }
 0x19f   : > { %997 = vrot.lane.b32.xlu0 %v995_v39, %s10698_s27  ;;  %1026 = vrot.lane.b32.xlu1 %v1025_v42, %s10696_s26  ;;  %v8682_v16 = vcvt.f32.s32 %v7798_v7  ;;  %v7909_v7 = vld [vmem:[%s8565_s25 + $0x70] sm:$0xff]   ;;  %s10758_s26 = sld [smem:[#allocation15_spill]] }
 0x1a0   : > { %v7804_v17 = vtrunc.f32 %v1108_v10 }
 0x1a1   : > { %v1033_v23 = vmul.u32 16, %v8682_v16 }
 0x1a2   : > { %v7805_v24 = vcvt.f32.s32 %v7804_v17 }
 0x1a3   : > { %1096 = vrot.lane.b32.xlu0 %v1095_v45, %s10698_s27  ;;  %1021 = vrot.lane.b32.xlu1 %v1020_v46, %s10698_s27 }
 0x1a4   : > { %v1110_v28 = vmul.u32 16, %v7805_v24  ;;  %v7912_v24 = vld [vmem:[%s8565_s25 + $0xb0] sm:$0xff]  }
 0x1a7   : > { %1037 = vrot.lane.b32.xlu0 %v7801_v47, %s10692_s9  ;;  %1070 = vrot.lane.b32.xlu1 %v7803_v48, %s10692_s9  ;;  %s10755_s9 = sld [smem:[#allocation12_spill]] }
 0x1ab   : > { %1102 = vrot.lane.b32.xlu0 %v1101_v49, %s10698_s27 }
 0x1af   : > { %1612 = vperm.xlu0 %7875, %v1595_v50  }
 0x205   : > { %v966_v51 = vpop.permute.xlu1 %965 }
 0x206   : > { %vm967_vm14 = vcmp.ne.s32.totalorder %v966_v51, 0 }
 0x207   : > { %vm968_vm5 = vmand %vm947_vm10, %vm967_vm14  ;;  %vm1062_vm10 = vcmp.le.f32.partialorder %v8602_v29, 15.0 }
 0x209   : > { %v972_v52 = vpop.permute.xlu1 %971  ;;  %v978_v53 = vpop.permute.xlu0 %977 }
 0x20a   : > { %vm973_vm15 = vcmp.ne.s32.totalorder %v972_v52, 0  ;;  %vm979_vm7 = vcmp.ne.s32.totalorder %v978_v53, 0  ;;  %v7905_v52 = vld [vmem:[%s8565_s25 + $0x78] sm:$0xff]  }
 0x20b   : > { %vm974_vm6 = vmand %vm968_vm5, %vm973_vm15  ;;  %v7906_v53 = vld [vmem:[%s8565_s25 + $0xf8] sm:$0xff]   ;;  %7122 = vmatprep.subr.bf16.mxu1 %v7905_v52 }
 0x20c   : > { %vm980_vm9 = vmand %vm974_vm6, %vm979_vm7  ;;  %7144 = vmatprep.subr.bf16.mxu0 %v7906_v53 }
 0x20d   : > { %v984_v54 = vpop.permute.xlu1 %983  ;;  %v1016_v55 = vpop.permute.xlu0 %1015  ;;  %vm8653_vm15 = vmand %vm1010_vm12, %vm1011_vm13 }
 0x20e   : > { %vm985_vm8 = vcmp.ne.s32.totalorder %v984_v54, 0  ;;  %vm1017_vm14 = vcmp.ne.s32.totalorder %v1016_v55, 0  ;;  %vm8657_vm5 = vmand %vm1061_vm4, %vm1062_vm10  ;;  %v8384_v54 = vmov 2102212464  }
 0x20f   : > { %vm986_vm11 = vmand %vm980_vm9, %vm985_vm8 }
 0x210   : > { %v8646_v58 = vsel %vm986_vm11, 1.0, %v8372_v0  ;;  %vm1018_vm7 = vmand %vm8653_vm15, %vm1017_vm14 }
 0x211   : > { %v998_v56 = vpop.permute.xlu0 %997  ;;  %v1027_v57 = vpop.permute.xlu1 %1026  ;;  %1159 = vrot.lane.b32.xlu1 %v8646_v58, %s10691_s30  ;;  %vm1064_vm8 = vmand %vm8657_vm5, %vm1017_vm14  ;;  %s10757_s30 = sld [smem:[#allocation13_spill]] }
 0x212   : > { %v1002_v5 = vmul.f32 %v998_v56, %v8597_v27  ;;  %vm1028_vm4 = vcmp.ne.s32.totalorder %v1027_v57, 0  ;;  %v1000_v15 = vmul.f32 %v998_v56, %v994_v13  ;;  %v8385_v56 = vmov 920167782  }
 0x215   : > { %v1097_v61 = vpop.permute.xlu0 %1096  ;;  %v1022_v62 = vpop.permute.xlu1 %1021  ;;  %1005 = vrot.lane.b32.xlu1 %v8610_v32, %s10698_s27  ;;  %v8383_v32 = vmov 4   ;;  %s10760_s27 = smov 32  }
 0x216   : > { %vm1023_vm6 = vcmp.ne.s32.totalorder %v1022_v62, 0  ;;  %vm1098_vm9 = vcmp.ne.s32.totalorder %v1097_v61, 0 }
 0x217   : > { %vm8668_vm11 = vmand %vm1018_vm7, %vm1023_vm6 }
 0x218   : > { %vm1065_vm12 = vmand %vm1064_vm8, %vm1023_vm6 }
 0x219   : > { %v1038_v4 = vpop.permute.xlu0 %1037  ;;  %1598 = vperm.xlu1 %7876, %v1595_v50   ;;  %vm1066_vm13 = vmand %vm1065_vm12, %vm1028_vm4  ;;  %v8702_v26 = vpop.permute.xlu1 %1070 }
 0x21a   : > { %vm1099_vm10 = vmand %vm8653_vm15, %vm1098_vm9  ;;  %v1080_v11 = vsel %vm1066_vm13, %v1002_v5, 0.0  ;;  %v8700_v25 = vadd.s32 %v1038_v4, %v1033_v23  ;;  %v8707_v29 = vadd.s32 %v1110_v28, %v8702_v26  ;;  %v8710_v30 = vadd.s32 %v1110_v28, %v1038_v4  ;;  %v7907_v4 = vld [vmem:[%s8565_s25 + $0x38] sm:$0xff]  }
 0x21b   : > { %vm1133_vm14 = vmand %vm8657_vm5, %vm1098_vm9  ;;  %1083 = vperm.xlu0 %7875, %v1080_v11   ;;  %v7908_v5 = vld [vmem:[%s8565_s25 + $0xb8] sm:$0xff]   ;;  %7123 = vmatpush3.bf16.msra.mxu1 %v7907_v4 }
 0x21c   : > { %vm1029_vm6 = vmand %vm8668_vm11, %vm1028_vm4  ;;  %v1203_v31 = vadd.s32 256, %v8710_v30  ;;  %7145 = vmatpush3.bf16.msra.mxu0 %v7908_v5  ;;  %7124 = vmatprep.subr.bf16.mxu1 %v7909_v7 }
 0x21d   : > { %v1103_v14 = vpop.permute.xlu0 %1102  ;;  %7877 = vset.pattern.permute.xlu1 %v8381_v18  ;;  %v1047_v20 = vsel %vm1029_vm6, %v1000_v15, 0.0 }
 0x21e   : > { %vm1104_vm7 = vcmp.ne.s32.totalorder %v1103_v14, 0  ;;  %1618 = vperm.xlu1 %7877, %v1595_v50  }
 0x21f   : > { %vm1105_vm8 = vmand %vm1099_vm10, %vm1104_vm7  ;;  %7879 = vset.pattern.permute.xlu0 %v8382_v19  ;;  %7125 = vmatpush3.bf16.msra.mxu1 %v7911_v22 }
 0x220   : > { %vm1134_vm15 = vmand %vm1133_vm14, %vm1104_vm7  ;;  %1172 = vperm.xlu0 %7879, %v1047_v20  }
 0x221   : > { %vm8687_vm5 = vmand %vm1134_vm15, %vm1028_vm4 }
 0x222   : > { %vm8692_vm9 = vmand %vm1105_vm8, %vm1028_vm4  ;;  %7878 = vset.pattern.permute.xlu1 %v8374_v12 }
 0x223   : > { %1050 = vperm.xlu1 %7878, %v1047_v20   ;;  %v7910_v20 = vld [vmem:[%s8565_s25 + $0xf0] sm:$0xff]  }
 0x224   : > { %7883 = vset.pattern.permute.xlu0 %v8379_v38  ;;  %7146 = vmatprep.subr.bf16.mxu0 %v7910_v20 }
 0x225   : > { %1041 = vperm.xlu0 %7883, %v8700_v25   ;;  %7147 = vmatpush3.bf16.msra.mxu0 %v7912_v24  ;;  %v1163_v24 = vadd.s32 256, %v8700_v25 }
 0x227   : > { %7880 = vset.pattern.permute.xlu1 %v8382_v19 }
 0x228   : > { %1192 = vperm.xlu1 %7880, %v1080_v11   ;;  %v8389_v11 = vmov 2131351028  }
 0x229   : > { %1138 = vperm.xlu0 %7883, %v8707_v29  }
 0x22a   : > { %v1613_v34 = vpop.permute.xlu0 %1612 }
 0x22b   : > { %v1615_v35 = vmul.f32 %v8720_v33, %v1613_v34 }
 0x22c   : > { %7881 = vset.pattern.permute.xlu1 %v8374_v12 }
 0x22d   : > { %7886 = vset.pattern.permute.xlu0 %v8383_v32  ;;  %v8729_v37 = vadd.f32 %v8726_v36, %v1615_v35 }
 0x22e   : > { %1205 = vperm.xlu0 %7886, %v1203_v31  }
 0x22f   : > { %v1730_v39 = vand.u32 2139095040, %v8729_v37  ;;  %v1727_v62 = vand.u32 2147483647, %v8729_v37 }
 0x231   : > { %v1731_v40 = vshrl.u32 %v1730_v39, 23  ;;  %v1734_v28 = vand.u32 8388607, %v1727_v62 }
 0x232   : > { %7887 = vset.pattern.permute.xlu0 %v8382_v19 }
 0x233   : > { %v6788_v41 = vadd.s32 4294967169, %v1731_v40 }
 0x235   : > { %v1737_v42 = vadd.s32 1, %v6788_v41 }
 0x237   : > { %vm1738_vm11 = vcmp.gt.s32.totalorder %v1737_v42, 0 }
 0x238   : > { %v1739_v43 = vsel %vm1738_vm11, %v1737_v42, 0 }
 0x239   : > { %v1741_v45 = vand.u32 31, %v1739_v43  ;;  %v8746_v57 = vshrl.u32 %v1739_v43, 5  ;;  %v7913_v43 = vld [vmem:[%s8565_s25 + $0x68] sm:$0xff]  }
 0x23a   : > { %7126 = vmatprep.subr.bf16.mxu1 %v7913_v43 }
 0x23b   : > { %v8735_v49 = vsub.s32 32, %v1741_v45  ;;  %v1753_v55 = vshll.u32 %v8384_v54, %v1741_v45  ;;  %v1756_v59 = vshll.u32 %v8385_v56, %v1741_v45  ;;  %v1744_v1 = vshll.u32 %v8387_v63, %v1741_v45 }
 0x23c   : > { %v1747_v10 = vshll.u32 %v8388_v2, %v1741_v45  ;;  %v1750_v14 = vshll.u32 %v8389_v11, %v1741_v45  ;;  %vm1762_vm4 = vcmp.lt.s32.totalorder %v8746_v57, 4  ;;  %vm1759_vm12 = vcmp.lt.s32.totalorder %v8746_v57, 1  ;;  %v7914_v45 = vld [vmem:[%s8565_s25 + $0xe8] sm:$0xff]  }
 0x23d   : > { %v1757_v61 = vshrl.u32 %v8386_v60, %v8735_v49  ;;  %v1745_v3 = vshrl.u32 %v8388_v2, %v8735_v49  ;;  %v1751_v15 = vshrl.u32 %v8384_v54, %v8735_v49  ;;  %vm1761_vm13 = vcmp.lt.s32.totalorder %v8746_v57, 3  ;;  %7148 = vmatprep.subr.bf16.mxu0 %v7914_v45  ;;  %v7925_v45 = vld [vmem:[%s8565_s25 + $0x50] sm:$0xff]  }
 0x23e   : > { %vm1760_vm10 = vcmp.lt.s32.totalorder %v8746_v57, 2  ;;  %v7932_v57 = vld [vmem:[%s8565_s25 + $0x88] sm:$0xff]  }
 0x23f   : > { %v1758_v21 = vor.u32 %v1757_v61, %v1756_v59  ;;  %v8771_v34 = vor.u32 %v1745_v3, %v1744_v1  ;;  %v1752_v39 = vor.u32 %v1751_v15, %v1750_v14  ;;  %v7919_v14 = vld [vmem:[%s8565_s25 + $0x20] sm:$0xff]  }
 0x241   : > { %v1772_v42 = vsel %vm1762_vm4, %v1758_v21, 1326507024 }
 0x283   : > { %v8732_v44 = vpop.permute.xlu1 %1159 }
 0x284   : > { %v1162_v53 = vadd.f32 %v8646_v58, %v8732_v44 }
 0x287   : > { %v1006_v46 = vpop.permute.xlu1 %1005 }
 0x288   : > { %v1008_v47 = vmul.f32 %v1006_v46, %v994_v13  ;;  %v1009_v48 = vmul.f32 %v1006_v46, %v8597_v27  ;;  %v1754_v27 = vshrl.u32 %v8385_v56, %v8735_v49  ;;  %v1748_v13 = vshrl.u32 %v8389_v11, %v8735_v49  ;;  %v7915_v46 = vld [vmem:[%s8565_s25 + $0x28] sm:$0xff]  }
 0x289   : > { %7127 = vmatpush3.bf16.msra.mxu1 %v7915_v46  ;;  %v7926_v46 = vld [vmem:[%s8565_s25 + $0xd0] sm:$0xff]  }
 0x28a   : > { %v1144_v50 = vsel %vm8687_vm5, %v1009_v48, 0.0  ;;  %v1119_v51 = vsel %vm8692_vm9, %v1008_v47, 0.0  ;;  %v1755_v17 = vor.u32 %v1754_v27, %v1753_v55  ;;  %v8773_v35 = vor.u32 %v1748_v13, %v1747_v10  ;;  %v7917_v10 = vld [vmem:[%s8565_s25 + $0x60] sm:$0xff]  }
 0x28b   : > { %1232 = vperm.xlu0 %7887, %v1144_v50   ;;  %1122 = vperm.xlu1 %7881, %v1119_v51   ;;  %v1735_v47 = vor.u32 8388608, %v1734_v28  ;;  %v7918_v13 = vld [vmem:[%s8565_s25 + $0xe0] sm:$0xff]   ;;  %v1764_v28 = vsel %vm1762_vm4, %v1752_v39, 2102212464 }
 0x28c   : > { %v1768_v40 = vsel %vm1762_vm4, %v1755_v17, 920167782  ;;  %v1771_v59 = vsel %vm1759_vm12, %v8773_v35, %v1752_v39  ;;  %v1773_v61 = vsel %vm1761_vm13, %v1755_v17, %v1772_v42  ;;  %7128 = vmatprep.subr.bf16.mxu1 %v7917_v10  ;;  %v1743_v17 = vshrl.u32 %v8387_v63, %v8735_v49  ;;  %v7923_v49 = vld [vmem:[%s8565_s25 + $0x18] sm:$0xff]  }
 0x28d   : > { %v1769_v52 = vsel %vm1761_vm13, %v1752_v39, %v1768_v40  ;;  %v8807_v58 = vshll.u32 %v1735_v47, 8  ;;  %v1774_v5 = vsel %vm1760_vm10, %v1771_v59, %v1773_v61  ;;  %7129 = vmatpush3.bf16.msra.mxu1 %v7919_v14  ;;  %v7922_v40 = vld [vmem:[%s8565_s25 + $0xd8] sm:$0xff]   ;;  %v1765_v39 = vsel %vm1761_vm13, %v8773_v35, %v1764_v28  ;;  %v7931_v61 = vld [vmem:[%s8565_s25 + $0x8] sm:$0xff]  }
 0x28e   : > { %v7924_v42 = vld [vmem:[%s8565_s25 + $0x98] sm:$0xff]   ;;  %v1763_v25 = vsel %vm1759_vm12, %v1743_v17, %v8771_v34  ;;  %v1223_v59 = vadd.s32 256, %v8707_v29  ;;  %v7935_v29 = vld [vmem:[%s8565_s25] sm:$0xff]  }
 0x28f   : > { %1147 = vperm.xlu1 %7881, %v1144_v50   ;;  %v7916_v50 = vld [vmem:[%s8565_s25 + $0xa8] sm:$0xff]   ;;  %v8832_v20 = vmul.u32.u64.low %v8807_v58, %v1774_v5  ;;  %v8833_v21 = vmul.u32.u64.high %v8807_v58, %v1774_v5, %v8832_v20 }
 0x290   : > { %7149 = vmatpush3.bf16.msra.mxu0 %v7916_v50 }
 0x291   : > { %7150 = vmatprep.subr.bf16.mxu0 %v7918_v13 }
 0x293   : > { %7882 = vset.pattern.permute.xlu1 %v8382_v19 }
 0x294   : > { %1212 = vperm.xlu1 %7882, %v1119_v51   ;;  %v1599_v31 = vpop.permute.xlu1 %1598  ;;  %v1767_v51 = vsel %vm1759_vm12, %v8771_v34, %v8773_v35  ;;  %v1766_v34 = vsel %vm1760_vm10, %v1763_v25, %v1765_v39  ;;  %v7929_v35 = vld [vmem:[%s8565_s25 + $0x48] sm:$0xff]  }
 0x295   : > { %v1605_v41 = vmul.f32 %v8720_v33, %v1599_v31  ;;  %v1770_v3 = vsel %vm1760_vm10, %v1767_v51, %v1769_v52  ;;  %v7921_v31 = vld [vmem:[%s8565_s25 + $0x58] sm:$0xff]   ;;  %v7927_v51 = vld [vmem:[%s8565_s25 + $0x10] sm:$0xff]  }
 0x296   : > { %7130 = vmatprep.subr.bf16.mxu1 %v7921_v31  ;;  %v7928_v52 = vld [vmem:[%s8565_s25 + $0x90] sm:$0xff]  }
 0x297   : > { %v8786_v48 = vadd.f32 %v8726_v36, %v1605_v41  ;;  %7131 = vmatpush3.bf16.msra.mxu1 %v7923_v49 }
 0x298   : > { %7884 = vset.pattern.permute.xlu1 %v8379_v38  ;;  %7132 = vmatprep.subr.bf16.mxu1 %v7925_v45 }
 0x299   : > { %v1626_v55 = vand.u32 2139095040, %v8786_v48  ;;  %1113 = vperm.xlu1 %7884, %v8710_v30   ;;  %v1619_v27 = vpop.permute.xlu1 %1618  ;;  %v1072_v30 = vadd.s32 %v8702_v26, %v1033_v23  ;;  %v7920_v23 = vld [vmem:[%s8565_s25 + $0xa0] sm:$0xff]   ;;  %v8825_v26 = vmul.u32.u64.low %v8807_v58, %v1770_v3  ;;  %v8826_v15 = vmul.u32.u64.high %v8807_v58, %v1770_v3, %v8825_v26 }
 0x29a   : > { %v1621_v1 = vmul.f32 %v8720_v33, %v1619_v27  ;;  %v1243_v33 = vmax.f32 %v1162_v53, 1.0  ;;  %7151 = vmatpush3.bf16.msra.mxu0 %v7920_v23  ;;  %v7934_v3 = vld [vmem:[%s8565_s25 + $0xc0] sm:$0xff]  }
 0x29b   : > { %v1627_v44 = vshrl.u32 %v1626_v55, 23  ;;  %7152 = vmatprep.subr.bf16.mxu0 %v7922_v40  ;;  %v1183_v43 = vadd.s32 256, %v1072_v30  ;;  %v1785_v53 = vadd.s32 1, %v8826_v15  ;;  %v7930_v55 = vld [vmem:[%s8565_s25 + $0xc8] sm:$0xff]   ;;  %vm1784_vm7 = vc.u32 %v8833_v21, %v8825_v26  ;;  %7133 = vmatpush3.bf16.msra.mxu1 %v7927_v51 }
 0x29c   : > { %v8815_v4 = vadd.f32 %v8726_v36, %v1621_v1  ;;  %8125 = vrcp.f32 %v1243_v33  ;;  %7134 = vmatprep.subr.bf16.mxu1 %v7929_v35  ;;  %v1782_v1 = vmul.u32 %v8807_v58, %v1766_v34  ;;  %v1623_v58 = vand.u32 2147483647, %v8786_v48 }
 0x29d   : > { %v6784_v7 = vadd.s32 4294967169, %v1627_v44  ;;  %1074 = vperm.xlu1 %7884, %v1072_v30   ;;  %v7933_v44 = vld [vmem:[%s8565_s25 + $0x40] sm:$0xff]   ;;  %v1786_v5 = vsel %vm1784_vm7, %v1785_v53, %v8826_v15  ;;  %v7937_v15 = vld [vmem:[%s10747_s4 + $0x78] sm:$0xff]  }
 0x29e   : > { %v1834_v16 = vand.u32 2139095040, %v8815_v4  ;;  %7153 = vmatpush3.bf16.msra.mxu0 %v7924_v42  ;;  %v8871_v13 = vadd.s32 %v1786_v5, %v1782_v1  ;;  %v1630_v25 = vand.u32 8388607, %v1623_v58  ;;  %v1831_v39 = vand.u32 2147483647, %v8815_v4 }
 0x29f   : > { %v1633_v36 = vadd.s32 1, %v6784_v7  ;;  %7154 = vmatprep.subr.bf16.mxu0 %v7926_v46  ;;  %7135 = vmatpush3.bf16.msra.mxu1 %v7931_v61  ;;  %v7936_v7 = vld [vmem:[%s8565_s25 + $0x80] sm:$0xff]  }
 0x2a0   : > { %v1835_v22 = vshrl.u32 %v1834_v16, 23  ;;  %7136 = vmatprep.subr.bf16.mxu1 %v7933_v44  ;;  %v1788_v31 = vadd.s32 536870912, %v8871_v13 }
 0x2a1   : > { %7885 = vset.pattern.permute.xlu1 %v8383_v32  ;;  %vm1634_vm14 = vcmp.gt.s32.totalorder %v1633_v36, 0 }
 0x2a2   : > { %v6792_v41 = vadd.s32 4294967169, %v1835_v22  ;;  %1165 = vperm.xlu1 %7885, %v1163_v24   ;;  %v1635_v47 = vsel %vm1634_vm14, %v1633_v36, 0  ;;  %7155 = vmatpush3.bf16.msra.mxu0 %v7928_v52 }
 0x2a3   : > { %v1637_v27 = vand.u32 31, %v1635_v47  ;;  %7156 = vmatprep.subr.bf16.mxu0 %v7930_v55  ;;  %v8875_v16 = vshrl.u32 %v1635_v47, 5  ;;  %7137 = vmatpush3.bf16.msra.mxu1 %v7935_v29  ;;  %v1838_v29 = vand.u32 8388607, %v1831_v39 }
 0x2a4   : > { %v1841_v50 = vadd.s32 1, %v6792_v41  ;;  %7166 = vmatprep.subr.bf16.mxu1 %v7937_v15 }
 0x2a5   : > { %v8867_v33 = vsub.s32 32, %v1637_v27  ;;  %v1640_v23 = vshll.u32 %v8387_v63, %v1637_v27  ;;  %v1649_v17 = vshll.u32 %v8384_v54, %v1637_v27  ;;  %v1652_v24 = vshll.u32 %v8385_v56, %v1637_v27 }
 0x2a6   : > { %1185 = vperm.xlu1 %7885, %v1183_v43   ;;  %vm1842_vm6 = vcmp.gt.s32.totalorder %v1841_v50, 0  ;;  %7157 = vmatpush3.bf16.msra.mxu0 %v7932_v57  ;;  %v1643_v40 = vshll.u32 %v8388_v2, %v1637_v27  ;;  %v1646_v41 = vshll.u32 %v8389_v11, %v1637_v27  ;;  %vm1655_vm8 = vcmp.lt.s32.totalorder %v8875_v16, 1 }
 0x2a7   : > { %v1843_v30 = vsel %vm1842_vm6, %v1841_v50, 0  ;;  %7158 = vmatprep.subr.bf16.mxu0 %v7934_v3  ;;  %v1641_v36 = vshrl.u32 %v8388_v2, %v8867_v33  ;;  %v1650_v20 = vshrl.u32 %v8385_v56, %v8867_v33  ;;  %v1653_v28 = vshrl.u32 %v8386_v60, %v8867_v33 }
 0x2a8   : > { %v1845_v10 = vand.u32 31, %v1843_v30  ;;  %v1644_v49 = vshrl.u32 %v8389_v11, %v8867_v33  ;;  %v1647_v42 = vshrl.u32 %v8384_v54, %v8867_v33  ;;  %vm1658_vm15 = vcmp.lt.s32.totalorder %v8875_v16, 4 }
 0x2a9   : > { %v8126_v14 = vpop.eup %8125  ;;  %v1642_v43 = vor.u32 %v1641_v36, %v1640_v23  ;;  %v1651_v45 = vor.u32 %v1650_v20, %v1649_v17  ;;  %v1654_v50 = vor.u32 %v1653_v28, %v1652_v24  ;;  %v8907_v51 = vshrl.u32 %v1843_v30, 5 }
 0x2aa   : > { %1225 = vperm.xlu1 %7885, %v1223_v59   ;;  %v8886_v22 = vsub.s32 32, %v1845_v10  ;;  %7159 = vmatpush3.bf16.msra.mxu0 %v7936_v7  ;;  %v1857_v46 = vshll.u32 %v8384_v54, %v1845_v10  ;;  %v1860_v52 = vshll.u32 %v8385_v56, %v1845_v10  ;;  %v1645_v53 = vor.u32 %v1644_v49, %v1643_v40 }
 0x2ab   : > { %7499 = vmatprep.subr.bf16.mxu0 %v8372_v0  ;;  %v1648_v35 = vor.u32 %v1647_v42, %v1646_v41  ;;  %v1848_v55 = vshll.u32 %v8387_v63, %v1845_v10  ;;  %v1851_v27 = vshll.u32 %v8388_v2, %v1845_v10  ;;  %v1854_v57 = vshll.u32 %v8389_v11, %v1845_v10 }
 0x2ac   : > { %v1858_v47 = vshrl.u32 %v8385_v56, %v8886_v22  ;;  %v1861_v34 = vshrl.u32 %v8386_v60, %v8886_v22  ;;  %v1849_v59 = vshrl.u32 %v8388_v2, %v8886_v22  ;;  %v1852_v61 = vshrl.u32 %v8389_v11, %v8886_v22 }
 0x2ad   : > { %v1855_v1 = vshrl.u32 %v8384_v54, %v8886_v22  ;;  %v1631_v30 = vor.u32 8388608, %v1630_v25  ;;  %vm1657_vm5 = vcmp.lt.s32.totalorder %v8875_v16, 3  ;;  %v1664_v44 = vsel %vm1658_vm15, %v1651_v45, 920167782 }
 0x2ae   : > { %7888 = vset.pattern.permute.xlu1 %v8381_v18  ;;  %v1859_v3 = vor.u32 %v1858_v47, %v1857_v46  ;;  %v1668_v5 = vsel %vm1658_vm15, %v1654_v50, 1326507024  ;;  %v1862_v7 = vor.u32 %v1861_v34, %v1860_v52  ;;  %vm1866_vm9 = vcmp.lt.s32.totalorder %v8907_v51, 4 }
 0x2af   : > { %1248 = vperm.xlu1 %7888, %v8126_v14   ;;  %vm1656_vm11 = vcmp.lt.s32.totalorder %v8875_v16, 2  ;;  %v1663_v10 = vsel %vm1655_vm8, %v1642_v43, %v1645_v53  ;;  %v1667_v14 = vsel %vm1655_vm8, %v1645_v53, %v1648_v35  ;;  %v8934_v23 = vshrl.u32 %v1788_v31, 30 }
 0x2b0   : > { %v1665_v15 = vsel %vm1657_vm5, %v1648_v35, %v1664_v44  ;;  %v1850_v36 = vor.u32 %v1849_v59, %v1848_v55  ;;  %v1853_v17 = vor.u32 %v1852_v61, %v1851_v27  ;;  %v1856_v20 = vor.u32 %v1855_v1, %v1854_v57 }
 0x2b1   : > { %v1669_v24 = vsel %vm1657_vm5, %v1651_v45, %v1668_v5  ;;  %vm1863_vm4 = vcmp.lt.s32.totalorder %v8907_v51, 1  ;;  %vm1865_vm12 = vcmp.lt.s32.totalorder %v8907_v51, 3  ;;  %v1872_v28 = vsel %vm1866_vm9, %v1859_v3, 920167782 }
 0x2b2   : > { %v1671_v40 = vshll.u32 %v1631_v30, 8  ;;  %v1839_v49 = vor.u32 8388608, %v1838_v29  ;;  %v1876_v31 = vsel %vm1866_vm9, %v1862_v7, 1326507024  ;;  %v1666_v41 = vsel %vm1656_vm11, %v1663_v10, %v1665_v15 }
 0x2b3   : > { %v1790_v42 = vshll.u32 %v8934_v23, 30  ;;  %v1670_v25 = vsel %vm1656_vm11, %v1667_v14, %v1669_v24  ;;  %vm1864_vm13 = vcmp.lt.s32.totalorder %v8907_v51, 2  ;;  %v1871_v45 = vsel %vm1863_vm4, %v1850_v36, %v1853_v17 }
 0x2b4   : > { %v1873_v46 = vsel %vm1865_vm12, %v1856_v20, %v1872_v28  ;;  %v1875_v47 = vsel %vm1863_vm4, %v1853_v17, %v1856_v20  ;;  %v1877_v50 = vsel %vm1865_vm12, %v1859_v3, %v1876_v31  ;;  %v1639_v52 = vshrl.u32 %v8387_v63, %v8867_v33 }
 0x2b5   : > { %v8962_v34 = vmul.u32.u64.low %v1671_v40, %v1666_v41  ;;  %v8963_v55 = vmul.u32.u64.high %v1671_v40, %v1666_v41, %v8962_v34  ;;  %v1879_v27 = vshll.u32 %v1839_v49, 8  ;;  %v1874_v57 = vsel %vm1864_vm13, %v1871_v45, %v1873_v46 }
 0x2b6   : > { %v8966_v59 = vmul.u32.u64.low %v1671_v40, %v1670_v25  ;;  %v8967_v61 = vmul.u32.u64.high %v1671_v40, %v1670_v25, %v8966_v59  ;;  %v1660_v1 = vsel %vm1658_vm15, %v1648_v35, 2102212464  ;;  %v1878_v30 = vsel %vm1864_vm13, %v1875_v47, %v1877_v50 }
 0x2b7   : > { %v1791_v44 = vsub.s32 %v8871_v13, %v1790_v42  ;;  %v1659_v33 = vsel %vm1655_vm8, %v1639_v52, %v1642_v43  ;;  %v8978_v3 = vmul.u32.u64.low %v1879_v27, %v1874_v57  ;;  %v8979_v5 = vmul.u32.u64.high %v1879_v27, %v1874_v57, %v8978_v3 }
 0x2b8   : > { %v1661_v29 = vsel %vm1657_vm5, %v1645_v53, %v1660_v1  ;;  %v1847_v7 = vshrl.u32 %v8387_v63, %v8886_v22  ;;  %v8986_v10 = vmul.u32.u64.low %v1879_v27, %v1878_v30  ;;  %v8987_v35 = vmul.u32.u64.high %v1879_v27, %v1878_v30, %v8986_v10 }
 0x2b9   : > { %v1868_v14 = vsel %vm1866_vm9, %v1856_v20, 2102212464  ;;  %v1793_v13 = vsub.s32 0, %v1791_v44  ;;  %v1662_v43 = vsel %vm1656_vm11, %v1659_v33, %v1661_v29  ;;  %v1681_v15 = vadd.s32 1, %v8963_v55 }
 0x2ba   : > { %vm1680_vm10 = vc.u32 %v8967_v61, %v8962_v34  ;;  %v1867_v53 = vsel %vm1863_vm4, %v1847_v7, %v1850_v36  ;;  %v1869_v22 = vsel %vm1865_vm12, %v1853_v17, %v1868_v14  ;;  %v1678_v28 = vmul.u32 %v1671_v40, %v1662_v43 }
 0x2bb   : > { %v6789_v24 = vmin.u32 %v1793_v13, %v1791_v44  ;;  %v1682_v49 = vsel %vm1680_vm10, %v1681_v15, %v8963_v55  ;;  %v1870_v20 = vsel %vm1864_vm13, %v1867_v53, %v1869_v22  ;;  %v1889_v16 = vadd.s32 1, %v8979_v5 }
 0x2bc   : > { %vm1888_vm14 = vc.u32 %v8987_v35, %v8978_v3  ;;  %v1683_v41 = vadd.s32 %v1682_v49, %v1678_v28  ;;  %v1886_v42 = vmul.u32 %v1879_v27, %v1870_v20  ;;  %v1783_v27 = vadd.s32 %v8825_v26, %v8833_v21 }
 0x2bd   : > { %v1795_v31 = vclz %v6789_v24  ;;  %v1890_v36 = vsel %vm1888_vm14, %v1889_v16, %v8979_v5  ;;  %vm1729_vm8 = vcmp.lt.s32.totalorder %v8729_v37, 0  ;;  %vm9018_vm5 = vcmp.le.f32.partialorder %v1727_v62, 0.7853982 }
 0x2be   : > { %v1684_v45 = vadd.s32 536870912, %v1683_v41  ;;  %v1891_v17 = vadd.s32 %v1890_v36, %v1886_v42  ;;  %v9024_v36 = vpop.permute.xlu1 %1050  ;;  %vm1625_vm14 = vcmp.lt.s32.totalorder %v8786_v48, 0 }
 0x2bf   : > { %v6790_v25 = vadd.s32 4294967294, %v1795_v31 }
 0x2c0   : > { %v9007_v40 = vshrl.u32 %v1684_v45, 30  ;;  %v1892_v46 = vadd.s32 536870912, %v1891_v17  ;;  %v9029_v45 = vpop.permute.xlu0 %1083 }
 0x2c1   : > { %vm6791_vm7 = vcmp.lt.s32.totalorder %v6790_v25, 0 }
 0x2c2   : > { %v1798_v47 = vsel %vm6791_vm7, 0, %v6790_v25  ;;  %v1686_v51 = vshll.u32 %v9007_v40, 30  ;;  %v9010_v50 = vshrl.u32 %v1892_v46, 30  ;;  %v1813_v46 = vsub.s32 4, %v8934_v23 }
 0x2c3   : > { %v1803_v52 = vsub.s32 4294967266, %v1798_v47  ;;  %v1799_v57 = vsub.s32 32, %v1798_v47  ;;  %v1800_v5 = vshll.u32 %v1791_v44, %v1798_v47 }
 0x2c4   : > { %v1687_v55 = vsub.s32 %v1683_v41, %v1686_v51  ;;  %v1894_v59 = vshll.u32 %v9010_v50, 30 }
 0x2c5   : > { %v1804_v1 = vadd.s32 127, %v1803_v52  ;;  %v1801_v29 = vshrl.u32 %v1783_v27, %v1799_v57  ;;  %v1814_v27 = vsel %vm1729_vm8, %v1813_v46, %v8934_v23 }
 0x2c6   : > { %v1689_v30 = vsub.s32 0, %v1687_v55  ;;  %v1895_v33 = vsub.s32 %v1891_v17, %v1894_v59  ;;  %v1679_v17 = vadd.s32 %v8962_v34, %v8967_v61  ;;  %v9039_v34 = vpop.permute.xlu1 %1192  ;;  %v9041_v61 = vpop.permute.xlu0 %1172 }
 0x2c7   : > { %v1805_v7 = vshll.u32 %v1804_v1, 23  ;;  %v1802_v13 = vor.u32 %v1801_v29, %v1800_v5  ;;  %v1887_v1 = vadd.s32 %v8978_v3, %v8987_v35 }
 0x2c8   : > { %v6785_v10 = vmin.u32 %v1689_v30, %v1687_v55  ;;  %v1897_v14 = vsub.s32 0, %v1895_v33 }
 0x2c9   : > { %v1806_v43 = vor.u32 4788187, %v1805_v7  ;;  %v1809_v24 = vcvt.s32.f32 %v1802_v13  ;;  %v850_v7 = vlaneseq }
 0x2ca   : > { %v1691_v15 = vclz %v6785_v10  ;;  %v6793_v53 = vmin.u32 %v1897_v14, %v1895_v33  ;;  %v1042_v3 = vpop.permute.xlu0 %1041 }
 0x2cb   : > { %v1807_v22 = vand.u32 2147483647, %v1806_v43 }
 0x2cc   : > { %v6786_v28 = vadd.s32 4294967294, %v1691_v15  ;;  %v1899_v49 = vclz %v6793_v53  ;;  %v9047_v15 = vand.u32 127, %v850_v7 }
 0x2cd   : > { %v1810_v20 = vmul.f32 %v1809_v24, %v1807_v22 }
 0x2ce   : > { %vm6787_vm6 = vcmp.lt.s32.totalorder %v6786_v28, 0  ;;  %v6794_v26 = vadd.s32 4294967294, %v1899_v49  ;;  %vm1043_vm9 = vcmp.eq.s32.totalorder %v9047_v15, %v1042_v3 }
 0x2cf   : > { %v1811_v21 = vxor.u32 2147483648, %v1810_v20  ;;  %v1694_v16 = vsel %vm6787_vm6, 0, %v6786_v28 }
 0x2d0   : > { %vm6795_vm15 = vcmp.lt.s32.totalorder %v6794_v26, 0  ;;  %v1699_v41 = vsub.s32 4294967266, %v1694_v16  ;;  %v1695_v62 = vsub.s32 32, %v1694_v16  ;;  %v1696_v52 = vshll.u32 %v1687_v55, %v1694_v16 }
 0x2d1   : > { %v1812_v31 = vsel %vm1729_vm8, %v1811_v21, %v1810_v20  ;;  %v1902_v42 = vsel %vm6795_vm15, 0, %v6794_v26  ;;  %v1816_v55 = vsel %vm9018_vm5, 0, %v1814_v27  ;;  %v9050_v21 = vadd.s32 128, %v9047_v15 }
 0x2d2   : > { %v1815_v25 = vsel %vm9018_vm5, %v8729_v37, %v1812_v31  ;;  %v1700_v47 = vadd.s32 127, %v1699_v41  ;;  %v1907_v51 = vsub.s32 4294967266, %v1902_v42  ;;  %v1697_v59 = vshrl.u32 %v1679_v17, %v1695_v62 }
 0x2d3   : > { %8127 = vcosq.f32 %v1815_v25  ;;  %v1903_v30 = vsub.s32 32, %v1902_v42  ;;  %v1904_v14 = vshll.u32 %v1895_v33, %v1902_v42  ;;  %v1820_v35 = vadd.s32 3, %v1816_v55 }
 0x2d4   : > { %8129 = vsinq.f32 %v1815_v25  ;;  %v1701_v57 = vshll.u32 %v1700_v47, 23  ;;  %v1908_v5 = vadd.s32 127, %v1907_v51  ;;  %v1698_v29 = vor.u32 %v1697_v59, %v1696_v52  ;;  %v1139_v25 = vpop.permute.xlu0 %1138 }
 0x2d5   : > { %v1905_v13 = vshrl.u32 %v1887_v1, %v1903_v30  ;;  %v9053_v33 = vadd.s32 256, %v9047_v15  ;;  %v9055_v16 = vand.u32 3, %v1820_v35  ;;  %v9058_v42 = vadd.s32 384, %v9047_v15 }
 0x2d6   : > { %v1702_v10 = vor.u32 4788187, %v1701_v57  ;;  %v1909_v43 = vshll.u32 %v1908_v5, 23  ;;  %v1705_v22 = vcvt.s32.f32 %v1698_v29  ;;  %vm1044_vm11 = vcmp.eq.s32.totalorder %v9050_v21, %v1042_v3 }
 0x2d7   : > { %v1906_v24 = vor.u32 %v1905_v13, %v1904_v14  ;;  %vm1823_vm4 = vcmp.eq.s32.totalorder %v9055_v16, 0  ;;  %vm1826_vm12 = vcmp.eq.s32.totalorder %v9055_v16, 2  ;;  %vm1045_vm13 = vcmp.eq.s32.totalorder %v9053_v33, %v1042_v3 }
 0x2d8   : > { %v1703_v53 = vand.u32 2147483647, %v1702_v10  ;;  %v1910_v28 = vor.u32 4788187, %v1909_v43  ;;  %vm1046_vm10 = vcmp.eq.s32.totalorder %v9058_v42, %v1042_v3  ;;  %v1053_v52 = vsel %vm1043_vm9, %v9024_v36, 0.0  ;;  %v9081_v29 = vpop.permute.xlu0 %1205 }
 0x2d9   : > { %v1913_v41 = vcvt.s32.f32 %v1906_v24  ;;  %v1054_v59 = vsel %vm1044_vm11, %v9024_v36, 0.0  ;;  %v1055_v30 = vsel %vm1045_vm13, %v9024_v36, 0.0  ;;  %v1056_v5 = vsel %vm1046_vm10, %v9024_v36, 0.0 }
 0x2da   : > { %v1706_v44 = vmul.f32 %v1705_v22, %v1703_v53  ;;  %v1911_v31 = vand.u32 2147483647, %v1910_v28  ;;  %vm1140_vm7 = vcmp.eq.s32.totalorder %v9047_v15, %v1139_v25  ;;  %vm1141_vm6 = vcmp.eq.s32.totalorder %v9050_v21, %v1139_v25 }
 0x2db   : > { %vm1142_vm8 = vcmp.eq.s32.totalorder %v9053_v33, %v1139_v25  ;;  %vm1143_vm15 = vcmp.eq.s32.totalorder %v9058_v42, %v1139_v25  ;;  %vm1207_vm5 = vcmp.eq.s32.totalorder %v9047_v15, %v9081_v29 }
 0x2dc   : > { %v1707_v47 = vxor.u32 2147483648, %v1706_v44  ;;  %v9066_v51 = vmul.f32 %v1913_v41, %v1911_v31 }
 0x2de   : > { %v9085_v7 = vsel %vm1625_vm14, %v1707_v47, %v1706_v44  ;;  %v1915_v55 = vxor.u32 2147483648, %v9066_v51 }
 0x2e0   : > { %v8128_v20 = vpop.eup %8127 }
 0x2e1   : > { %v8130_v26 = vpop.eup %8129  ;;  %v1827_v46 = vxor.u32 2147483648, %v8128_v20 }
 0x2e2   : > { %v1824_v62 = vxor.u32 2147483648, %v8130_v26 }
 0x2e3   : > { %v9075_v1 = vsel %vm1826_vm12, %v1827_v46, %v8130_v26 }
 0x2e4   : > { %v9073_v57 = vsel %vm1823_vm4, %v8128_v20, %v1824_v62 }
 0x306   : > { %v9045_v23 = vpop.permute.xlu1 %1122 }
 0x30a   : > { %v1148_v49 = vpop.permute.xlu1 %1147 }
 0x30b   : > { %v1150_v10 = vsel %vm1140_vm7, %v1148_v49, 0.0  ;;  %v1151_v14 = vsel %vm1141_vm6, %v1148_v49, 0.0  ;;  %v1152_v13 = vsel %vm1142_vm8, %v1148_v49, 0.0  ;;  %v1153_v36 = vsel %vm1143_vm15, %v1148_v49, 0.0 }
 0x30c   : > { %vm1209_vm8 = vcmp.eq.s32.totalorder %v9053_v33, %v9081_v29  ;;  %vm1210_vm15 = vcmp.eq.s32.totalorder %v9058_v42, %v9081_v29 }
 0x30f   : > { %v9060_v17 = vpop.permute.xlu1 %1212 }
 0x314   : > { %v1114_v27 = vpop.permute.xlu1 %1113 }
 0x315   : > { %vm1115_vm9 = vcmp.eq.s32.totalorder %v9047_v15, %v1114_v27  ;;  %vm1116_vm11 = vcmp.eq.s32.totalorder %v9050_v21, %v1114_v27  ;;  %vm1117_vm4 = vcmp.eq.s32.totalorder %v9053_v33, %v1114_v27  ;;  %vm1118_vm12 = vcmp.eq.s32.totalorder %v9058_v42, %v1114_v27 }
 0x316   : > { %v1125_v26 = vsel %vm1115_vm9, %v9045_v23, 0.0  ;;  %v1126_v44 = vsel %vm1116_vm11, %v9045_v23, 0.0  ;;  %v1128_v31 = vsel %vm1118_vm12, %v9045_v23, 0.0  ;;  %vm1833_vm12 = vcmp.lt.s32.totalorder %v8815_v4, 0 }
 0x318   : > { %v1075_v43 = vpop.permute.xlu1 %1074 }
 0x319   : > { %vm1076_vm13 = vcmp.eq.s32.totalorder %v9047_v15, %v1075_v43  ;;  %vm1077_vm10 = vcmp.eq.s32.totalorder %v9050_v21, %v1075_v43  ;;  %vm1078_vm7 = vcmp.eq.s32.totalorder %v9053_v33, %v1075_v43  ;;  %vm1079_vm6 = vcmp.eq.s32.totalorder %v9058_v42, %v1075_v43 }
 0x31a   : > { %v1086_v3 = vsel %vm1076_vm13, %v9029_v45, 0.0  ;;  %v1087_v35 = vsel %vm1077_vm10, %v9029_v45, 0.0  ;;  %v1088_v53 = vsel %vm1078_vm7, %v9029_v45, 0.0  ;;  %v1089_v22 = vsel %vm1079_vm6, %v9029_v45, 0.0 }
 0x31b   : > { %v1090_v24 = vadd.f32 %v1086_v3, %v1053_v52  ;;  %v1091_v28 = vadd.f32 %v1087_v35, %v1054_v59  ;;  %v1092_v49 = vadd.f32 %v1088_v53, %v1055_v30  ;;  %v1093_v20 = vadd.f32 %v1089_v22, %v1056_v5  ;;  %v7949_v30 = vld [vmem:[%s10747_s4 + $0x58] sm:$0xff]  }
 0x31c   : > { %v1127_v45 = vsel %vm1117_vm4, %v9045_v23, 0.0  ;;  %vm1208_vm13 = vcmp.eq.s32.totalorder %v9050_v21, %v9081_v29  ;;  %vm1822_vm7 = vcmp.lt.s32.totalorder %v9055_v16, 2  ;;  %vm9131_vm6 = vcmp.le.f32.partialorder %v1623_v58, 0.7853982 }
 0x31d   : > { %v1129_v41 = vadd.f32 %v1125_v26, %v1090_v24  ;;  %v1131_v25 = vadd.f32 %v1127_v45, %v1092_v49  ;;  %v1132_v62 = vadd.f32 %v1128_v31, %v1093_v20  ;;  %v1166_v46 = vpop.permute.xlu1 %1165  ;;  %v1130_v47 = vadd.f32 %v1126_v44, %v1091_v28 }
 0x31e   : > { %vm1167_vm9 = vcmp.eq.s32.totalorder %v9047_v15, %v1166_v46  ;;  %vm1168_vm11 = vcmp.eq.s32.totalorder %v9050_v21, %v1166_v46  ;;  %vm1169_vm10 = vcmp.eq.s32.totalorder %v9053_v33, %v1166_v46  ;;  %vm1170_vm4 = vcmp.eq.s32.totalorder %v9058_v42, %v1166_v46 }
 0x31f   : > { %v1154_v23 = vadd.f32 %v1150_v10, %v1129_v41  ;;  %v1156_v52 = vadd.f32 %v1152_v13, %v1131_v25  ;;  %v1157_v59 = vadd.f32 %v1153_v36, %v1132_v62  ;;  %v1175_v27 = vsel %vm1167_vm9, %v9041_v61, 0.0 }
 0x320   : > { %v1177_v5 = vsel %vm1169_vm10, %v9041_v61, 0.0  ;;  %v1178_v43 = vsel %vm1170_vm4, %v9041_v61, 0.0  ;;  %v1155_v3 = vadd.f32 %v1151_v14, %v1130_v47  ;;  %v1176_v35 = vsel %vm1168_vm11, %v9041_v61, 0.0 }
 0x321   : > { %v1215_v10 = vsel %vm1207_vm5, %v9060_v17, 0.0  ;;  %v1179_v13 = vadd.f32 %v1175_v27, %v1154_v23  ;;  %v1181_v36 = vadd.f32 %v1177_v5, %v1156_v52  ;;  %v1182_v53 = vadd.f32 %v1178_v43, %v1157_v59  ;;  %v1186_v22 = vpop.permute.xlu1 %1185 }
 0x322   : > { %vm1187_vm9 = vcmp.eq.s32.totalorder %v9047_v15, %v1186_v22  ;;  %vm1189_vm3 = vcmp.eq.s32.totalorder %v9053_v33, %v1186_v22  ;;  %vm1190_vm10 = vcmp.eq.s32.totalorder %v9058_v42, %v1186_v22  ;;  %v1180_v58 = vadd.f32 %v1176_v35, %v1155_v3 }
 0x323   : > { %v1195_v14 = vsel %vm1187_vm9, %v9039_v34, 0.0  ;;  %v1197_v61 = vsel %vm1189_vm3, %v9039_v34, 0.0  ;;  %v1198_v24 = vsel %vm1190_vm10, %v9039_v34, 0.0  ;;  %vm1188_vm11 = vcmp.eq.s32.totalorder %v9050_v21, %v1186_v22 }
 0x324   : > { %v1201_v28 = vadd.f32 %v1197_v61, %v1181_v36  ;;  %v1196_v49 = vsel %vm1188_vm11, %v9039_v34, 0.0  ;;  %v1202_v20 = vadd.f32 %v1198_v24, %v1182_v53  ;;  %v1199_v26 = vadd.f32 %v1195_v14, %v1179_v13  ;;  %v1233_v34 = vpop.permute.xlu0 %1232 }
 0x325   : > { %v1217_v44 = vsel %vm1209_vm8, %v9060_v17, 0.0  ;;  %v1218_v45 = vsel %vm1210_vm15, %v9060_v17, 0.0  ;;  %v1226_v31 = vpop.permute.xlu1 %1225  ;;  %v1200_v41 = vadd.f32 %v1196_v49, %v1180_v58  ;;  %v1216_v25 = vsel %vm1208_vm13, %v9060_v17, 0.0 }
 0x326   : > { %vm1229_vm3 = vcmp.eq.s32.totalorder %v9053_v33, %v1226_v31  ;;  %vm1228_vm5 = vcmp.eq.s32.totalorder %v9050_v21, %v1226_v31  ;;  %v1222_v62 = vadd.f32 %v1218_v45, %v1202_v20  ;;  %vm1230_vm8 = vcmp.eq.s32.totalorder %v9058_v42, %v1226_v31  ;;  %v7943_v45 = vld [vmem:[%s10747_s4 + $0x68] sm:$0xff]  }
 0x327   : > { %v1237_v46 = vsel %vm1229_vm3, %v1233_v34, 0.0  ;;  %v1220_v47 = vadd.f32 %v1216_v25, %v1200_v41  ;;  %v1236_v23 = vsel %vm1228_vm5, %v1233_v34, 0.0  ;;  %v1238_v52 = vsel %vm1230_vm8, %v1233_v34, 0.0  ;;  %v7944_v25 = vld [vmem:[%s10747_s4 + $0x28] sm:$0xff]  }
 0x328   : > { %v1242_v59 = vadd.f32 %v1238_v52, %v1222_v62  ;;  %v1219_v27 = vadd.f32 %v1215_v10, %v1199_v26  ;;  %vm1227_vm15 = vcmp.eq.s32.totalorder %v9047_v15, %v1226_v31  ;;  %v1221_v5 = vadd.f32 %v1217_v44, %v1201_v28  ;;  %v7940_v28 = vld [vmem:[%s10747_s4 + $0x70] sm:$0xff]  }
 0x329   : > { %v1240_v43 = vadd.f32 %v1236_v23, %v1220_v47  ;;  %v1235_v29 = vsel %vm1227_vm15, %v1233_v34, 0.0  ;;  %vm1819_vm13 = vweird.f32 %v8729_v37  ;;  %v1829_v17 = vsel %vm1822_vm7, %v9073_v57, %v9075_v1  ;;  %v7941_v37 = vld [vmem:[%s10747_s4 + $0x30] sm:$0xff]   ;;  %v7945_v34 = vld [vmem:[%s10747_s4 + $0xa8] sm:$0xff]   ;;  %v7948_v47 = vld [vmem:[%s10747_s4 + $0xa0] sm:$0xff]  }
 0x32a   : > { %vm9173_vm4 = vcmp.le.f32.partialorder %v1831_v39, 0.7853982  ;;  %v1916_v35 = vsel %vm1833_vm12, %v1915_v55, %v9066_v51  ;;  %v1249_v10 = vpop.permute.xlu1 %1248  ;;  %v1239_v13 = vadd.f32 %v1235_v29, %v1219_v27  ;;  %v1241_v36 = vadd.f32 %v1237_v46, %v1221_v5  ;;  %v7938_v51 = vld [vmem:[%s10747_s4 + $0x38] sm:$0xff]   ;;  %v7942_v44 = vld [vmem:[%s10747_s4 + $0xb0] sm:$0xff]   ;;  %v7947_v46 = vld [vmem:[%s10747_s4 + $0x20] sm:$0xff]  }
 0x32b   : > { %v1711_v16 = vsel %vm9131_vm6, %v8786_v48, %v9085_v7  ;;  %v1252_v57 = vmul.f32 %v1249_v10, %v1240_v43  ;;  %v1254_v1 = vmul.f32 %v1249_v10, %v1242_v59  ;;  %v1919_v22 = vsel %vm9173_vm4, %v8815_v4, %v1916_v35  ;;  %v7939_v55 = vld [vmem:[%s10747_s4 + $0xb8] sm:$0xff]   ;;  %v7952_v35 = vld [vmem:[%s10747_s4 + $0x50] sm:$0xff]  }
 0x32c   : > { %v1251_v39 = vmul.f32 %v1249_v10, %v1239_v13  ;;  %v1253_v53 = vmul.f32 %v1249_v10, %v1241_v36  ;;  %v1830_v7 = vsel %vm1819_vm13, nan, %v1829_v17  ;;  %8131 = vcosq.f32 %v1711_v16  ;;  %v7950_v43 = vld [vmem:[%s10747_s4 + $0x18] sm:$0xff]   ;;  %v7953_v36 = vld [vmem:[%s10747_s4 + $0x10] sm:$0xff]  }
 0x32d   : > { %v1256_v58 = vpack.c.bf16 %v1252_v57, %v1252_v57  ;;  %v1258_v14 = vpack.c.bf16 %v1254_v1, %v1254_v1  ;;  %8133 = vsinq.f32 %v1711_v16  ;;  %v1709_v49 = vsub.s32 4, %v9007_v40  ;;  %v7951_v29 = vld [vmem:[%s10747_s4 + $0x98] sm:$0xff]   ;;  %v7954_v16 = vld [vmem:[%s10747_s4 + $0x90] sm:$0xff]  }
 0x32e   : > { %v1255_v61 = vpack.c.bf16 %v1251_v39, %v1251_v39  ;;  %v1257_v24 = vpack.c.bf16 %v1253_v53, %v1253_v53  ;;  %8135 = vcosq.f32 %v1919_v22  ;;  %v1936_v20 = vpack.c.bf16 %v1830_v7, %v1830_v7  ;;  %v7955_v53 = vld [vmem:[%s10747_s4 + $0x48] sm:$0xff]  }
 0x32f   : > { %1547 = vmatprep.mubr.bf16.mxu1 %v1256_v58  ;;  %1587 = vmatprep.mubr.bf16.mxu0 %v1258_v14  ;;  %v1917_v26 = vsub.s32 4, %v9010_v50  ;;  %8137 = vsinq.f32 %v1919_v22  ;;  %v1710_v31 = vsel %vm1625_vm14, %v1709_v49, %v9007_v40  ;;  %v7946_v40 = vld [vmem:[%s10747_s4 + $0x60] sm:$0xff]   ;;  %v7956_v58 = vld [vmem:[%s10747_s4 + $0x8] sm:$0xff]   ;;  %vm1715_vm11 = vweird.f32 %v8786_v48 }
 0x330   : > { %1548 = vmatmul.mubr.bf16.vlgmr.msra.gmra.mxu1 %v1255_v61  ;;  %1588 = vmatmul.mubr.bf16.vlgmr.msra.gmra.mxu0 %v1257_v24  ;;  %v7957_v14 = vld [vmem:[%s10747_s4 + $0x88] sm:$0xff]   ;;  %v7958_v61 = vld [vmem:[%s10747_s4 + $0x40] sm:$0xff]   ;;  %vm1923_vm3 = vweird.f32 %v8815_v4  ;;  %vm10713_vm5 = vcmask 261120   ;;  %vm10712_vm8 = vcmask 64512   ;;  %vm10711_vm15 = vcmask 523264  }
 0x331   : > { %7167 = vmatpush3.bf16.msra.mxu1 %v7938_v51  ;;  %7500 = vmatpush3.bf16.msra.mxu0 %v7939_v55  ;;  %v1918_v41 = vsel %vm1833_vm12, %v1917_v26, %v9010_v50  ;;  %v1712_v50 = vsel %vm9131_vm6, 0, %v1710_v31  ;;  %v7959_v49 = vld [vmem:[%s10747_s4] sm:$0xff]   ;;  %v7963_v31 = vld [vmem:[%s10755_s9 + $0x8] sm:$0xff]   ;;  %vm10710_vm13 = vcmask 785408  }
 0x332   : > { %2169 = vmatprep.mubr.bf16.mxu1 %v1936_v20  ;;  %7168 = vmatprep.subr.bf16.mxu1 %v7940_v28  ;;  %v1920_v62 = vsel %vm9173_vm4, 0, %v1918_v41  ;;  %v1716_v23 = vadd.s32 3, %v1712_v50  ;;  %v7960_v20 = vld [vmem:[%s10747_s4 + $0x80] sm:$0xff]   ;;  %vm10765_vm4 = vcmask 23552  }
 0x333   : > { %7501 = vmatprep.subr.bf16.mxu0 %v8372_v0  ;;  %7515 = vmatprep.mubr.msk.bf16.mxu0 %vm8373_vm0, %v8372_v0  ;;  %v1924_v52 = vadd.s32 3, %v1920_v62  ;;  %v7964_v41 = vld [vmem:[%s10755_s9] sm:$0xff]  }
 0x334   : > { %v1717_v17 = vand.u32 3, %v1716_v23 }
 0x335   : > { %7169 = vmatpush3.bf16.msra.mxu1 %v7941_v37  ;;  %7502 = vmatpush3.bf16.msra.mxu0 %v7942_v44  ;;  %v1925_v10 = vand.u32 3, %v1924_v52  ;;  %v7961_v44 = vld [vmem:[%s10754_s1 + $0x8] sm:$0xff]  }
 0x336   : > { %7170 = vmatprep.subr.bf16.mxu1 %v7943_v45  ;;  %7503 = vmatprep.subr.bf16.mxu0 %v8372_v0  ;;  %vm1722_vm14 = vcmp.eq.s32.totalorder %v1717_v17, 2  ;;  %vm1719_vm7 = vcmp.eq.s32.totalorder %v1717_v17, 0  ;;  %vm1718_vm9 = vcmp.lt.s32.totalorder %v1717_v17, 2  ;;  %v7962_v45 = vld [vmem:[%s10754_s1] sm:$0xff]  }
 0x337   : > { %vm1927_vm12 = vcmp.eq.s32.totalorder %v1925_v10, 0  ;;  %vm1930_vm6 = vcmp.eq.s32.totalorder %v1925_v10, 2  ;;  %vm1926_vm10 = vcmp.lt.s32.totalorder %v1925_v10, 2 }
 0x339   : > { %7171 = vmatpush3.bf16.msra.mxu1 %v7944_v25  ;;  %7504 = vmatpush3.bf16.msra.mxu0 %v7945_v34  ;;  %v8132_v59 = vpop.eup %8131 }
 0x33a   : > { %7172 = vmatprep.subr.bf16.mxu1 %v7946_v40  ;;  %7505 = vmatprep.subr.bf16.mxu0 %v8372_v0  ;;  %v8134_v27 = vpop.eup %8133  ;;  %v1723_v13 = vxor.u32 2147483648, %v8132_v59 }
 0x33b   : > { %v8136_v5 = vpop.eup %8135  ;;  %v1720_v57 = vxor.u32 2147483648, %v8134_v27 }
 0x33c   : > { %v8138_v3 = vpop.eup %8137  ;;  %v1931_v39 = vxor.u32 2147483648, %v8136_v5  ;;  %v1724_v22 = vsel %vm1722_vm14, %v1723_v13, %v8134_v27  ;;  %vm10766_vm14 = vcmask 31744  }
 0x33d   : > { %7173 = vmatpush3.bf16.msra.mxu1 %v7947_v46  ;;  %7506 = vmatpush3.bf16.msra.mxu0 %v7948_v47  ;;  %v1928_v1 = vxor.u32 2147483648, %v8138_v3  ;;  %v1721_v51 = vsel %vm1719_vm7, %v8132_v59, %v1720_v57 }
 0x33e   : > { %7174 = vmatprep.subr.bf16.mxu1 %v7949_v30  ;;  %7507 = vmatprep.subr.bf16.mxu0 %v8372_v0  ;;  %v1932_v7 = vsel %vm1930_vm6, %v1931_v39, %v8138_v3  ;;  %v1725_v24 = vsel %vm1718_vm9, %v1721_v51, %v1724_v22  ;;  %v6821_v22 = vld [vmem:[%s10757_s30] ss:$0 sm:$0xff] }
 0x33f   : > { %v1929_v55 = vsel %vm1927_vm12, %v8136_v5, %v1928_v1  ;;  %v1726_v26 = vsel %vm1715_vm11, nan, %v1725_v24 }
 0x340   : > { %v1933_v28 = vsel %vm1926_vm10, %v1929_v55, %v1932_v7  ;;  %v1935_v48 = vpack.c.bf16 %v1726_v26, %v1726_v26 }
 0x341   : > { %7175 = vmatpush3.bf16.msra.mxu1 %v7950_v43  ;;  %7508 = vmatpush3.bf16.msra.mxu0 %v7951_v29  ;;  %v1934_v37 = vsel %vm1923_vm3, nan, %v1933_v28  ;;  %v6796_v29 = vld [vmem:[%s10756_s5] ss:$0 sm:$0xff] }
 0x342   : > { %7176 = vmatprep.subr.bf16.mxu1 %v7952_v35  ;;  %7509 = vmatprep.subr.bf16.mxu0 %v8372_v0  ;;  %v1937_v4 = vpack.c.bf16 %v1934_v37, %v1934_v37 }
 0x345   : > { %7177 = vmatpush3.bf16.msra.mxu1 %v7953_v36  ;;  %7510 = vmatpush3.bf16.msra.mxu0 %v7954_v16 }
 0x346   : > { %7178 = vmatprep.subr.bf16.mxu1 %v7955_v53  ;;  %7511 = vmatprep.subr.bf16.mxu0 %v8372_v0 }
 0x349   : > { %7179 = vmatpush3.bf16.msra.mxu1 %v7956_v58  ;;  %7512 = vmatpush3.bf16.msra.mxu0 %v7957_v14 }
 0x34a   : > { %7180 = vmatprep.subr.bf16.mxu1 %v7958_v61  ;;  %7513 = vmatprep.subr.bf16.mxu0 %v8372_v0 }
 0x34d   : > { %7181 = vmatpush3.bf16.msra.mxu1 %v7959_v49  ;;  %7514 = vmatpush3.bf16.msra.mxu0 %v7960_v20  ;;  %v6825_v49 = vld [vmem:[%s10758_s26] ss:$0 sm:$0xff]  ;;  %s10829_s26 = sld [smem:[#allocation19_spill]] }
 0x34e   : > { %7527 = vmatprep.subr.bf16.mxu0 %v8372_v0  ;;  %7519 = vmatprep.subr.bf16.mxu1 %v8372_v0 }
 0x350   : > { %2170 = vmatmul.mubr.bf16.vlgmr.msra.gmra.mxu1 %v1935_v48  ;;  %7516 = vmatmul.mubr.bf16.vlgmr.msra.gmra.mxu0 %v1937_v4 }
 0x351   : > { %7523 = vmatprep.mubr.msk.bf16.mxu1 %vm8373_vm0, %v8372_v0  ;;  %7531 = vmatprep.mubr.msk.bf16.mxu0 %vm8373_vm0, %v8372_v0 }
 0x352   : > { %7528 = vmatpush3.bf16.msra.mxu0 %v7961_v44  ;;  %7520 = vmatpush3.bf16.msra.mxu1 %v7963_v31 }
 0x353   : > { %7529 = vmatprep.subr.bf16.mxu0 %v8372_v0  ;;  %7521 = vmatprep.subr.bf16.mxu1 %v8372_v0 }
 0x356   : > { %7530 = vmatpush3.bf16.msra.mxu0 %v7962_v45  ;;  %7522 = vmatpush3.bf16.msra.mxu1 %v7964_v41 }
 0x3f0   : > { %v7138_v25 = vpop.f32.mrf.mxu1  ;;  %v7160_v34 = vpop.f32.mrf.mxu0 }
 0x3f2   : > { %v7139_v40 = vpop.f32.mrf.mxu1  ;;  %v7161_v50 = vpop.f32.mrf.mxu0 }
 0x3f3   : > { %v7140_v62 = vadd.f32 %v7139_v40, %v7138_v25  ;;  %v7162_v46 = vadd.f32 %v7161_v50, %v7160_v34 }
 0x3f4   : > { %v7141_v47 = vpop.f32.mrf.mxu1  ;;  %v7163_v23 = vpop.f32.mrf.mxu0 }
 0x3f5   : > { %v9303_v30 = vadd.f32 %v7162_v46, %v7140_v62 }
 0x3f6   : > { %v7142_v52 = vpop.f32.mrf.mxu1  ;;  %v7164_v59 = vpop.f32.mrf.mxu0 }
 0x3f7   : > { %v2321_v27 = vpack.c.bf16 %v9303_v30, %v9303_v30 }
 0x3f9   : > { %7796 = vmatprep.subr.msk.bf16.mxu0 %vm873_vm1, %v2321_v27  ;;  %v2531_v28 = vsel %vm873_vm1, %v2321_v27, 0 }
 0x410   : > { %v7182_v5 = vpop.f32.mrf.mxu1  ;;  %v2211_v43 = vpop.f32.mrf.mxu0 }
 0x412   : > { %v7183_v17 = vpop.f32.mrf.mxu1  ;;  %v7517_v3 = vpop.f32.mrf.mxu0 }
 0x413   : > { %v7184_v35 = vadd.f32 %v7183_v17, %v7182_v5 }
 0x414   : > { %v7185_v10 = vpop.f32.mrf.mxu1  ;;  %v2214_v13 = vpop.f32.mrf.mxu0 }
 0x415   : > { %v2172_v36 = vadd.f32 %v7184_v35, %v6796_v29 }
 0x416   : > { %v7186_v16 = vpop.f32.mrf.mxu1  ;;  %v7518_v57 = vpop.f32.mrf.mxu0 }
 0x417   : > { %v2212_v1 = vadd.f32 %v2211_v43, %v2172_v36 }
 0x419   : > { %v2217_v39 = vmax.f32 %v2212_v1, 0.0 }
 0x41b   : > { %v2218_v53 = vpack.c.bf16 %v2217_v39, %v2217_v39 }
 0x41d   : > { %7524 = vmatmul.mubr.msk.bf16.vlgmr.msra.gmra.mxu1 %vm10713_vm5, %v2218_v53 }
 0x4dd   : > { %v2280_v58 = vpop.f32.mrf.mxu1 }
 0x4de   : > { %v9315_v14 = vadd.f32 %v6821_v22, %v2280_v58 }
 0x4df   : > { %v7525_v51 = vpop.f32.mrf.mxu1 }
 0x4e0   : > { %v2286_v55 = vadd.f32 %v9315_v14, %v9303_v30 }
 0x4e1   : > { %v2283_v7 = vpop.f32.mrf.mxu1 }
 0x4e2   : > { %v2344_v61 = vpack.c.bf16 %v2286_v55, %v2286_v55 }
 0x4e3   : > { %v7526_v24 = vpop.f32.mrf.mxu1 }
 0x4e4   : > { %7532 = vmatmul.mubr.msk.bf16.vlgmr.msra.gmra.mxu0 %vm10713_vm5, %v2344_v61 }
 0x4e5   : > { %7544 = vmatpush3.bf16.msra.mxu0 %v2531_v28 }
 0x4e6   : > { %7569 = vmatprep.subr.bf16.mxu0 %v8372_v0 }
 0x5a4   : > { %v2400_v20 = vpop.f32.mrf.mxu0 }
 0x5a5   : > { %v2401_v26 = vadd.f32 %v6825_v49, %v2400_v20 }
 0x5a6   : > { %v7533_v37 = vpop.f32.mrf.mxu0 }
 0x5a7   : > { %2410 = vrot.lane.b32.xlu0 %v2401_v26, %s10704_s28  ;;  %2407 = vrot.lane.b32.xlu1 %v2401_v26, %s10700_s6  ;;  %s10761_s28 = smov 96   ;;  %s10770_s6 = smov 1  }
 0x5a8   : > { %v2403_v48 = vpop.f32.mrf.mxu0 }
 0x5aa   : > { %v7534_v4 = vpop.f32.mrf.mxu0 }
 0x5ab   : > { %2413 = vrot.lane.b32.xlu1 %v2401_v26, %s10702_s7  ;;  %s10814_s7 = sld [smem:[#allocation17_spill]] }
 0x5c5   : > { %2287 = vxpose.xlu0.b32.start.end [1/1] (short) (narrow) %v2286_v55, 32 }
 0x619   : > { %v2408_v44 = vpop.permute.xlu1 %2407  ;;  %v2411_v31 = vpop.permute.xlu0 %2410 }
 0x61a   : > { %v2416_v45 = vpack.c.bf16 %v2408_v44, %v2401_v26 }
 0x61c   : > { %7539 = vmatprep.mubr.msk.bf16.mxu1 %vm10713_vm5, %v2416_v45 }
 0x61d   : > { %v2414_v46 = vpop.permute.xlu1 %2413 }
 0x61e   : > { %v2417_v47 = vpack.c.bf16 %v2414_v46, %v2411_v31 }
 0x641   : > { %v2303_v41 = vpop.trf.xlu0 }
 0x645   : > { %v2304_v25 = vpop.trf.xlu0 }
 0x646   : > { %v2319_v62 = vpack.c.bf16 %v2304_v25, %v2303_v41 }
 0x649   : > { %v2305_v34 = vpop.trf.xlu0 }
 0x64d   : > { %v2306_v40 = vpop.trf.xlu0 }
 0x64e   : > { %v2320_v50 = vpack.c.bf16 %v2306_v40, %v2305_v34 }
 0x650   : > { %7535 = vmatprep.subr.bf16.mxu1 %v2320_v50 }
 0x651   : > { %7536 = vmatpush3.bf16.msra.mxu1 %v2320_v50 }
 0x652   : > { %7537 = vmatprep.subr.bf16.mxu1 %v2319_v62 }
 0x655   : > { %7538 = vmatpush3.bf16.msra.mxu1 %v2319_v62 }
 0x656   : > { %7549 = vmatprep.subr.bf16.mxu1 %v8372_v0 }
 0x658   : > { %7540 = vmatmul.mubr.msk.bf16.vlgmr.msra.gmra.mxu1 %vm10713_vm5, %v2417_v47  ;;  %v7965_v47 = vld [vmem:[%s10664_s11 + $0x38] sm:$0xff]  }
 0x659   : > { %7565 = vmatprep.mubr.msk.bf16.mxu1 %vm8373_vm0, %v8372_v0  ;;  %7550 = vmatpush3.bf16.msra.mxu1 %v7965_v47 }
 0x65a   : > { %7551 = vmatprep.subr.bf16.mxu1 %v8372_v0 }
 0x718   : > { %v7541_v23 = vpop.f32.mrf.mxu1 }
 0x719   : > { %v2480_v43 = vsel %vm10712_vm8, %v7541_v23, -inf }
 0x71a   : > { %v2458_v52 = vpop.f32.mrf.mxu1 }
 0x71b   : > { %v2474_v59 = vsel %vm10712_vm8, %v2458_v52, -inf }
 0x71c   : > { %2475 = vmax.xlane.f32.xlu1 %v2474_v59  ;;  %v7542_v27 = vpop.f32.mrf.mxu1  ;;  %v7968_v59 = vld [vmem:[%s10664_s11 + $0x20] sm:$0xff]  }
 0x71d   : > { %v2483_v17 = vsel %vm10712_vm8, %v7542_v27, -inf }
 0x71e   : > { %v2461_v5 = vpop.f32.mrf.mxu1 }
 0x71f   : > { %v2477_v29 = vsel %vm10712_vm8, %v2461_v5, -inf }
 0x720   : > { %2481 = vmax.xlane.f32.xlu1 %v2480_v43  ;;  %2478 = vmax.xlane.f32.xlu0 %v2477_v29  ;;  %v7971_v43 = vld [vmem:[%s10664_s11 + $0x8] sm:$0xff]   ;;  %v7972_v29 = vld [vmem:[%s10664_s11] sm:$0xff]  }
 0x724   : > { %2484 = vmax.xlane.f32.xlu1 %v2483_v17 }
 0x7a5   : > { %v2476_v3 = vpop.xlane.xlu1 %2475 }
 0x7a6   : > { %v2486_v35 = vsub.f32 %v2458_v52, %v2476_v3  ;;  %v7967_v52 = vld [vmem:[%s10664_s11 + $0x28] sm:$0xff]  }
 0x7a8   : > { %v2490_v16 = vmul.f32 1.442695, %v2486_v35 }
 0x7a9   : > { %v2482_v10 = vpop.xlane.xlu1 %2481  ;;  %v2479_v13 = vpop.xlane.xlu0 %2478 }
 0x7aa   : > { %v2488_v36 = vsub.f32 %v7541_v23, %v2482_v10  ;;  %v2487_v1 = vsub.f32 %v2461_v5, %v2479_v13  ;;  %v7966_v23 = vld [vmem:[%s10664_s11 + $0x30] sm:$0xff]  }
 0x7ab   : > { %7552 = vmatpush3.bf16.msra.mxu1 %v7966_v23  ;;  %v7970_v5 = vld [vmem:[%s10664_s11 + $0x10] sm:$0xff]  }
 0x7ac   : > { %v2494_v57 = vmul.f32 1.442695, %v2488_v36  ;;  %v2492_v53 = vmul.f32 1.442695, %v2487_v1  ;;  %7553 = vmatprep.subr.bf16.mxu1 %v8372_v0  ;;  %v7975_v23 = vld [vmem:[%s8571_s29 + $0x20] ss:$16 sps:$4 sm:$0xff]  }
 0x7ad   : > { %v2485_v39 = vpop.xlane.xlu1 %2484 }
 0x7ae   : > { %8139 = vpow2.f32 %v2494_v57  ;;  %v2489_v22 = vsub.f32 %v7542_v27, %v2485_v39  ;;  %v7969_v27 = vld [vmem:[%s10664_s11 + $0x18] sm:$0xff]  }
 0x7af   : > { %8141 = vpow2.f32 %v2490_v16  ;;  %7554 = vmatpush3.bf16.msra.mxu1 %v7967_v52  ;;  %v7977_v52 = vld [vmem:[%s8571_s29 + $0x24] ss:$16 sps:$4 sm:$0xff]  }
 0x7b0   : > { %8143 = vpow2.f32 %v2492_v53  ;;  %v2496_v58 = vmul.f32 1.442695, %v2489_v22  ;;  %7555 = vmatprep.subr.bf16.mxu1 %v8372_v0  ;;  %v6833_v22 = vld [vmem:[%s10665_s12] ss:$0 sm:$0xff] }
 0x7b2   : > { %8145 = vpow2.f32 %v2496_v58 }
 0x7b3   : > { %7556 = vmatpush3.bf16.msra.mxu1 %v7968_v59  ;;  %v7978_v59 = vld [vmem:[%s8571_s29 + $0x28] ss:$16 sps:$4 sm:$0xff]  }
 0x7b4   : > { %7557 = vmatprep.subr.bf16.mxu1 %v8372_v0 }
 0x7b7   : > { %7558 = vmatpush3.bf16.msra.mxu1 %v7969_v27  ;;  %v7980_v27 = vld [vmem:[%s8571_s29 + $0x2c] ss:$16 sps:$4 sm:$0xff]  }
 0x7b8   : > { %7559 = vmatprep.subr.bf16.mxu1 %v8372_v0 }
 0x7bb   : > { %v8140_v51 = vpop.eup %8139  ;;  %7560 = vmatpush3.bf16.msra.mxu1 %v7970_v5  ;;  %v7983_v5 = vld [vmem:[%s8571_s29 + $0x4] ss:$16 sps:$4 sm:$0xff]  }
 0x7bc   : > { %v2504_v55 = vsel %vm10712_vm8, %v8140_v51, 0.0  ;;  %v8142_v7 = vpop.eup %8141  ;;  %7561 = vmatprep.subr.bf16.mxu1 %v8372_v0 }
 0x7bd   : > { %2505 = vadd.xlane.f32.xlu1 %v2504_v55  ;;  %v2498_v61 = vsel %vm10712_vm8, %v8142_v7, 0.0  ;;  %v8144_v24 = vpop.eup %8143 }
 0x7be   : > { %v2501_v28 = vsel %vm10712_vm8, %v8144_v24, 0.0 }
 0x7bf   : > { %v8146_v49 = vpop.eup %8145  ;;  %7562 = vmatpush3.bf16.msra.mxu1 %v7971_v43  ;;  %v7986_v43 = vld [vmem:[%s8571_s29 + $0xc] ss:$16 sps:$4 sm:$0xff]  }
 0x7c0   : > { %v2507_v20 = vsel %vm10712_vm8, %v8146_v49, 0.0  ;;  %7563 = vmatprep.subr.bf16.mxu1 %v8372_v0 }
 0x7c1   : > { %2499 = vadd.xlane.f32.xlu1 %v2498_v61 }
 0x7c3   : > { %7564 = vmatpush3.bf16.msra.mxu1 %v7972_v29  ;;  %v7981_v29 = vld [vmem:[%s8571_s29] ss:$16 sps:$4 sm:$0xff]  }
 0x7c4   : > { %2889 = vmatprep.subr.bf16.mxu1 %v7977_v52  ;;  %v8323_v52 = vld [vmem:[%s8565_s25 + $0x8] sm:$0xff]  }
 0x7c5   : > { %2502 = vadd.xlane.f32.xlu1 %v2501_v28 }
 0x7c9   : > { %2508 = vadd.xlane.f32.xlu1 %v2507_v20 }
 0x846   : > { %v2506_v26 = vpop.xlane.xlu1 %2505 }
 0x84a   : > { %v2500_v37 = vpop.xlane.xlu1 %2499 }
 0x84b   : > { %8147 = vrcp.f32 %v2500_v37 }
 0x84e   : > { %v2503_v48 = vpop.xlane.xlu1 %2502 }
 0x84f   : > { %8149 = vrcp.f32 %v2503_v48 }
 0x850   : > { %8151 = vrcp.f32 %v2506_v26 }
 0x852   : > { %v2509_v4 = vpop.xlane.xlu1 %2508 }
 0x853   : > { %8153 = vrcp.f32 %v2509_v4  ;;  %v7973_v4 = vld [vmem:[%s10762_s13 + $0x8] sm:$0xff]  }
 0x858   : > { %v8148_v44 = vpop.eup %8147 }
 0x859   : > { %v2518_v31 = vmul.f32 %v8148_v44, %v8142_v7 }
 0x85c   : > { %v8150_v45 = vpop.eup %8149 }
 0x85d   : > { %v2519_v41 = vmul.f32 %v8150_v45, %v8144_v24  ;;  %v8152_v25 = vpop.eup %8151 }
 0x85e   : > { %v2520_v50 = vmul.f32 %v8152_v25, %v8140_v51  ;;  %v6843_v25 = vld [vmem:[%s10670_s17] ss:$0 sm:$0xff] }
 0x85f   : > { %v2522_v34 = vpack.c.bf16 %v2519_v41, %v2518_v31 }
 0x860   : > { %v8154_v40 = vpop.eup %8153 }
 0x861   : > { %7545 = vmatprep.mubr.msk.bf16.mxu0 %vm10712_vm8, %v2522_v34  ;;  %v2521_v62 = vmul.f32 %v8154_v40, %v8146_v49  ;;  %v6844_v40 = vld [vmem:[%s10670_s17 + $0x1] ss:$0 sm:$0xff] }
 0x863   : > { %v2523_v46 = vpack.c.bf16 %v2521_v62, %v2520_v50 }
 0x865   : > { %7546 = vmatmul.mubr.msk.bf16.vlgmr.msra.gmra.mxu0 %vm10712_vm8, %v2523_v46 }
 0x866   : > { %7573 = vmatprep.mubr.msk.bf16.mxu0 %vm8373_vm0, %v8372_v0  ;;  %7570 = vmatpush3.bf16.msra.mxu0 %v7973_v4  ;;  %v8310_v4 = vld [vmem:[%s8565_s25 + $0xe0] sm:$0xff]  }
 0x867   : > { %7571 = vmatprep.subr.bf16.mxu0 %v8372_v0 }
 0x925   : > { %v7547_v17 = vpop.f32.mrf.mxu0 }
 0x926   : > { %2587 = vrot.lane.b32.xlu1 %v7547_v17, %s10759_s8  ;;  %v8297_v17 = vld [vmem:[%s8565_s25 + $0x78] sm:$0xff]  }
 0x927   : > { %v2567_v3 = vpop.f32.mrf.mxu0 }
 0x929   : > { %v7548_v35 = vpop.f32.mrf.mxu0 }
 0x92b   : > { %v2570_v10 = vpop.f32.mrf.mxu0 }
 0x92c   : > { %2583 = vrot.lane.b32.xlu1 %v2570_v10, %s10760_s27 }
 0x930   : > { %2591 = vrot.lane.b32.xlu1 %v7548_v35, %s10761_s28  ;;  %v6845_v35 = vld [vmem:[%s10763_s14] ss:$0 sm:$0xff]  ;;  %s10764_s14 = sld [smem:[#allocation18_spill]] }
 0x998   : > { %v2588_v13 = vpop.permute.xlu1 %2587 }
 0x99e   : > { %v2584_v36 = vpop.permute.xlu1 %2583 }
 0x99f   : > { %v2594_v16 = vsel %vm10713_vm5, %v2567_v3, %v2584_v36  ;;  %v8298_v3 = vld [vmem:[%s8565_s25 + $0xf8] sm:$0xff]  }
 0x9a0   : > { %v2596_v57 = vsel %vm10711_vm15, %v2594_v16, %v2588_v13 }
 0x9a2   : > { %v2592_v1 = vpop.permute.xlu1 %2591 }
 0x9a3   : > { %v2598_v39 = vsel %vm10710_vm13, %v2596_v57, %v2592_v1 }
 0x9a4   : > { %v2599_v53 = vpack.c.bf16 %v2598_v39, %v2598_v39 }
 0x9a6   : > { %7566 = vmatmul.mubr.bf16.vlgmr.msra.gmra.mxu1 %v2599_v53 }
 0x9a7   : > { %2909 = vmatprep.mubr.bf16.mxu1 %v8374_v12  ;;  %2890 = vmatpush1.bf16.msra.mxu1 %v7975_v23  ;;  %v8322_v23 = vld [vmem:[%s8565_s25 + $0xc8] sm:$0xff]  }
 0x9a8   : > { %2891 = vmatprep.subr.bf16.mxu1 %v7983_v5  ;;  %v8326_v5 = vld [vmem:[%s8565_s25 + $0xc0] sm:$0xff]  }
 0x9ab   : > { %2892 = vmatpush1.bf16.msra.mxu1 %v7981_v29  ;;  %v8328_v29 = vld [vmem:[%s8565_s25 + $0x80] sm:$0xff]  }
 0x9ac   : > { %7222 = vmatprep.subr.bf16.mxu1 %v8297_v17 }
 0xa66   : > { %v2688_v58 = vpop.f32.mrf.mxu1 }
 0xa67   : > { %v2689_v51 = vadd.f32 %v6833_v22, %v2688_v58  ;;  %v8299_v22 = vld [vmem:[%s8565_s25 + $0x38] sm:$0xff]  }
 0xa68   : > { %v7567_v55 = vpop.f32.mrf.mxu1  ;;  %v8300_v58 = vld [vmem:[%s8565_s25 + $0xb8] sm:$0xff]  }
 0xa69   : > { %v2694_v7 = vadd.f32 %v2689_v51, %v9303_v30  ;;  %v7974_v30 = vld [vmem:[%s10762_s13] sm:$0xff]   ;;  %v8301_v51 = vld [vmem:[%s8565_s25 + $0x70] sm:$0xff]   ;;  %s10767_s13 = smov 127  }
 0xa6a   : > { %v2691_v61 = vpop.f32.mrf.mxu1  ;;  %7572 = vmatpush3.bf16.msra.mxu0 %v7974_v30  ;;  %v8302_v55 = vld [vmem:[%s8565_s25 + $0xf0] sm:$0xff]   ;;  %v8311_v30 = vld [vmem:[%s8565_s25 + $0x20] sm:$0xff]  }
 0xa6b   : > { %v2698_v24 = vsel %vm10713_vm5, %v2694_v7, 0.0  ;;  %2942 = vmatprep.subr.bf16.mxu0 %v7980_v27  ;;  %v8325_v27 = vld [vmem:[%s8565_s25 + $0x40] sm:$0xff]  }
 0xa6c   : > { %2699 = vadd.xlane.f32.xlu1 %v2698_v24  ;;  %v7568_v28 = vpop.f32.mrf.mxu1  ;;  %v8303_v24 = vld [vmem:[%s8565_s25 + $0x30] sm:$0xff]  }
 0xa6d   : > { %v8304_v28 = vld [vmem:[%s8565_s25 + $0xb0] sm:$0xff]  }
 0xaf5   : > { %v2700_v49 = vpop.xlane.xlu1 %2699 }
 0xaf6   : > { %v2702_v20 = vmul.f32 0.03125, %v2700_v49  ;;  %v8305_v49 = vld [vmem:[%s8565_s25 + $0x68] sm:$0xff]  }
 0xaf8   : > { %v2703_v26 = vsub.f32 %v2694_v7, %v2702_v20  ;;  %v8306_v20 = vld [vmem:[%s8565_s25 + $0xe8] sm:$0xff]  }
 0xafa   : > { %v2704_v37 = vmul.f32 %v2703_v26, %v2703_v26 }
 0xafc   : > { %v2705_v48 = vsel %vm10713_vm5, %v2704_v37, 0.0  ;;  %v8308_v37 = vld [vmem:[%s8565_s25 + $0xa8] sm:$0xff]  }
 0xafd   : > { %2706 = vadd.xlane.f32.xlu0 %v2705_v48  ;;  %v8309_v48 = vld [vmem:[%s8565_s25 + $0x60] sm:$0xff]  }
 0xb86   : > { %v2707_v44 = vpop.xlane.xlu0 %2706 }
 0xb87   : > { %v2708_v45 = vmul.f32 0.03125, %v2707_v44  ;;  %v8312_v44 = vld [vmem:[%s8565_s25 + $0xa0] sm:$0xff]  }
 0xb89   : > { %v2709_v31 = vadd.f32 1e-05, %v2708_v45  ;;  %v8313_v45 = vld [vmem:[%s8565_s25 + $0x58] sm:$0xff]  }
 0xb8b   : > { %8155 = vrsqrt.f32 %v2709_v31  ;;  %v8314_v31 = vld [vmem:[%s8565_s25 + $0xd8] sm:$0xff]  }
 0xb98   : > { %v8156_v41 = vpop.eup %8155 }
 0xb99   : > { %v2711_v34 = vmul.f32 %v8156_v41, %v2703_v26  ;;  %v8307_v26 = vld [vmem:[%s8565_s25 + $0x28] sm:$0xff]   ;;  %v8315_v41 = vld [vmem:[%s8565_s25 + $0x18] sm:$0xff]  }
 0xb9b   : > { %v2718_v50 = vmul.f32 %v6843_v25, %v2711_v34  ;;  %v8316_v25 = vld [vmem:[%s8565_s25 + $0x98] sm:$0xff]   ;;  %v8317_v34 = vld [vmem:[%s8565_s25 + $0x50] sm:$0xff]  }
 0xb9d   : > { %v9402_v62 = vadd.f32 %v6844_v40, %v2718_v50  ;;  %v8318_v40 = vld [vmem:[%s8565_s25 + $0xd0] sm:$0xff]  }
 0xb9e   : > { %v8319_v50 = vld [vmem:[%s8565_s25 + $0x10] sm:$0xff]  }
 0xb9f   : > { %v2726_v46 = vadd.f32 %v9402_v62, %v9315_v14  ;;  %v7984_v14 = vld [vmem:[%s8571_s29 + $0x8] ss:$16 sps:$4 sm:$0xff]   ;;  %s10768_s29 = smov 126  }
 0xba1   : > { %v2757_v47 = vpack.c.bf16 %v2726_v46, %v2726_v46  ;;  %v8320_v46 = vld [vmem:[%s8565_s25 + $0x90] sm:$0xff]  }
 0xba3   : > { %7574 = vmatmul.mubr.msk.bf16.vlgmr.msra.gmra.mxu0 %vm10713_vm5, %v2757_v47  ;;  %v8321_v47 = vld [vmem:[%s8565_s25 + $0x48] sm:$0xff]  }
 0xba4   : > { %2962 = vmatprep.mubr.bf16.mxu0 %v8374_v12  ;;  %2943 = vmatpush1.bf16.msra.mxu0 %v7978_v59  ;;  %v8324_v59 = vld [vmem:[%s8565_s25 + $0x88] sm:$0xff]  }
 0xba5   : > { %2944 = vmatprep.subr.bf16.mxu0 %v7986_v43  ;;  %v8327_v43 = vld [vmem:[%s8565_s25] sm:$0xff]  }
 0xba8   : > { %2945 = vmatpush1.bf16.msra.mxu0 %v7984_v14 }
 0xba9   : > { %7250 = vmatprep.subr.bf16.mxu0 %v8298_v3 }
 0xc63   : > { %v2813_v10 = vpop.f32.mrf.mxu0 }
 0xc64   : > { %v2814_v13 = vadd.f32 %v6845_v35, %v2813_v10 }
 0xc65   : > { %v7575_v36 = vpop.f32.mrf.mxu0 }
 0xc66   : > { %2820 = vrot.lane.b32.xlu0 %v2814_v13, %s10761_s28 }
 0xc67   : > { %v2816_v16 = vpop.f32.mrf.mxu0 }
 0xc69   : > { %v7576_v57 = vpop.f32.mrf.mxu0 }
 0xc6a   : > { %2823 = vrot.lane.b32.xlu0 %v2814_v13, %s10759_s8 }
 0xc6e   : > { %2826 = vrot.lane.b32.xlu0 %v2814_v13, %s10760_s27 }
 0xcd8   : > { %v2821_v1 = vpop.permute.xlu0 %2820 }
 0xcd9   : > { %v2829_v39 = vpack.c.bf16 %v2821_v1, %v2814_v13 }
 0xcdb   : > { %6857 = vmatmul.mubr.msk.bf16.vlgmr.msra.gmra.mxu1 %vm10713_vm5, %v2829_v39  ;;  %6859 = vmatmul.mubr.msk.bf16.vlgmr.msra.gmra.mxu0 %vm10713_vm5, %v2829_v39 }
 0xcdc   : > { %v2824_v53 = vpop.permute.xlu0 %2823  ;;  %2919 = vmatprep.mubr.bf16.mxu1 %v8374_v12  ;;  %2972 = vmatprep.mubr.bf16.mxu0 %v8374_v12 }
 0xcdd   : > { %7223 = vmatpush3.bf16.msra.mxu1 %v8299_v22  ;;  %7251 = vmatpush3.bf16.msra.mxu0 %v8300_v58 }
 0xcde   : > { %7224 = vmatprep.subr.bf16.mxu1 %v8301_v51  ;;  %7252 = vmatprep.subr.bf16.mxu0 %v8302_v55 }
 0xce0   : > { %v2827_v7 = vpop.permute.xlu0 %2826 }
 0xce1   : > { %v2830_v61 = vpack.c.bf16 %v2827_v7, %v2824_v53  ;;  %7225 = vmatpush3.bf16.msra.mxu1 %v8303_v24  ;;  %7253 = vmatpush3.bf16.msra.mxu0 %v8304_v28 }
 0xce2   : > { %7226 = vmatprep.subr.bf16.mxu1 %v8305_v49  ;;  %7254 = vmatprep.subr.bf16.mxu0 %v8306_v20 }
 0xce3   : > { %6858 = vmatmul.mubr.msk.bf16.gmra.mxu1 %vm10713_vm5, %v2830_v61  ;;  %6860 = vmatmul.mubr.msk.bf16.gmra.mxu0 %vm10713_vm5, %v2830_v61 }
 0xce5   : > { %7227 = vmatpush3.bf16.msra.mxu1 %v8307_v26  ;;  %7255 = vmatpush3.bf16.msra.mxu0 %v8308_v37 }
 0xce6   : > { %7228 = vmatprep.subr.bf16.mxu1 %v8309_v48  ;;  %7256 = vmatprep.subr.bf16.mxu0 %v8310_v4 }
 0xce9   : > { %7229 = vmatpush3.bf16.msra.mxu1 %v8311_v30  ;;  %7257 = vmatpush3.bf16.msra.mxu0 %v8312_v44 }
 0xcea   : > { %7230 = vmatprep.subr.bf16.mxu1 %v8313_v45  ;;  %7258 = vmatprep.subr.bf16.mxu0 %v8314_v31 }
 0xced   : > { %7231 = vmatpush3.bf16.msra.mxu1 %v8315_v41  ;;  %7259 = vmatpush3.bf16.msra.mxu0 %v8316_v25 }
 0xcee   : > { %7232 = vmatprep.subr.bf16.mxu1 %v8317_v34  ;;  %7260 = vmatprep.subr.bf16.mxu0 %v8318_v40 }
 0xcf1   : > { %7233 = vmatpush3.bf16.msra.mxu1 %v8319_v50  ;;  %7261 = vmatpush3.bf16.msra.mxu0 %v8320_v46 }
 0xcf2   : > { %7234 = vmatprep.subr.bf16.mxu1 %v8321_v47  ;;  %7262 = vmatprep.subr.bf16.mxu0 %v8322_v23 }
 0xcf5   : > { %7235 = vmatpush3.bf16.msra.mxu1 %v8323_v52  ;;  %7263 = vmatpush3.bf16.msra.mxu0 %v8324_v59 }
 0xcf6   : > { %7236 = vmatprep.subr.bf16.mxu1 %v8325_v27  ;;  %7264 = vmatprep.subr.bf16.mxu0 %v8326_v5 }
 0xcf9   : > { %7237 = vmatpush3.bf16.msra.mxu1 %v8327_v43  ;;  %7265 = vmatpush3.bf16.msra.mxu0 %v8328_v29 }
 0xcfa   : > { %7577 = vmatprep.subr.bf16.mxu1 %v8372_v0  ;;  %7597 = vmatprep.subr.bf16.mxu0 %v8372_v0 }
 0xd9b   : > { %v2911_v14 = vpop.f32.mrf.mxu1  ;;  %v2964_v17 = vpop.f32.mrf.mxu0 }
 0xd9d   : > { %v2913_v3 = vpop.f32.mrf.mxu1  ;;  %v2966_v35 = vpop.f32.mrf.mxu0 }
 0xd9e   : > { %v2983_v10 = vmax.f32 %v2911_v14, %v2913_v3 }
 0xd9f   : > { %v2915_v13 = vpop.f32.mrf.mxu1  ;;  %v2968_v36 = vpop.f32.mrf.mxu0 }
 0xda0   : > { %v2984_v16 = vmax.f32 %v2983_v10, %v2964_v17 }
 0xda1   : > { %v2917_v57 = vpop.f32.mrf.mxu1  ;;  %v2970_v1 = vpop.f32.mrf.mxu0 }
 0xda2   : > { %v2988_v39 = vmax.f32 %v2915_v13, %v2917_v57  ;;  %v2985_v53 = vmax.f32 %v2984_v16, %v2966_v35 }
 0xda3   : > { %v2921_v22 = vpop.f32.mrf.mxu1  ;;  %v2974_v58 = vpop.f32.mrf.mxu0 }
 0xda4   : > { %2986 = vmax.xlane.f32.xlu0 %v2985_v53  ;;  %v2989_v51 = vmax.f32 %v2988_v39, %v2968_v36 }
 0xda5   : > { %v2923_v55 = vpop.f32.mrf.mxu1  ;;  %v2976_v7 = vpop.f32.mrf.mxu0 }
 0xda6   : > { %v2993_v61 = vmax.f32 %v2921_v22, %v2923_v55  ;;  %v2990_v24 = vmax.f32 %v2989_v51, %v2970_v1 }
 0xda7   : > { %v2925_v28 = vpop.f32.mrf.mxu1  ;;  %v2978_v20 = vpop.f32.mrf.mxu0 }
 0xda8   : > { %2991 = vmax.xlane.f32.xlu1 %v2990_v24  ;;  %v2994_v49 = vmax.f32 %v2993_v61, %v2974_v58 }
 0xda9   : > { %v2927_v26 = vpop.f32.mrf.mxu1  ;;  %v2980_v30 = vpop.f32.mrf.mxu0 }
 0xdaa   : > { %v2998_v37 = vmax.f32 %v2925_v28, %v2927_v26  ;;  %v2995_v48 = vmax.f32 %v2994_v49, %v2976_v7 }
 0xdac   : > { %2996 = vmax.xlane.f32.xlu1 %v2995_v48  ;;  %v2999_v4 = vmax.f32 %v2998_v37, %v2978_v20 }
 0xdae   : > { %v3000_v44 = vmax.f32 %v2999_v4, %v2980_v30 }
 0xdb0   : > { %3001 = vmax.xlane.f32.xlu1 %v3000_v44 }
 0xe2d   : > { %v2987_v45 = vpop.xlane.xlu0 %2986 }
 0xe2e   : > { %v3003_v31 = vsub.f32 %v2911_v14, %v2987_v45  ;;  %v3004_v41 = vsub.f32 %v2913_v3, %v2987_v45  ;;  %v3005_v25 = vsub.f32 %v2964_v17, %v2987_v45  ;;  %v3006_v34 = vsub.f32 %v2966_v35, %v2987_v45 }
 0xe30   : > { %v3019_v40 = vmul.f32 1.442695, %v3003_v31  ;;  %v3021_v50 = vmul.f32 1.442695, %v3004_v41  ;;  %v3023_v46 = vmul.f32 1.442695, %v3005_v25 }
 0xe31   : > { %v3025_v47 = vmul.f32 1.442695, %v3006_v34  ;;  %v2992_v23 = vpop.xlane.xlu1 %2991 }
 0xe32   : > { %8157 = vpow2.f32 %v3019_v40  ;;  %v3007_v52 = vsub.f32 %v2915_v13, %v2992_v23  ;;  %v3008_v59 = vsub.f32 %v2917_v57, %v2992_v23  ;;  %v3009_v27 = vsub.f32 %v2968_v36, %v2992_v23 }
 0xe33   : > { %8159 = vpow2.f32 %v3021_v50  ;;  %v3010_v5 = vsub.f32 %v2970_v1, %v2992_v23 }
 0xe34   : > { %8161 = vpow2.f32 %v3023_v46  ;;  %v3027_v43 = vmul.f32 1.442695, %v3007_v52  ;;  %v3029_v29 = vmul.f32 1.442695, %v3008_v59  ;;  %v3031_v10 = vmul.f32 1.442695, %v3009_v27 }
 0xe35   : > { %8163 = vpow2.f32 %v3025_v47  ;;  %v3033_v14 = vmul.f32 1.442695, %v3010_v5  ;;  %v2997_v3 = vpop.xlane.xlu1 %2996 }
 0xe36   : > { %8165 = vpow2.f32 %v3027_v43  ;;  %v3011_v17 = vsub.f32 %v2921_v22, %v2997_v3  ;;  %v3012_v35 = vsub.f32 %v2923_v55, %v2997_v3  ;;  %v3013_v16 = vsub.f32 %v2974_v58, %v2997_v3 }
 0xe37   : > { %8167 = vpow2.f32 %v3029_v29  ;;  %v3014_v39 = vsub.f32 %v2976_v7, %v2997_v3 }
 0xe38   : > { %8169 = vpow2.f32 %v3031_v10  ;;  %v3035_v53 = vmul.f32 1.442695, %v3011_v17  ;;  %v3037_v13 = vmul.f32 1.442695, %v3012_v35  ;;  %v3039_v57 = vmul.f32 1.442695, %v3013_v16 }
 0xe39   : > { %8171 = vpow2.f32 %v3033_v14  ;;  %v3041_v36 = vmul.f32 1.442695, %v3014_v39  ;;  %v3002_v1 = vpop.xlane.xlu1 %3001 }
 0xe3a   : > { %8173 = vpow2.f32 %v3035_v53  ;;  %v3015_v51 = vsub.f32 %v2925_v28, %v3002_v1  ;;  %v3016_v61 = vsub.f32 %v2927_v26, %v3002_v1  ;;  %v3017_v24 = vsub.f32 %v2978_v20, %v3002_v1 }
 0xe3b   : > { %8175 = vpow2.f32 %v3037_v13  ;;  %v3018_v49 = vsub.f32 %v2980_v30, %v3002_v1 }
 0xe3c   : > { %8177 = vpow2.f32 %v3039_v57  ;;  %v3043_v37 = vmul.f32 1.442695, %v3015_v51  ;;  %v3045_v22 = vmul.f32 1.442695, %v3016_v61  ;;  %v3047_v58 = vmul.f32 1.442695, %v3017_v24 }
 0xe3d   : > { %8179 = vpow2.f32 %v3041_v36  ;;  %v3049_v7 = vmul.f32 1.442695, %v3018_v49 }
 0xe3e   : > { %8181 = vpow2.f32 %v3043_v37 }
 0xe3f   : > { %v8158_v55 = vpop.eup %8157  ;;  %8183 = vpow2.f32 %v3045_v22 }
 0xe40   : > { %v8160_v48 = vpop.eup %8159  ;;  %8185 = vpow2.f32 %v3047_v58 }
 0xe41   : > { %v8162_v4 = vpop.eup %8161  ;;  %v3051_v44 = vadd.f32 %v8160_v48, %v8158_v55  ;;  %8187 = vpow2.f32 %v3049_v7 }
 0xe42   : > { %v8164_v45 = vpop.eup %8163 }
 0xe43   : > { %v8166_v31 = vpop.eup %8165  ;;  %v3052_v28 = vadd.f32 %v8162_v4, %v3051_v44 }
 0xe44   : > { %v8168_v20 = vpop.eup %8167 }
 0xe45   : > { %v8170_v26 = vpop.eup %8169  ;;  %v3053_v30 = vadd.f32 %v8164_v45, %v3052_v28  ;;  %v3056_v41 = vadd.f32 %v8168_v20, %v8166_v31 }
 0xe46   : > { %v8172_v25 = vpop.eup %8171 }
 0xe47   : > { %v8174_v34 = vpop.eup %8173  ;;  %3054 = vadd.xlane.f32.xlu1 %v3053_v30  ;;  %v3057_v40 = vadd.f32 %v8170_v26, %v3056_v41 }
 0xe48   : > { %v8176_v50 = vpop.eup %8175 }
 0xe49   : > { %v8178_v46 = vpop.eup %8177  ;;  %v3058_v47 = vadd.f32 %v8172_v25, %v3057_v40  ;;  %v3061_v23 = vadd.f32 %v8176_v50, %v8174_v34 }
 0xe4a   : > { %v8180_v52 = vpop.eup %8179 }
 0xe4b   : > { %v8182_v59 = vpop.eup %8181  ;;  %3059 = vadd.xlane.f32.xlu1 %v3058_v47  ;;  %v3062_v27 = vadd.f32 %v8178_v46, %v3061_v23 }
 0xe4c   : > { %v8184_v5 = vpop.eup %8183 }
 0xe4d   : > { %v3063_v43 = vadd.f32 %v8180_v52, %v3062_v27  ;;  %v3066_v29 = vadd.f32 %v8184_v5, %v8182_v59  ;;  %v8186_v10 = vpop.eup %8185 }
 0xe4e   : > { %v8188_v3 = vpop.eup %8187 }
 0xe4f   : > { %3064 = vadd.xlane.f32.xlu1 %v3063_v43  ;;  %v3067_v14 = vadd.f32 %v8186_v10, %v3066_v29 }
 0xe51   : > { %v3068_v17 = vadd.f32 %v8188_v3, %v3067_v14 }
 0xe53   : > { %3069 = vadd.xlane.f32.xlu1 %v3068_v17 }
 0xed0   : > { %v3055_v35 = vpop.xlane.xlu1 %3054 }
 0xed1   : > { %8189 = vrcp.f32 %v3055_v35 }
 0xed4   : > { %v3060_v16 = vpop.xlane.xlu1 %3059 }
 0xed5   : > { %8191 = vrcp.f32 %v3060_v16 }
 0xed8   : > { %v3065_v39 = vpop.xlane.xlu1 %3064 }
 0xed9   : > { %8193 = vrcp.f32 %v3065_v39 }
 0xedc   : > { %v3070_v53 = vpop.xlane.xlu1 %3069 }
 0xedd   : > { %8195 = vrcp.f32 %v3070_v53 }
 0xede   : > { %v8190_v13 = vpop.eup %8189 }
 0xedf   : > { %v3080_v36 = vmul.f32 %v8190_v13, %v8160_v48  ;;  %v3082_v1 = vmul.f32 %v8190_v13, %v8164_v45  ;;  %v3079_v51 = vmul.f32 %v8190_v13, %v8158_v55  ;;  %v3081_v61 = vmul.f32 %v8190_v13, %v8162_v4 }
 0xee2   : > { %v8192_v57 = vpop.eup %8191 }
 0xee3   : > { %v3084_v24 = vmul.f32 %v8192_v57, %v8168_v20  ;;  %v3086_v49 = vmul.f32 %v8192_v57, %v8172_v25  ;;  %v3083_v37 = vmul.f32 %v8192_v57, %v8166_v31  ;;  %v3085_v22 = vmul.f32 %v8192_v57, %v8170_v26 }
 0xee5   : > { %v3096_v58 = vpack.c.bf16 %v3084_v24, %v3080_v36  ;;  %v3098_v7 = vpack.c.bf16 %v3086_v49, %v3082_v1  ;;  %v3095_v44 = vpack.c.bf16 %v3083_v37, %v3079_v51  ;;  %v3097_v28 = vpack.c.bf16 %v3085_v22, %v3081_v61  ;;  %v7994_v51 = vld [vmem:[%s10668_s15] sm:$0xff]  }
 0xee6   : > { %v8194_v30 = vpop.eup %8193 }
 0xee7   : > { %3135 = vmatprep.mubr.bf16.mxu1 %v3096_v58  ;;  %3184 = vmatprep.mubr.bf16.mxu0 %v3098_v7  ;;  %v3088_v40 = vmul.f32 %v8194_v30, %v8176_v50  ;;  %v3090_v47 = vmul.f32 %v8194_v30, %v8180_v52  ;;  %v3087_v48 = vmul.f32 %v8194_v30, %v8174_v34  ;;  %v7987_v34 = vld [vmem:[%s10668_s15 + $0x38] sm:$0xff]   ;;  %v7988_v50 = vld [vmem:[%s10668_s15 + $0x30] sm:$0xff]   ;;  %v7990_v52 = vld [vmem:[%s10668_s15 + $0x20] sm:$0xff]  }
 0xee8   : > { %3136 = vmatmul.mubr.bf16.vlgmr.msra.gmra.mxu1 %v3095_v44  ;;  %3185 = vmatmul.mubr.bf16.vlgmr.msra.gmra.mxu0 %v3097_v28  ;;  %v3089_v45 = vmul.f32 %v8194_v30, %v8178_v46  ;;  %v7989_v46 = vld [vmem:[%s10668_s15 + $0x28] sm:$0xff]  }
 0xee9   : > { %7578 = vmatpush3.bf16.msra.mxu1 %v7987_v34 }
 0xeea   : > { %v8196_v41 = vpop.eup %8195  ;;  %7579 = vmatprep.subr.bf16.mxu1 %v8372_v0 }
 0xeeb   : > { %v3092_v55 = vmul.f32 %v8196_v41, %v8184_v5  ;;  %v3094_v4 = vmul.f32 %v8196_v41, %v8188_v3  ;;  %v3091_v20 = vmul.f32 %v8196_v41, %v8182_v59  ;;  %v3093_v25 = vmul.f32 %v8196_v41, %v8186_v10  ;;  %v7991_v59 = vld [vmem:[%s10668_s15 + $0x18] sm:$0xff]   ;;  %v7992_v5 = vld [vmem:[%s10668_s15 + $0x10] sm:$0xff]   ;;  %v7993_v3 = vld [vmem:[%s10668_s15 + $0x8] sm:$0xff]  }
 0xeed   : > { %v3100_v31 = vpack.c.bf16 %v3092_v55, %v3088_v40  ;;  %v3102_v26 = vpack.c.bf16 %v3094_v4, %v3090_v47  ;;  %v3099_v23 = vpack.c.bf16 %v3091_v20, %v3087_v48  ;;  %v3101_v27 = vpack.c.bf16 %v3093_v25, %v3089_v45  ;;  %7580 = vmatpush3.bf16.msra.mxu1 %v7988_v50 }
 0xeee   : > { %7581 = vmatprep.subr.bf16.mxu1 %v8372_v0 }
 0xeef   : > { %3143 = vmatprep.mubr.bf16.mxu1 %v3100_v31  ;;  %3192 = vmatprep.mubr.bf16.mxu0 %v3102_v26 }
 0xef0   : > { %3144 = vmatmul.mubr.bf16.gmra.mxu1 %v3099_v23  ;;  %3193 = vmatmul.mubr.bf16.gmra.mxu0 %v3101_v27  ;;  %v6861_v27 = vld [vmem:[%s10669_s16] ss:$0 sm:$0xff] }
 0xef1   : > { %7593 = vmatprep.mubr.msk.bf16.mxu1 %vm8373_vm0, %v8372_v0  ;;  %7601 = vmatprep.mubr.msk.bf16.mxu0 %vm8373_vm0, %v8372_v0 }
 0xef2   : > { %7582 = vmatpush3.bf16.msra.mxu1 %v7989_v46 }
 0xef3   : > { %7583 = vmatprep.subr.bf16.mxu1 %v8372_v0 }
 0xef6   : > { %7584 = vmatpush3.bf16.msra.mxu1 %v7990_v52 }
 0xef7   : > { %7585 = vmatprep.subr.bf16.mxu1 %v8372_v0 }
 0xefa   : > { %7586 = vmatpush3.bf16.msra.mxu1 %v7991_v59 }
 0xefb   : > { %7587 = vmatprep.subr.bf16.mxu1 %v8372_v0 }
 0xefe   : > { %7588 = vmatpush3.bf16.msra.mxu1 %v7992_v5 }
 0xeff   : > { %7589 = vmatprep.subr.bf16.mxu1 %v8372_v0 }
 0xf02   : > { %7590 = vmatpush3.bf16.msra.mxu1 %v7993_v3 }
 0xf03   : > { %7591 = vmatprep.subr.bf16.mxu1 %v8372_v0 }
 0xf06   : > { %7592 = vmatpush3.bf16.msra.mxu1 %v7994_v51 }
 0xf07   : > { %7617 = vmatprep.subr.bf16.mxu1 %v8372_v0 }
 0xfa8   : > { %v7238_v43 = vpop.f32.mrf.mxu1  ;;  %v7266_v29 = vpop.f32.mrf.mxu0 }
 0xfaa   : > { %v7239_v10 = vpop.f32.mrf.mxu1  ;;  %v7267_v14 = vpop.f32.mrf.mxu0 }
 0xfab   : > { %v7240_v17 = vadd.f32 %v7239_v10, %v7238_v43  ;;  %v7268_v35 = vadd.f32 %v7267_v14, %v7266_v29 }
 0xfac   : > { %v7241_v16 = vpop.f32.mrf.mxu1  ;;  %v7269_v39 = vpop.f32.mrf.mxu0 }
 0xfad   : > { %v3187_v53 = vadd.f32 %v7268_v35, %v7240_v17  ;;  %v7995_v35 = vld [vmem:[%s10671_s18 + $0x8] sm:$0xff]  }
 0xfae   : > { %v7242_v13 = vpop.f32.mrf.mxu1  ;;  %v7270_v57 = vpop.f32.mrf.mxu0  ;;  %7598 = vmatpush3.bf16.msra.mxu0 %v7995_v35 }
 0xfaf   : > { %v7243_v36 = vadd.f32 %v7242_v13, %v7241_v16  ;;  %v7271_v1 = vadd.f32 %v7270_v57, %v7269_v39  ;;  %7599 = vmatprep.subr.bf16.mxu0 %v8372_v0  ;;  %v6872_v57 = vld [vmem:[%s10670_s17 + $0x2] ss:$0 sm:$0xff] }
 0xfb0   : > { %v7244_v61 = vpop.f32.mrf.mxu1  ;;  %v7272_v24 = vpop.f32.mrf.mxu0 }
 0xfb1   : > { %v3190_v49 = vadd.f32 %v7271_v1, %v7243_v36  ;;  %v6873_v1 = vld [vmem:[%s10670_s17 + $0x3] ss:$0 sm:$0xff] }
 0xfb2   : > { %v7245_v37 = vpop.f32.mrf.mxu1  ;;  %v7273_v22 = vpop.f32.mrf.mxu0 }
 0xfb3   : > { %v7246_v58 = vadd.f32 %v7245_v37, %v7244_v61  ;;  %v7274_v7 = vadd.f32 %v7273_v22, %v7272_v24  ;;  %3202 = vrot.lane.b32.xlu1 %v3190_v49, %s10760_s27  ;;  %v7997_v24 = vld [vmem:[%s10673_s20 + $0x18] sm:$0xff]   ;;  %v7998_v37 = vld [vmem:[%s10673_s20 + $0x10] sm:$0xff]   ;;  %v7999_v22 = vld [vmem:[%s10673_s20 + $0x8] sm:$0xff]  }
 0xfb4   : > { %v7247_v44 = vpop.f32.mrf.mxu1  ;;  %v7275_v28 = vpop.f32.mrf.mxu0 }
 0xfb5   : > { %v3195_v30 = vadd.f32 %v7274_v7, %v7246_v58  ;;  %v8000_v58 = vld [vmem:[%s10673_s20] sm:$0xff]  }
 0xfb6   : > { %v7248_v41 = vpop.f32.mrf.mxu1  ;;  %v7276_v40 = vpop.f32.mrf.mxu0  ;;  %v6874_v7 = vld [vmem:[%s10672_s19] ss:$0 sm:$0xff] }
 0xfb7   : > { %v7249_v47 = vadd.f32 %v7248_v41, %v7247_v44  ;;  %v7277_v48 = vadd.f32 %v7276_v40, %v7275_v28  ;;  %3206 = vrot.lane.b32.xlu0 %v3195_v30, %s10759_s8 }
 0xfb9   : > { %v3198_v45 = vadd.f32 %v7277_v48, %v7249_v47 }
 0xfbb   : > { %3210 = vrot.lane.b32.xlu1 %v3198_v45, %s10761_s28  ;;  %v6878_v45 = vld [vmem:[%s10674_s21] ss:$0 sm:$0xff] }
0x1025   : > { %v3203_v55 = vpop.permute.xlu1 %3202 }
0x1026   : > { %v3213_v20 = vsel %vm10713_vm5, %v3187_v53, %v3203_v55 }
0x1029   : > { %v3207_v4 = vpop.permute.xlu0 %3206 }
0x102a   : > { %v3214_v25 = vsel %vm10711_vm15, %v3213_v20, %v3207_v4 }
0x102d   : > { %v3211_v31 = vpop.permute.xlu1 %3210 }
0x102e   : > { %v3215_v26 = vsel %vm10710_vm13, %v3214_v25, %v3211_v31 }
0x102f   : > { %v3216_v23 = vpack.c.bf16 %v3215_v26, %v3215_v26 }
0x1031   : > { %7594 = vmatmul.mubr.bf16.vlgmr.msra.gmra.mxu1 %v3216_v23 }
0x1032   : > { %7621 = vmatprep.mubr.msk.bf16.mxu1 %vm8373_vm0, %v8372_v0 }
0x10f1   : > { %v3305_v34 = vpop.f32.mrf.mxu1 }
0x10f2   : > { %v3306_v50 = vadd.f32 %v6861_v27, %v3305_v34 }
0x10f3   : > { %v7595_v46 = vpop.f32.mrf.mxu1 }
0x10f4   : > { %v3311_v52 = vadd.f32 %v3306_v50, %v9402_v62  ;;  %v7996_v62 = vld [vmem:[%s10671_s18] sm:$0xff]  }
0x10f5   : > { %v3308_v59 = vpop.f32.mrf.mxu1  ;;  %7600 = vmatpush3.bf16.msra.mxu0 %v7996_v62 }
0x10f6   : > { %v3316_v5 = vsel %vm10713_vm5, %v3311_v52, 0.0  ;;  %7605 = vmatprep.subr.bf16.mxu0 %v8372_v0  ;;  %v8001_v59 = vld [vmem:[%s10675_s22 + $0x8] sm:$0xff]  }
0x10f7   : > { %3317 = vadd.xlane.f32.xlu1 %v3316_v5  ;;  %v7596_v43 = vpop.f32.mrf.mxu1  ;;  %7618 = vmatpush3.bf16.msra.mxu1 %v8001_v59  ;;  %v8002_v5 = vld [vmem:[%s10675_s22] sm:$0xff]  }
0x10f8   : > { %7619 = vmatprep.subr.bf16.mxu1 %v8372_v0  ;;  %v8003_v43 = vld [vmem:[%s10677_s24 + $0x38] sm:$0xff]  }
0x10fb   : > { %7620 = vmatpush3.bf16.msra.mxu1 %v8002_v5 }
0x10fc   : > { %7645 = vmatprep.subr.mxu1 %v8372_v0 }
0x1180   : > { %v3318_v29 = vpop.xlane.xlu1 %3317 }
0x1181   : > { %v3319_v10 = vmul.f32 0.03125, %v3318_v29  ;;  %v8004_v29 = vld [vmem:[%s10677_s24 + $0x30] sm:$0xff]  }
0x1183   : > { %v3320_v14 = vsub.f32 %v3311_v52, %v3319_v10  ;;  %v8005_v10 = vld [vmem:[%s10677_s24 + $0x28] sm:$0xff]  }
0x1185   : > { %v3321_v3 = vmul.f32 %v3320_v14, %v3320_v14 }
0x1187   : > { %v3322_v17 = vsel %vm10713_vm5, %v3321_v3, 0.0  ;;  %v8007_v3 = vld [vmem:[%s10677_s24 + $0x18] sm:$0xff]  }
0x1188   : > { %3323 = vadd.xlane.f32.xlu0 %v3322_v17  ;;  %v8008_v17 = vld [vmem:[%s10677_s24 + $0x10] sm:$0xff]  }
0x1211   : > { %v3324_v16 = vpop.xlane.xlu0 %3323 }
0x1212   : > { %v3325_v39 = vmul.f32 0.03125, %v3324_v16 }
0x1214   : > { %v3326_v53 = vadd.f32 1e-05, %v3325_v39 }
0x1216   : > { %8197 = vrsqrt.f32 %v3326_v53  ;;  %v6886_v53 = vld [vmem:[%s10670_s17 + $0x4] ss:$0 sm:$0xff] }
0x1223   : > { %v8198_v13 = vpop.eup %8197 }
0x1224   : > { %v3328_v36 = vmul.f32 %v8198_v13, %v3320_v14  ;;  %v8006_v14 = vld [vmem:[%s10677_s24 + $0x20] sm:$0xff]  }
0x1226   : > { %v3335_v51 = vmul.f32 %v6872_v57, %v3328_v36  ;;  %v6887_v57 = vld [vmem:[%s10670_s17 + $0x5] ss:$0 sm:$0xff] }
0x1228   : > { %v3342_v61 = vadd.f32 %v6873_v1, %v3335_v51 }
0x122a   : > { %v3343_v49 = vpack.c.bf16 %v3342_v61, %v3342_v61 }
0x122c   : > { %7602 = vmatmul.mubr.msk.bf16.vlgmr.msra.gmra.mxu0 %vm10713_vm5, %v3343_v49  ;;  %v8010_v49 = vld [vmem:[%s10677_s24] sm:$0xff]  }
0x122d   : > { %7606 = vmatpush3.bf16.msra.mxu0 %v7997_v24  ;;  %7613 = vmatprep.mubr.msk.bf16.mxu0 %vm8373_vm0, %v8372_v0  ;;  %v8009_v24 = vld [vmem:[%s10677_s24 + $0x8] sm:$0xff]  }
0x122e   : > { %7607 = vmatprep.subr.bf16.mxu0 %v8372_v0 }
0x1231   : > { %7608 = vmatpush3.bf16.msra.mxu0 %v7998_v37  ;;  %v3706_v37 = vmax.f32 %v8573_v6, 0.0 }
0x1232   : > { %7609 = vmatprep.subr.bf16.mxu0 %v8372_v0 }
0x1235   : > { %7610 = vmatpush3.bf16.msra.mxu0 %v7999_v22  ;;  %v3707_v22 = vmin.f32 %v3706_v37, 1.0 }
0x1236   : > { %7611 = vmatprep.subr.bf16.mxu0 %v8372_v0 }
0x1239   : > { %7612 = vmatpush3.bf16.msra.mxu0 %v8000_v58  ;;  %v3709_v58 = vsub.f32 1.0, %v3707_v22 }
0x123a   : > { %7625 = vmatprep.subr.bf16.mxu0 %v8372_v0 }
0x12ec   : > { %v3404_v44 = vpop.f32.mrf.mxu0 }
0x12ed   : > { %v3405_v28 = vadd.f32 %v6874_v7, %v3404_v44  ;;  %v3710_v7 = vmax.f32 %v3709_v58, 0.001  ;;  %v3708_v44 = vmax.f32 %v3707_v22, 0.001 }
0x12ee   : > { %v7603_v30 = vpop.f32.mrf.mxu0 }
0x12ef   : > { %v3410_v41 = vmax.f32 %v3405_v28, 0.0 }
0x12f0   : > { %v3407_v40 = vpop.f32.mrf.mxu0 }
0x12f1   : > { %v3411_v47 = vpack.c.bf16 %v3410_v41, %v3410_v41 }
0x12f2   : > { %v7604_v48 = vpop.f32.mrf.mxu0 }
0x12f3   : > { %7614 = vmatmul.mubr.msk.bf16.vlgmr.msra.gmra.mxu0 %vm10711_vm15, %v3411_v47  ;;  %v6888_v47 = vld [vmem:[%s10676_s23] ss:$0 sm:$0xff] }
0x12f4   : > { %7641 = vmatprep.mubr.msk.bf16.mxu0 %vm8373_vm0, %v8372_v0  ;;  %7626 = vmatpush3.bf16.msra.mxu0 %v8003_v43 }
0x12f5   : > { %7627 = vmatprep.subr.bf16.mxu0 %v8372_v0 }
0x12f8   : > { %7628 = vmatpush3.bf16.msra.mxu0 %v8004_v29 }
0x12f9   : > { %7629 = vmatprep.subr.bf16.mxu0 %v8372_v0 }
0x12fc   : > { %7630 = vmatpush3.bf16.msra.mxu0 %v8005_v10 }
0x12fd   : > { %7631 = vmatprep.subr.bf16.mxu0 %v8372_v0 }
0x1300   : > { %7632 = vmatpush3.bf16.msra.mxu0 %v8006_v14 }
0x1301   : > { %7633 = vmatprep.subr.bf16.mxu0 %v8372_v0 }
0x1304   : > { %7634 = vmatpush3.bf16.msra.mxu0 %v8007_v3 }
0x1305   : > { %7635 = vmatprep.subr.bf16.mxu0 %v8372_v0 }
0x1308   : > { %7636 = vmatpush3.bf16.msra.mxu0 %v8008_v17 }
0x1309   : > { %7637 = vmatprep.subr.bf16.mxu0 %v8372_v0 }
0x130c   : > { %7638 = vmatpush3.bf16.msra.mxu0 %v8009_v24 }
0x130d   : > { %7639 = vmatprep.subr.bf16.mxu0 %v8372_v0 }
0x1310   : > { %7640 = vmatpush3.bf16.msra.mxu0 %v8010_v49 }
0x13b3   : > { %v3488_v55 = vpop.f32.mrf.mxu0 }
0x13b4   : > { %v3489_v4 = vadd.f32 %v6878_v45, %v3488_v55 }
0x13b5   : > { %v7615_v20 = vpop.f32.mrf.mxu0 }
0x13b6   : > { %v3494_v25 = vadd.f32 %v3489_v4, %v3342_v61  ;;  %v8329_v61 = vld [vmem:[%s8554_s0] sm:$0xf]  ;;  %s8393_s0 = smov 6  }
0x13b7   : > { %v3491_v31 = vpop.f32.mrf.mxu0 }
0x13b8   : > { %v3499_v26 = vsel %vm10713_vm5, %v3494_v25, 0.0  ;;  %v6892_v31 = vld [vmem:[%s10764_s14] ss:$0 sm:$0xff] }
0x13b9   : > { %3500 = vadd.xlane.f32.xlu0 %v3499_v26  ;;  %v7616_v23 = vpop.f32.mrf.mxu0 }
0x1442   : > { %v3501_v27 = vpop.xlane.xlu0 %3500 }
0x1443   : > { %v3502_v34 = vmul.f32 0.03125, %v3501_v27 }
0x1445   : > { %v3503_v50 = vsub.f32 %v3494_v25, %v3502_v34 }
0x1447   : > { %v3504_v46 = vmul.f32 %v3503_v50, %v3503_v50 }
0x1449   : > { %v3505_v52 = vsel %vm10713_vm5, %v3504_v46, 0.0 }
0x144a   : > { %3506 = vadd.xlane.f32.xlu1 %v3505_v52 }
0x14d3   : > { %v3507_v35 = vpop.xlane.xlu1 %3506 }
0x14d4   : > { %v3508_v62 = vmul.f32 0.03125, %v3507_v35 }
0x14d6   : > { %v3509_v16 = vadd.f32 1e-05, %v3508_v62 }
0x14d8   : > { %8199 = vrsqrt.f32 %v3509_v16 }
0x14d9   : > { %8201 = vrcp.f32 %v3710_v7 }
0x14e5   : > { %v8200_v39 = vpop.eup %8199 }
0x14e6   : > { %v3511_v13 = vmul.f32 %v8200_v39, %v3503_v50  ;;  %v8202_v28 = vpop.eup %8201 }
0x14e7   : > { %v3712_v30 = vmul.f32 %v8202_v28, %v3708_v44 }
0x14e8   : > { %v3518_v36 = vmul.f32 %v6886_v53, %v3511_v13 }
0x14e9   : > { %8203 = vlog2.f32 %v3712_v30 }
0x14ea   : > { %v3525_v1 = vadd.f32 %v6887_v57, %v3518_v36  ;;  %v8395_v57 = vmov 6  }
0x14eb   : > { %7889 = vset.pattern.permute.xlu0 %v8395_v57 }
0x14ec   : > { %v3526_v51 = vpack.c.bf16 %v3525_v1, %v3525_v1 }
0x14ee   : > { %7622 = vmatmul.mubr.msk.bf16.vlgmr.msra.gmra.mxu1 %vm10713_vm5, %v3526_v51 }
0x14ef   : > { %7646 = vmatpush3.msk.msra.mxu1 %vm873_vm1, %v8329_v61  ;;  %7647 = vmatprep.mubr.msk.f32.mxu1 %vm8373_vm0, %v8372_v0 }
0x14f6   : > { %v8204_v41 = vpop.eup %8203 }
0x14f7   : > { %v3714_v40 = vmul.f32 0.6931472, %v8204_v41 }
0x14f9   : > { %3716 = vrot.lane.b32.xlu0 %v3714_v40, %s8393_s0  ;;  %s10769_s0 = smov 2  }
0x156b   : > { %v3717_v23 = vpop.permute.xlu0 %3716 }
0x15ae   : > { %v3587_v6 = vpop.f32.mrf.mxu1 }
0x15af   : > { %v3588_v48 = vadd.f32 %v6888_v47, %v3587_v6 }
0x15b0   : > { %v7623_v45 = vpop.f32.mrf.mxu1 }
0x15b1   : > { %v3593_v55 = vmax.f32 %v3588_v48, 0.0  ;;  %v8396_v45 = vmov 7  }
0x15b2   : > { %v3590_v4 = vpop.f32.mrf.mxu1  ;;  %7890 = vset.pattern.permute.xlu1 %v8396_v45 }
0x15b3   : > { %v3594_v20 = vpack.c.bf16 %v3593_v55, %v3593_v55 }
0x15b4   : > { %v7624_v25 = vpop.f32.mrf.mxu1 }
0x15b5   : > { %7642 = vmatmul.mubr.bf16.vlgmr.msra.gmra.mxu0 %v3594_v20 }
0x1675   : > { %v3700_v26 = vpop.f32.mrf.mxu0 }
0x1676   : > { %v9613_v27 = vadd.f32 %v6892_v31, %v3700_v26 }
0x1677   : > { %v7643_v34 = vpop.f32.mrf.mxu0 }
0x1678   : > { %v3719_v50 = vadd.f32 %v3717_v23, %v9613_v27 }
0x1679   : > { %v3703_v46 = vpop.f32.mrf.mxu0 }
0x167a   : > { %v6901_v52 = vmul.f32 -1.442695, %v3719_v50 }
0x167b   : > { %v7644_v59 = vpop.f32.mrf.mxu0 }
0x167c   : > { %8205 = vpow2.f32 %v6901_v52 }
0x1689   : > { %v8206_v5 = vpop.eup %8205 }
0x168a   : > { %v3723_v43 = vadd.f32 1.0, %v8206_v5 }
0x168c   : > { %8207 = vrcp.f32 %v3723_v43 }
0x1699   : > { %v9616_v29 = vpop.eup %8207 }
0x169a   : > { %v3726_v10 = vmul.f32 4.0, %v9616_v29 }
0x169c   : > { %v9619_v14 = vadd.f32 -2.0, %v3726_v10  ;;  %v9622_v3 = vadd.f32 0.5, %v3726_v10 }
0x169e   : > { %3760 = vrot.lane.b32.xlu1 %v9619_v14, %s8394_s2 }
0x16a2   : > { %3763 = vrot.lane.b32.xlu1 %v9622_v3, %s8394_s2  ;;  %s10794_s2 = sld [smem:[#allocation15_spill]] }
0x1710   : > { %v3761_v17 = vpop.permute.xlu1 %3760 }
0x1714   : > { %v3764_v35 = vpop.permute.xlu1 %3763 }
0x1715   : > { %v3766_v62 = vsel %vm865_vm2, %v3761_v17, %v3764_v35  ;;  %v4489_v17 = vmul.f32 6.2831855, %v9616_v29 }
0x1716   : > { %v3767_v16 = vsel %vm10765_vm4, %v3766_v62, 1.0 }
0x1717   : > { %7648 = vmatmul.mubr.msk.f32.vlgmr.msra.gmra.mxu1 %vm10766_vm14, %v3767_v16 }
0x17d7   : > { %v9628_v39 = vpop.f32.mrf.mxu1 }
0x17d8   : > { %v3842_v53 = vmax.f32 %v9628_v39, 1e-05  ;;  %v3843_v51 = vmul.f32 8.0, %v9628_v39  ;;  %vm3841_vm9 = vcmp.gt.f32.partialorder %v9628_v39, 1e-05 }
0x17d9   : > { %v7649_v13 = vpop.f32.mrf.mxu1  ;;  %v3919_v31 = vsel %vm3841_vm9, 1, %v8374_v12 }
0x17da   : > { %3851 = vrot.lane.b32.xlu1 %v3842_v53, %s10767_s13  ;;  %3845 = vrot.lane.b32.xlu0 %v3842_v53, %s10768_s29 }
0x184c   : > { %v3852_v36 = vpop.permute.xlu1 %3851  ;;  %v3846_v1 = vpop.permute.xlu0 %3845 }
0x184d   : > { %8209 = vrcp.f32 %v3852_v36 }
0x184e   : > { %8211 = vrcp.f32 %v3846_v1 }
0x185a   : > { %v8210_v61 = vpop.eup %8209 }
0x185b   : > { %v8212_v24 = vpop.eup %8211  ;;  %v3855_v49 = vmul.f32 %v8210_v61, %v3843_v51 }
0x185c   : > { %v3849_v37 = vmul.f32 %v8212_v24, %v3843_v51 }
0x185d   : > { %v3856_v58 = vadd.f32 7.5, %v3855_v49 }
0x185e   : > { %v3850_v22 = vadd.f32 7.5, %v3849_v37 }
0x185f   : > { %vm3875_vm12 = vcmp.le.f32.partialorder %v3856_v58, 15.0  ;;  %vm3869_vm6 = vcmp.ge.f32.partialorder %v3856_v58, 0.0  ;;  %v9640_v30 = vfloor.f32 %v3856_v58 }
0x1860   : > { %vm3863_vm2 = vcmp.le.f32.partialorder %v3850_v22, 15.0  ;;  %v9634_v7 = vfloor.f32 %v3850_v22  ;;  %vm3857_vm7 = vcmp.ge.f32.partialorder %v3850_v22, 0.0  ;;  %v3876_v40 = vsel %vm3875_vm12, 1, %v8374_v12 }
0x1861   : > { %v3864_v44 = vsel %vm3863_vm2, 1, %v8374_v12  ;;  %v3858_v28 = vsel %vm3857_vm7, 1, %v8374_v12  ;;  %v3870_v47 = vsel %vm3869_vm6, 1, %v8374_v12  ;;  %vm3907_vm10 = vcmp.ge.f32.partialorder %v9640_v30, 0.0 }
0x1862   : > { %3865 = vrot.lane.b32.xlu1 %v3864_v44, %s10769_s0  ;;  %3859 = vrot.lane.b32.xlu0 %v3858_v28, %s10769_s0  ;;  %v9643_v41 = vadd.f32 1.0, %v9634_v7  ;;  %v9653_v48 = vsub.f32 %v3850_v22, %v9634_v7  ;;  %v3887_v55 = vsub.f32 %v3856_v58, %v9640_v30  ;;  %v3928_v20 = vmax.f32 %v9634_v7, 0.0  ;;  %s8400_s0 = smov 21  }
0x1863   : > { %v3908_v25 = vsel %vm3907_vm10, 1, %v8374_v12  ;;  %vm3913_vm11 = vcmp.le.f32.partialorder %v9640_v30, 15.0  ;;  %v3897_v26 = vadd.f32 1.0, %v9640_v30  ;;  %vm3905_vm13 = vcmp.le.f32.partialorder %v9634_v7, 15.0 }
0x1864   : > { %v3961_v6 = vmax.f32 %v9643_v41, 0.0  ;;  %v3889_v23 = vsub.f32 1.0, %v3887_v55  ;;  %v3929_v50 = vmin.f32 %v3928_v20, 15.0  ;;  %v3914_v46 = vsel %vm3913_vm11, 1, %v8374_v12 }
0x1865   : > { %vm3988_vm3 = vcmp.ge.f32.partialorder %v3897_v26, 0.0  ;;  %vm3994_vm4 = vcmp.le.f32.partialorder %v3897_v26, 15.0  ;;  %vm3955_vm15 = vcmp.ge.f32.partialorder %v9643_v41, 0.0  ;;  %v3924_v39 = vmax.f32 %v9640_v30, 0.0 }
0x1866   : > { %3877 = vrot.lane.b32.xlu1 %v3876_v40, %s10770_s6  ;;  %3871 = vrot.lane.b32.xlu0 %v3870_v47, %s10770_s6  ;;  %v3962_v4 = vmin.f32 %v3961_v6, 15.0  ;;  %v7820_v59 = vtrunc.f32 %v3929_v50  ;;  %v3989_v5 = vsel %vm3988_vm3, 1, %v8374_v12  ;;  %v3995_v10 = vsel %vm3994_vm4, 1, %v8374_v12 }
0x1867   : > { %vm3904_vm4 = vcmp.ge.f32.partialorder %v9634_v7, 0.0  ;;  %v3925_v49 = vmin.f32 %v3924_v39, 15.0  ;;  %v4001_v37 = vmax.f32 %v3897_v26, 0.0  ;;  %v3888_v44 = vsub.f32 1.0, %v9653_v48 }
0x1868   : > { %v7822_v34 = vtrunc.f32 %v3962_v4  ;;  %v7821_v43 = vcvt.f32.s32 %v7820_v59  ;;  %v8397_v20 = vmov 8  }
0x1869   : > { %v7818_v28 = vtrunc.f32 %v3925_v49  ;;  %v4002_v30 = vmin.f32 %v4001_v37, 15.0 }
0x186a   : > { %3909 = vrot.lane.b32.xlu0 %v3908_v25, %s10767_s13  ;;  %3920 = vrot.lane.b32.xlu1 %v3919_v31, %s10768_s29  ;;  %v7823_v52 = vcvt.f32.s32 %v7822_v34  ;;  %s10828_s29 = sld [smem:[#allocation3_spill]] }
0x186b   : > { %v7824_v4 = vtrunc.f32 %v4002_v30 }
0x186e   : > { %3891 = vrot.lane.b32.xlu0 %v3889_v23, %s10767_s13  ;;  %3915 = vrot.lane.b32.xlu1 %v3914_v46, %s10767_s13  ;;  %v7825_v23 = vcvt.f32.s32 %v7824_v4 }
0x1872   : > { %3990 = vrot.lane.b32.xlu0 %v3989_v5, %s10767_s13  ;;  %3964 = vrot.lane.b32.xlu1 %v7823_v52, %s10770_s6  ;;  %v4004_v52 = vmul.u32 16, %v7825_v23 }
0x1876   : > { %3931 = vrot.lane.b32.xlu0 %v7821_v43, %s10770_s6  ;;  %s8398_s6 = smov 12  }
0x187a   : > { %3996 = vrot.lane.b32.xlu0 %v3995_v10, %s10767_s13 }
0x187e   : > { %4498 = vperm.xlu0 %7889, %v4489_v17  }
0x1882   : > { %7893 = vset.pattern.permute.xlu0 %v8374_v12 }
0x18d4   : > { %v3866_v35 = vpop.permute.xlu1 %3865  ;;  %v3860_v62 = vpop.permute.xlu0 %3859 }
0x18d5   : > { %vm3861_vm14 = vcmp.ne.s32.totalorder %v3860_v62, 0  ;;  %vm3867_vm2 = vcmp.ne.s32.totalorder %v3866_v35, 0  ;;  %v9765_v35 = vld [vmem:[%s10746_s10] ss:$0 sm:$0xff] }
0x18d6   : > { %vm3862_vm7 = vmand %vm3841_vm9, %vm3861_vm14  ;;  %vm3956_vm9 = vcmp.le.f32.partialorder %v9643_v41, 15.0  ;;  %v8011_v41 = vld [vmem:[%s8565_s25 + $0x78] sm:$0xff]  }
0x18d7   : > { %vm3868_vm6 = vmand %vm3862_vm7, %vm3867_vm2  ;;  %7309 = vmatprep.subr.bf16.mxu1 %v8011_v41 }
0x18d8   : > { %v3878_v16 = vpop.permute.xlu1 %3877  ;;  %v3872_v53 = vpop.permute.xlu0 %3871  ;;  %vm9688_vm2 = vmand %vm3904_vm4, %vm3905_vm13 }
0x18d9   : > { %vm3879_vm12 = vcmp.ne.s32.totalorder %v3878_v16, 0  ;;  %vm3873_vm10 = vcmp.ne.s32.totalorder %v3872_v53, 0  ;;  %vm9692_vm7 = vmand %vm3955_vm15, %vm3956_vm9  ;;  %v9771_v16 = vld [vmem:[%s10746_s10 + $0x1] ss:$0 sm:$0xff] }
0x18da   : > { %vm3874_vm11 = vmand %vm3868_vm6, %vm3873_vm10 }
0x18db   : > { %vm3880_vm3 = vmand %vm3874_vm11, %vm3879_vm12 }
0x18dc   : > { %v3910_v13 = vpop.permute.xlu0 %3909  ;;  %v3921_v57 = vpop.permute.xlu1 %3920  ;;  %v9681_v36 = vsel %vm3880_vm3, 1.0, %v8372_v0 }
0x18dd   : > { %4053 = vrot.lane.b32.xlu1 %v9681_v36, %s10771_s3  ;;  %vm3911_vm14 = vcmp.ne.s32.totalorder %v3910_v13, 0  ;;  %vm3922_vm15 = vcmp.ne.s32.totalorder %v3921_v57, 0  ;;  %s10811_s3 = sld [smem:[#allocation16_spill]] }
0x18de   : > { %vm3912_vm12 = vmand %vm9688_vm2, %vm3911_vm14 }
0x18df   : > { %vm3958_vm13 = vmand %vm9692_vm7, %vm3911_vm14 }
0x18e0   : > { %v3892_v61 = vpop.permute.xlu0 %3891  ;;  %v3916_v24 = vpop.permute.xlu1 %3915 }
0x18e1   : > { %vm3917_vm6 = vcmp.ne.s32.totalorder %v3916_v24, 0  ;;  %3899 = vrot.lane.b32.xlu1 %v3887_v55, %s10767_s13  ;;  %v3896_v22 = vmul.f32 %v3892_v61, %v9653_v48  ;;  %v3894_v47 = vmul.f32 %v3892_v61, %v3888_v44  ;;  %v9723_v55 = vcvt.f32.s32 %v7818_v28 }
0x18e2   : > { %vm9702_vm10 = vmand %vm3912_vm12, %vm3917_vm6 }
0x18e3   : > { %vm3959_vm11 = vmand %vm3958_vm13, %vm3917_vm6  ;;  %v3927_v26 = vmul.u32 16, %v9723_v55  ;;  %v8024_v55 = vld [vmem:[%s8565_s25 + $0xe0] sm:$0xff]  }
0x18e4   : > { %v3991_v7 = vpop.permute.xlu0 %3990  ;;  %vm3960_vm3 = vmand %vm3959_vm11, %vm3922_vm15  ;;  %v9740_v46 = vpop.permute.xlu1 %3964 }
0x18e5   : > { %vm3992_vm4 = vcmp.ne.s32.totalorder %v3991_v7, 0  ;;  %4492 = vperm.xlu1 %7890, %v4489_v17   ;;  %v3974_v40 = vsel %vm3960_vm3, %v3896_v22, 0.0  ;;  %vm3923_vm12 = vmand %vm9702_vm10, %vm3922_vm15  ;;  %v9752_v5 = vadd.s32 %v4004_v52, %v9740_v46 }
0x18e6   : > { %vm9710_vm9 = vmand %vm9688_vm2, %vm3992_vm4  ;;  %3977 = vperm.xlu0 %7893, %v3974_v40   ;;  %v3941_v25 = vsel %vm3923_vm12, %v3894_v47, 0.0 }
0x18e7   : > { %vm9716_vm14 = vmand %vm9692_vm7, %vm3992_vm4 }
0x18e8   : > { %v3932_v45 = vpop.permute.xlu0 %3931 }
0x18e9   : > { %7891 = vset.pattern.permute.xlu1 %v8397_v20  ;;  %v9733_v34 = vadd.s32 %v3932_v45, %v3927_v26  ;;  %v9755_v43 = vadd.s32 %v4004_v52, %v3932_v45 }
0x18ea   : > { %4504 = vperm.xlu1 %7891, %v4489_v17   ;;  %7894 = vset.pattern.permute.xlu0 %v8382_v19 }
0x18eb   : > { %4066 = vperm.xlu0 %7894, %v3941_v25   ;;  %v4097_v10 = vadd.s32 256, %v9755_v43 }
0x18ec   : > { %v3997_v31 = vpop.permute.xlu0 %3996 }
0x18ed   : > { %vm3998_vm2 = vcmp.ne.s32.totalorder %v3997_v31, 0 }
0x18ee   : > { %vm3999_vm7 = vmand %vm9710_vm9, %vm3998_vm2  ;;  %7892 = vset.pattern.permute.xlu1 %v8374_v12 }
0x18ef   : > { %vm9736_vm6 = vmand %vm3999_vm7, %vm3922_vm15  ;;  %3944 = vperm.xlu1 %7892, %v3941_v25   ;;  %7898 = vset.pattern.permute.xlu0 %v8379_v38 }
0x18f0   : > { %vm4028_vm13 = vmand %vm9716_vm14, %vm3998_vm2  ;;  %3935 = vperm.xlu0 %7898, %v9733_v34  }
0x18f1   : > { %vm9746_vm10 = vmand %vm4028_vm13, %vm3922_vm15 }
0x18f3   : > { %7895 = vset.pattern.permute.xlu1 %v8382_v19 }
0x18f4   : > { %4086 = vperm.xlu1 %7895, %v3974_v40   ;;  %4032 = vperm.xlu0 %7898, %v9752_v5   ;;  %v8012_v40 = vld [vmem:[%s8565_s25 + $0xf8] sm:$0xff]  }
0x18f5   : > { %7331 = vmatprep.subr.bf16.mxu0 %v8012_v40 }
0x18f8   : > { %7896 = vset.pattern.permute.xlu1 %v8374_v12  ;;  %7901 = vset.pattern.permute.xlu0 %v8383_v32 }
0x18f9   : > { %4099 = vperm.xlu0 %7901, %v4097_v10   ;;  %v4499_v17 = vpop.permute.xlu0 %4498 }
0x18fa   : > { %v4501_v62 = vmul.f32 %v9765_v35, %v4499_v17  ;;  %v8013_v17 = vld [vmem:[%s8565_s25 + $0x38] sm:$0xff]  }
0x18fb   : > { %7310 = vmatpush3.bf16.msra.mxu1 %v8013_v17 }
0x18fc   : > { %v9774_v53 = vadd.f32 %v9771_v16, %v4501_v62  ;;  %v8014_v62 = vld [vmem:[%s8565_s25 + $0xb8] sm:$0xff]  }
0x18fd   : > { %7902 = vset.pattern.permute.xlu0 %v8382_v19  ;;  %7332 = vmatpush3.bf16.msra.mxu0 %v8014_v62 }
0x18fe   : > { %v4616_v13 = vand.u32 2139095040, %v9774_v53 }
0x1900   : > { %v4617_v57 = vshrl.u32 %v4616_v13, 23  ;;  %v8015_v13 = vld [vmem:[%s8565_s25 + $0x70] sm:$0xff]  }
0x1901   : > { %7311 = vmatprep.subr.bf16.mxu1 %v8015_v13 }
0x1902   : > { %v6941_v39 = vadd.s32 4294967169, %v4617_v57 }
0x1904   : > { %v4623_v1 = vadd.s32 1, %v6941_v39  ;;  %v8016_v39 = vld [vmem:[%s8565_s25 + $0xf0] sm:$0xff]  }
0x1905   : > { %7333 = vmatprep.subr.bf16.mxu0 %v8016_v39 }
0x1906   : > { %vm4624_vm15 = vcmp.gt.s32.totalorder %v4623_v1, 0 }
0x1907   : > { %v4625_v51 = vsel %vm4624_vm15, %v4623_v1, 0 }
0x1908   : > { %v4627_v61 = vand.u32 31, %v4625_v51 }
0x190a   : > { %v9779_v49 = vsub.s32 32, %v4627_v61  ;;  %v4639_v6 = vshll.u32 %v8384_v54, %v4627_v61  ;;  %v4642_v31 = vshll.u32 %v8385_v56, %v4627_v61  ;;  %v4630_v50 = vshll.u32 %v8387_v63, %v4627_v61 }
0x190b   : > { %v4633_v52 = vshll.u32 %v8388_v2, %v4627_v61  ;;  %v4636_v59 = vshll.u32 %v8389_v11, %v4627_v61 }
0x190c   : > { %v4640_v30 = vshrl.u32 %v8385_v56, %v9779_v49  ;;  %v4643_v47 = vshrl.u32 %v8386_v60, %v9779_v49  ;;  %v4631_v45 = vshrl.u32 %v8388_v2, %v9779_v49  ;;  %v4634_v4 = vshrl.u32 %v8389_v11, %v9779_v49 }
0x190d   : > { %v4637_v25 = vshrl.u32 %v8384_v54, %v9779_v49 }
0x190e   : > { %v4641_v23 = vor.u32 %v4640_v30, %v4639_v6  ;;  %v4644_v10 = vor.u32 %v4643_v47, %v4642_v31  ;;  %v9812_v1 = vor.u32 %v4631_v45, %v4630_v50  ;;  %v8020_v6 = vld [vmem:[%s8565_s25 + $0xe8] sm:$0xff]  }
0x190f   : > { %v8021_v45 = vld [vmem:[%s8565_s25 + $0x28] sm:$0xff]  }
0x1910   : > { %v8022_v50 = vld [vmem:[%s8565_s25 + $0xa8] sm:$0xff]  }
0x194f   : > { %v9777_v24 = vpop.permute.xlu1 %4053 }
0x1953   : > { %v3900_v37 = vpop.permute.xlu1 %3899 }
0x1954   : > { %v3902_v22 = vmul.f32 %v3900_v37, %v3888_v44  ;;  %v3903_v58 = vmul.f32 %v3900_v37, %v9653_v48  ;;  %v4613_v44 = vand.u32 2147483647, %v9774_v53  ;;  %v9793_v48 = vshrl.u32 %v4625_v51, 5 }
0x1955   : > { %v9814_v51 = vor.u32 %v4634_v4, %v4633_v52  ;;  %v4638_v37 = vor.u32 %v4637_v25, %v4636_v59  ;;  %v4056_v59 = vadd.f32 %v9681_v36, %v9777_v24  ;;  %v3966_v36 = vadd.s32 %v9740_v46, %v3927_v26  ;;  %v8025_v26 = vld [vmem:[%s8565_s25 + $0x20] sm:$0xff]  }
0x1956   : > { %v4038_v7 = vsel %vm9746_vm10, %v3903_v58, 0.0  ;;  %v4013_v28 = vsel %vm9736_vm6, %v3902_v22, 0.0  ;;  %v4620_v57 = vand.u32 8388607, %v4613_v44  ;;  %vm4648_vm11 = vcmp.lt.s32.totalorder %v9793_v48, 4  ;;  %v8017_v22 = vld [vmem:[%s8565_s25 + $0x30] sm:$0xff]  }
0x1957   : > { %4126 = vperm.xlu0 %7902, %v4038_v7   ;;  %4016 = vperm.xlu1 %7896, %v4013_v28   ;;  %v8018_v58 = vld [vmem:[%s8565_s25 + $0xb0] sm:$0xff]   ;;  %v4654_v61 = vsel %vm4648_vm11, %v4641_v23, 920167782  ;;  %vm4645_vm3 = vcmp.lt.s32.totalorder %v9793_v48, 1  ;;  %vm4647_vm4 = vcmp.lt.s32.totalorder %v9793_v48, 3  ;;  %vm4646_vm9 = vcmp.lt.s32.totalorder %v9793_v48, 2 }
0x1958   : > { %v4621_v40 = vor.u32 8388608, %v4620_v57  ;;  %v4655_v47 = vsel %vm4647_vm4, %v4638_v37, %v4654_v61  ;;  %7312 = vmatpush3.bf16.msra.mxu1 %v8017_v22  ;;  %7334 = vmatpush3.bf16.msra.mxu0 %v8018_v58  ;;  %v4657_v4 = vsel %vm4645_vm3, %v9814_v51, %v4638_v37  ;;  %v8023_v61 = vld [vmem:[%s8565_s25 + $0x60] sm:$0xff]  }
0x1959   : > { %7335 = vmatprep.subr.bf16.mxu0 %v8020_v6  ;;  %v8029_v6 = vld [vmem:[%s8565_s25 + $0x18] sm:$0xff]  }
0x195b   : > { %4041 = vperm.xlu1 %7896, %v4038_v7   ;;  %v4658_v7 = vsel %vm4648_vm11, %v4644_v10, 1326507024 }
0x195c   : > { %v4659_v25 = vsel %vm4647_vm4, %v4641_v23, %v4658_v7  ;;  %7336 = vmatpush3.bf16.msra.mxu0 %v8022_v50  ;;  %v8026_v7 = vld [vmem:[%s8565_s25 + $0xa0] sm:$0xff]   ;;  %v8031_v50 = vld [vmem:[%s8565_s25 + $0x50] sm:$0xff]  }
0x195d   : > { %v4660_v17 = vsel %vm4646_vm9, %v4657_v4, %v4659_v25  ;;  %7337 = vmatprep.subr.bf16.mxu0 %v8024_v55 }
0x195f   : > { %7897 = vset.pattern.permute.xlu1 %v8382_v19  ;;  %v4653_v19 = vsel %vm4645_vm3, %v9812_v1, %v9814_v51 }
0x1960   : > { %4106 = vperm.xlu1 %7897, %v4013_v28   ;;  %v4493_v30 = vpop.permute.xlu1 %4492  ;;  %v8019_v28 = vld [vmem:[%s8565_s25 + $0x68] sm:$0xff]   ;;  %v4656_v52 = vsel %vm4646_vm9, %v4653_v19, %v4655_v47  ;;  %7338 = vmatpush3.bf16.msra.mxu0 %v8026_v7  ;;  %v4629_v19 = vshrl.u32 %v8387_v63, %v9779_v49  ;;  %v8027_v47 = vld [vmem:[%s8565_s25 + $0x58] sm:$0xff]   ;;  %v8041_v7 = vld [vmem:[%s8565_s25] sm:$0xff]  }
0x1961   : > { %v4495_v41 = vmul.f32 %v9765_v35, %v4493_v30  ;;  %7313 = vmatprep.subr.bf16.mxu1 %v8019_v28  ;;  %v8028_v28 = vld [vmem:[%s8565_s25 + $0xd8] sm:$0xff]  }
0x1962   : > { %7314 = vmatpush3.bf16.msra.mxu1 %v8021_v45  ;;  %7339 = vmatprep.subr.bf16.mxu0 %v8028_v28 }
0x1963   : > { %v9842_v31 = vadd.f32 %v9771_v16, %v4495_v41  ;;  %7315 = vmatprep.subr.bf16.mxu1 %v8023_v61  ;;  %v4650_v41 = vsel %vm4648_vm11, %v4638_v37, 2102212464  ;;  %v4649_v37 = vsel %vm4645_vm3, %v4629_v19, %v9812_v1 }
0x1964   : > { %7899 = vset.pattern.permute.xlu1 %v8379_v38  ;;  %v9855_v38 = vshll.u32 %v4621_v40, 8  ;;  %v4651_v49 = vsel %vm4647_vm4, %v9814_v51, %v4650_v41  ;;  %v8034_v51 = vld [vmem:[%s8565_s25 + $0x90] sm:$0xff]   ;;  %v8042_v41 = vld [vmem:[%s8565_s25 + $0x80] sm:$0xff]  }
0x1965   : > { %v4512_v10 = vand.u32 2139095040, %v9842_v31  ;;  %4007 = vperm.xlu1 %7899, %v9755_v43   ;;  %v4505_v23 = vpop.permute.xlu1 %4504 }
0x1966   : > { %v4507_v62 = vmul.f32 %v9765_v35, %v4505_v23  ;;  %v9862_v24 = vmul.u32.u64.low %v9855_v38, %v4656_v52  ;;  %v9863_v13 = vmul.u32.u64.high %v9855_v38, %v4656_v52, %v9862_v24  ;;  %v4137_v35 = vmax.f32 %v4056_v59, 1.0  ;;  %7316 = vmatpush3.bf16.msra.mxu1 %v8025_v26  ;;  %v8032_v52 = vld [vmem:[%s8565_s25 + $0xd0] sm:$0xff]  }
0x1967   : > { %v4513_v43 = vshrl.u32 %v4512_v10, 23  ;;  %v9870_v39 = vmul.u32.u64.low %v9855_v38, %v4660_v17  ;;  %v9871_v22 = vmul.u32.u64.high %v9855_v38, %v4660_v17, %v9870_v39  ;;  %7317 = vmatprep.subr.bf16.mxu1 %v8027_v47  ;;  %v8033_v59 = vld [vmem:[%s8565_s25 + $0x10] sm:$0xff]   ;;  %v4652_v10 = vsel %vm4646_vm9, %v4649_v37, %v4651_v49  ;;  %v8035_v17 = vld [vmem:[%s8565_s25 + $0x48] sm:$0xff]  }
0x1968   : > { %v9867_v57 = vadd.f32 %v9771_v16, %v4507_v62  ;;  %v4057_v16 = vadd.s32 256, %v9733_v34  ;;  %8213 = vrcp.f32 %v4137_v35  ;;  %v8030_v34 = vld [vmem:[%s8565_s25 + $0x98] sm:$0xff]   ;;  %v4671_v25 = vadd.s32 1, %v9863_v13  ;;  %v8036_v62 = vld [vmem:[%s8565_s25 + $0xc8] sm:$0xff]  }
0x1969   : > { %v6937_v58 = vadd.s32 4294967169, %v4513_v43  ;;  %3968 = vperm.xlu1 %7899, %v3966_v36   ;;  %7340 = vmatpush3.bf16.msra.mxu0 %v8030_v34  ;;  %vm4670_vm12 = vc.u32 %v9871_v22, %v9862_v24  ;;  %v8037_v39 = vld [vmem:[%s8565_s25 + $0x8] sm:$0xff]  }
0x196a   : > { %v4720_v46 = vand.u32 2139095040, %v9867_v57  ;;  %7318 = vmatpush3.bf16.msra.mxu1 %v8029_v6  ;;  %7341 = vmatprep.subr.bf16.mxu0 %v8032_v52  ;;  %v4672_v43 = vsel %vm4670_vm12, %v4671_v25, %v9863_v13  ;;  %v8038_v35 = vld [vmem:[%s8565_s25 + $0x88] sm:$0xff]  }
0x196b   : > { %v4519_v30 = vadd.s32 1, %v6937_v58  ;;  %7319 = vmatprep.subr.bf16.mxu1 %v8031_v50  ;;  %v4668_v58 = vmul.u32 %v9855_v38, %v4652_v10  ;;  %v8039_v38 = vld [vmem:[%s8565_s25 + $0x40] sm:$0xff]  }
0x196c   : > { %v4721_v40 = vshrl.u32 %v4720_v46, 23  ;;  %v8040_v46 = vld [vmem:[%s8565_s25 + $0xc0] sm:$0xff]  }
0x196d   : > { %vm4520_vm14 = vcmp.gt.s32.totalorder %v4519_v30, 0  ;;  %7900 = vset.pattern.permute.xlu1 %v8383_v32  ;;  %v4077_v32 = vadd.s32 256, %v3966_v36  ;;  %v4117_v36 = vadd.s32 256, %v9752_v5  ;;  %7342 = vmatpush3.bf16.msra.mxu0 %v8034_v51  ;;  %v9912_v5 = vadd.s32 %v4672_v43, %v4668_v58 }
0x196e   : > { %v6945_v45 = vadd.s32 4294967169, %v4721_v40  ;;  %4059 = vperm.xlu1 %7900, %v4057_v16   ;;  %v4521_v4 = vsel %vm4520_vm14, %v4519_v30, 0  ;;  %7320 = vmatpush3.bf16.msra.mxu1 %v8033_v59  ;;  %v4509_v16 = vand.u32 2147483647, %v9842_v31  ;;  %v4717_v59 = vand.u32 2147483647, %v9867_v57 }
0x196f   : > { %v4523_v23 = vand.u32 31, %v4521_v4  ;;  %7321 = vmatprep.subr.bf16.mxu1 %v8035_v17  ;;  %7343 = vmatprep.subr.bf16.mxu0 %v8036_v62  ;;  %v4674_v30 = vadd.s32 536870912, %v9912_v5  ;;  %v9931_v28 = vshrl.u32 %v4521_v4, 5 }
0x1970   : > { %v4727_v1 = vadd.s32 1, %v6945_v45  ;;  %v4516_v4 = vand.u32 8388607, %v4509_v16 }
0x1971   : > { %v9910_v48 = vsub.s32 32, %v4523_v23  ;;  %7344 = vmatpush3.bf16.msra.mxu0 %v8038_v35  ;;  %v4535_v40 = vshll.u32 %v8384_v54, %v4523_v23  ;;  %v4538_v49 = vshll.u32 %v8385_v56, %v4523_v23  ;;  %v4526_v25 = vshll.u32 %v8387_v63, %v4523_v23 }
0x1972   : > { %4079 = vperm.xlu1 %7900, %v4077_v32   ;;  %vm4728_vm2 = vcmp.gt.s32.totalorder %v4727_v1, 0  ;;  %7322 = vmatpush3.bf16.msra.mxu1 %v8037_v39  ;;  %v9940_v32 = vshrl.u32 %v4674_v30, 30  ;;  %v4529_v50 = vshll.u32 %v8388_v2, %v4523_v23  ;;  %v4532_v52 = vshll.u32 %v8389_v11, %v4523_v23 }
0x1973   : > { %v4729_v61 = vsel %vm4728_vm2, %v4727_v1, 0  ;;  %v4536_v26 = vshrl.u32 %v8385_v56, %v9910_v48  ;;  %v4539_v19 = vshrl.u32 %v8386_v60, %v9910_v48  ;;  %7323 = vmatprep.subr.bf16.mxu1 %v8039_v38  ;;  %7345 = vmatprep.subr.bf16.mxu0 %v8040_v46  ;;  %v4527_v6 = vshrl.u32 %v8388_v2, %v9910_v48 }
0x1974   : > { %v4731_v13 = vand.u32 31, %v4729_v61  ;;  %v4530_v45 = vshrl.u32 %v8389_v11, %v9910_v48  ;;  %v4533_v34 = vshrl.u32 %v8384_v54, %v9910_v48  ;;  %vm4544_vm7 = vcmp.lt.s32.totalorder %v9931_v28, 4 }
0x1975   : > { %v8214_v55 = vpop.eup %8213  ;;  %7346 = vmatpush3.bf16.msra.mxu0 %v8042_v41  ;;  %v4537_v37 = vor.u32 %v4536_v26, %v4535_v40  ;;  %v4540_v1 = vor.u32 %v4539_v19, %v4538_v49  ;;  %v4528_v10 = vor.u32 %v4527_v6, %v4526_v25  ;;  %v9956_v39 = vshrl.u32 %v4729_v61, 5 }
0x1976   : > { %4119 = vperm.xlu1 %7900, %v4117_v36   ;;  %v9926_v47 = vsub.s32 32, %v4731_v13  ;;  %7324 = vmatpush3.bf16.msra.mxu1 %v8041_v7  ;;  %v4531_v17 = vor.u32 %v4530_v45, %v4529_v50  ;;  %v4534_v36 = vor.u32 %v4533_v34, %v4532_v52  ;;  %v4743_v23 = vshll.u32 %v8384_v54, %v4731_v13 }
0x1977   : > { %7650 = vmatprep.subr.bf16.mxu0 %v8372_v0  ;;  %v4550_v43 = vsel %vm4544_vm7, %v4537_v37, 920167782  ;;  %v4746_v26 = vshll.u32 %v8385_v56, %v4731_v13  ;;  %vm4541_vm6 = vcmp.lt.s32.totalorder %v9931_v28, 1  ;;  %vm4543_vm13 = vcmp.lt.s32.totalorder %v9931_v28, 3 }
0x1978   : > { %v4744_v51 = vshrl.u32 %v8385_v56, %v9926_v47  ;;  %v4747_v62 = vshrl.u32 %v8386_v60, %v9926_v47  ;;  %v4735_v35 = vshrl.u32 %v8388_v2, %v9926_v47  ;;  %v4738_v58 = vshrl.u32 %v8389_v11, %v9926_v47 }
0x1979   : > { %v4554_v60 = vsel %vm4544_vm7, %v4540_v1, 1326507024  ;;  %v4734_v38 = vshll.u32 %v8387_v63, %v4731_v13  ;;  %v4737_v46 = vshll.u32 %v8388_v2, %v4731_v13  ;;  %v4740_v7 = vshll.u32 %v8389_v11, %v4731_v13 }
0x197a   : > { %7903 = vset.pattern.permute.xlu1 %v8381_v18  ;;  %v8043_v18 = vld [vmem:[%s10747_s4 + $0x78] sm:$0xff]   ;;  %v4745_v61 = vor.u32 %v4744_v51, %v4743_v23  ;;  %v4748_v30 = vor.u32 %v4747_v62, %v4746_v26  ;;  %v4517_v41 = vor.u32 8388608, %v4516_v4  ;;  %v4551_v56 = vsel %vm4543_vm13, %v4534_v36, %v4550_v43 }
0x197b   : > { %4142 = vperm.xlu1 %7903, %v8214_v55   ;;  %7353 = vmatprep.subr.bf16.mxu1 %v8043_v18  ;;  %v4741_v55 = vshrl.u32 %v8384_v54, %v9926_v47  ;;  %v4549_v54 = vsel %vm4541_vm6, %v4528_v10, %v4531_v17  ;;  %v4724_v40 = vand.u32 8388607, %v4717_v59  ;;  %v4736_v19 = vor.u32 %v4735_v35, %v4734_v38 }
0x197c   : > { %v4739_v18 = vor.u32 %v4738_v58, %v4737_v46  ;;  %vm4752_vm10 = vcmp.lt.s32.totalorder %v9956_v39, 4  ;;  %v4553_v2 = vsel %vm4541_vm6, %v4531_v17, %v4534_v36  ;;  %v4555_v11 = vsel %vm4543_vm13, %v4537_v37, %v4554_v60 }
0x197d   : > { %v4742_v6 = vor.u32 %v4741_v55, %v4740_v7  ;;  %v4758_v13 = vsel %vm4752_vm10, %v4745_v61, 920167782  ;;  %v4676_v45 = vshll.u32 %v9940_v32, 30  ;;  %vm4542_vm15 = vcmp.lt.s32.totalorder %v9931_v28, 2 }
0x197e   : > { %v4762_v34 = vsel %vm4752_vm10, %v4748_v30, 1326507024  ;;  %v4552_v49 = vsel %vm4542_vm15, %v4549_v54, %v4551_v56  ;;  %v4557_v4 = vshll.u32 %v4517_v41, 8  ;;  %vm4749_vm11 = vcmp.lt.s32.totalorder %v9956_v39, 1 }
0x197f   : > { %vm4751_vm3 = vcmp.lt.s32.totalorder %v9956_v39, 3  ;;  %v4556_v37 = vsel %vm4542_vm15, %v4553_v2, %v4555_v11  ;;  %v4725_v25 = vor.u32 8388608, %v4724_v40  ;;  %v4757_v50 = vsel %vm4749_vm11, %v4736_v19, %v4739_v18 }
0x1980   : > { %v4759_v52 = vsel %vm4751_vm3, %v4742_v6, %v4758_v13  ;;  %v4761_v1 = vsel %vm4749_vm11, %v4739_v18, %v4742_v6  ;;  %v4763_v51 = vsel %vm4751_vm3, %v4745_v61, %v4762_v34  ;;  %vm4750_vm4 = vcmp.lt.s32.totalorder %v9956_v39, 2 }
0x1981   : > { %v10004_v62 = vmul.u32.u64.low %v4557_v4, %v4552_v49  ;;  %v10005_v43 = vmul.u32.u64.high %v4557_v4, %v4552_v49, %v10004_v62  ;;  %v10009_v23 = vmul.u32.u64.low %v4557_v4, %v4556_v37  ;;  %v10010_v35 = vmul.u32.u64.high %v4557_v4, %v4556_v37, %v10009_v23 }
0x1982   : > { %v4760_v58 = vsel %vm4750_vm4, %v4757_v50, %v4759_v52  ;;  %v4677_v55 = vsub.s32 %v9912_v5, %v4676_v45  ;;  %v4764_v26 = vsel %vm4750_vm4, %v4761_v1, %v4763_v51  ;;  %v4765_v60 = vshll.u32 %v4725_v25, 8 }
0x1983   : > { %v4546_v61 = vsel %vm4544_vm7, %v4534_v36, 2102212464  ;;  %v4525_v7 = vshrl.u32 %v8387_v63, %v9910_v48  ;;  %v4567_v40 = vadd.s32 1, %v10005_v43  ;;  %v4754_v36 = vsel %vm4752_vm10, %v4742_v6, 2102212464 }
0x1984   : > { %v10019_v38 = vmul.u32.u64.low %v4765_v60, %v4760_v58  ;;  %v10020_v46 = vmul.u32.u64.high %v4765_v60, %v4760_v58, %v10019_v38  ;;  %v10025_v30 = vmul.u32.u64.low %v4765_v60, %v4764_v26  ;;  %v10026_v41 = vmul.u32.u64.high %v4765_v60, %v4764_v26, %v10025_v30 }
0x1985   : > { %v4679_v54 = vsub.s32 0, %v4677_v55  ;;  %v4545_v5 = vsel %vm4541_vm6, %v4525_v7, %v4528_v10  ;;  %v4547_v56 = vsel %vm4543_vm13, %v4531_v17, %v4546_v61  ;;  %vm4566_vm9 = vc.u32 %v10010_v35, %v10004_v62 }
0x1986   : > { %v4733_v48 = vshrl.u32 %v8387_v63, %v9926_v47  ;;  %v4548_v11 = vsel %vm4542_vm15, %v4545_v5, %v4547_v56  ;;  %v4755_v17 = vsel %vm4751_vm3, %v4739_v18, %v4754_v36  ;;  %v4568_v13 = vsel %vm4566_vm9, %v4567_v40, %v10005_v43 }
0x1987   : > { %v6942_v2 = vmin.u32 %v4679_v54, %v4677_v55  ;;  %v4775_v6 = vadd.s32 1, %v10020_v46  ;;  %v4564_v45 = vmul.u32 %v4557_v4, %v4548_v11  ;;  %vm4774_vm14 = vc.u32 %v10026_v41, %v10019_v38 }
0x1988   : > { %v4753_v10 = vsel %vm4749_vm11, %v4733_v48, %v4736_v19  ;;  %v4669_v61 = vadd.s32 %v9862_v24, %v9871_v22  ;;  %vm4615_vm7 = vcmp.lt.s32.totalorder %v9774_v53, 0  ;;  %vm10065_vm13 = vcmp.le.f32.partialorder %v4613_v44, 0.7853982 }
0x1989   : > { %v4681_v34 = vclz %v6942_v2  ;;  %v4756_v63 = vsel %vm4750_vm4, %v4753_v10, %v4755_v17  ;;  %v4569_v47 = vadd.s32 %v4568_v13, %v4564_v45  ;;  %v4776_v28 = vsel %vm4774_vm14, %v4775_v6, %v10020_v46 }
0x198a   : > { %v4772_v49 = vmul.u32 %v4765_v60, %v4756_v63  ;;  %v4565_v44 = vadd.s32 %v10004_v62, %v10010_v35  ;;  %v4773_v62 = vadd.s32 %v10019_v38, %v10026_v41  ;;  %vm4511_vm14 = vcmp.lt.s32.totalorder %v9842_v31, 0 }
0x198b   : > { %v6943_v19 = vadd.s32 4294967294, %v4681_v34  ;;  %v4570_v37 = vadd.s32 536870912, %v4569_v47 }
0x198c   : > { %v4777_v25 = vadd.s32 %v4776_v28, %v4772_v49 }
0x198d   : > { %vm6944_vm12 = vcmp.lt.s32.totalorder %v6943_v19, 0  ;;  %v10052_v18 = vshrl.u32 %v4570_v37, 30  ;;  %v4699_v37 = vsub.s32 4, %v9940_v32 }
0x198e   : > { %v4778_v50 = vadd.s32 536870912, %v4777_v25  ;;  %v4684_v52 = vsel %vm6944_vm12, 0, %v6943_v19 }
0x198f   : > { %v4572_v4 = vshll.u32 %v10052_v18, 30  ;;  %v4689_v51 = vsub.s32 4294967266, %v4684_v52  ;;  %v4685_v58 = vsub.s32 32, %v4684_v52  ;;  %v4686_v5 = vshll.u32 %v4677_v55, %v4684_v52 }
0x1990   : > { %v10055_v1 = vshrl.u32 %v4778_v50, 30 }
0x1991   : > { %v4573_v43 = vsub.s32 %v4569_v47, %v4572_v4  ;;  %v4690_v23 = vadd.s32 127, %v4689_v51  ;;  %v4687_v7 = vshrl.u32 %v4669_v61, %v4685_v58  ;;  %v3945_v47 = vpop.permute.xlu1 %3944 }
0x1992   : > { %v4780_v39 = vshll.u32 %v10055_v1, 30 }
0x1993   : > { %v4575_v26 = vsub.s32 0, %v4573_v43  ;;  %v4691_v46 = vshll.u32 %v4690_v23, 23  ;;  %v4688_v40 = vor.u32 %v4687_v7, %v4686_v5 }
0x1994   : > { %v4781_v60 = vsub.s32 %v4777_v25, %v4780_v39  ;;  %v10073_v25 = vpop.permute.xlu0 %3977  ;;  %v4700_v39 = vsel %vm4615_vm7, %v4699_v37, %v9940_v32 }
0x1995   : > { %v6938_v30 = vmin.u32 %v4575_v26, %v4573_v43  ;;  %v4692_v56 = vor.u32 4788187, %v4691_v46  ;;  %v4695_v11 = vcvt.s32.f32 %v4688_v40  ;;  %v10077_v51 = vpop.permute.xlu1 %4086  ;;  %v4702_v26 = vsel %vm10065_vm13, 0, %v4700_v39 }
0x1996   : > { %v4783_v54 = vsub.s32 0, %v4781_v60 }
0x1997   : > { %v4577_v36 = vclz %v6938_v30  ;;  %v4693_v2 = vand.u32 2147483647, %v4692_v56  ;;  %v4706_v56 = vadd.s32 3, %v4702_v26 }
0x1998   : > { %v6946_v48 = vmin.u32 %v4783_v54, %v4781_v60  ;;  %v10084_v7 = vpop.permute.xlu0 %4066 }
0x1999   : > { %v6939_v10 = vadd.s32 4294967294, %v4577_v36  ;;  %v4696_v13 = vmul.f32 %v4695_v11, %v4693_v2 }
0x199a   : > { %v4785_v17 = vclz %v6946_v48 }
0x199b   : > { %vm6940_vm2 = vcmp.lt.s32.totalorder %v6939_v10, 0  ;;  %v4697_v45 = vxor.u32 2147483648, %v4696_v13 }
0x199c   : > { %v6947_v6 = vadd.s32 4294967294, %v4785_v17  ;;  %v4580_v34 = vsel %vm6940_vm2, 0, %v6939_v10 }
0x199d   : > { %v4698_v24 = vsel %vm4615_vm7, %v4697_v45, %v4696_v13  ;;  %v4585_v22 = vsub.s32 4294967266, %v4580_v34  ;;  %v4581_v50 = vsub.s32 32, %v4580_v34  ;;  %v4582_v61 = vshll.u32 %v4573_v43, %v4580_v34  ;;  %v3936_v43 = vpop.permute.xlu0 %3935 }
0x199e   : > { %vm6948_vm6 = vcmp.lt.s32.totalorder %v6947_v6, 0  ;;  %v4701_v28 = vsel %vm10065_vm13, %v9774_v53, %v4698_v24  ;;  %v10090_v13 = vand.u32 3, %v4706_v56  ;;  %vm3937_vm10 = vcmp.eq.s32.totalorder %v9047_v15, %v3936_v43 }
0x199f   : > { %v4788_v55 = vsel %vm6948_vm6, 0, %v6947_v6  ;;  %v4586_v49 = vadd.s32 127, %v4585_v22  ;;  %8215 = vcosq.f32 %v4701_v28  ;;  %v4583_v23 = vshrl.u32 %v4565_v44, %v4581_v50 }
0x19a0   : > { %v4793_v19 = vsub.s32 4294967266, %v4788_v55  ;;  %8217 = vsinq.f32 %v4701_v28  ;;  %v4789_v58 = vsub.s32 32, %v4788_v55  ;;  %v4790_v32 = vshll.u32 %v4781_v60, %v4788_v55 }
0x19a1   : > { %v4587_v52 = vshll.u32 %v4586_v49, 23  ;;  %v4584_v54 = vor.u32 %v4583_v23, %v4582_v61  ;;  %vm3938_vm15 = vcmp.eq.s32.totalorder %v9050_v21, %v3936_v43  ;;  %vm4712_vm11 = vcmp.eq.s32.totalorder %v10090_v13, 2  ;;  %v4033_v55 = vpop.permute.xlu0 %4032 }
0x19a2   : > { %v4794_v4 = vadd.s32 127, %v4793_v19  ;;  %v4791_v5 = vshrl.u32 %v4773_v62, %v4789_v58  ;;  %vm3939_vm3 = vcmp.eq.s32.totalorder %v9053_v33, %v3936_v43  ;;  %vm3940_vm4 = vcmp.eq.s32.totalorder %v9058_v42, %v3936_v43 }
0x19a3   : > { %v4588_v46 = vor.u32 4788187, %v4587_v52  ;;  %v4591_v11 = vcvt.s32.f32 %v4584_v54  ;;  %vm4709_vm9 = vcmp.eq.s32.totalorder %v10090_v13, 0  ;;  %v3947_v28 = vsel %vm3937_vm10, %v3945_v47, 0.0 }
0x19a4   : > { %v4795_v35 = vshll.u32 %v4794_v4, 23  ;;  %v4792_v10 = vor.u32 %v4791_v5, %v4790_v32  ;;  %v3948_v49 = vsel %vm3938_vm15, %v3945_v47, 0.0  ;;  %v3949_v50 = vsel %vm3939_vm3, %v3945_v47, 0.0 }
0x19a5   : > { %v4589_v40 = vand.u32 2147483647, %v4588_v46  ;;  %v3950_v44 = vsel %vm3940_vm4, %v3945_v47, 0.0  ;;  %vm4034_vm12 = vcmp.eq.s32.totalorder %v9047_v15, %v4033_v55  ;;  %vm4035_vm2 = vcmp.eq.s32.totalorder %v9050_v21, %v4033_v55  ;;  %v4100_v61 = vpop.permute.xlu0 %4099 }
0x19a6   : > { %v4796_v36 = vor.u32 4788187, %v4795_v35  ;;  %v4799_v34 = vcvt.s32.f32 %v4792_v10  ;;  %vm4036_vm7 = vcmp.eq.s32.totalorder %v9053_v33, %v4033_v55  ;;  %vm4037_vm6 = vcmp.eq.s32.totalorder %v9058_v42, %v4033_v55 }
0x19a7   : > { %v4592_v6 = vmul.f32 %v4591_v11, %v4589_v40  ;;  %vm4104_vm8 = vcmp.eq.s32.totalorder %v9058_v42, %v4100_v61 }
0x19a8   : > { %v4797_v45 = vand.u32 2147483647, %v4796_v36 }
0x19a9   : > { %v4593_v60 = vxor.u32 2147483648, %v4592_v6 }
0x19aa   : > { %v10097_v22 = vmul.f32 %v4799_v34, %v4797_v45 }
0x19ab   : > { %v10111_v52 = vsel %vm4511_vm14, %v4593_v60, %v4592_v6 }
0x19ac   : > { %v8216_v2 = vpop.eup %8215  ;;  %v4801_v4 = vxor.u32 2147483648, %v10097_v22 }
0x19ad   : > { %v8218_v17 = vpop.eup %8217  ;;  %v4713_v41 = vxor.u32 2147483648, %v8216_v2 }
0x19ae   : > { %v4710_v24 = vxor.u32 2147483648, %v8218_v17 }
0x19af   : > { %v10102_v63 = vsel %vm4712_vm11, %v4713_v41, %v8218_v17 }
0x19b0   : > { %v10105_v37 = vsel %vm4709_vm9, %v8216_v2, %v4710_v24 }
0x19d2   : > { %v10088_v30 = vpop.permute.xlu1 %4016 }
0x19d6   : > { %v4042_v48 = vpop.permute.xlu1 %4041 }
0x19d7   : > { %v4044_v39 = vsel %vm4034_vm12, %v4042_v48, 0.0  ;;  %v4045_v23 = vsel %vm4035_vm2, %v4042_v48, 0.0  ;;  %v4046_v58 = vsel %vm4036_vm7, %v4042_v48, 0.0  ;;  %v4047_v26 = vsel %vm4037_vm6, %v4042_v48, 0.0 }
0x19d8   : > { %vm4101_vm2 = vcmp.eq.s32.totalorder %v9047_v15, %v4100_v61  ;;  %vm4102_vm7 = vcmp.eq.s32.totalorder %v9050_v21, %v4100_v61  ;;  %vm4103_vm6 = vcmp.eq.s32.totalorder %v9053_v33, %v4100_v61 }
0x19db   : > { %v10092_v38 = vpop.permute.xlu1 %4106 }
0x19e0   : > { %v4008_v19 = vpop.permute.xlu1 %4007 }
0x19e1   : > { %vm4009_vm13 = vcmp.eq.s32.totalorder %v9047_v15, %v4008_v19  ;;  %vm4010_vm10 = vcmp.eq.s32.totalorder %v9050_v21, %v4008_v19  ;;  %vm4011_vm15 = vcmp.eq.s32.totalorder %v9053_v33, %v4008_v19  ;;  %vm4012_vm11 = vcmp.eq.s32.totalorder %v9058_v42, %v4008_v19 }
0x19e2   : > { %v4019_v36 = vsel %vm4009_vm13, %v10088_v30, 0.0  ;;  %v4021_v48 = vsel %vm4011_vm15, %v10088_v30, 0.0  ;;  %v4022_v2 = vsel %vm4012_vm11, %v10088_v30, 0.0  ;;  %vm4719_vm15 = vcmp.lt.s32.totalorder %v9867_v57, 0 }
0x19e3   : > { %vm4708_vm11 = vcmp.lt.s32.totalorder %v10090_v13, 2 }
0x19e4   : > { %v3969_v47 = vpop.permute.xlu1 %3968 }
0x19e5   : > { %vm3970_vm3 = vcmp.eq.s32.totalorder %v9047_v15, %v3969_v47  ;;  %vm3971_vm4 = vcmp.eq.s32.totalorder %v9050_v21, %v3969_v47  ;;  %vm3972_vm9 = vcmp.eq.s32.totalorder %v9053_v33, %v3969_v47  ;;  %vm3973_vm12 = vcmp.eq.s32.totalorder %v9058_v42, %v3969_v47 }
0x19e6   : > { %v3980_v46 = vsel %vm3970_vm3, %v10073_v25, 0.0  ;;  %v3981_v62 = vsel %vm3971_vm4, %v10073_v25, 0.0  ;;  %v3982_v35 = vsel %vm3972_vm9, %v10073_v25, 0.0  ;;  %v3983_v54 = vsel %vm3973_vm12, %v10073_v25, 0.0 }
0x19e7   : > { %v3984_v5 = vadd.f32 %v3980_v46, %v3947_v28  ;;  %v3985_v56 = vadd.f32 %v3981_v62, %v3948_v49  ;;  %v3986_v40 = vadd.f32 %v3982_v35, %v3949_v50  ;;  %v3987_v32 = vadd.f32 %v3983_v54, %v3950_v44 }
0x19e8   : > { %v4020_v25 = vsel %vm4010_vm10, %v10088_v30, 0.0  ;;  %v4109_v54 = vsel %vm4101_vm2, %v10092_v38, 0.0 }
0x19e9   : > { %v4023_v11 = vadd.f32 %v4019_v36, %v3984_v5  ;;  %v4024_v10 = vadd.f32 %v4020_v25, %v3985_v56  ;;  %v4025_v43 = vadd.f32 %v4021_v48, %v3986_v40  ;;  %v4026_v17 = vadd.f32 %v4022_v2, %v3987_v32  ;;  %v4060_v6 = vpop.permute.xlu1 %4059  ;;  %v4127_v32 = vpop.permute.xlu0 %4126 }
0x19ea   : > { %vm4061_vm3 = vcmp.eq.s32.totalorder %v9047_v15, %v4060_v6  ;;  %vm4062_vm13 = vcmp.eq.s32.totalorder %v9050_v21, %v4060_v6  ;;  %vm4063_vm4 = vcmp.eq.s32.totalorder %v9053_v33, %v4060_v6  ;;  %vm4064_vm10 = vcmp.eq.s32.totalorder %v9058_v42, %v4060_v6 }
0x19eb   : > { %v4048_v45 = vadd.f32 %v4044_v39, %v4023_v11  ;;  %v4049_v41 = vadd.f32 %v4045_v23, %v4024_v10  ;;  %v4050_v34 = vadd.f32 %v4046_v58, %v4025_v43  ;;  %v4051_v24 = vadd.f32 %v4047_v26, %v4026_v17 }
0x19ec   : > { %v4069_v30 = vsel %vm4061_vm3, %v10084_v7, 0.0  ;;  %v4070_v60 = vsel %vm4062_vm13, %v10084_v7, 0.0  ;;  %v4071_v55 = vsel %vm4063_vm4, %v10084_v7, 0.0  ;;  %v4072_v28 = vsel %vm4064_vm10, %v10084_v7, 0.0 }
0x19ed   : > { %v4073_v49 = vadd.f32 %v4069_v30, %v4048_v45  ;;  %v4074_v19 = vadd.f32 %v4070_v60, %v4049_v41  ;;  %v4075_v50 = vadd.f32 %v4071_v55, %v4050_v34  ;;  %v4076_v44 = vadd.f32 %v4072_v28, %v4051_v24  ;;  %v4080_v39 = vpop.permute.xlu1 %4079  ;;  %v8046_v55 = vld [vmem:[%s10747_s4 + $0x70] sm:$0xff]  }
0x19ee   : > { %vm4081_vm9 = vcmp.eq.s32.totalorder %v9047_v15, %v4080_v39  ;;  %vm4082_vm12 = vcmp.eq.s32.totalorder %v9050_v21, %v4080_v39  ;;  %vm4083_vm5 = vcmp.eq.s32.totalorder %v9053_v33, %v4080_v39  ;;  %vm4084_vm3 = vcmp.eq.s32.totalorder %v9058_v42, %v4080_v39 }
0x19ef   : > { %v4089_v23 = vsel %vm4081_vm9, %v10077_v51, 0.0  ;;  %v4090_v58 = vsel %vm4082_vm12, %v10077_v51, 0.0  ;;  %v4091_v7 = vsel %vm4083_vm5, %v10077_v51, 0.0  ;;  %v4092_v26 = vsel %vm4084_vm3, %v10077_v51, 0.0 }
0x19f0   : > { %v4093_v47 = vadd.f32 %v4089_v23, %v4073_v49  ;;  %v4094_v46 = vadd.f32 %v4090_v58, %v4074_v19  ;;  %v4095_v62 = vadd.f32 %v4091_v7, %v4075_v50  ;;  %v4096_v35 = vadd.f32 %v4092_v26, %v4076_v44  ;;  %v8047_v49 = vld [vmem:[%s10747_s4 + $0x30] sm:$0xff]   ;;  %v8049_v44 = vld [vmem:[%s10747_s4 + $0x68] sm:$0xff]   ;;  %v8052_v26 = vld [vmem:[%s10747_s4 + $0x60] sm:$0xff]  }
0x19f1   : > { %v4110_v5 = vsel %vm4102_vm7, %v10092_v38, 0.0  ;;  %v4111_v56 = vsel %vm4103_vm6, %v10092_v38, 0.0  ;;  %v4112_v51 = vsel %vm4104_vm8, %v10092_v38, 0.0  ;;  %v4120_v40 = vpop.permute.xlu1 %4119  ;;  %vm10180_vm8 = vcmp.le.f32.partialorder %v4509_v16, 0.7853982  ;;  %v8048_v19 = vld [vmem:[%s10747_s4 + $0xb0] sm:$0xff]  }
0x19f2   : > { %vm4121_vm5 = vcmp.eq.s32.totalorder %v9047_v15, %v4120_v40  ;;  %vm4122_vm13 = vcmp.eq.s32.totalorder %v9050_v21, %v4120_v40  ;;  %vm4123_vm2 = vcmp.eq.s32.totalorder %v9053_v33, %v4120_v40  ;;  %vm4124_vm4 = vcmp.eq.s32.totalorder %v9058_v42, %v4120_v40  ;;  %v8050_v23 = vld [vmem:[%s10747_s4 + $0x28] sm:$0xff]  }
0x19f3   : > { %v4129_v36 = vsel %vm4121_vm5, %v4127_v32, 0.0  ;;  %v4130_v25 = vsel %vm4122_vm13, %v4127_v32, 0.0  ;;  %v4131_v48 = vsel %vm4123_vm2, %v4127_v32, 0.0  ;;  %v4132_v2 = vsel %vm4124_vm4, %v4127_v32, 0.0  ;;  %v8051_v58 = vld [vmem:[%s10747_s4 + $0xa8] sm:$0xff]   ;;  %v8056_v32 = vld [vmem:[%s10747_s4 + $0x18] sm:$0xff]  }
0x19f4   : > { %v4113_v11 = vadd.f32 %v4109_v54, %v4093_v47  ;;  %v4115_v10 = vadd.f32 %v4111_v56, %v4095_v62  ;;  %v4114_v43 = vadd.f32 %v4110_v5, %v4094_v46  ;;  %v4116_v17 = vadd.f32 %v4112_v51, %v4096_v35  ;;  %v8054_v62 = vld [vmem:[%s10747_s4 + $0xa0] sm:$0xff]  }
0x19f5   : > { %v4802_v15 = vsel %vm4719_vm15, %v4801_v4, %v10097_v22  ;;  %v4715_v21 = vsel %vm4708_vm11, %v10105_v37, %v10102_v63  ;;  %v4597_v16 = vsel %vm10180_vm8, %v9842_v31, %v10111_v52  ;;  %vm10199_vm7 = vcmp.le.f32.partialorder %v4717_v59, 0.7853982  ;;  %v8044_v59 = vld [vmem:[%s10747_s4 + $0x38] sm:$0xff]  }
0x19f6   : > { %v4133_v33 = vadd.f32 %v4129_v36, %v4113_v11  ;;  %v4135_v42 = vadd.f32 %v4131_v48, %v4115_v10  ;;  %v4143_v61 = vpop.permute.xlu1 %4142  ;;  %v4134_v6 = vadd.f32 %v4130_v25, %v4114_v43  ;;  %v4136_v45 = vadd.f32 %v4132_v2, %v4116_v17  ;;  %v8057_v36 = vld [vmem:[%s10747_s4 + $0x98] sm:$0xff]   ;;  %v8058_v48 = vld [vmem:[%s10747_s4 + $0x50] sm:$0xff]  }
0x19f7   : > { %vm4705_vm6 = vweird.f32 %v9774_v53  ;;  %v4805_v4 = vsel %vm10199_vm7, %v9867_v57, %v4802_v15  ;;  %v8045_v53 = vld [vmem:[%s10747_s4 + $0xb8] sm:$0xff]   ;;  %8219 = vcosq.f32 %v4597_v16  ;;  %v4595_v50 = vsub.s32 4, %v10052_v18  ;;  %v8059_v43 = vld [vmem:[%s10747_s4 + $0x10] sm:$0xff]  }
0x19f8   : > { %v4145_v13 = vmul.f32 %v4143_v61, %v4133_v33  ;;  %v4147_v22 = vmul.f32 %v4143_v61, %v4135_v42  ;;  %v4146_v63 = vmul.f32 %v4143_v61, %v4134_v6  ;;  %v4148_v37 = vmul.f32 %v4143_v61, %v4136_v45  ;;  %v8060_v17 = vld [vmem:[%s10747_s4 + $0x90] sm:$0xff]   ;;  %v8061_v33 = vld [vmem:[%s10747_s4 + $0x48] sm:$0xff]  }
0x19f9   : > { %v4716_v34 = vsel %vm4705_vm6, nan, %v4715_v21  ;;  %8221 = vsinq.f32 %v4597_v16  ;;  %v4803_v39 = vsub.s32 4, %v10055_v1  ;;  %v4596_v7 = vsel %vm4511_vm14, %v4595_v50, %v10052_v18  ;;  %v8053_v18 = vld [vmem:[%s10747_s4 + $0x20] sm:$0xff]   ;;  %v8062_v61 = vld [vmem:[%s10747_s4 + $0x8] sm:$0xff]  }
0x19fa   : > { %v4149_v24 = vpack.c.bf16 %v4145_v13, %v4145_v13  ;;  %v4151_v30 = vpack.c.bf16 %v4147_v22, %v4147_v22  ;;  %v4150_v52 = vpack.c.bf16 %v4146_v63, %v4146_v63  ;;  %v4152_v60 = vpack.c.bf16 %v4148_v37, %v4148_v37  ;;  %v8063_v6 = vld [vmem:[%s10747_s4 + $0x88] sm:$0xff]   ;;  %v8064_v13 = vld [vmem:[%s10747_s4 + $0x40] sm:$0xff]  }
0x19fb   : > { %8223 = vcosq.f32 %v4805_v4  ;;  %v4822_v28 = vpack.c.bf16 %v4716_v34, %v4716_v34  ;;  %v4804_v47 = vsel %vm4719_vm15, %v4803_v39, %v10055_v1  ;;  %v4598_v46 = vsel %vm10180_vm8, 0, %v4596_v7  ;;  %v8055_v1 = vld [vmem:[%s10747_s4 + $0x58] sm:$0xff]   ;;  %v8065_v37 = vld [vmem:[%s10747_s4] sm:$0xff]  }
0x19fc   : > { %4441 = vmatprep.mubr.bf16.mxu1 %v4150_v52  ;;  %4481 = vmatprep.mubr.bf16.mxu0 %v4152_v60  ;;  %8225 = vsinq.f32 %v4805_v4  ;;  %v4806_v35 = vsel %vm10199_vm7, 0, %v4804_v47  ;;  %v4602_v5 = vadd.s32 3, %v4598_v46  ;;  %v8066_v4 = vld [vmem:[%s10747_s4 + $0x80] sm:$0xff]   ;;  %vm4601_vm3 = vweird.f32 %v9842_v31  ;;  %v8067_v60 = vld [vmem:[%s10755_s9 + $0x8] sm:$0xff]  }
0x19fd   : > { %4442 = vmatmul.mubr.bf16.vlgmr.msra.gmra.mxu1 %v4149_v24  ;;  %4482 = vmatmul.mubr.bf16.vlgmr.msra.gmra.mxu0 %v4151_v30  ;;  %v4810_v51 = vadd.s32 3, %v4806_v35  ;;  %vm4809_vm5 = vweird.f32 %v9867_v57  ;;  %v8068_v31 = vld [vmem:[%s10755_s9] sm:$0xff]   ;;  %vm10797_vm8 = vcmask 64512  }
0x19fe   : > { %7354 = vmatpush3.bf16.msra.mxu1 %v8044_v59  ;;  %7651 = vmatpush3.bf16.msra.mxu0 %v8045_v53  ;;  %v4603_v2 = vand.u32 3, %v4602_v5  ;;  %v6949_v46 = vld [vmem:[%s10756_s5] ss:$0 sm:$0xff]  ;;  %vm10798_vm7 = vmmov %vm10797_vm8 }
0x19ff   : > { %5055 = vmatprep.mubr.bf16.mxu1 %v4822_v28  ;;  %7355 = vmatprep.subr.bf16.mxu1 %v8046_v55  ;;  %v4811_v10 = vand.u32 3, %v4810_v51  ;;  %vm10799_vm6 = vmmov %vm10798_vm7 }
0x1a00   : > { %7652 = vmatprep.subr.bf16.mxu0 %v8372_v0  ;;  %7666 = vmatprep.mubr.msk.bf16.mxu0 %vm8373_vm0, %v8372_v0  ;;  %vm4608_vm14 = vcmp.eq.s32.totalorder %v4603_v2, 2  ;;  %vm4605_vm10 = vcmp.eq.s32.totalorder %v4603_v2, 0  ;;  %vm4604_vm9 = vcmp.lt.s32.totalorder %v4603_v2, 2  ;;  %v6974_v2 = vld [vmem:[%s10757_s30] ss:$0 sm:$0xff] }
0x1a01   : > { %vm4813_vm15 = vcmp.eq.s32.totalorder %v4811_v10, 0  ;;  %vm4816_vm11 = vcmp.eq.s32.totalorder %v4811_v10, 2  ;;  %vm4812_vm12 = vcmp.lt.s32.totalorder %v4811_v10, 2 }
0x1a02   : > { %7356 = vmatpush3.bf16.msra.mxu1 %v8047_v49  ;;  %7653 = vmatpush3.bf16.msra.mxu0 %v8048_v19 }
0x1a03   : > { %7357 = vmatprep.subr.bf16.mxu1 %v8049_v44  ;;  %7654 = vmatprep.subr.bf16.mxu0 %v8372_v0 }
0x1a04   : > { %v8220_v54 = vpop.eup %8219 }
0x1a05   : > { %v4609_v11 = vxor.u32 2147483648, %v8220_v54 }
0x1a06   : > { %7358 = vmatpush3.bf16.msra.mxu1 %v8050_v23  ;;  %7655 = vmatpush3.bf16.msra.mxu0 %v8051_v58  ;;  %v8222_v56 = vpop.eup %8221 }
0x1a07   : > { %7359 = vmatprep.subr.bf16.mxu1 %v8052_v26  ;;  %7656 = vmatprep.subr.bf16.mxu0 %v8372_v0  ;;  %v4606_v38 = vxor.u32 2147483648, %v8222_v56  ;;  %v4610_v42 = vsel %vm4608_vm14, %v4609_v11, %v8222_v56  ;;  %vm10800_vm14 = vmmov %vm10799_vm6 }
0x1a08   : > { %v8224_v40 = vpop.eup %8223 }
0x1a09   : > { %v8226_v25 = vpop.eup %8225  ;;  %v4817_v21 = vxor.u32 2147483648, %v8224_v40  ;;  %v4607_v45 = vsel %vm4605_vm10, %v8220_v54, %v4606_v38  ;;  %vm10801_vm10 = vmmov %vm10799_vm6 }
0x1a0a   : > { %7360 = vmatpush3.bf16.msra.mxu1 %v8053_v18  ;;  %7657 = vmatpush3.bf16.msra.mxu0 %v8054_v62  ;;  %v4814_v15 = vxor.u32 2147483648, %v8226_v25  ;;  %v4611_v22 = vsel %vm4604_vm9, %v4607_v45, %v4610_v42  ;;  %vm10804_vm9 = vmmov %vm10799_vm6 }
0x1a0b   : > { %7361 = vmatprep.subr.bf16.mxu1 %v8055_v1  ;;  %7658 = vmatprep.subr.bf16.mxu0 %v8372_v0  ;;  %v4818_v41 = vsel %vm4816_vm11, %v4817_v21, %v8226_v25  ;;  %v4612_v34 = vsel %vm4601_vm3, nan, %v4611_v22  ;;  %v8069_v25 = vld [vmem:[%s10754_s1 + $0x18] sm:$0xff]   ;;  %vm10803_vm11 = vmmov %vm10799_vm6 }
0x1a0c   : > { %v4815_v16 = vsel %vm4813_vm15, %v8224_v40, %v4814_v15  ;;  %v4821_v30 = vpack.c.bf16 %v4612_v34, %v4612_v34  ;;  %vm10802_vm15 = vmmov %vm10799_vm6 }
0x1a0d   : > { %v4819_v63 = vsel %vm4812_vm12, %v4815_v16, %v4818_v41  ;;  %vm10805_vm12 = vmmov %vm10799_vm6 }
0x1a0e   : > { %7362 = vmatpush3.bf16.msra.mxu1 %v8056_v32  ;;  %7659 = vmatpush3.bf16.msra.mxu0 %v8057_v36  ;;  %v4820_v24 = vsel %vm4809_vm5, nan, %v4819_v63  ;;  %vm10806_vm3 = vmmov %vm10799_vm6 }
0x1a0f   : > { %7363 = vmatprep.subr.bf16.mxu1 %v8058_v48  ;;  %7660 = vmatprep.subr.bf16.mxu0 %v8372_v0  ;;  %v4823_v52 = vpack.c.bf16 %v4820_v24, %v4820_v24  ;;  %v8070_v48 = vld [vmem:[%s10754_s1 + $0x10] sm:$0xff]  }
0x1a12   : > { %7364 = vmatpush3.bf16.msra.mxu1 %v8059_v43  ;;  %7661 = vmatpush3.bf16.msra.mxu0 %v8060_v17 }
0x1a13   : > { %7365 = vmatprep.subr.bf16.mxu1 %v8061_v33  ;;  %7662 = vmatprep.subr.bf16.mxu0 %v8372_v0  ;;  %v7000_v33 = vld [vmem:[%s10794_s2 + $0x1] ss:$0 sm:$0xff]  ;;  %s10812_s2 = sld [smem:[#allocation4_spill]] }
0x1a16   : > { %7366 = vmatpush3.bf16.msra.mxu1 %v8062_v61  ;;  %7663 = vmatpush3.bf16.msra.mxu0 %v8063_v6 }
0x1a17   : > { %7367 = vmatprep.subr.bf16.mxu1 %v8064_v13  ;;  %7664 = vmatprep.subr.bf16.mxu0 %v8372_v0 }
0x1a1a   : > { %7368 = vmatpush3.bf16.msra.mxu1 %v8065_v37  ;;  %7665 = vmatpush3.bf16.msra.mxu0 %v8066_v4 }
0x1a1b   : > { %7670 = vmatprep.subr.bf16.mxu1 %v8372_v0 }
0x1a1d   : > { %5056 = vmatmul.mubr.bf16.vlgmr.msra.gmra.mxu1 %v4821_v30  ;;  %7667 = vmatmul.mubr.bf16.vlgmr.msra.gmra.mxu0 %v4823_v52 }
0x1a1e   : > { %7674 = vmatprep.mubr.msk.bf16.mxu1 %vm8373_vm0, %v8372_v0  ;;  %7671 = vmatpush3.bf16.msra.mxu1 %v8067_v60 }
0x1a1f   : > { %7672 = vmatprep.subr.bf16.mxu1 %v8372_v0 }
0x1a22   : > { %7673 = vmatpush3.bf16.msra.mxu1 %v8068_v31 }
0x1a23   : > { %7678 = vmatprep.subr.bf16.mxu1 %v8372_v0 }
0x1abd   : > { %v7325_v57 = vpop.f32.mrf.mxu1  ;;  %v7347_v59 = vpop.f32.mrf.mxu0 }
0x1abf   : > { %v7326_v53 = vpop.f32.mrf.mxu1  ;;  %v7348_v55 = vpop.f32.mrf.mxu0 }
0x1ac0   : > { %v7327_v28 = vadd.f32 %v7326_v53, %v7325_v57  ;;  %v7349_v49 = vadd.f32 %v7348_v55, %v7347_v59 }
0x1ac1   : > { %v7328_v19 = vpop.f32.mrf.mxu1  ;;  %v7350_v50 = vpop.f32.mrf.mxu0 }
0x1ac2   : > { %v10310_v44 = vadd.f32 %v7349_v49, %v7327_v28 }
0x1ac3   : > { %v7329_v39 = vpop.f32.mrf.mxu1  ;;  %v7351_v23 = vpop.f32.mrf.mxu0 }
0x1ac4   : > { %v5206_v58 = vpack.c.bf16 %v10310_v44, %v10310_v44 }
0x1ac6   : > { %7797 = vmatprep.subr.msk.bf16.mxu0 %vm873_vm1, %v5206_v58  ;;  %v5419_v7 = vsel %vm873_vm1, %v5206_v58, 0  ;;  %vm10792_vm1 = vcmask 261120  }
0x1ac7   : > { %7695 = vmatpush3.bf16.msra.mxu0 %v5419_v7  ;;  %vm10793_vm13 = vmmov %vm10792_vm1 }
0x1ac8   : > { %7720 = vmatprep.subr.bf16.mxu0 %v8372_v0  ;;  %vm10795_vm2 = vmmov %vm10792_vm1 }
0x1ac9   : > { %vm10796_vm4 = vmmov %vm10792_vm1 }
0x1aca   : > { %vm10807_vm5 = vmmov %vm10792_vm1 }
0x1add   : > { %v7369_v26 = vpop.f32.mrf.mxu1  ;;  %v5097_v47 = vpop.f32.mrf.mxu0 }
0x1adf   : > { %v7370_v18 = vpop.f32.mrf.mxu1  ;;  %v7668_v62 = vpop.f32.mrf.mxu0 }
0x1ae0   : > { %v7371_v35 = vadd.f32 %v7370_v18, %v7369_v26 }
0x1ae1   : > { %v7372_v1 = vpop.f32.mrf.mxu1  ;;  %v5100_v54 = vpop.f32.mrf.mxu0 }
0x1ae2   : > { %v5058_v5 = vadd.f32 %v7371_v35, %v6949_v46 }
0x1ae3   : > { %v7373_v56 = vpop.f32.mrf.mxu1  ;;  %v7669_v51 = vpop.f32.mrf.mxu0 }
0x1ae4   : > { %v5098_v40 = vadd.f32 %v5097_v47, %v5058_v5 }
0x1ae6   : > { %v5103_v32 = vmax.f32 %v5098_v40, 0.0 }
0x1ae8   : > { %v5104_v36 = vpack.c.bf16 %v5103_v32, %v5103_v32 }
0x1aea   : > { %7675 = vmatmul.mubr.msk.bf16.vlgmr.msra.gmra.mxu1 %vm10792_vm1, %v5104_v36  ;;  %vm10808_vm1 = vcmask 523264  }
0x1aeb   : > { %7682 = vmatprep.mubr.msk.bf16.mxu1 %vm8373_vm0, %v8372_v0  ;;  %7679 = vmatpush3.bf16.msra.mxu1 %v8069_v25 }
0x1aec   : > { %7680 = vmatprep.subr.bf16.mxu1 %v8372_v0 }
0x1aef   : > { %7681 = vmatpush3.bf16.msra.mxu1 %v8070_v48 }
0x1baa   : > { %v5165_v11 = vpop.f32.mrf.mxu1 }
0x1bab   : > { %v10333_v10 = vadd.f32 %v6974_v2, %v5165_v11 }
0x1bac   : > { %v7676_v43 = vpop.f32.mrf.mxu1 }
0x1bad   : > { %v5171_v17 = vadd.f32 %v10333_v10, %v10310_v44 }
0x1bae   : > { %v5168_v38 = vpop.f32.mrf.mxu1 }
0x1baf   : > { %v5233_v15 = vpack.c.bf16 %v5171_v17, %v5171_v17 }
0x1bb0   : > { %v7677_v21 = vpop.f32.mrf.mxu1 }
0x1bb1   : > { %7683 = vmatmul.mubr.msk.bf16.vlgmr.msra.gmra.mxu1 %vm10793_vm13, %v5233_v15  ;;  %vm10809_vm13 = vcmask 785408  }
0x1c71   : > { %v5289_v42 = vpop.f32.mrf.mxu1 }
0x1c72   : > { %v5290_v61 = vadd.f32 %v7000_v33, %v5289_v42 }
0x1c73   : > { %v7684_v6 = vpop.f32.mrf.mxu1 }
0x1c74   : > { %5299 = vrot.lane.b32.xlu0 %v5290_v61, %s10759_s8  ;;  %5296 = vrot.lane.b32.xlu1 %v5290_v61, %s10761_s28 }
0x1c75   : > { %v5292_v45 = vpop.f32.mrf.mxu1 }
0x1c77   : > { %v7685_v16 = vpop.f32.mrf.mxu1 }
0x1c78   : > { %5302 = vrot.lane.b32.xlu1 %v5290_v61, %s10760_s27  ;;  %v8071_v16 = vld [vmem:[%s10664_s11 + $0x78] sm:$0xff]  }
0x1c92   : > { %5172 = vxpose.xlu0.b32.start.end [1/1] (short) (narrow) %v5171_v17, 32 }
0x1cbb   : > { %7904 = vset.pattern.permute.xlu0 %v8397_v20 }
0x1ce6   : > { %v5297_v41 = vpop.permute.xlu1 %5296  ;;  %v5300_v22 = vpop.permute.xlu0 %5299 }
0x1ce7   : > { %v5305_v13 = vpack.c.bf16 %v5297_v41, %v5290_v61  ;;  %v8072_v41 = vld [vmem:[%s10664_s11 + $0x70] sm:$0xff]  }
0x1ce9   : > { %7690 = vmatprep.mubr.msk.bf16.mxu1 %vm10795_vm2, %v5305_v13  ;;  %v8073_v13 = vld [vmem:[%s10664_s11 + $0x68] sm:$0xff]  }
0x1cea   : > { %v5303_v52 = vpop.permute.xlu1 %5302 }
0x1ceb   : > { %v5306_v60 = vpack.c.bf16 %v5303_v52, %v5300_v22  ;;  %v8074_v22 = vld [vmem:[%s10664_s11 + $0x60] sm:$0xff]   ;;  %v8332_v52 = vld [vmem:[%s8565_s25 + $0x78] sm:$0xff]  }
0x1d0e   : > { %v5188_v63 = vpop.trf.xlu0 }
0x1d12   : > { %v5189_v37 = vpop.trf.xlu0 }
0x1d13   : > { %v5204_v30 = vpack.c.bf16 %v5189_v37, %v5188_v63  ;;  %v8075_v63 = vld [vmem:[%s10664_s11 + $0x58] sm:$0xff]   ;;  %v8076_v37 = vld [vmem:[%s10664_s11 + $0x50] sm:$0xff]  }
0x1d16   : > { %v5190_v4 = vpop.trf.xlu0 }
0x1d1a   : > { %v5191_v34 = vpop.trf.xlu0 }
0x1d1b   : > { %v5205_v24 = vpack.c.bf16 %v5191_v34, %v5190_v4  ;;  %v8077_v4 = vld [vmem:[%s10664_s11 + $0x48] sm:$0xff]   ;;  %v8078_v34 = vld [vmem:[%s10664_s11 + $0x40] sm:$0xff]  }
0x1d1d   : > { %7686 = vmatprep.subr.bf16.mxu1 %v5205_v24 }
0x1d1e   : > { %7687 = vmatpush3.bf16.msra.mxu1 %v5205_v24 }
0x1d1f   : > { %7688 = vmatprep.subr.bf16.mxu1 %v5204_v30 }
0x1d22   : > { %7689 = vmatpush3.bf16.msra.mxu1 %v5204_v30 }
0x1d23   : > { %7700 = vmatprep.subr.bf16.mxu1 %v8372_v0 }
0x1d25   : > { %7691 = vmatmul.mubr.msk.bf16.vlgmr.msra.gmra.mxu1 %vm10796_vm4, %v5306_v60  ;;  %vm10810_vm4 = vmmov %vm10795_vm2 }
0x1d26   : > { %7716 = vmatprep.mubr.msk.bf16.mxu1 %vm8373_vm0, %v8372_v0  ;;  %7701 = vmatpush3.bf16.msra.mxu1 %v8071_v16 }
0x1d27   : > { %7702 = vmatprep.subr.bf16.mxu1 %v8372_v0 }
0x1d2a   : > { %7703 = vmatpush3.bf16.msra.mxu1 %v8072_v41  ;;  %v7020_v41 = vld [vmem:[%s10670_s17 + $0x7] ss:$0 sm:$0xff] }
0x1d2b   : > { %7704 = vmatprep.subr.bf16.mxu1 %v8372_v0 }
0x1d2e   : > { %7705 = vmatpush3.bf16.msra.mxu1 %v8073_v13 }
0x1d2f   : > { %7706 = vmatprep.subr.bf16.mxu1 %v8372_v0 }
0x1d32   : > { %7707 = vmatpush3.bf16.msra.mxu1 %v8074_v22 }
0x1d33   : > { %7708 = vmatprep.subr.bf16.mxu1 %v8372_v0 }
0x1d36   : > { %7709 = vmatpush3.bf16.msra.mxu1 %v8075_v63 }
0x1d37   : > { %7710 = vmatprep.subr.bf16.mxu1 %v8372_v0 }
0x1d3a   : > { %7711 = vmatpush3.bf16.msra.mxu1 %v8076_v37 }
0x1d3b   : > { %7712 = vmatprep.subr.bf16.mxu1 %v8372_v0 }
0x1d3e   : > { %7713 = vmatpush3.bf16.msra.mxu1 %v8077_v4  ;;  %v8081_v4 = vld [vmem:[%s10812_s2 + $0x20] ss:$16 sps:$4 sm:$0xff]  }
0x1d3f   : > { %7714 = vmatprep.subr.bf16.mxu1 %v8372_v0 }
0x1d42   : > { %7715 = vmatpush3.bf16.msra.mxu1 %v8078_v34  ;;  %v8083_v34 = vld [vmem:[%s10812_s2 + $0x24] ss:$16 sps:$4 sm:$0xff]  }
0x1d43   : > { %7409 = vmatprep.subr.bf16.mxu1 %v8332_v52  ;;  %v8089_v52 = vld [vmem:[%s10812_s2 + $0x2c] ss:$16 sps:$4 sm:$0xff]  }
0x1de5   : > { %v7692_v20 = vpop.f32.mrf.mxu1 }
0x1de6   : > { %v5368_v55 = vsel %vm10798_vm7, %v7692_v20, -inf  ;;  %vm10815_vm7 = vmmov %vm10795_vm2 }
0x1de7   : > { %v5347_v31 = vpop.f32.mrf.mxu1 }
0x1de8   : > { %v5362_v57 = vsel %vm10797_vm8, %v5347_v31, -inf  ;;  %vm10813_vm8 = vmmov %vm10795_vm2 }
0x1de9   : > { %5363 = vmax.xlane.f32.xlu1 %v5362_v57  ;;  %v7693_v59 = vpop.f32.mrf.mxu1 }
0x1dea   : > { %v5371_v49 = vsel %vm10800_vm14, %v7693_v59, -inf  ;;  %vm10817_vm14 = vmmov %vm10795_vm2 }
0x1deb   : > { %v5350_v53 = vpop.f32.mrf.mxu1 }
0x1dec   : > { %v5365_v28 = vsel %vm10799_vm6, %v5350_v53, -inf  ;;  %vm10816_vm6 = vmmov %vm10795_vm2 }
0x1ded   : > { %5369 = vmax.xlane.f32.xlu1 %v5368_v55  ;;  %5366 = vmax.xlane.f32.xlu0 %v5365_v28 }
0x1df1   : > { %5372 = vmax.xlane.f32.xlu1 %v5371_v49 }
0x1e72   : > { %v5364_v19 = vpop.xlane.xlu1 %5363 }
0x1e73   : > { %v5374_v50 = vsub.f32 %v5347_v31, %v5364_v19  ;;  %v8333_v19 = vld [vmem:[%s8565_s25 + $0x38] sm:$0xff]  }
0x1e75   : > { %v5378_v7 = vmul.f32 1.442695, %v5374_v50  ;;  %v8334_v50 = vld [vmem:[%s8565_s25 + $0x70] sm:$0xff]  }
0x1e76   : > { %v5370_v39 = vpop.xlane.xlu1 %5369  ;;  %v5367_v23 = vpop.xlane.xlu0 %5366 }
0x1e77   : > { %v5376_v58 = vsub.f32 %v7692_v20, %v5370_v39  ;;  %v5375_v47 = vsub.f32 %v5350_v53, %v5367_v23  ;;  %v8335_v39 = vld [vmem:[%s8565_s25 + $0x30] sm:$0xff]   ;;  %v8336_v23 = vld [vmem:[%s8565_s25 + $0x68] sm:$0xff]  }
0x1e79   : > { %v5382_v26 = vmul.f32 1.442695, %v5376_v58  ;;  %v5380_v18 = vmul.f32 1.442695, %v5375_v47  ;;  %v8337_v58 = vld [vmem:[%s8565_s25 + $0x28] sm:$0xff]   ;;  %v8340_v47 = vld [vmem:[%s8565_s25 + $0x58] sm:$0xff]  }
0x1e7a   : > { %v5373_v46 = vpop.xlane.xlu1 %5372 }
0x1e7b   : > { %8227 = vpow2.f32 %v5382_v26  ;;  %v5377_v62 = vsub.f32 %v7693_v59, %v5373_v46  ;;  %v8339_v26 = vld [vmem:[%s8565_s25 + $0x20] sm:$0xff]   ;;  %v8341_v46 = vld [vmem:[%s8565_s25 + $0x18] sm:$0xff]  }
0x1e7c   : > { %8229 = vpow2.f32 %v5378_v7  ;;  %v8338_v7 = vld [vmem:[%s8565_s25 + $0x60] sm:$0xff]  }
0x1e7d   : > { %8231 = vpow2.f32 %v5380_v18  ;;  %v5384_v35 = vmul.f32 1.442695, %v5377_v62  ;;  %v8342_v18 = vld [vmem:[%s8565_s25 + $0x50] sm:$0xff]  }
0x1e7e   : > { %v8343_v62 = vld [vmem:[%s8565_s25 + $0x10] sm:$0xff]  }
0x1e7f   : > { %8233 = vpow2.f32 %v5384_v35  ;;  %v8344_v35 = vld [vmem:[%s8565_s25 + $0x48] sm:$0xff]  }
0x1e88   : > { %v8228_v1 = vpop.eup %8227 }
0x1e89   : > { %v5392_v54 = vsel %vm10801_vm10, %v8228_v1, 0.0  ;;  %v8230_v5 = vpop.eup %8229  ;;  %vm10818_vm10 = vmmov %vm10795_vm2 }
0x1e8a   : > { %5393 = vadd.xlane.f32.xlu1 %v5392_v54  ;;  %v5386_v56 = vsel %vm10802_vm15, %v8230_v5, 0.0  ;;  %v8232_v51 = vpop.eup %8231  ;;  %v8346_v54 = vld [vmem:[%s8565_s25 + $0x40] sm:$0xff]   ;;  %vm10819_vm15 = vmmov %vm10795_vm2 }
0x1e8b   : > { %v5389_v40 = vsel %vm10803_vm11, %v8232_v51, 0.0  ;;  %vm10820_vm11 = vmmov %vm10808_vm1 }
0x1e8c   : > { %v8234_v32 = vpop.eup %8233 }
0x1e8d   : > { %v5395_v36 = vsel %vm10804_vm9, %v8234_v32, 0.0  ;;  %vm10821_vm9 = vmmov %vm10809_vm13 }
0x1e8e   : > { %5387 = vadd.xlane.f32.xlu1 %v5386_v56  ;;  %v7008_v56 = vld [vmem:[%s10665_s12 + $0x1] ss:$0 sm:$0xff] }
0x1e92   : > { %5390 = vadd.xlane.f32.xlu1 %v5389_v40 }
0x1e96   : > { %5396 = vadd.xlane.f32.xlu1 %v5395_v36 }
0x1f13   : > { %v5394_v25 = vpop.xlane.xlu1 %5393 }
0x1f17   : > { %v5388_v48 = vpop.xlane.xlu1 %5387 }
0x1f18   : > { %8235 = vrcp.f32 %v5388_v48 }
0x1f1b   : > { %v5391_v2 = vpop.xlane.xlu1 %5390 }
0x1f1c   : > { %8237 = vrcp.f32 %v5391_v2 }
0x1f1d   : > { %8239 = vrcp.f32 %v5394_v25 }
0x1f1f   : > { %v5397_v11 = vpop.xlane.xlu1 %5396 }
0x1f20   : > { %8241 = vrcp.f32 %v5397_v11 }
0x1f25   : > { %v8236_v43 = vpop.eup %8235 }
0x1f26   : > { %v5406_v38 = vmul.f32 %v8236_v43, %v8230_v5  ;;  %v8347_v5 = vld [vmem:[%s8565_s25] sm:$0xff]  }
0x1f29   : > { %v8238_v17 = vpop.eup %8237 }
0x1f2a   : > { %v5407_v15 = vmul.f32 %v8238_v17, %v8232_v51  ;;  %v8240_v21 = vpop.eup %8239 }
0x1f2b   : > { %v5408_v61 = vmul.f32 %v8240_v21, %v8228_v1  ;;  %v8345_v1 = vld [vmem:[%s8565_s25 + $0x8] sm:$0xff]   ;;  %v8079_v21 = vld [vmem:[%s10811_s3 + $0x18] sm:$0xff]  }
0x1f2c   : > { %v5410_v33 = vpack.c.bf16 %v5407_v15, %v5406_v38 }
0x1f2d   : > { %v8242_v42 = vpop.eup %8241 }
0x1f2e   : > { %7696 = vmatprep.mubr.msk.bf16.mxu0 %vm10805_vm12, %v5410_v33  ;;  %v5409_v6 = vmul.f32 %v8242_v42, %v8234_v32  ;;  %vm10822_vm12 = vmmov %vm10795_vm2 }
0x1f30   : > { %v5411_v45 = vpack.c.bf16 %v5409_v6, %v5408_v61 }
0x1f32   : > { %7697 = vmatmul.mubr.msk.bf16.vlgmr.msra.gmra.mxu0 %vm10806_vm3, %v5411_v45  ;;  %v7019_v45 = vld [vmem:[%s10670_s17 + $0x6] ss:$0 sm:$0xff]  ;;  %vm10823_vm3 = vmmov %vm10795_vm2 }
0x1f33   : > { %7724 = vmatprep.mubr.msk.bf16.mxu0 %vm8373_vm0, %v8372_v0  ;;  %7721 = vmatpush3.bf16.msra.mxu0 %v8079_v21 }
0x1f34   : > { %7722 = vmatprep.subr.bf16.mxu0 %v8372_v0 }
0x1ff2   : > { %v7698_v24 = vpop.f32.mrf.mxu0 }
0x1ff3   : > { %5475 = vrot.lane.b32.xlu1 %v7698_v24, %s10759_s8  ;;  %v8086_v24 = vld [vmem:[%s10812_s2 + $0x4] ss:$16 sps:$4 sm:$0xff]  }
0x1ff4   : > { %v5455_v30 = vpop.f32.mrf.mxu0 }
0x1ff6   : > { %v7699_v60 = vpop.f32.mrf.mxu0 }
0x1ff8   : > { %v5458_v20 = vpop.f32.mrf.mxu0 }
0x1ff9   : > { %5471 = vrot.lane.b32.xlu1 %v5458_v20, %s10760_s27 }
0x1ffd   : > { %5479 = vrot.lane.b32.xlu1 %v7699_v60, %s10761_s28 }
0x2065   : > { %v5476_v31 = vpop.permute.xlu1 %5475 }
0x206b   : > { %v5472_v57 = vpop.permute.xlu1 %5471 }
0x206c   : > { %v5482_v59 = vsel %vm10807_vm5, %v5455_v30, %v5472_v57  ;;  %v8084_v30 = vld [vmem:[%s10812_s2] ss:$16 sps:$4 sm:$0xff]   ;;  %vm10824_vm5 = vmmov %vm10795_vm2 }
0x206d   : > { %v5483_v53 = vsel %vm10808_vm1, %v5482_v59, %v5476_v31 }
0x206f   : > { %v5480_v55 = vpop.permute.xlu1 %5479 }
0x2070   : > { %v5484_v28 = vsel %vm10809_vm13, %v5483_v53, %v5480_v55  ;;  %v8087_v55 = vld [vmem:[%s10812_s2 + $0x28] ss:$16 sps:$4 sm:$0xff]   ;;  %vm10825_vm13 = vmmov %vm10795_vm2 }
0x2071   : > { %v5485_v49 = vpack.c.bf16 %v5484_v28, %v5484_v28 }
0x2073   : > { %7717 = vmatmul.mubr.bf16.vlgmr.msra.gmra.mxu1 %v5485_v49  ;;  %v8092_v49 = vld [vmem:[%s10812_s2 + $0xc] ss:$16 sps:$4 sm:$0xff]  }
0x2074   : > { %7410 = vmatpush3.bf16.msra.mxu1 %v8333_v19 }
0x2075   : > { %7411 = vmatprep.subr.bf16.mxu1 %v8334_v50  ;;  %v8090_v50 = vld [vmem:[%s10812_s2 + $0x8] ss:$16 sps:$4 sm:$0xff]  }
0x2078   : > { %7412 = vmatpush3.bf16.msra.mxu1 %v8335_v39 }
0x2079   : > { %7413 = vmatprep.subr.bf16.mxu1 %v8336_v23 }
0x207c   : > { %7414 = vmatpush3.bf16.msra.mxu1 %v8337_v58  ;;  %v8348_v58 = vld [vmem:[%s8565_s25 + $0xf8] sm:$0xff]  }
0x207d   : > { %7415 = vmatprep.subr.bf16.mxu1 %v8338_v7  ;;  %v8349_v7 = vld [vmem:[%s8565_s25 + $0xb8] sm:$0xff]  }
0x2080   : > { %7416 = vmatpush3.bf16.msra.mxu1 %v8339_v26  ;;  %v8350_v26 = vld [vmem:[%s8565_s25 + $0xf0] sm:$0xff]  }
0x2081   : > { %7417 = vmatprep.subr.bf16.mxu1 %v8340_v47  ;;  %v8351_v47 = vld [vmem:[%s8565_s25 + $0xb0] sm:$0xff]  }
0x2084   : > { %7418 = vmatpush3.bf16.msra.mxu1 %v8341_v46  ;;  %v8352_v46 = vld [vmem:[%s8565_s25 + $0xe8] sm:$0xff]  }
0x2085   : > { %7419 = vmatprep.subr.bf16.mxu1 %v8342_v18  ;;  %v8353_v18 = vld [vmem:[%s8565_s25 + $0xa8] sm:$0xff]  }
0x2088   : > { %7420 = vmatpush3.bf16.msra.mxu1 %v8343_v62  ;;  %v8354_v62 = vld [vmem:[%s8565_s25 + $0xe0] sm:$0xff]  }
0x2089   : > { %7421 = vmatprep.subr.bf16.mxu1 %v8344_v35  ;;  %v8356_v35 = vld [vmem:[%s8565_s25 + $0xd8] sm:$0xff]  }
0x208c   : > { %7422 = vmatpush3.bf16.msra.mxu1 %v8345_v1  ;;  %v8357_v1 = vld [vmem:[%s8565_s25 + $0x98] sm:$0xff]  }
0x208d   : > { %7423 = vmatprep.subr.bf16.mxu1 %v8346_v54  ;;  %v8358_v54 = vld [vmem:[%s8565_s25 + $0xd0] sm:$0xff]  }
0x2090   : > { %7424 = vmatpush3.bf16.msra.mxu1 %v8347_v5  ;;  %v8359_v5 = vld [vmem:[%s8565_s25 + $0x90] sm:$0xff]  }
0x2091   : > { %7728 = vmatprep.subr.bf16.mxu1 %v8372_v0 }
0x2133   : > { %v5574_v51 = vpop.f32.mrf.mxu1 }
0x2134   : > { %v5575_v40 = vadd.f32 %v7008_v56, %v5574_v51  ;;  %v8360_v56 = vld [vmem:[%s8565_s25 + $0xc8] sm:$0xff]  }
0x2135   : > { %v7718_v32 = vpop.f32.mrf.mxu1  ;;  %v8361_v51 = vld [vmem:[%s8565_s25 + $0x88] sm:$0xff]  }
0x2136   : > { %v5580_v36 = vadd.f32 %v5575_v40, %v10310_v44  ;;  %v8080_v44 = vld [vmem:[%s10811_s3 + $0x10] sm:$0xff]   ;;  %v8362_v40 = vld [vmem:[%s8565_s25 + $0xc0] sm:$0xff]   ;;  %s8399_s3 = smov 15  }
0x2137   : > { %v5577_v25 = vpop.f32.mrf.mxu1  ;;  %7723 = vmatpush3.bf16.msra.mxu0 %v8080_v44  ;;  %v8363_v32 = vld [vmem:[%s8565_s25 + $0x80] sm:$0xff]  }
0x2138   : > { %v5585_v48 = vsel %vm10795_vm2, %v5580_v36, 0.0  ;;  %5779 = vmatprep.subr.bf16.mxu0 %v8083_v34 }
0x2139   : > { %5586 = vadd.xlane.f32.xlu1 %v5585_v48  ;;  %v7719_v2 = vpop.f32.mrf.mxu1 }
0x21c2   : > { %v5587_v11 = vpop.xlane.xlu1 %5586 }
0x21c3   : > { %v5588_v43 = vmul.f32 0.03125, %v5587_v11 }
0x21c5   : > { %v5589_v17 = vsub.f32 %v5580_v36, %v5588_v43 }
0x21c7   : > { %v5590_v38 = vmul.f32 %v5589_v17, %v5589_v17 }
0x21c9   : > { %v5591_v15 = vsel %vm10810_vm4, %v5590_v38, 0.0  ;;  %vm3745_vm4 = vcmask 146432  }
0x21ca   : > { %5592 = vadd.xlane.f32.xlu0 %v5591_v15 }
0x2253   : > { %v5593_v33 = vpop.xlane.xlu0 %5592 }
0x2254   : > { %v5594_v42 = vmul.f32 0.03125, %v5593_v33 }
0x2256   : > { %v5595_v61 = vadd.f32 1e-05, %v5594_v42 }
0x2258   : > { %8243 = vrsqrt.f32 %v5595_v61 }
0x2265   : > { %v8244_v6 = vpop.eup %8243 }
0x2266   : > { %v5597_v16 = vmul.f32 %v8244_v6, %v5589_v17 }
0x2268   : > { %v5604_v13 = vmul.f32 %v7019_v45, %v5597_v16 }
0x226a   : > { %v10435_v22 = vadd.f32 %v7020_v41, %v5604_v13 }
0x226c   : > { %v5612_v63 = vadd.f32 %v10435_v22, %v10333_v10  ;;  %v7043_v10 = vld [vmem:[%s10814_s7 + $0x1] ss:$0 sm:$0xff] }
0x226e   : > { %v5647_v37 = vpack.c.bf16 %v5612_v63, %v5612_v63 }
0x2270   : > { %7725 = vmatmul.mubr.msk.bf16.vlgmr.msra.gmra.mxu0 %vm10813_vm8, %v5647_v37  ;;  %vm3747_vm8 = vcmask 154624  }
0x2271   : > { %5799 = vmatprep.mubr.bf16.mxu0 %v8374_v12  ;;  %5780 = vmatpush1.bf16.msra.mxu0 %v8081_v4 }
0x2272   : > { %5781 = vmatprep.subr.bf16.mxu0 %v8086_v24 }
0x2275   : > { %5782 = vmatpush1.bf16.msra.mxu0 %v8084_v30 }
0x2276   : > { %5832 = vmatprep.subr.bf16.mxu0 %v8089_v52 }
0x2330   : > { %v5703_v60 = vpop.f32.mrf.mxu0 }
0x2331   : > { %v5704_v20 = vadd.f32 %v7043_v10, %v5703_v60 }
0x2332   : > { %v7726_v31 = vpop.f32.mrf.mxu0 }
0x2333   : > { %5710 = vrot.lane.b32.xlu0 %v5704_v20, %s10761_s28 }
0x2334   : > { %v5706_v57 = vpop.f32.mrf.mxu0 }
0x2336   : > { %v7727_v59 = vpop.f32.mrf.mxu0 }
0x2337   : > { %5713 = vrot.lane.b32.xlu0 %v5704_v20, %s10759_s8 }
0x233b   : > { %5716 = vrot.lane.b32.xlu0 %v5704_v20, %s10760_s27 }
0x23a5   : > { %v5711_v53 = vpop.permute.xlu0 %5710 }
0x23a6   : > { %v5719_v28 = vpack.c.bf16 %v5711_v53, %v5704_v20 }
0x23a8   : > { %7055 = vmatmul.mubr.msk.bf16.vlgmr.msra.gmra.mxu0 %vm10815_vm7, %v5719_v28  ;;  %vm3749_vm7 = vcmask 162816  }
0x23a9   : > { %5833 = vmatpush1.bf16.msra.mxu0 %v8087_v55  ;;  %v5714_v19 = vpop.permute.xlu0 %5713  ;;  %5809 = vmatprep.mubr.bf16.mxu0 %v8374_v12 }
0x23aa   : > { %5834 = vmatprep.subr.bf16.mxu0 %v8092_v49 }
0x23ad   : > { %v5717_v39 = vpop.permute.xlu0 %5716  ;;  %5835 = vmatpush1.bf16.msra.mxu0 %v8090_v50 }
0x23ae   : > { %v5720_v23 = vpack.c.bf16 %v5717_v39, %v5714_v19  ;;  %7437 = vmatprep.subr.bf16.mxu0 %v8348_v58 }
0x23b0   : > { %7056 = vmatmul.mubr.msk.bf16.gmra.mxu0 %vm10816_vm6, %v5720_v23  ;;  %vm3751_vm6 = vcmask 171008  }
0x23b1   : > { %5852 = vmatprep.mubr.bf16.mxu0 %v8374_v12 }
0x23b8   : > { %7057 = vmatmul.mubr.msk.bf16.vlgmr.msra.gmra.mxu0 %vm10817_vm14, %v5719_v28  ;;  %vm3753_vm14 = vcmask 179200  }
0x23b9   : > { %5862 = vmatprep.mubr.bf16.mxu0 %v8374_v12  ;;  %7438 = vmatpush3.bf16.msra.mxu0 %v8349_v7  ;;  %v8355_v12 = vld [vmem:[%s8565_s25 + $0xa0] sm:$0xff]  }
0x23ba   : > { %7439 = vmatprep.subr.bf16.mxu0 %v8350_v26 }
0x23bd   : > { %7440 = vmatpush3.bf16.msra.mxu0 %v8351_v47 }
0x23be   : > { %7441 = vmatprep.subr.bf16.mxu0 %v8352_v46 }
0x23c0   : > { %7058 = vmatmul.mubr.msk.bf16.gmra.mxu0 %vm10818_vm10, %v5720_v23  ;;  %vm3755_vm10 = vcmask 187392  }
0x23c1   : > { %7442 = vmatpush3.bf16.msra.mxu0 %v8353_v18 }
0x23c2   : > { %7443 = vmatprep.subr.bf16.mxu0 %v8354_v62 }
0x23c5   : > { %7444 = vmatpush3.bf16.msra.mxu0 %v8355_v12 }
0x23c6   : > { %7445 = vmatprep.subr.bf16.mxu0 %v8356_v35 }
0x23c9   : > { %7446 = vmatpush3.bf16.msra.mxu0 %v8357_v1 }
0x23ca   : > { %7447 = vmatprep.subr.bf16.mxu0 %v8358_v54 }
0x23cd   : > { %7448 = vmatpush3.bf16.msra.mxu0 %v8359_v5 }
0x23ce   : > { %7449 = vmatprep.subr.bf16.mxu0 %v8360_v56 }
0x23d1   : > { %7450 = vmatpush3.bf16.msra.mxu0 %v8361_v51 }
0x23d2   : > { %7451 = vmatprep.subr.bf16.mxu0 %v8362_v40 }
0x23d5   : > { %7452 = vmatpush3.bf16.msra.mxu0 %v8363_v32 }
0x23d6   : > { %7748 = vmatprep.subr.bf16.mxu0 %v8372_v0 }
0x2468   : > { %v5801_v36 = vpop.f32.mrf.mxu0 }
0x246a   : > { %v5803_v25 = vpop.f32.mrf.mxu0 }
0x246b   : > { %v5873_v15 = vmax.f32 %v5801_v36, %v5803_v25 }
0x246c   : > { %v5805_v48 = vpop.f32.mrf.mxu0 }
0x246e   : > { %v5807_v2 = vpop.f32.mrf.mxu0 }
0x246f   : > { %v5878_v42 = vmax.f32 %v5805_v48, %v5807_v2 }
0x2470   : > { %v5811_v11 = vpop.f32.mrf.mxu0 }
0x2472   : > { %v5813_v43 = vpop.f32.mrf.mxu0 }
0x2473   : > { %v5883_v41 = vmax.f32 %v5811_v11, %v5813_v43 }
0x2474   : > { %v10479_v17 = vpop.f32.mrf.mxu0 }
0x2476   : > { %v10481_v38 = vpop.f32.mrf.mxu0 }
0x2477   : > { %v5888_v34 = vmax.f32 %v10479_v17, %v10481_v38 }
0x2478   : > { %v5854_v21 = vpop.f32.mrf.mxu0 }
0x2479   : > { %v5874_v44 = vmax.f32 %v5873_v15, %v5854_v21 }
0x247a   : > { %v5856_v33 = vpop.f32.mrf.mxu0 }
0x247b   : > { %v5875_v61 = vmax.f32 %v5874_v44, %v5856_v33 }
0x247c   : > { %v5858_v6 = vpop.f32.mrf.mxu0 }
0x247d   : > { %v5879_v45 = vmax.f32 %v5878_v42, %v5858_v6  ;;  %5876 = vmax.xlane.f32.xlu0 %v5875_v61 }
0x247e   : > { %v5860_v16 = vpop.f32.mrf.mxu0 }
0x247f   : > { %v5880_v13 = vmax.f32 %v5879_v45, %v5860_v16 }
0x2480   : > { %v5864_v63 = vpop.f32.mrf.mxu0 }
0x2481   : > { %v5884_v37 = vmax.f32 %v5883_v41, %v5864_v63  ;;  %5881 = vmax.xlane.f32.xlu1 %v5880_v13 }
0x2482   : > { %v5866_v4 = vpop.f32.mrf.mxu0 }
0x2483   : > { %v5885_v24 = vmax.f32 %v5884_v37, %v5866_v4 }
0x2484   : > { %v5868_v30 = vpop.f32.mrf.mxu0 }
0x2485   : > { %v5889_v52 = vmax.f32 %v5888_v34, %v5868_v30  ;;  %5886 = vmax.xlane.f32.xlu1 %v5885_v24 }
0x2486   : > { %v5870_v10 = vpop.f32.mrf.mxu0 }
0x2487   : > { %v5890_v60 = vmax.f32 %v5889_v52, %v5870_v10 }
0x2489   : > { %5891 = vmax.xlane.f32.xlu1 %v5890_v60 }
0x2506   : > { %v5877_v20 = vpop.xlane.xlu0 %5876 }
0x2507   : > { %v5893_v31 = vsub.f32 %v5801_v36, %v5877_v20  ;;  %v5894_v57 = vsub.f32 %v5803_v25, %v5877_v20  ;;  %v5895_v59 = vsub.f32 %v5854_v21, %v5877_v20  ;;  %v5896_v53 = vsub.f32 %v5856_v33, %v5877_v20 }
0x2509   : > { %v5909_v55 = vmul.f32 1.442695, %v5893_v31  ;;  %v5911_v28 = vmul.f32 1.442695, %v5894_v57  ;;  %v5913_v49 = vmul.f32 1.442695, %v5895_v59 }
0x250a   : > { %v5915_v19 = vmul.f32 1.442695, %v5896_v53  ;;  %v5882_v50 = vpop.xlane.xlu1 %5881 }
0x250b   : > { %8245 = vpow2.f32 %v5909_v55  ;;  %v5897_v39 = vsub.f32 %v5805_v48, %v5882_v50  ;;  %v5898_v23 = vsub.f32 %v5807_v2, %v5882_v50  ;;  %v5899_v58 = vsub.f32 %v5858_v6, %v5882_v50 }
0x250c   : > { %8247 = vpow2.f32 %v5911_v28  ;;  %v5900_v7 = vsub.f32 %v5860_v16, %v5882_v50 }
0x250d   : > { %8249 = vpow2.f32 %v5913_v49  ;;  %v5917_v26 = vmul.f32 1.442695, %v5897_v39  ;;  %v5919_v47 = vmul.f32 1.442695, %v5898_v23  ;;  %v5921_v46 = vmul.f32 1.442695, %v5899_v58 }
0x250e   : > { %8251 = vpow2.f32 %v5915_v19  ;;  %v5923_v18 = vmul.f32 1.442695, %v5900_v7  ;;  %v5887_v62 = vpop.xlane.xlu1 %5886 }
0x250f   : > { %8253 = vpow2.f32 %v5917_v26  ;;  %v5901_v12 = vsub.f32 %v5811_v11, %v5887_v62  ;;  %v5902_v35 = vsub.f32 %v5813_v43, %v5887_v62  ;;  %v5903_v1 = vsub.f32 %v5864_v63, %v5887_v62 }
0x2510   : > { %8255 = vpow2.f32 %v5919_v47  ;;  %v5904_v54 = vsub.f32 %v5866_v4, %v5887_v62 }
0x2511   : > { %8257 = vpow2.f32 %v5921_v46  ;;  %v5925_v5 = vmul.f32 1.442695, %v5901_v12  ;;  %v5927_v56 = vmul.f32 1.442695, %v5902_v35  ;;  %v5929_v51 = vmul.f32 1.442695, %v5903_v1 }
0x2512   : > { %8259 = vpow2.f32 %v5923_v18  ;;  %v5931_v40 = vmul.f32 1.442695, %v5904_v54  ;;  %v5892_v32 = vpop.xlane.xlu1 %5891 }
0x2513   : > { %8261 = vpow2.f32 %v5925_v5  ;;  %v5905_v36 = vsub.f32 %v10479_v17, %v5892_v32  ;;  %v5906_v25 = vsub.f32 %v10481_v38, %v5892_v32  ;;  %v5907_v48 = vsub.f32 %v5868_v30, %v5892_v32 }
0x2514   : > { %8263 = vpow2.f32 %v5927_v56  ;;  %v5908_v2 = vsub.f32 %v5870_v10, %v5892_v32 }
0x2515   : > { %8265 = vpow2.f32 %v5929_v51  ;;  %v5933_v11 = vmul.f32 1.442695, %v5905_v36  ;;  %v5935_v43 = vmul.f32 1.442695, %v5906_v25  ;;  %v5937_v15 = vmul.f32 1.442695, %v5907_v48 }
0x2516   : > { %8267 = vpow2.f32 %v5931_v40  ;;  %v5939_v44 = vmul.f32 1.442695, %v5908_v2 }
0x2517   : > { %8269 = vpow2.f32 %v5933_v11 }
0x2518   : > { %v8246_v21 = vpop.eup %8245  ;;  %8271 = vpow2.f32 %v5935_v43 }
0x2519   : > { %v8248_v33 = vpop.eup %8247  ;;  %8273 = vpow2.f32 %v5937_v15 }
0x251a   : > { %v8250_v42 = vpop.eup %8249  ;;  %v5941_v61 = vadd.f32 %v8248_v33, %v8246_v21  ;;  %8275 = vpow2.f32 %v5939_v44 }
0x251b   : > { %v8252_v6 = vpop.eup %8251 }
0x251c   : > { %v8254_v17 = vpop.eup %8253  ;;  %v5942_v38 = vadd.f32 %v8250_v42, %v5941_v61 }
0x251d   : > { %v8256_v45 = vpop.eup %8255 }
0x251e   : > { %v8258_v16 = vpop.eup %8257  ;;  %v5943_v41 = vadd.f32 %v8252_v6, %v5942_v38  ;;  %v5946_v13 = vadd.f32 %v8256_v45, %v8254_v17  ;;  %v8095_v38 = vld [vmem:[%s10668_s15 + $0x68] sm:$0xff]  }
0x251f   : > { %v8260_v63 = vpop.eup %8259 }
0x2520   : > { %v8262_v37 = vpop.eup %8261  ;;  %5944 = vadd.xlane.f32.xlu1 %v5943_v41  ;;  %v5947_v4 = vadd.f32 %v8258_v16, %v5946_v13  ;;  %v8098_v41 = vld [vmem:[%s10668_s15 + $0x50] sm:$0xff]  }
0x2521   : > { %v8264_v34 = vpop.eup %8263 }
0x2522   : > { %v8266_v24 = vpop.eup %8265  ;;  %v5948_v30 = vadd.f32 %v8260_v63, %v5947_v4  ;;  %v5951_v52 = vadd.f32 %v8264_v34, %v8262_v37 }
0x2523   : > { %v8268_v10 = vpop.eup %8267 }
0x2524   : > { %v8270_v60 = vpop.eup %8269  ;;  %5949 = vadd.xlane.f32.xlu1 %v5948_v30  ;;  %v5952_v20 = vadd.f32 %v8266_v24, %v5951_v52 }
0x2525   : > { %v8272_v31 = vpop.eup %8271 }
0x2526   : > { %v5953_v57 = vadd.f32 %v8268_v10, %v5952_v20  ;;  %v5956_v59 = vadd.f32 %v8272_v31, %v8270_v60  ;;  %v8274_v53 = vpop.eup %8273 }
0x2527   : > { %v8276_v28 = vpop.eup %8275 }
0x2528   : > { %5954 = vadd.xlane.f32.xlu1 %v5953_v57  ;;  %v5957_v55 = vadd.f32 %v8274_v53, %v5956_v59 }
0x252a   : > { %v5958_v49 = vadd.f32 %v8276_v28, %v5957_v55 }
0x252c   : > { %5959 = vadd.xlane.f32.xlu1 %v5958_v49 }
0x25a9   : > { %v5945_v19 = vpop.xlane.xlu1 %5944 }
0x25aa   : > { %8277 = vrcp.f32 %v5945_v19 }
0x25ad   : > { %v5950_v50 = vpop.xlane.xlu1 %5949 }
0x25ae   : > { %8279 = vrcp.f32 %v5950_v50 }
0x25b1   : > { %v5955_v39 = vpop.xlane.xlu1 %5954 }
0x25b2   : > { %8281 = vrcp.f32 %v5955_v39 }
0x25b5   : > { %v5960_v23 = vpop.xlane.xlu1 %5959 }
0x25b6   : > { %8283 = vrcp.f32 %v5960_v23 }
0x25b7   : > { %v8278_v58 = vpop.eup %8277 }
0x25b8   : > { %v5970_v26 = vmul.f32 %v8278_v58, %v8248_v33  ;;  %v5972_v47 = vmul.f32 %v8278_v58, %v8252_v6  ;;  %v5969_v46 = vmul.f32 %v8278_v58, %v8246_v21  ;;  %v5971_v18 = vmul.f32 %v8278_v58, %v8250_v42  ;;  %v8093_v6 = vld [vmem:[%s10668_s15 + $0x78] sm:$0xff]  }
0x25bb   : > { %v8280_v7 = vpop.eup %8279 }
0x25bc   : > { %v5974_v62 = vmul.f32 %v8280_v7, %v8256_v45  ;;  %v5976_v12 = vmul.f32 %v8280_v7, %v8260_v63  ;;  %v5973_v35 = vmul.f32 %v8280_v7, %v8254_v17  ;;  %v5975_v1 = vmul.f32 %v8280_v7, %v8258_v16  ;;  %v8094_v17 = vld [vmem:[%s10668_s15 + $0x70] sm:$0xff]   ;;  %v8096_v45 = vld [vmem:[%s10668_s15 + $0x60] sm:$0xff]   ;;  %v8097_v16 = vld [vmem:[%s10668_s15 + $0x58] sm:$0xff]  }
0x25be   : > { %v5986_v54 = vpack.c.bf16 %v5974_v62, %v5970_v26  ;;  %v5988_v5 = vpack.c.bf16 %v5976_v12, %v5972_v47  ;;  %v5985_v56 = vpack.c.bf16 %v5973_v35, %v5969_v46  ;;  %v5987_v51 = vpack.c.bf16 %v5975_v1, %v5971_v18 }
0x25bf   : > { %v8282_v40 = vpop.eup %8281 }
0x25c0   : > { %6025 = vmatprep.mubr.bf16.mxu1 %v5986_v54  ;;  %6074 = vmatprep.mubr.bf16.mxu0 %v5988_v5  ;;  %v5978_v36 = vmul.f32 %v8282_v40, %v8264_v34  ;;  %v5980_v25 = vmul.f32 %v8282_v40, %v8268_v10  ;;  %v5977_v48 = vmul.f32 %v8282_v40, %v8262_v37  ;;  %v8099_v34 = vld [vmem:[%s10668_s15 + $0x48] sm:$0xff]  }
0x25c1   : > { %6026 = vmatmul.mubr.bf16.vlgmr.msra.gmra.mxu1 %v5985_v56  ;;  %6075 = vmatmul.mubr.bf16.vlgmr.msra.gmra.mxu0 %v5987_v51  ;;  %v5979_v2 = vmul.f32 %v8282_v40, %v8266_v24 }
0x25c2   : > { %7729 = vmatpush3.bf16.msra.mxu1 %v8093_v6  ;;  %v8101_v6 = vld [vmem:[%s10671_s18 + $0x18] sm:$0xff]  }
0x25c3   : > { %v8284_v32 = vpop.eup %8283  ;;  %7730 = vmatprep.subr.bf16.mxu1 %v8372_v0  ;;  %7749 = vmatpush3.bf16.msra.mxu0 %v8101_v6 }
0x25c4   : > { %v5982_v11 = vmul.f32 %v8284_v32, %v8272_v31  ;;  %v5984_v43 = vmul.f32 %v8284_v32, %v8276_v28  ;;  %v5981_v15 = vmul.f32 %v8284_v32, %v8270_v60  ;;  %v5983_v21 = vmul.f32 %v8284_v32, %v8274_v53  ;;  %v8100_v53 = vld [vmem:[%s10668_s15 + $0x40] sm:$0xff]   ;;  %7750 = vmatprep.subr.bf16.mxu0 %v8372_v0 }
0x25c5   : > { %v7059_v32 = vld [vmem:[%s10669_s16 + $0x1] ss:$0 sm:$0xff] }
0x25c6   : > { %v5990_v44 = vpack.c.bf16 %v5982_v11, %v5978_v36  ;;  %v5992_v33 = vpack.c.bf16 %v5984_v43, %v5980_v25  ;;  %v5989_v42 = vpack.c.bf16 %v5981_v15, %v5977_v48  ;;  %v5991_v61 = vpack.c.bf16 %v5983_v21, %v5979_v2  ;;  %7731 = vmatpush3.bf16.msra.mxu1 %v8094_v17 }
0x25c7   : > { %7732 = vmatprep.subr.bf16.mxu1 %v8372_v0 }
0x25c8   : > { %6033 = vmatprep.mubr.bf16.mxu1 %v5990_v44  ;;  %6082 = vmatprep.mubr.bf16.mxu0 %v5992_v33 }
0x25c9   : > { %6034 = vmatmul.mubr.bf16.gmra.mxu1 %v5989_v42  ;;  %6083 = vmatmul.mubr.bf16.gmra.mxu0 %v5991_v61 }
0x25ca   : > { %7744 = vmatprep.mubr.msk.bf16.mxu1 %vm8373_vm0, %v8372_v0  ;;  %7752 = vmatprep.mubr.msk.bf16.mxu0 %vm8373_vm0, %v8372_v0 }
0x25cb   : > { %7733 = vmatpush3.bf16.msra.mxu1 %v8095_v38 }
0x25cc   : > { %7734 = vmatprep.subr.bf16.mxu1 %v8372_v0 }
0x25cf   : > { %7735 = vmatpush3.bf16.msra.mxu1 %v8096_v45 }
0x25d0   : > { %7736 = vmatprep.subr.bf16.mxu1 %v8372_v0 }
0x25d3   : > { %7737 = vmatpush3.bf16.msra.mxu1 %v8097_v16 }
0x25d4   : > { %7738 = vmatprep.subr.bf16.mxu1 %v8372_v0 }
0x25d7   : > { %7739 = vmatpush3.bf16.msra.mxu1 %v8098_v41  ;;  %v7070_v41 = vld [vmem:[%s10670_s17 + $0x8] ss:$0 sm:$0xff] }
0x25d8   : > { %7740 = vmatprep.subr.bf16.mxu1 %v8372_v0 }
0x25db   : > { %7741 = vmatpush3.bf16.msra.mxu1 %v8099_v34  ;;  %v8103_v34 = vld [vmem:[%s10673_s20 + $0x38] sm:$0xff]  }
0x25dc   : > { %7742 = vmatprep.subr.bf16.mxu1 %v8372_v0 }
0x25df   : > { %7743 = vmatpush3.bf16.msra.mxu1 %v8100_v53 }
0x25e0   : > { %7768 = vmatprep.subr.bf16.mxu1 %v8372_v0 }
0x2681   : > { %v7425_v13 = vpop.f32.mrf.mxu1  ;;  %v7453_v63 = vpop.f32.mrf.mxu0 }
0x2683   : > { %v7426_v37 = vpop.f32.mrf.mxu1  ;;  %v7454_v4 = vpop.f32.mrf.mxu0 }
0x2684   : > { %v7427_v24 = vadd.f32 %v7426_v37, %v7425_v13  ;;  %v7455_v30 = vadd.f32 %v7454_v4, %v7453_v63  ;;  %v7071_v63 = vld [vmem:[%s10670_s17 + $0x9] ss:$0 sm:$0xff] }
0x2685   : > { %v7428_v52 = vpop.f32.mrf.mxu1  ;;  %v7456_v10 = vpop.f32.mrf.mxu0 }
0x2686   : > { %v6077_v60 = vadd.f32 %v7455_v30, %v7427_v24  ;;  %v8104_v30 = vld [vmem:[%s10673_s20 + $0x30] sm:$0xff]  }
0x2687   : > { %v7429_v20 = vpop.f32.mrf.mxu1  ;;  %v7457_v31 = vpop.f32.mrf.mxu0 }
0x2688   : > { %v7430_v57 = vadd.f32 %v7429_v20, %v7428_v52  ;;  %v7458_v59 = vadd.f32 %v7457_v31, %v7456_v10  ;;  %v8105_v52 = vld [vmem:[%s10673_s20 + $0x28] sm:$0xff]   ;;  %v8106_v10 = vld [vmem:[%s10673_s20 + $0x20] sm:$0xff]  }
0x2689   : > { %v7431_v55 = vpop.f32.mrf.mxu1  ;;  %v7459_v28 = vpop.f32.mrf.mxu0 }
0x268a   : > { %v6080_v49 = vadd.f32 %v7458_v59, %v7430_v57 }
0x268b   : > { %v7432_v19 = vpop.f32.mrf.mxu1  ;;  %v7460_v50 = vpop.f32.mrf.mxu0 }
0x268c   : > { %v7433_v39 = vadd.f32 %v7432_v19, %v7431_v55  ;;  %v7461_v23 = vadd.f32 %v7460_v50, %v7459_v28  ;;  %6092 = vrot.lane.b32.xlu1 %v6080_v49, %s10760_s27  ;;  %v7090_v49 = vld [vmem:[%s10674_s21 + $0x1] ss:$0 sm:$0xff] }
0x268d   : > { %v7434_v58 = vpop.f32.mrf.mxu1  ;;  %v7462_v7 = vpop.f32.mrf.mxu0 }
0x268e   : > { %v6085_v26 = vadd.f32 %v7461_v23, %v7433_v39 }
0x268f   : > { %v7435_v47 = vpop.f32.mrf.mxu1  ;;  %v7463_v46 = vpop.f32.mrf.mxu0 }
0x2690   : > { %v7436_v18 = vadd.f32 %v7435_v47, %v7434_v58  ;;  %v7464_v62 = vadd.f32 %v7463_v46, %v7462_v7  ;;  %6096 = vrot.lane.b32.xlu0 %v6085_v26, %s10759_s8 }
0x2692   : > { %v6088_v12 = vadd.f32 %v7464_v62, %v7436_v18 }
0x2694   : > { %6100 = vrot.lane.b32.xlu1 %v6088_v12, %s10761_s28 }
0x26fe   : > { %v6093_v35 = vpop.permute.xlu1 %6092 }
0x26ff   : > { %v6103_v54 = vsel %vm10819_vm15, %v6077_v60, %v6093_v35  ;;  %v7077_v60 = vld [vmem:[%s10672_s19 + $0x1] ss:$0 sm:$0xff]  ;;  %v8107_v35 = vld [vmem:[%s10675_s22 + $0x8] sm:$0xff]   ;;  %vm3757_vm15 = vcmask 195584  }
0x2702   : > { %v6097_v1 = vpop.permute.xlu0 %6096 }
0x2703   : > { %v6104_v5 = vsel %vm10820_vm11, %v6103_v54, %v6097_v1  ;;  %v8108_v1 = vld [vmem:[%s10675_s22] sm:$0xff]   ;;  %v8110_v54 = vld [vmem:[%s10677_s24 + $0x30] sm:$0xff]  }
0x2706   : > { %v6101_v56 = vpop.permute.xlu1 %6100 }
0x2707   : > { %v6105_v51 = vsel %vm10821_vm9, %v6104_v5, %v6101_v56  ;;  %v8111_v5 = vld [vmem:[%s10677_s24 + $0x28] sm:$0xff]   ;;  %v8112_v56 = vld [vmem:[%s10677_s24 + $0x20] sm:$0xff]  }
0x2708   : > { %v6106_v40 = vpack.c.bf16 %v6105_v51, %v6105_v51  ;;  %v8113_v51 = vld [vmem:[%s10677_s24 + $0x18] sm:$0xff]  }
0x270a   : > { %7745 = vmatmul.mubr.bf16.vlgmr.msra.gmra.mxu1 %v6106_v40  ;;  %v8114_v40 = vld [vmem:[%s10677_s24 + $0x10] sm:$0xff]  }
0x270b   : > { %7772 = vmatprep.mubr.msk.bf16.mxu1 %vm8373_vm0, %v8372_v0  ;;  %7769 = vmatpush3.bf16.msra.mxu1 %v8107_v35 }
0x270c   : > { %7770 = vmatprep.subr.bf16.mxu1 %v8372_v0 }
0x270f   : > { %7771 = vmatpush3.bf16.msra.mxu1 %v8108_v1 }
0x27ca   : > { %v6195_v36 = vpop.f32.mrf.mxu1 }
0x27cb   : > { %v6196_v25 = vadd.f32 %v7059_v32, %v6195_v36 }
0x27cc   : > { %v7746_v48 = vpop.f32.mrf.mxu1 }
0x27cd   : > { %v6201_v2 = vadd.f32 %v6196_v25, %v10435_v22  ;;  %v8102_v22 = vld [vmem:[%s10671_s18 + $0x10] sm:$0xff]  }
0x27ce   : > { %v6198_v11 = vpop.f32.mrf.mxu1  ;;  %7751 = vmatpush3.bf16.msra.mxu0 %v8102_v22 }
0x27cf   : > { %v6206_v43 = vsel %vm10822_vm12, %v6201_v2, 0.0  ;;  %7756 = vmatprep.subr.bf16.mxu0 %v8372_v0 }
0x27d0   : > { %6207 = vadd.xlane.f32.xlu1 %v6206_v43  ;;  %v7747_v15 = vpop.f32.mrf.mxu1  ;;  %v7099_v43 = vld [vmem:[%s10670_s17 + $0xb] ss:$0 sm:$0xff] }
0x2859   : > { %v6208_v21 = vpop.xlane.xlu1 %6207 }
0x285a   : > { %v6209_v44 = vmul.f32 0.03125, %v6208_v21 }
0x285c   : > { %v6210_v33 = vsub.f32 %v6201_v2, %v6209_v44  ;;  %v7098_v2 = vld [vmem:[%s10670_s17 + $0xa] ss:$0 sm:$0xff] }
0x285e   : > { %v6211_v42 = vmul.f32 %v6210_v33, %v6210_v33 }
0x2860   : > { %v6212_v61 = vsel %vm10823_vm3, %v6211_v42, 0.0  ;;  %v8116_v42 = vld [vmem:[%s10677_s24] sm:$0xff]  }
0x2861   : > { %6213 = vadd.xlane.f32.xlu0 %v6212_v61  ;;  %v7100_v61 = vld [vmem:[%s10676_s23] ss:$0 sm:$0xff] }
0x28ea   : > { %v6214_v17 = vpop.xlane.xlu0 %6213 }
0x28eb   : > { %v6215_v38 = vmul.f32 0.03125, %v6214_v17 }
0x28ed   : > { %v6216_v45 = vadd.f32 1e-05, %v6215_v38 }
0x28ef   : > { %8285 = vrsqrt.f32 %v6216_v45 }
0x28fc   : > { %v8286_v16 = vpop.eup %8285 }
0x28fd   : > { %v6218_v13 = vmul.f32 %v8286_v16, %v6210_v33  ;;  %v8115_v33 = vld [vmem:[%s10677_s24 + $0x8] sm:$0xff]  }
0x28ff   : > { %v6225_v37 = vmul.f32 %v7070_v41, %v6218_v13  ;;  %v6600_v13 = vmax.f32 %v9616_v29, 0.0 }
0x2901   : > { %v6232_v4 = vadd.f32 %v7071_v63, %v6225_v37  ;;  %v6601_v63 = vmin.f32 %v6600_v13, 1.0 }
0x2903   : > { %v6233_v24 = vpack.c.bf16 %v6232_v4, %v6232_v4  ;;  %v6603_v37 = vsub.f32 1.0, %v6601_v63 }
0x2905   : > { %7753 = vmatmul.mubr.msk.bf16.vlgmr.msra.gmra.mxu0 %vm10824_vm5, %v6233_v24 }
0x2906   : > { %7757 = vmatpush3.bf16.msra.mxu0 %v8103_v34  ;;  %7764 = vmatprep.mubr.msk.bf16.mxu0 %vm8373_vm0, %v8372_v0  ;;  %v6602_v34 = vmax.f32 %v6601_v63, 0.001 }
0x2907   : > { %7758 = vmatprep.subr.bf16.mxu0 %v8372_v0 }
0x290a   : > { %7759 = vmatpush3.bf16.msra.mxu0 %v8104_v30 }
0x290b   : > { %7760 = vmatprep.subr.bf16.mxu0 %v8372_v0 }
0x290e   : > { %7761 = vmatpush3.bf16.msra.mxu0 %v8105_v52  ;;  %v7104_v52 = vld [vmem:[%s10764_s14] ss:$0 sm:$0xff] }
0x290f   : > { %7762 = vmatprep.subr.bf16.mxu0 %v8372_v0 }
0x2912   : > { %7763 = vmatpush3.bf16.msra.mxu0 %v8106_v10 }
0x2913   : > { %7776 = vmatprep.subr.bf16.mxu0 %v8372_v0 }
0x29c5   : > { %v6296_v20 = vpop.f32.mrf.mxu0 }
0x29c6   : > { %v6297_v31 = vadd.f32 %v7077_v60, %v6296_v20 }
0x29c7   : > { %v7754_v57 = vpop.f32.mrf.mxu0 }
0x29c8   : > { %v6302_v59 = vmax.f32 %v6297_v31, 0.0 }
0x29c9   : > { %v6299_v53 = vpop.f32.mrf.mxu0 }
0x29ca   : > { %v6303_v55 = vpack.c.bf16 %v6302_v59, %v6302_v59 }
0x29cb   : > { %v7755_v28 = vpop.f32.mrf.mxu0 }
0x29cc   : > { %7765 = vmatmul.mubr.msk.bf16.vlgmr.msra.gmra.mxu0 %vm10808_vm1, %v6303_v55 }
0x29cd   : > { %7792 = vmatprep.mubr.msk.bf16.mxu0 %vm8373_vm0, %v8372_v0  ;;  %vm10826_vm0 = vmmov %vm10795_vm2 }
0x29ce   : > { %vm10827_vm2 = vmmov %vm10826_vm0 }
0x2a8c   : > { %v6382_v19 = vpop.f32.mrf.mxu0 }
0x2a8d   : > { %v6383_v50 = vadd.f32 %v7090_v49, %v6382_v19 }
0x2a8e   : > { %v7766_v39 = vpop.f32.mrf.mxu0 }
0x2a8f   : > { %v6388_v23 = vadd.f32 %v6383_v50, %v6232_v4  ;;  %v6604_v4 = vmax.f32 %v6603_v37, 0.001 }
0x2a90   : > { %v6385_v58 = vpop.f32.mrf.mxu0 }
0x2a91   : > { %v6393_v7 = vsel %vm10825_vm13, %v6388_v23, 0.0 }
0x2a92   : > { %6394 = vadd.xlane.f32.xlu0 %v6393_v7  ;;  %v7767_v26 = vpop.f32.mrf.mxu0 }
0x2aa8   : > { %3730 = vrot.lane.b32.xlu0 %v9619_v14, %s8398_s6 }
0x2aac   : > { %6627 = vrot.lane.b32.xlu0 %v9619_v14, %s8399_s3  ;;  %v8109_v14 = vld [vmem:[%s10677_s24 + $0x38] sm:$0xff]  }
0x2aad   : > { %7777 = vmatpush3.bf16.msra.mxu0 %v8109_v14 }
0x2aae   : > { %7778 = vmatprep.subr.bf16.mxu0 %v8372_v0 }
0x2ab1   : > { %7779 = vmatpush3.bf16.msra.mxu0 %v8110_v54 }
0x2ab2   : > { %7780 = vmatprep.subr.bf16.mxu0 %v8372_v0 }
0x2ab5   : > { %7781 = vmatpush3.bf16.msra.mxu0 %v8111_v5 }
0x2ab6   : > { %7782 = vmatprep.subr.bf16.mxu0 %v8372_v0 }
0x2ab9   : > { %7783 = vmatpush3.bf16.msra.mxu0 %v8112_v56 }
0x2aba   : > { %7784 = vmatprep.subr.bf16.mxu0 %v8372_v0 }
0x2abd   : > { %7785 = vmatpush3.bf16.msra.mxu0 %v8113_v51 }
0x2abe   : > { %7786 = vmatprep.subr.bf16.mxu0 %v8372_v0 }
0x2ac1   : > { %7787 = vmatpush3.bf16.msra.mxu0 %v8114_v40 }
0x2ac2   : > { %7788 = vmatprep.subr.bf16.mxu0 %v8372_v0 }
0x2ac5   : > { %7789 = vmatpush3.bf16.msra.mxu0 %v8115_v33 }
0x2ac6   : > { %7790 = vmatprep.subr.bf16.mxu0 %v8372_v0 }
0x2ac9   : > { %7791 = vmatpush3.bf16.msra.mxu0 %v8116_v42 }
0x2b1b   : > { %v6395_v47 = vpop.xlane.xlu0 %6394 }
0x2b1c   : > { %v6396_v46 = vmul.f32 0.03125, %v6395_v47 }
0x2b1e   : > { %v6397_v18 = vsub.f32 %v6388_v23, %v6396_v46 }
0x2b1f   : > { %v3731_v23 = vpop.permute.xlu0 %3730 }
0x2b20   : > { %v6398_v62 = vmul.f32 %v6397_v18, %v6397_v18  ;;  %v3746_v26 = vsel %vm3745_vm4, %v9613_v27, %v3731_v23 }
0x2b22   : > { %v6399_v12 = vsel %vm10826_vm0, %v6398_v62, 0.0 }
0x2b23   : > { %6400 = vadd.xlane.f32.xlu1 %v6399_v12  ;;  %v6628_v58 = vpop.permute.xlu0 %6627 }
0x2b34   : > { %3734 = vrot.lane.b32.xlu1 %v9622_v3, %s8398_s6 }
0x2bac   : > { %v6401_v32 = vpop.xlane.xlu1 %6400 }
0x2bad   : > { %v6402_v36 = vmul.f32 0.03125, %v6401_v32 }
0x2baf   : > { %v6403_v25 = vadd.f32 1e-05, %v6402_v36 }
0x2bb0   : > { %v3735_v7 = vpop.permute.xlu1 %3734 }
0x2bb1   : > { %8287 = vrsqrt.f32 %v6403_v25 }
0x2bb2   : > { %8289 = vrcp.f32 %v6604_v4 }
0x2bbe   : > { %v8288_v48 = vpop.eup %8287 }
0x2bbf   : > { %v6405_v11 = vmul.f32 %v8288_v48, %v6397_v18  ;;  %v8290_v0 = vpop.eup %8289 }
0x2bc0   : > { %v6606_v24 = vmul.f32 %v8290_v0, %v6602_v34 }
0x2bc1   : > { %v6412_v15 = vmul.f32 %v7098_v2, %v6405_v11 }
0x2bc2   : > { %8291 = vlog2.f32 %v6606_v24 }
0x2bc3   : > { %v6419_v21 = vadd.f32 %v7099_v43, %v6412_v15 }
0x2bc5   : > { %v6420_v44 = vpack.c.bf16 %v6419_v21, %v6419_v21 }
0x2bc7   : > { %7773 = vmatmul.mubr.msk.bf16.vlgmr.msra.gmra.mxu1 %vm10827_vm2, %v6420_v44 }
0x2bcf   : > { %v8292_v30 = vpop.eup %8291 }
0x2bd0   : > { %v6608_v20 = vmul.f32 0.6931472, %v8292_v30 }
0x2c87   : > { %v6481_v6 = vpop.f32.mrf.mxu1 }
0x2c88   : > { %v6482_v22 = vadd.f32 %v7100_v61, %v6481_v6 }
0x2c89   : > { %v7774_v17 = vpop.f32.mrf.mxu1 }
0x2c8a   : > { %v6487_v38 = vmax.f32 %v6482_v22, 0.0 }
0x2c8b   : > { %v6484_v45 = vpop.f32.mrf.mxu1 }
0x2c8c   : > { %v6488_v16 = vpack.c.bf16 %v6487_v38, %v6487_v38 }
0x2c8d   : > { %v7775_v41 = vpop.f32.mrf.mxu1 }
0x2c8e   : > { %7793 = vmatmul.mubr.bf16.vlgmr.msra.gmra.mxu0 %v6488_v16 }
0x2d4e   : > { %v6594_v10 = vpop.f32.mrf.mxu0 }
0x2d4f   : > { %v6595_v60 = vadd.f32 %v7104_v52, %v6594_v10 }
0x2d50   : > { %v7794_v31 = vpop.f32.mrf.mxu0 }
0x2d51   : > { %v6609_v57 = vadd.f32 %v6608_v20, %v6595_v60 }
0x2d52   : > { %v6597_v59 = vpop.f32.mrf.mxu0 }
0x2d53   : > { %v7113_v29 = vmul.f32 -1.442695, %v6609_v57 }
0x2d54   : > { %v7795_v53 = vpop.f32.mrf.mxu0 }
0x2d55   : > { %8293 = vpow2.f32 %v7113_v29 }
0x2d62   : > { %v8294_v55 = vpop.eup %8293 }
0x2d63   : > { %v6613_v28 = vadd.f32 1.0, %v8294_v55 }
0x2d65   : > { %8295 = vrcp.f32 %v6613_v28 }
0x2d72   : > { %v8296_v49 = vpop.eup %8295 }
0x2d73   : > { %v6616_v19 = vmul.f32 4.0, %v8296_v49 }
0x2d75   : > { %v6618_v50 = vadd.f32 0.5, %v6616_v19  ;;  %v6617_v39 = vadd.f32 -2.0, %v6616_v19 }
0x2d77   : > { %6624 = vrot.lane.b32.xlu0 %v6618_v50, %s8398_s6  ;;  %6620 = vrot.lane.b32.xlu1 %v6617_v39, %s8398_s6  ;;  %s7119_s6 = sshll.u32 %s10828_s29, 4 }
0x2d78   : > { %s845_s8 = scalar_lea.vmem %s10829_s26, %s7119_s6 }
0x2d7b   : > { %6630 = vrot.lane.b32.xlu0 %v9622_v3, %s8399_s3  ;;  %3738 = vrot.lane.b32.xlu1 %v8576_v8, %s8400_s0  ;;  %v3748_v3 = vsel %vm3747_vm8, %v3746_v26, %v3731_v23 }
0x2d7c   : > { %v3750_v8 = vsel %vm3749_vm7, %v3748_v3, %v3735_v7 }
0x2d7f   : > { %3742 = vrot.lane.b32.xlu1 %v8578_v9, %s8400_s0 }
0x2de9   : > { %v6625_v47 = vpop.permute.xlu0 %6624  ;;  %v6621_v46 = vpop.permute.xlu1 %6620 }
0x2dea   : > { %v6633_v18 = vsel %vm3745_vm4, %v6595_v60, %v6621_v46 }
0x2deb   : > { %v6634_v62 = vsel %vm3747_vm8, %v6633_v18, %v6621_v46 }
0x2dec   : > { %v6635_v12 = vsel %vm3749_vm7, %v6634_v62, %v6625_v47 }
0x2ded   : > { %v6631_v9 = vpop.permute.xlu0 %6630  ;;  %v6636_v35 = vsel %vm3751_vm6, %v6635_v12, %v6628_v58  ;;  %v3739_v1 = vpop.permute.xlu1 %3738 }
0x2dee   : > { %v6637_v27 = vsel %vm3753_vm14, %v6636_v35, %v6628_v58  ;;  %v3752_v14 = vsel %vm3751_vm6, %v3750_v8, %v3739_v1 }
0x2def   : > { %v6638_v54 = vsel %vm3755_vm10, %v6637_v27, %v6631_v9  ;;  %v3754_v56 = vsel %vm3753_vm14, %v3752_v14, %v3739_v1 }
0x2df0   : > { %v6639_v5 = vsel %vm3757_vm15, %v6638_v54, 0.0 }
0x2df1   : > { %7114 = vst [vmem:[%s845_s8 + $0x8] sm:$0xff] %v6639_v5  ;;  %v3743_v51 = vpop.permute.xlu1 %3742 }
0x2df2   : > { %v3756_v40 = vsel %vm3755_vm10, %v3754_v56, %v3743_v51 }
0x2df3   : > { %v3758_v32 = vsel %vm3757_vm15, %v3756_v40, 0.0 }
0x2df4   : > { %3759 = vst [vmem:[%s845_s8] sm:$0xff] %v3758_v32 }
0x2df5 PF: > { %s10830_s28 = sld [smem:[#allocation2_spill]] }
0x2dfb   : > { %s36_s27 = sadd.s32 1, %s10830_s28  }
0x2dfc   : > { %p33_p4 = scmp.ge.s32.totalorder %s36_s27, 4  }
0x2dfe   :  { %35 = sbr.rel (!%p33_p4) target bundleno = 16 (0x10), region = 187 }

</bundles_post_ra>
